<compile_context>
chip_gen: v6e
topology: v6e:2x2x1
jax: 0.10.0
libtpu: 0.0.40
codegen_flags: <defaults>
</compile_context>

<pallas_src>
import functools

import jax
import jax.numpy as jnp
from jax import lax
from jax.experimental import pallas as pl
from jax.experimental.pallas import tpu as pltpu

INIT_DIM = 64    # first VGG block channels
HIDE_DIM = 128   # second VGG block channels


def check_dim(input_dim):
    """Mirror of VGGExtractor.check_dim."""
    if input_dim % 13 == 0:
        return input_dim // 13, 13, (13 // 4) * HIDE_DIM
    elif input_dim % 40 == 0:
        return input_dim // 40, 40, (40 // 4) * HIDE_DIM
    raise ValueError("input_dim must be a multiple of 13 or 40")


def _phase_shift(nph, m, dh):
    """Time index t = nph*u + m.  For a shift t+dh return (source phase,
    start offset into the 1-padded per-phase time axis) so that slot (start+u)
    of the source phase holds time t+dh (zero pad at the sequence ends)."""
    mm = m + dh
    ph = mm % nph
    start = (mm - ph) // nph + 1     # in {0, 1, 2}
    return ph, start


# ----------------------------------------------------------------------------
# Pallas kernel: full VGG extractor for ONE batch element.
#   conv3x3+ReLU -> conv3x3+ReLU -> maxpool2x2 -> conv3x3+ReLU -> conv3x3+ReLU
#   -> maxpool2x2, all fused; pools are folded into the conv2/conv4 epilogues.
# ----------------------------------------------------------------------------
def _vgg_kernel(x_ref, w1_ref, b1_ref, w2_ref, b2_ref, w3_ref, b3_ref,
                w4_ref, b4_ref, out_ref, act1, actp, act3, *, F, U, Cin):
    C1, C2 = INIT_DIM, HIDE_DIM
    F2, F4 = F // 2, F // 4
    bf16 = jnp.bfloat16

    # ---- zero only the freq pad-border rows (interiors are fully rewritten;
    #      time pad slots are written together with every row store) ----------
    def zero_freq_borders(ref, nph, nf, C):
        zrow = jnp.zeros((U + 2, C), bf16)
        for m in range(nph):
            ref[m, 0, :, :] = zrow
            ref[m, nf + 1, :, :] = zrow

    zero_freq_borders(act1, 4, F, C1)
    zero_freq_borders(actp, 2, F2, C1)
    zero_freq_borders(act3, 2, F2, C2)

    def pad_time(row_f32, C):
        z1 = jnp.zeros((1, C), jnp.float32)
        return jnp.concatenate([z1, row_f32, z1], axis=0).astype(bf16)

    # ---- conv1: Cin -> 64 (VPU broadcast-MAC; Cin is 1..3), 4 time phases ----
    w1v = w1_ref[...]                      # (9*Cin, 64) f32, hoisted
    b1v = b1_ref[...]                      # (1, 64) f32

    def conv1_body(f, carry):
        for m in range(4):
            acc = jnp.zeros((U, C1), jnp.float32)
            for dh in (-1, 0, 1):
                ph, st = _phase_shift(4, m, dh)
                for dw in range(3):
                    col = x_ref[ph, f + dw, pl.ds(st, U), :]        # (U, Cin)
                    for ci in range(Cin):
                        k = ((dh + 1) * 3 + dw) * Cin + ci
                        acc = acc + col[:, ci:ci + 1] * w1v[k:k + 1, :]
            row = jnp.maximum(acc + b1v, 0.0)
            act1[m, 1 + f, :, :] = pad_time(row, C1)
        return carry

    lax.fori_loop(0, F, conv1_body, 0)

    # ---- conv2 (64->64) + fused 2x2 maxpool -> actp (2 phases, F2 freqs) -----
    b2v = b2_ref[...]

    def conv2_body(g, carry):
        for q in range(2):                       # output time phase (T/2 grid)
            pooled = None
            for mf in range(2):                  # the two pooled time phases
                m = 2 * q + mf
                for ff in range(2):              # the two pooled freq columns
                    acc = jnp.zeros((U, C1), jnp.float32)
                    for dh in (-1, 0, 1):
                        ph, st = _phase_shift(4, m, dh)
                        for dw in range(3):
                            lhs = act1[ph, 2 * g + ff + dw, pl.ds(st, U), :]
                            acc = acc + jnp.dot(
                                lhs, w2_ref[(dh + 1) * 3 + dw],
                                preferred_element_type=jnp.float32)
                    row = jnp.maximum(acc + b2v, 0.0)
                    pooled = row if pooled is None else jnp.maximum(pooled, row)
            actp[q, 1 + g, :, :] = pad_time(pooled, C1)
        return carry

    lax.fori_loop(0, F2, conv2_body, 0)

    # ---- conv3 (64->128), 2 time phases --------------------------------------
    b3v = b3_ref[...]

    def conv3_body(f, carry):
        for q in range(2):
            acc = jnp.zeros((U, C2), jnp.float32)
            for dh in (-1, 0, 1):
                ph, st = _phase_shift(2, q, dh)
                for dw in range(3):
                    lhs = actp[ph, f + dw, pl.ds(st, U), :]
                    acc = acc + jnp.dot(
                        lhs, w3_ref[(dh + 1) * 3 + dw],
                        preferred_element_type=jnp.float32)
            act3[q, 1 + f, :, :] = pad_time(jnp.maximum(acc + b3v, 0.0), C2)
        return carry

    lax.fori_loop(0, F2, conv3_body, 0)

    # ---- conv4 (128->128) + fused 2x2 maxpool -> out_ref (F4, U, 128) --------
    b4v = b4_ref[...]

    def conv4_body(h, carry):
        pooled = None
        for q in range(2):                       # pooled time phases
            for ff in range(2):                  # pooled freq columns
                acc = jnp.zeros((U, C2), jnp.float32)
                for dh in (-1, 0, 1):
                    ph, st = _phase_shift(2, q, dh)
                    for dw in range(3):
                        lhs = act3[ph, 2 * h + ff + dw, pl.ds(st, U), :]
                        acc = acc + jnp.dot(
                            lhs, w4_ref[(dh + 1) * 3 + dw],
                            preferred_element_type=jnp.float32)
                row = jnp.maximum(acc + b4v, 0.0)
                pooled = row if pooled is None else jnp.maximum(pooled, row)
        out_ref[h, :, :] = pooled                # (U, 128) lane-dense store
        return carry

    lax.fori_loop(0, F4, conv4_body, 0)


# ----------------------------------------------------------------------------
# Wrapper: reproduces VGGExtractor.forward (view_input + extractor + reshape)
# ----------------------------------------------------------------------------
def vgg_extractor_forward(feature, feat_len, params, input_dim):
    in_c, F, out_dim = check_dim(input_dim)
    C1, C2 = INIT_DIM, HIDE_DIM

    # --- view_input ---
    feat_len = feat_len // 4
    ts = feature.shape[1]
    if ts % 4 != 0:
        feature = feature[:, : ts - (ts % 4), :]
    bs, T, _ = feature.shape
    if T < 4:
        raise ValueError("need at least 4 time frames")
    U = T // 4                      # = T4, per-phase time length
    F2, F4 = F // 2, F // 4

    # phase-split the time axis (t = 4u + m) and pad freq/time by 1:
    # x_prep[b, m, 1+f, 1+u, c] = feature[b, 4u+m, c*F + f]
    x = feature.reshape(bs, U, 4, in_c, F)           # (b, u, m, c, f)
    x = x.transpose(0, 2, 4, 1, 3)                   # (b, m, f, u, c)
    x = jnp.pad(x.astype(jnp.float32), ((0, 0), (0, 0), (1, 1), (1, 1), (0, 0)))

    w1, b1, w2, b2, w3, b3, w4, b4 = params
    w1p = w1.reshape(9 * in_c, C1).astype(jnp.float32)
    w2p = w2.reshape(9, C1, C1).astype(jnp.bfloat16)
    w3p = w3.reshape(9, C1, C2).astype(jnp.bfloat16)
    w4p = w4.reshape(9, C2, C2).astype(jnp.bfloat16)
    b1p = b1.reshape(1, C1).astype(jnp.float32)
    b2p = b2.reshape(1, C1).astype(jnp.float32)
    b3p = b3.reshape(1, C2).astype(jnp.float32)
    b4p = b4.reshape(1, C2).astype(jnp.float32)

    kernel = functools.partial(_vgg_kernel, F=F, U=U, Cin=in_c)

    def full_spec(arr):
        nd = arr.ndim
        return pl.BlockSpec(arr.shape, lambda b, nd=nd: (0,) * nd)

    out = pl.pallas_call(
        kernel,
        out_shape=jax.ShapeDtypeStruct((bs, F4, U, C2), jnp.float32),
        grid_spec=pltpu.PrefetchScalarGridSpec(
            num_scalar_prefetch=0,
            grid=(bs,),
            in_specs=[
                pl.BlockSpec((None, 4, F + 2, U + 2, in_c),
                             lambda b: (b, 0, 0, 0, 0)),
                full_spec(w1p), full_spec(b1p),
                full_spec(w2p), full_spec(b2p),
                full_spec(w3p), full_spec(b3p),
                full_spec(w4p), full_spec(b4p),
            ],
            out_specs=pl.BlockSpec((None, F4, U, C2), lambda b: (b, 0, 0, 0)),
            scratch_shapes=[
                pltpu.VMEM((4, F + 2, U + 2, C1), jnp.bfloat16),   # conv1 out
                pltpu.VMEM((2, F2 + 2, U + 2, C1), jnp.bfloat16),  # pool1 out
                pltpu.VMEM((2, F2 + 2, U + 2, C2), jnp.bfloat16),  # conv3 out
            ],
        ),
        compiler_params=pltpu.CompilerParams(
            dimension_semantics=("parallel",),
            vmem_limit_bytes=64 * 1024 * 1024,
        ),
    )(x, w1p, b1p, w2p, b2p, w3p, b3p, w4p, b4p)

    # kernel out: (bs, F4, U, C) -> PyTorch layout (bs, T4, C*F4), channel outer
    out = out.transpose(0, 2, 3, 1).reshape(bs, U, C2 * F4)
    return out, feat_len


# ----------------------------------------------------------------------------
# Deterministic parameter init (HWIO conv weights) and pure-JAX references
# ----------------------------------------------------------------------------
def init_params(key, in_channel):
    ks = jax.random.split(key, 8)

    def cw(k, cin, cout):
        return jax.random.normal(k, (3, 3, cin, cout), jnp.float32) * 0.05

    def cb(k, cout):
        return jax.random.normal(k, (1, cout), jnp.float32) * 0.01

    return (cw(ks[0], in_channel, INIT_DIM), cb(ks[1], INIT_DIM),
            cw(ks[2], INIT_DIM, INIT_DIM), cb(ks[3], INIT_DIM),
            cw(ks[4], INIT_DIM, HIDE_DIM), cb(ks[5], HIDE_DIM),
            cw(ks[6], HIDE_DIM, HIDE_DIM), cb(ks[7], HIDE_DIM))


def _ref_forward(feature, feat_len, params, input_dim, *, bf16_intermediates):
    """XLA reference. With bf16_intermediates=True it mirrors the kernel's
    numerics exactly (bf16 activations/weights at the MXU, f32 accumulation)."""
    in_c, freq_dim, out_dim = check_dim(input_dim)
    feat_len = feat_len // 4
    ts = feature.shape[1]
    if ts % 4 != 0:
        feature = feature[:, : ts - (ts % 4), :]
    bs, T, _ = feature.shape
    x = feature.reshape(bs, T, in_c, freq_dim).transpose(0, 1, 3, 2)  # NHWC

    def conv(x, w, b, cast):
        if cast:
            x = x.astype(jnp.bfloat16)
            w = w.astype(jnp.bfloat16)
        y = lax.conv_general_dilated(
            x, w, (1, 1), "SAME",
            dimension_numbers=("NHWC", "HWIO", "NHWC"),
            preferred_element_type=jnp.float32)
        return jnp.maximum(y + b.reshape(1, 1, 1, -1).astype(jnp.float32), 0.0)

    def pool(x):
        return lax.reduce_window(x, -jnp.inf, lax.max,
                                 (1, 2, 2, 1), (1, 2, 2, 1), "VALID")

    def rnd(x):
        return x.astype(jnp.bfloat16) if bf16_intermediates else x

    w1, b1, w2, b2, w3, b3, w4, b4 = params
    c = bf16_intermediates
    a1 = rnd(conv(x, w1, b1, False))
    a2 = rnd(pool(conv(a1, w2, b2, c)))
    a3 = rnd(conv(a2, w3, b3, c))
    a4 = pool(conv(a3, w4, b4, c))
    out = a4.transpose(0, 1, 3, 2).reshape(bs, a4.shape[1], out_dim)
    return out.astype(jnp.float32), feat_len


if __name__ == "__main__":
    key = jax.random.PRNGKey(0)
    kx, kp = jax.random.split(key)

    input_dim = 13          # MFCC -> in_channel=1, freq_dim=13, out_dim=384
    bs, ts = 2, 10          # ts not a multiple of 4 -> exercises truncation to 8

    feature = jax.random.normal(kx, (bs, ts, input_dim), jnp.float32)
    feat_len = jnp.array([10, 7], jnp.int32)
    params = init_params(kp, in_channel=1)

    out, new_len = vgg_extractor_forward(feature, feat_len, params, input_dim)
    out = jax.block_until_ready(out)

    assert out.shape == (bs, 2, (13 // 4) * HIDE_DIM), out.shape
    assert new_len.tolist() == [2, 1]

    # tight check vs a reference with the same bf16 rounding as the kernel
    ref_bf16, _ = _ref_forward(feature, feat_len, params, input_dim,
                               bf16_intermediates=True)
    err_bf16 = float(jnp.max(jnp.abs(out - ref_bf16)))
    assert err_bf16 < 1e-3, f"max abs error vs bf16-matched reference: {err_bf16}"

    # sanity check vs the pure-f32 reference (loose: bf16 intermediates)
    ref_f32, _ = _ref_forward(feature, feat_len, params, input_dim,
                              bf16_intermediates=False)
    err_f32 = float(jnp.max(jnp.abs(out - ref_f32)))
    assert err_f32 < 5e-2, f"max abs error vs f32 reference: {err_f32}"

    print("KERNEL_OK")
</pallas_src>

<mosaic_0001>
module attributes {stable_mosaic.version = 11 : i64} {
  func.func @_vgg_kernel(%arg0: i32, %arg1: memref<1x4x15x4x1xf32, #tpu.memory_space<vmem>>, %arg2: memref<9x64xf32, #tpu.memory_space<vmem>>, %arg3: memref<1x64xf32, #tpu.memory_space<vmem>>, %arg4: memref<9x64x64xbf16, #tpu.memory_space<vmem>>, %arg5: memref<1x64xf32, #tpu.memory_space<vmem>>, %arg6: memref<9x64x128xbf16, #tpu.memory_space<vmem>>, %arg7: memref<1x128xf32, #tpu.memory_space<vmem>>, %arg8: memref<9x128x128xbf16, #tpu.memory_space<vmem>>, %arg9: memref<1x128xf32, #tpu.memory_space<vmem>>, %arg10: memref<1x3x2x128xf32, #tpu.memory_space<vmem>>, %arg11: memref<4x15x4x64xbf16, #tpu.memory_space<vmem>>, %arg12: memref<2x8x4x64xbf16, #tpu.memory_space<vmem>>, %arg13: memref<2x8x4x128xbf16, #tpu.memory_space<vmem>>) attributes {dimension_semantics = [#tpu.dimension_semantics<parallel>], iteration_bounds = array<i64: 2>, scalar_prefetch = 0 : i64, scratch_operands = 3 : i64, tpu.core_type = #tpu.core_type<tc>, window_params = [{transform_indices = @transform_0, window_bounds = array<i64: 1, 4, 15, 4, 1>}, {pipeline_mode = #tpu.pipeline_mode<synchronous>, transform_indices = @transform_1, window_bounds = array<i64: 9, 64>}, {pipeline_mode = #tpu.pipeline_mode<synchronous>, transform_indices = @transform_2, window_bounds = array<i64: 1, 64>}, {pipeline_mode = #tpu.pipeline_mode<synchronous>, transform_indices = @transform_3, window_bounds = array<i64: 9, 64, 64>}, {pipeline_mode = #tpu.pipeline_mode<synchronous>, transform_indices = @transform_4, window_bounds = array<i64: 1, 64>}, {pipeline_mode = #tpu.pipeline_mode<synchronous>, transform_indices = @transform_5, window_bounds = array<i64: 9, 64, 128>}, {pipeline_mode = #tpu.pipeline_mode<synchronous>, transform_indices = @transform_6, window_bounds = array<i64: 1, 128>}, {pipeline_mode = #tpu.pipeline_mode<synchronous>, transform_indices = @transform_7, window_bounds = array<i64: 9, 128, 128>}, {pipeline_mode = #tpu.pipeline_mode<synchronous>, transform_indices = @transform_8, window_bounds = array<i64: 1, 128>}, {transform_indices = @transform_9, window_bounds = array<i64: 1, 3, 2, 128>}]} {
    %cst = arith.constant 0.000000e+00 : bf16
    %0 = vector.broadcast %cst : bf16 to vector<4x64xbf16>
    %c0 = arith.constant 0 : index
    %c0_0 = arith.constant 0 : index
    %c0_1 = arith.constant 0 : index
    %c0_2 = arith.constant 0 : index
    %1 = vector.load %arg11[%c0, %c0_0, %c0_1, %c0_2] : memref<4x15x4x64xbf16, #tpu.memory_space<vmem>>, vector<1x1x4x64xbf16>
    %2 = vector.shape_cast %1 : vector<1x1x4x64xbf16> to vector<4x64xbf16>
    %3 = vector.shape_cast %0 : vector<4x64xbf16> to vector<1x1x4x64xbf16>
    tpu.vector_store %arg11[%c0, %c0_0, %c0_1, %c0_2], %3 {strides = array<i32>} : memref<4x15x4x64xbf16, #tpu.memory_space<vmem>>, vector<1x1x4x64xbf16>,
    %c0_3 = arith.constant 0 : index
    %c14 = arith.constant 14 : index
    %c0_4 = arith.constant 0 : index
    %c0_5 = arith.constant 0 : index
    %4 = vector.load %arg11[%c0_3, %c14, %c0_4, %c0_5] : memref<4x15x4x64xbf16, #tpu.memory_space<vmem>>, vector<1x1x4x64xbf16>
    %5 = vector.shape_cast %4 : vector<1x1x4x64xbf16> to vector<4x64xbf16>
    %6 = vector.shape_cast %0 : vector<4x64xbf16> to vector<1x1x4x64xbf16>
    tpu.vector_store %arg11[%c0_3, %c14, %c0_4, %c0_5], %6 {strides = array<i32>} : memref<4x15x4x64xbf16, #tpu.memory_space<vmem>>, vector<1x1x4x64xbf16>,
    %c1 = arith.constant 1 : index
    %c0_6 = arith.constant 0 : index
    %c0_7 = arith.constant 0 : index
    %c0_8 = arith.constant 0 : index
    %7 = vector.load %arg11[%c1, %c0_6, %c0_7, %c0_8] : memref<4x15x4x64xbf16, #tpu.memory_space<vmem>>, vector<1x1x4x64xbf16>
    %8 = vector.shape_cast %7 : vector<1x1x4x64xbf16> to vector<4x64xbf16>
    %9 = vector.shape_cast %0 : vector<4x64xbf16> to vector<1x1x4x64xbf16>
    tpu.vector_store %arg11[%c1, %c0_6, %c0_7, %c0_8], %9 {strides = array<i32>} : memref<4x15x4x64xbf16, #tpu.memory_space<vmem>>, vector<1x1x4x64xbf16>,
    %c1_9 = arith.constant 1 : index
    %c14_10 = arith.constant 14 : index
    %c0_11 = arith.constant 0 : index
    %c0_12 = arith.constant 0 : index
    %10 = vector.load %arg11[%c1_9, %c14_10, %c0_11, %c0_12] : memref<4x15x4x64xbf16, #tpu.memory_space<vmem>>, vector<1x1x4x64xbf16>
    %11 = vector.shape_cast %10 : vector<1x1x4x64xbf16> to vector<4x64xbf16>
    %12 = vector.shape_cast %0 : vector<4x64xbf16> to vector<1x1x4x64xbf16>
    tpu.vector_store %arg11[%c1_9, %c14_10, %c0_11, %c0_12], %12 {strides = array<i32>} : memref<4x15x4x64xbf16, #tpu.memory_space<vmem>>, vector<1x1x4x64xbf16>,
    %c2 = arith.constant 2 : index
    %c0_13 = arith.constant 0 : index
    %c0_14 = arith.constant 0 : index
    %c0_15 = arith.constant 0 : index
    %13 = vector.load %arg11[%c2, %c0_13, %c0_14, %c0_15] : memref<4x15x4x64xbf16, #tpu.memory_space<vmem>>, vector<1x1x4x64xbf16>
    %14 = vector.shape_cast %13 : vector<1x1x4x64xbf16> to vector<4x64xbf16>
    %15 = vector.shape_cast %0 : vector<4x64xbf16> to vector<1x1x4x64xbf16>
    tpu.vector_store %arg11[%c2, %c0_13, %c0_14, %c0_15], %15 {strides = array<i32>} : memref<4x15x4x64xbf16, #tpu.memory_space<vmem>>, vector<1x1x4x64xbf16>,
    %c2_16 = arith.constant 2 : index
    %c14_17 = arith.constant 14 : index
    %c0_18 = arith.constant 0 : index
    %c0_19 = arith.constant 0 : index
    %16 = vector.load %arg11[%c2_16, %c14_17, %c0_18, %c0_19] : memref<4x15x4x64xbf16, #tpu.memory_space<vmem>>, vector<1x1x4x64xbf16>
    %17 = vector.shape_cast %16 : vector<1x1x4x64xbf16> to vector<4x64xbf16>
    %18 = vector.shape_cast %0 : vector<4x64xbf16> to vector<1x1x4x64xbf16>
    tpu.vector_store %arg11[%c2_16, %c14_17, %c0_18, %c0_19], %18 {strides = array<i32>} : memref<4x15x4x64xbf16, #tpu.memory_space<vmem>>, vector<1x1x4x64xbf16>,
    %c3 = arith.constant 3 : index
    %c0_20 = arith.constant 0 : index
    %c0_21 = arith.constant 0 : index
    %c0_22 = arith.constant 0 : index
    %19 = vector.load %arg11[%c3, %c0_20, %c0_21, %c0_22] : memref<4x15x4x64xbf16, #tpu.memory_space<vmem>>, vector<1x1x4x64xbf16>
    %20 = vector.shape_cast %19 : vector<1x1x4x64xbf16> to vector<4x64xbf16>
    %21 = vector.shape_cast %0 : vector<4x64xbf16> to vector<1x1x4x64xbf16>
    tpu.vector_store %arg11[%c3, %c0_20, %c0_21, %c0_22], %21 {strides = array<i32>} : memref<4x15x4x64xbf16, #tpu.memory_space<vmem>>, vector<1x1x4x64xbf16>,
    %c3_23 = arith.constant 3 : index
    %c14_24 = arith.constant 14 : index
    %c0_25 = arith.constant 0 : index
    %c0_26 = arith.constant 0 : index
    %22 = vector.load %arg11[%c3_23, %c14_24, %c0_25, %c0_26] : memref<4x15x4x64xbf16, #tpu.memory_space<vmem>>, vector<1x1x4x64xbf16>
    %23 = vector.shape_cast %22 : vector<1x1x4x64xbf16> to vector<4x64xbf16>
    %24 = vector.shape_cast %0 : vector<4x64xbf16> to vector<1x1x4x64xbf16>
    tpu.vector_store %arg11[%c3_23, %c14_24, %c0_25, %c0_26], %24 {strides = array<i32>} : memref<4x15x4x64xbf16, #tpu.memory_space<vmem>>, vector<1x1x4x64xbf16>,
    %cst_27 = arith.constant 0.000000e+00 : bf16
    %25 = vector.broadcast %cst_27 : bf16 to vector<4x64xbf16>
    %c0_28 = arith.constant 0 : index
    %c0_29 = arith.constant 0 : index
    %c0_30 = arith.constant 0 : index
    %c0_31 = arith.constant 0 : index
    %26 = vector.load %arg12[%c0_28, %c0_29, %c0_30, %c0_31] : memref<2x8x4x64xbf16, #tpu.memory_space<vmem>>, vector<1x1x4x64xbf16>
    %27 = vector.shape_cast %26 : vector<1x1x4x64xbf16> to vector<4x64xbf16>
    %28 = vector.shape_cast %25 : vector<4x64xbf16> to vector<1x1x4x64xbf16>
    tpu.vector_store %arg12[%c0_28, %c0_29, %c0_30, %c0_31], %28 {strides = array<i32>} : memref<2x8x4x64xbf16, #tpu.memory_space<vmem>>, vector<1x1x4x64xbf16>,
    %c0_32 = arith.constant 0 : index
    %c7 = arith.constant 7 : index
    %c0_33 = arith.constant 0 : index
    %c0_34 = arith.constant 0 : index
    %29 = vector.load %arg12[%c0_32, %c7, %c0_33, %c0_34] : memref<2x8x4x64xbf16, #tpu.memory_space<vmem>>, vector<1x1x4x64xbf16>
    %30 = vector.shape_cast %29 : vector<1x1x4x64xbf16> to vector<4x64xbf16>
    %31 = vector.shape_cast %25 : vector<4x64xbf16> to vector<1x1x4x64xbf16>
    tpu.vector_store %arg12[%c0_32, %c7, %c0_33, %c0_34], %31 {strides = array<i32>} : memref<2x8x4x64xbf16, #tpu.memory_space<vmem>>, vector<1x1x4x64xbf16>,
    %c1_35 = arith.constant 1 : index
    %c0_36 = arith.constant 0 : index
    %c0_37 = arith.constant 0 : index
    %c0_38 = arith.constant 0 : index
    %32 = vector.load %arg12[%c1_35, %c0_36, %c0_37, %c0_38] : memref<2x8x4x64xbf16, #tpu.memory_space<vmem>>, vector<1x1x4x64xbf16>
    %33 = vector.shape_cast %32 : vector<1x1x4x64xbf16> to vector<4x64xbf16>
    %34 = vector.shape_cast %25 : vector<4x64xbf16> to vector<1x1x4x64xbf16>
    tpu.vector_store %arg12[%c1_35, %c0_36, %c0_37, %c0_38], %34 {strides = array<i32>} : memref<2x8x4x64xbf16, #tpu.memory_space<vmem>>, vector<1x1x4x64xbf16>,
    %c1_39 = arith.constant 1 : index
    %c7_40 = arith.constant 7 : index
    %c0_41 = arith.constant 0 : index
    %c0_42 = arith.constant 0 : index
    %35 = vector.load %arg12[%c1_39, %c7_40, %c0_41, %c0_42] : memref<2x8x4x64xbf16, #tpu.memory_space<vmem>>, vector<1x1x4x64xbf16>
    %36 = vector.shape_cast %35 : vector<1x1x4x64xbf16> to vector<4x64xbf16>
    %37 = vector.shape_cast %25 : vector<4x64xbf16> to vector<1x1x4x64xbf16>
    tpu.vector_store %arg12[%c1_39, %c7_40, %c0_41, %c0_42], %37 {strides = array<i32>} : memref<2x8x4x64xbf16, #tpu.memory_space<vmem>>, vector<1x1x4x64xbf16>,
    %cst_43 = arith.constant 0.000000e+00 : bf16
    %38 = vector.broadcast %cst_43 : bf16 to vector<4x128xbf16>
    %c0_44 = arith.constant 0 : index
    %c0_45 = arith.constant 0 : index
    %c0_46 = arith.constant 0 : index
    %c0_47 = arith.constant 0 : index
    %39 = vector.load %arg13[%c0_44, %c0_45, %c0_46, %c0_47] : memref<2x8x4x128xbf16, #tpu.memory_space<vmem>>, vector<1x1x4x128xbf16>
    %40 = vector.shape_cast %39 : vector<1x1x4x128xbf16> to vector<4x128xbf16>
    %41 = vector.shape_cast %38 : vector<4x128xbf16> to vector<1x1x4x128xbf16>
    tpu.vector_store %arg13[%c0_44, %c0_45, %c0_46, %c0_47], %41 {strides = array<i32>} : memref<2x8x4x128xbf16, #tpu.memory_space<vmem>>, vector<1x1x4x128xbf16>,
    %c0_48 = arith.constant 0 : index
    %c7_49 = arith.constant 7 : index
    %c0_50 = arith.constant 0 : index
    %c0_51 = arith.constant 0 : index
    %42 = vector.load %arg13[%c0_48, %c7_49, %c0_50, %c0_51] : memref<2x8x4x128xbf16, #tpu.memory_space<vmem>>, vector<1x1x4x128xbf16>
    %43 = vector.shape_cast %42 : vector<1x1x4x128xbf16> to vector<4x128xbf16>
    %44 = vector.shape_cast %38 : vector<4x128xbf16> to vector<1x1x4x128xbf16>
    tpu.vector_store %arg13[%c0_48, %c7_49, %c0_50, %c0_51], %44 {strides = array<i32>} : memref<2x8x4x128xbf16, #tpu.memory_space<vmem>>, vector<1x1x4x128xbf16>,
    %c1_52 = arith.constant 1 : index
    %c0_53 = arith.constant 0 : index
    %c0_54 = arith.constant 0 : index
    %c0_55 = arith.constant 0 : index
    %45 = vector.load %arg13[%c1_52, %c0_53, %c0_54, %c0_55] : memref<2x8x4x128xbf16, #tpu.memory_space<vmem>>, vector<1x1x4x128xbf16>
    %46 = vector.shape_cast %45 : vector<1x1x4x128xbf16> to vector<4x128xbf16>
    %47 = vector.shape_cast %38 : vector<4x128xbf16> to vector<1x1x4x128xbf16>
    tpu.vector_store %arg13[%c1_52, %c0_53, %c0_54, %c0_55], %47 {strides = array<i32>} : memref<2x8x4x128xbf16, #tpu.memory_space<vmem>>, vector<1x1x4x128xbf16>,
    %c1_56 = arith.constant 1 : index
    %c7_57 = arith.constant 7 : index
    %c0_58 = arith.constant 0 : index
    %c0_59 = arith.constant 0 : index
    %48 = vector.load %arg13[%c1_56, %c7_57, %c0_58, %c0_59] : memref<2x8x4x128xbf16, #tpu.memory_space<vmem>>, vector<1x1x4x128xbf16>
    %49 = vector.shape_cast %48 : vector<1x1x4x128xbf16> to vector<4x128xbf16>
    %50 = vector.shape_cast %38 : vector<4x128xbf16> to vector<1x1x4x128xbf16>
    tpu.vector_store %arg13[%c1_56, %c7_57, %c0_58, %c0_59], %50 {strides = array<i32>} : memref<2x8x4x128xbf16, #tpu.memory_space<vmem>>, vector<1x1x4x128xbf16>,
    %c0_60 = arith.constant 0 : index
    %c0_61 = arith.constant 0 : index
    %51 = vector.load %arg2[%c0_60, %c0_61] : memref<9x64xf32, #tpu.memory_space<vmem>>, vector<9x64xf32>
    %c0_62 = arith.constant 0 : index
    %c0_63 = arith.constant 0 : index
    %52 = vector.load %arg3[%c0_62, %c0_63] : memref<1x64xf32, #tpu.memory_space<vmem>>, vector<1x64xf32>
    %c0_i32 = arith.constant 0 : i32
    %c13_i32 = arith.constant 13 : i32
    %53 = arith.addi %c0_i32, %c13_i32 : i32
    %c1_i32 = arith.constant 1 : i32
    scf.for %arg14 = %c0_i32 to %53 step %c1_i32  : i32 {
      %cst_81 = arith.constant 0.000000e+00 : f32
      %60 = vector.broadcast %cst_81 : f32 to vector<2x64xf32>
      %c0_i32_82 = arith.constant 0 : i32
      %61 = arith.addi %arg14, %c0_i32_82 : i32
      %c0_83 = arith.constant 0 : index
      %c3_84 = arith.constant 3 : index
      %62 = arith.index_cast %61 : i32 to index
      %c0_85 = arith.constant 0 : index
      %c0_86 = arith.constant 0 : index
      %63 = vector.load %arg1[%c0_83, %c3_84, %62, %c0_85, %c0_86] : memref<1x4x15x4x1xf32, #tpu.memory_space<vmem>>, vector<1x1x1x2x1xf32>
      %64 = vector.shape_cast %63 : vector<1x1x1x2x1xf32> to vector<2x1xf32>
      %65 = vector.extract_strided_slice %51 {offsets = [0, 0], sizes = [1, 64], strides = [1, 1]} : vector<9x64xf32> to vector<1x64xf32>
      %66 = vector.broadcast %64 : vector<2x1xf32> to vector<2x64xf32>
      %67 = vector.broadcast %65 : vector<1x64xf32> to vector<2x64xf32>
      %68 = arith.mulf %66, %67 : vector<2x64xf32>
      %69 = arith.addf %60, %68 : vector<2x64xf32>
      %c1_i32_87 = arith.constant 1 : i32
      %70 = arith.addi %arg14, %c1_i32_87 : i32
      %c0_88 = arith.constant 0 : index
      %c3_89 = arith.constant 3 : index
      %71 = arith.index_cast %70 : i32 to index
      %c0_90 = arith.constant 0 : index
      %c0_91 = arith.constant 0 : index
      %72 = vector.load %arg1[%c0_88, %c3_89, %71, %c0_90, %c0_91] : memref<1x4x15x4x1xf32, #tpu.memory_space<vmem>>, vector<1x1x1x2x1xf32>
      %73 = vector.shape_cast %72 : vector<1x1x1x2x1xf32> to vector<2x1xf32>
      %74 = vector.extract_strided_slice %51 {offsets = [1, 0], sizes = [1, 64], strides = [1, 1]} : vector<9x64xf32> to vector<1x64xf32>
      %75 = vector.broadcast %73 : vector<2x1xf32> to vector<2x64xf32>
      %76 = vector.broadcast %74 : vector<1x64xf32> to vector<2x64xf32>
      %77 = arith.mulf %75, %76 : vector<2x64xf32>
      %78 = arith.addf %69, %77 : vector<2x64xf32>
      %c2_i32 = arith.constant 2 : i32
      %79 = arith.addi %arg14, %c2_i32 : i32
      %c0_92 = arith.constant 0 : index
      %c3_93 = arith.constant 3 : index
      %80 = arith.index_cast %79 : i32 to index
      %c0_94 = arith.constant 0 : index
      %c0_95 = arith.constant 0 : index
      %81 = vector.load %arg1[%c0_92, %c3_93, %80, %c0_94, %c0_95] : memref<1x4x15x4x1xf32, #tpu.memory_space<vmem>>, vector<1x1x1x2x1xf32>
      %82 = vector.shape_cast %81 : vector<1x1x1x2x1xf32> to vector<2x1xf32>
      %83 = vector.extract_strided_slice %51 {offsets = [2, 0], sizes = [1, 64], strides = [1, 1]} : vector<9x64xf32> to vector<1x64xf32>
      %84 = vector.broadcast %82 : vector<2x1xf32> to vector<2x64xf32>
      %85 = vector.broadcast %83 : vector<1x64xf32> to vector<2x64xf32>
      %86 = arith.mulf %84, %85 : vector<2x64xf32>
      %87 = arith.addf %78, %86 : vector<2x64xf32>
      %c0_i32_96 = arith.constant 0 : i32
      %88 = arith.addi %arg14, %c0_i32_96 : i32
      %c0_97 = arith.constant 0 : index
      %c0_98 = arith.constant 0 : index
      %89 = arith.index_cast %88 : i32 to index
      %c1_99 = arith.constant 1 : index
      %c0_100 = arith.constant 0 : index
      %90 = vector.load %arg1[%c0_97, %c0_98, %89, %c1_99, %c0_100] : memref<1x4x15x4x1xf32, #tpu.memory_space<vmem>>, vector<1x1x1x2x1xf32>
      %91 = vector.shape_cast %90 : vector<1x1x1x2x1xf32> to vector<2x1xf32>
      %92 = vector.extract_strided_slice %51 {offsets = [3, 0], sizes = [1, 64], strides = [1, 1]} : vector<9x64xf32> to vector<1x64xf32>
      %93 = vector.broadcast %91 : vector<2x1xf32> to vector<2x64xf32>
      %94 = vector.broadcast %92 : vector<1x64xf32> to vector<2x64xf32>
      %95 = arith.mulf %93, %94 : vector<2x64xf32>
      %96 = arith.addf %87, %95 : vector<2x64xf32>
      %c1_i32_101 = arith.constant 1 : i32
      %97 = arith.addi %arg14, %c1_i32_101 : i32
      %c0_102 = arith.constant 0 : index
      %c0_103 = arith.constant 0 : index
      %98 = arith.index_cast %97 : i32 to index
      %c1_104 = arith.constant 1 : index
      %c0_105 = arith.constant 0 : index
      %99 = vector.load %arg1[%c0_102, %c0_103, %98, %c1_104, %c0_105] : memref<1x4x15x4x1xf32, #tpu.memory_space<vmem>>, vector<1x1x1x2x1xf32>
      %100 = vector.shape_cast %99 : vector<1x1x1x2x1xf32> to vector<2x1xf32>
      %101 = vector.extract_strided_slice %51 {offsets = [4, 0], sizes = [1, 64], strides = [1, 1]} : vector<9x64xf32> to vector<1x64xf32>
      %102 = vector.broadcast %100 : vector<2x1xf32> to vector<2x64xf32>
      %103 = vector.broadcast %101 : vector<1x64xf32> to vector<2x64xf32>
      %104 = arith.mulf %102, %103 : vector<2x64xf32>
      %105 = arith.addf %96, %104 : vector<2x64xf32>
      %c2_i32_106 = arith.constant 2 : i32
      %106 = arith.addi %arg14, %c2_i32_106 : i32
      %c0_107 = arith.constant 0 : index
      %c0_108 = arith.constant 0 : index
      %107 = arith.index_cast %106 : i32 to index
      %c1_109 = arith.constant 1 : index
      %c0_110 = arith.constant 0 : index
      %108 = vector.load %arg1[%c0_107, %c0_108, %107, %c1_109, %c0_110] : memref<1x4x15x4x1xf32, #tpu.memory_space<vmem>>, vector<1x1x1x2x1xf32>
      %109 = vector.shape_cast %108 : vector<1x1x1x2x1xf32> to vector<2x1xf32>
      %110 = vector.extract_strided_slice %51 {offsets = [5, 0], sizes = [1, 64], strides = [1, 1]} : vector<9x64xf32> to vector<1x64xf32>
      %111 = vector.broadcast %109 : vector<2x1xf32> to vector<2x64xf32>
      %112 = vector.broadcast %110 : vector<1x64xf32> to vector<2x64xf32>
      %113 = arith.mulf %111, %112 : vector<2x64xf32>
      %114 = arith.addf %105, %113 : vector<2x64xf32>
      %c0_i32_111 = arith.constant 0 : i32
      %115 = arith.addi %arg14, %c0_i32_111 : i32
      %c0_112 = arith.constant 0 : index
      %c1_113 = arith.constant 1 : index
      %116 = arith.index_cast %115 : i32 to index
      %c1_114 = arith.constant 1 : index
      %c0_115 = arith.constant 0 : index
      %117 = vector.load %arg1[%c0_112, %c1_113, %116, %c1_114, %c0_115] : memref<1x4x15x4x1xf32, #tpu.memory_space<vmem>>, vector<1x1x1x2x1xf32>
      %118 = vector.shape_cast %117 : vector<1x1x1x2x1xf32> to vector<2x1xf32>
      %119 = vector.extract_strided_slice %51 {offsets = [6, 0], sizes = [1, 64], strides = [1, 1]} : vector<9x64xf32> to vector<1x64xf32>
      %120 = vector.broadcast %118 : vector<2x1xf32> to vector<2x64xf32>
      %121 = vector.broadcast %119 : vector<1x64xf32> to vector<2x64xf32>
      %122 = arith.mulf %120, %121 : vector<2x64xf32>
      %123 = arith.addf %114, %122 : vector<2x64xf32>
      %c1_i32_116 = arith.constant 1 : i32
      %124 = arith.addi %arg14, %c1_i32_116 : i32
      %c0_117 = arith.constant 0 : index
      %c1_118 = arith.constant 1 : index
      %125 = arith.index_cast %124 : i32 to index
      %c1_119 = arith.constant 1 : index
      %c0_120 = arith.constant 0 : index
      %126 = vector.load %arg1[%c0_117, %c1_118, %125, %c1_119, %c0_120] : memref<1x4x15x4x1xf32, #tpu.memory_space<vmem>>, vector<1x1x1x2x1xf32>
      %127 = vector.shape_cast %126 : vector<1x1x1x2x1xf32> to vector<2x1xf32>
      %128 = vector.extract_strided_slice %51 {offsets = [7, 0], sizes = [1, 64], strides = [1, 1]} : vector<9x64xf32> to vector<1x64xf32>
      %129 = vector.broadcast %127 : vector<2x1xf32> to vector<2x64xf32>
      %130 = vector.broadcast %128 : vector<1x64xf32> to vector<2x64xf32>
      %131 = arith.mulf %129, %130 : vector<2x64xf32>
      %132 = arith.addf %123, %131 : vector<2x64xf32>
      %c2_i32_121 = arith.constant 2 : i32
      %133 = arith.addi %arg14, %c2_i32_121 : i32
      %c0_122 = arith.constant 0 : index
      %c1_123 = arith.constant 1 : index
      %134 = arith.index_cast %133 : i32 to index
      %c1_124 = arith.constant 1 : index
      %c0_125 = arith.constant 0 : index
      %135 = vector.load %arg1[%c0_122, %c1_123, %134, %c1_124, %c0_125] : memref<1x4x15x4x1xf32, #tpu.memory_space<vmem>>, vector<1x1x1x2x1xf32>
      %136 = vector.shape_cast %135 : vector<1x1x1x2x1xf32> to vector<2x1xf32>
      %137 = vector.extract_strided_slice %51 {offsets = [8, 0], sizes = [1, 64], strides = [1, 1]} : vector<9x64xf32> to vector<1x64xf32>
      %138 = vector.broadcast %136 : vector<2x1xf32> to vector<2x64xf32>
      %139 = vector.broadcast %137 : vector<1x64xf32> to vector<2x64xf32>
      %140 = arith.mulf %138, %139 : vector<2x64xf32>
      %141 = arith.addf %132, %140 : vector<2x64xf32>
      %142 = vector.broadcast %52 : vector<1x64xf32> to vector<2x64xf32>
      %143 = arith.addf %141, %142 : vector<2x64xf32>
      %cst_126 = arith.constant 0.000000e+00 : f32
      %144 = vector.broadcast %cst_126 : f32 to vector<2x64xf32>
      %145 = arith.maximumf %143, %144 : vector<2x64xf32>
      %cst_127 = arith.constant 0.000000e+00 : f32
      %146 = vector.broadcast %cst_127 : f32 to vector<1x64xf32>
      %147 = tpu.concatenate %146, %145, %146 in 0 : vector<1x64xf32>, vector<2x64xf32>, vector<1x64xf32> -> vector<4x64xf32>
      %148 = arith.truncf %147 : vector<4x64xf32> to vector<4x64xbf16>
      %c1_i32_128 = arith.constant 1 : i32
      %149 = arith.addi %c1_i32_128, %arg14 : i32
      %c0_129 = arith.constant 0 : index
      %150 = arith.index_cast %149 : i32 to index
      %c0_130 = arith.constant 0 : index
      %c0_131 = arith.constant 0 : index
      %151 = vector.load %arg11[%c0_129, %150, %c0_130, %c0_131] : memref<4x15x4x64xbf16, #tpu.memory_space<vmem>>, vector<1x1x4x64xbf16>
      %152 = vector.shape_cast %151 : vector<1x1x4x64xbf16> to vector<4x64xbf16>
      %153 = vector.shape_cast %148 : vector<4x64xbf16> to vector<1x1x4x64xbf16>
      tpu.vector_store %arg11[%c0_129, %150, %c0_130, %c0_131], %153 {strides = array<i32>} : memref<4x15x4x64xbf16, #tpu.memory_space<vmem>>, vector<1x1x4x64xbf16>,
      %cst_132 = arith.constant 0.000000e+00 : f32
      %154 = vector.broadcast %cst_132 : f32 to vector<2x64xf32>
      %c0_i32_133 = arith.constant 0 : i32
      %155 = arith.addi %arg14, %c0_i32_133 : i32
      %c0_134 = arith.constant 0 : index
      %c0_135 = arith.constant 0 : index
      %156 = arith.index_cast %155 : i32 to index
      %c1_136 = arith.constant 1 : index
      %c0_137 = arith.constant 0 : index
      %157 = vector.load %arg1[%c0_134, %c0_135, %156, %c1_136, %c0_137] : memref<1x4x15x4x1xf32, #tpu.memory_space<vmem>>, vector<1x1x1x2x1xf32>
      %158 = vector.shape_cast %157 : vector<1x1x1x2x1xf32> to vector<2x1xf32>
      %159 = vector.extract_strided_slice %51 {offsets = [0, 0], sizes = [1, 64], strides = [1, 1]} : vector<9x64xf32> to vector<1x64xf32>
      %160 = vector.broadcast %158 : vector<2x1xf32> to vector<2x64xf32>
      %161 = vector.broadcast %159 : vector<1x64xf32> to vector<2x64xf32>
      %162 = arith.mulf %160, %161 : vector<2x64xf32>
      %163 = arith.addf %154, %162 : vector<2x64xf32>
      %c1_i32_138 = arith.constant 1 : i32
      %164 = arith.addi %arg14, %c1_i32_138 : i32
      %c0_139 = arith.constant 0 : index
      %c0_140 = arith.constant 0 : index
      %165 = arith.index_cast %164 : i32 to index
      %c1_141 = arith.constant 1 : index
      %c0_142 = arith.constant 0 : index
      %166 = vector.load %arg1[%c0_139, %c0_140, %165, %c1_141, %c0_142] : memref<1x4x15x4x1xf32, #tpu.memory_space<vmem>>, vector<1x1x1x2x1xf32>
      %167 = vector.shape_cast %166 : vector<1x1x1x2x1xf32> to vector<2x1xf32>
      %168 = vector.extract_strided_slice %51 {offsets = [1, 0], sizes = [1, 64], strides = [1, 1]} : vector<9x64xf32> to vector<1x64xf32>
      %169 = vector.broadcast %167 : vector<2x1xf32> to vector<2x64xf32>
      %170 = vector.broadcast %168 : vector<1x64xf32> to vector<2x64xf32>
      %171 = arith.mulf %169, %170 : vector<2x64xf32>
      %172 = arith.addf %163, %171 : vector<2x64xf32>
      %c2_i32_143 = arith.constant 2 : i32
      %173 = arith.addi %arg14, %c2_i32_143 : i32
      %c0_144 = arith.constant 0 : index
      %c0_145 = arith.constant 0 : index
      %174 = arith.index_cast %173 : i32 to index
      %c1_146 = arith.constant 1 : index
      %c0_147 = arith.constant 0 : index
      %175 = vector.load %arg1[%c0_144, %c0_145, %174, %c1_146, %c0_147] : memref<1x4x15x4x1xf32, #tpu.memory_space<vmem>>, vector<1x1x1x2x1xf32>
      %176 = vector.shape_cast %175 : vector<1x1x1x2x1xf32> to vector<2x1xf32>
      %177 = vector.extract_strided_slice %51 {offsets = [2, 0], sizes = [1, 64], strides = [1, 1]} : vector<9x64xf32> to vector<1x64xf32>
      %178 = vector.broadcast %176 : vector<2x1xf32> to vector<2x64xf32>
      %179 = vector.broadcast %177 : vector<1x64xf32> to vector<2x64xf32>
      %180 = arith.mulf %178, %179 : vector<2x64xf32>
      %181 = arith.addf %172, %180 : vector<2x64xf32>
      %c0_i32_148 = arith.constant 0 : i32
      %182 = arith.addi %arg14, %c0_i32_148 : i32
      %c0_149 = arith.constant 0 : index
      %c1_150 = arith.constant 1 : index
      %183 = arith.index_cast %182 : i32 to index
      %c1_151 = arith.constant 1 : index
      %c0_152 = arith.constant 0 : index
      %184 = vector.load %arg1[%c0_149, %c1_150, %183, %c1_151, %c0_152] : memref<1x4x15x4x1xf32, #tpu.memory_space<vmem>>, vector<1x1x1x2x1xf32>
      %185 = vector.shape_cast %184 : vector<1x1x1x2x1xf32> to vector<2x1xf32>
      %186 = vector.extract_strided_slice %51 {offsets = [3, 0], sizes = [1, 64], strides = [1, 1]} : vector<9x64xf32> to vector<1x64xf32>
      %187 = vector.broadcast %185 : vector<2x1xf32> to vector<2x64xf32>
      %188 = vector.broadcast %186 : vector<1x64xf32> to vector<2x64xf32>
      %189 = arith.mulf %187, %188 : vector<2x64xf32>
      %190 = arith.addf %181, %189 : vector<2x64xf32>
      %c1_i32_153 = arith.constant 1 : i32
      %191 = arith.addi %arg14, %c1_i32_153 : i32
      %c0_154 = arith.constant 0 : index
      %c1_155 = arith.constant 1 : index
      %192 = arith.index_cast %191 : i32 to index
      %c1_156 = arith.constant 1 : index
      %c0_157 = arith.constant 0 : index
      %193 = vector.load %arg1[%c0_154, %c1_155, %192, %c1_156, %c0_157] : memref<1x4x15x4x1xf32, #tpu.memory_space<vmem>>, vector<1x1x1x2x1xf32>
      %194 = vector.shape_cast %193 : vector<1x1x1x2x1xf32> to vector<2x1xf32>
      %195 = vector.extract_strided_slice %51 {offsets = [4, 0], sizes = [1, 64], strides = [1, 1]} : vector<9x64xf32> to vector<1x64xf32>
      %196 = vector.broadcast %194 : vector<2x1xf32> to vector<2x64xf32>
      %197 = vector.broadcast %195 : vector<1x64xf32> to vector<2x64xf32>
      %198 = arith.mulf %196, %197 : vector<2x64xf32>
      %199 = arith.addf %190, %198 : vector<2x64xf32>
      %c2_i32_158 = arith.constant 2 : i32
      %200 = arith.addi %arg14, %c2_i32_158 : i32
      %c0_159 = arith.constant 0 : index
      %c1_160 = arith.constant 1 : index
      %201 = arith.index_cast %200 : i32 to index
      %c1_161 = arith.constant 1 : index
      %c0_162 = arith.constant 0 : index
      %202 = vector.load %arg1[%c0_159, %c1_160, %201, %c1_161, %c0_162] : memref<1x4x15x4x1xf32, #tpu.memory_space<vmem>>, vector<1x1x1x2x1xf32>
      %203 = vector.shape_cast %202 : vector<1x1x1x2x1xf32> to vector<2x1xf32>
      %204 = vector.extract_strided_slice %51 {offsets = [5, 0], sizes = [1, 64], strides = [1, 1]} : vector<9x64xf32> to vector<1x64xf32>
      %205 = vector.broadcast %203 : vector<2x1xf32> to vector<2x64xf32>
      %206 = vector.broadcast %204 : vector<1x64xf32> to vector<2x64xf32>
      %207 = arith.mulf %205, %206 : vector<2x64xf32>
      %208 = arith.addf %199, %207 : vector<2x64xf32>
      %c0_i32_163 = arith.constant 0 : i32
      %209 = arith.addi %arg14, %c0_i32_163 : i32
      %c0_164 = arith.constant 0 : index
      %c2_165 = arith.constant 2 : index
      %210 = arith.index_cast %209 : i32 to index
      %c1_166 = arith.constant 1 : index
      %c0_167 = arith.constant 0 : index
      %211 = vector.load %arg1[%c0_164, %c2_165, %210, %c1_166, %c0_167] : memref<1x4x15x4x1xf32, #tpu.memory_space<vmem>>, vector<1x1x1x2x1xf32>
      %212 = vector.shape_cast %211 : vector<1x1x1x2x1xf32> to vector<2x1xf32>
      %213 = vector.extract_strided_slice %51 {offsets = [6, 0], sizes = [1, 64], strides = [1, 1]} : vector<9x64xf32> to vector<1x64xf32>
      %214 = vector.broadcast %212 : vector<2x1xf32> to vector<2x64xf32>
      %215 = vector.broadcast %213 : vector<1x64xf32> to vector<2x64xf32>
      %216 = arith.mulf %214, %215 : vector<2x64xf32>
      %217 = arith.addf %208, %216 : vector<2x64xf32>
      %c1_i32_168 = arith.constant 1 : i32
      %218 = arith.addi %arg14, %c1_i32_168 : i32
      %c0_169 = arith.constant 0 : index
      %c2_170 = arith.constant 2 : index
      %219 = arith.index_cast %218 : i32 to index
      %c1_171 = arith.constant 1 : index
      %c0_172 = arith.constant 0 : index
      %220 = vector.load %arg1[%c0_169, %c2_170, %219, %c1_171, %c0_172] : memref<1x4x15x4x1xf32, #tpu.memory_space<vmem>>, vector<1x1x1x2x1xf32>
      %221 = vector.shape_cast %220 : vector<1x1x1x2x1xf32> to vector<2x1xf32>
      %222 = vector.extract_strided_slice %51 {offsets = [7, 0], sizes = [1, 64], strides = [1, 1]} : vector<9x64xf32> to vector<1x64xf32>
      %223 = vector.broadcast %221 : vector<2x1xf32> to vector<2x64xf32>
      %224 = vector.broadcast %222 : vector<1x64xf32> to vector<2x64xf32>
      %225 = arith.mulf %223, %224 : vector<2x64xf32>
      %226 = arith.addf %217, %225 : vector<2x64xf32>
      %c2_i32_173 = arith.constant 2 : i32
      %227 = arith.addi %arg14, %c2_i32_173 : i32
      %c0_174 = arith.constant 0 : index
      %c2_175 = arith.constant 2 : index
      %228 = arith.index_cast %227 : i32 to index
      %c1_176 = arith.constant 1 : index
      %c0_177 = arith.constant 0 : index
      %229 = vector.load %arg1[%c0_174, %c2_175, %228, %c1_176, %c0_177] : memref<1x4x15x4x1xf32, #tpu.memory_space<vmem>>, vector<1x1x1x2x1xf32>
      %230 = vector.shape_cast %229 : vector<1x1x1x2x1xf32> to vector<2x1xf32>
      %231 = vector.extract_strided_slice %51 {offsets = [8, 0], sizes = [1, 64], strides = [1, 1]} : vector<9x64xf32> to vector<1x64xf32>
      %232 = vector.broadcast %230 : vector<2x1xf32> to vector<2x64xf32>
      %233 = vector.broadcast %231 : vector<1x64xf32> to vector<2x64xf32>
      %234 = arith.mulf %232, %233 : vector<2x64xf32>
      %235 = arith.addf %226, %234 : vector<2x64xf32>
      %236 = vector.broadcast %52 : vector<1x64xf32> to vector<2x64xf32>
      %237 = arith.addf %235, %236 : vector<2x64xf32>
      %cst_178 = arith.constant 0.000000e+00 : f32
      %238 = vector.broadcast %cst_178 : f32 to vector<2x64xf32>
      %239 = arith.maximumf %237, %238 : vector<2x64xf32>
      %cst_179 = arith.constant 0.000000e+00 : f32
      %240 = vector.broadcast %cst_179 : f32 to vector<1x64xf32>
      %241 = tpu.concatenate %240, %239, %240 in 0 : vector<1x64xf32>, vector<2x64xf32>, vector<1x64xf32> -> vector<4x64xf32>
      %242 = arith.truncf %241 : vector<4x64xf32> to vector<4x64xbf16>
      %c1_i32_180 = arith.constant 1 : i32
      %243 = arith.addi %c1_i32_180, %arg14 : i32
      %c1_181 = arith.constant 1 : index
      %244 = arith.index_cast %243 : i32 to index
      %c0_182 = arith.constant 0 : index
      %c0_183 = arith.constant 0 : index
      %245 = vector.load %arg11[%c1_181, %244, %c0_182, %c0_183] : memref<4x15x4x64xbf16, #tpu.memory_space<vmem>>, vector<1x1x4x64xbf16>
      %246 = vector.shape_cast %245 : vector<1x1x4x64xbf16> to vector<4x64xbf16>
      %247 = vector.shape_cast %242 : vector<4x64xbf16> to vector<1x1x4x64xbf16>
      tpu.vector_store %arg11[%c1_181, %244, %c0_182, %c0_183], %247 {strides = array<i32>} : memref<4x15x4x64xbf16, #tpu.memory_space<vmem>>, vector<1x1x4x64xbf16>,
      %cst_184 = arith.constant 0.000000e+00 : f32
      %248 = vector.broadcast %cst_184 : f32 to vector<2x64xf32>
      %c0_i32_185 = arith.constant 0 : i32
      %249 = arith.addi %arg14, %c0_i32_185 : i32
      %c0_186 = arith.constant 0 : index
      %c1_187 = arith.constant 1 : index
      %250 = arith.index_cast %249 : i32 to index
      %c1_188 = arith.constant 1 : index
      %c0_189 = arith.constant 0 : index
      %251 = vector.load %arg1[%c0_186, %c1_187, %250, %c1_188, %c0_189] : memref<1x4x15x4x1xf32, #tpu.memory_space<vmem>>, vector<1x1x1x2x1xf32>
      %252 = vector.shape_cast %251 : vector<1x1x1x2x1xf32> to vector<2x1xf32>
      %253 = vector.extract_strided_slice %51 {offsets = [0, 0], sizes = [1, 64], strides = [1, 1]} : vector<9x64xf32> to vector<1x64xf32>
      %254 = vector.broadcast %252 : vector<2x1xf32> to vector<2x64xf32>
      %255 = vector.broadcast %253 : vector<1x64xf32> to vector<2x64xf32>
      %256 = arith.mulf %254, %255 : vector<2x64xf32>
      %257 = arith.addf %248, %256 : vector<2x64xf32>
      %c1_i32_190 = arith.constant 1 : i32
      %258 = arith.addi %arg14, %c1_i32_190 : i32
      %c0_191 = arith.constant 0 : index
      %c1_192 = arith.constant 1 : index
      %259 = arith.index_cast %258 : i32 to index
      %c1_193 = arith.constant 1 : index
      %c0_194 = arith.constant 0 : index
      %260 = vector.load %arg1[%c0_191, %c1_192, %259, %c1_193, %c0_194] : memref<1x4x15x4x1xf32, #tpu.memory_space<vmem>>, vector<1x1x1x2x1xf32>
      %261 = vector.shape_cast %260 : vector<1x1x1x2x1xf32> to vector<2x1xf32>
      %262 = vector.extract_strided_slice %51 {offsets = [1, 0], sizes = [1, 64], strides = [1, 1]} : vector<9x64xf32> to vector<1x64xf32>
      %263 = vector.broadcast %261 : vector<2x1xf32> to vector<2x64xf32>
      %264 = vector.broadcast %262 : vector<1x64xf32> to vector<2x64xf32>
      %265 = arith.mulf %263, %264 : vector<2x64xf32>
      %266 = arith.addf %257, %265 : vector<2x64xf32>
      %c2_i32_195 = arith.constant 2 : i32
      %267 = arith.addi %arg14, %c2_i32_195 : i32
      %c0_196 = arith.constant 0 : index
      %c1_197 = arith.constant 1 : index
      %268 = arith.index_cast %267 : i32 to index
      %c1_198 = arith.constant 1 : index
      %c0_199 = arith.constant 0 : index
      %269 = vector.load %arg1[%c0_196, %c1_197, %268, %c1_198, %c0_199] : memref<1x4x15x4x1xf32, #tpu.memory_space<vmem>>, vector<1x1x1x2x1xf32>
      %270 = vector.shape_cast %269 : vector<1x1x1x2x1xf32> to vector<2x1xf32>
      %271 = vector.extract_strided_slice %51 {offsets = [2, 0], sizes = [1, 64], strides = [1, 1]} : vector<9x64xf32> to vector<1x64xf32>
      %272 = vector.broadcast %270 : vector<2x1xf32> to vector<2x64xf32>
      %273 = vector.broadcast %271 : vector<1x64xf32> to vector<2x64xf32>
      %274 = arith.mulf %272, %273 : vector<2x64xf32>
      %275 = arith.addf %266, %274 : vector<2x64xf32>
      %c0_i32_200 = arith.constant 0 : i32
      %276 = arith.addi %arg14, %c0_i32_200 : i32
      %c0_201 = arith.constant 0 : index
      %c2_202 = arith.constant 2 : index
      %277 = arith.index_cast %276 : i32 to index
      %c1_203 = arith.constant 1 : index
      %c0_204 = arith.constant 0 : index
      %278 = vector.load %arg1[%c0_201, %c2_202, %277, %c1_203, %c0_204] : memref<1x4x15x4x1xf32, #tpu.memory_space<vmem>>, vector<1x1x1x2x1xf32>
      %279 = vector.shape_cast %278 : vector<1x1x1x2x1xf32> to vector<2x1xf32>
      %280 = vector.extract_strided_slice %51 {offsets = [3, 0], sizes = [1, 64], strides = [1, 1]} : vector<9x64xf32> to vector<1x64xf32>
      %281 = vector.broadcast %279 : vector<2x1xf32> to vector<2x64xf32>
      %282 = vector.broadcast %280 : vector<1x64xf32> to vector<2x64xf32>
      %283 = arith.mulf %281, %282 : vector<2x64xf32>
      %284 = arith.addf %275, %283 : vector<2x64xf32>
      %c1_i32_205 = arith.constant 1 : i32
      %285 = arith.addi %arg14, %c1_i32_205 : i32
      %c0_206 = arith.constant 0 : index
      %c2_207 = arith.constant 2 : index
      %286 = arith.index_cast %285 : i32 to index
      %c1_208 = arith.constant 1 : index
      %c0_209 = arith.constant 0 : index
      %287 = vector.load %arg1[%c0_206, %c2_207, %286, %c1_208, %c0_209] : memref<1x4x15x4x1xf32, #tpu.memory_space<vmem>>, vector<1x1x1x2x1xf32>
      %288 = vector.shape_cast %287 : vector<1x1x1x2x1xf32> to vector<2x1xf32>
      %289 = vector.extract_strided_slice %51 {offsets = [4, 0], sizes = [1, 64], strides = [1, 1]} : vector<9x64xf32> to vector<1x64xf32>
      %290 = vector.broadcast %288 : vector<2x1xf32> to vector<2x64xf32>
      %291 = vector.broadcast %289 : vector<1x64xf32> to vector<2x64xf32>
      %292 = arith.mulf %290, %291 : vector<2x64xf32>
      %293 = arith.addf %284, %292 : vector<2x64xf32>
      %c2_i32_210 = arith.constant 2 : i32
      %294 = arith.addi %arg14, %c2_i32_210 : i32
      %c0_211 = arith.constant 0 : index
      %c2_212 = arith.constant 2 : index
      %295 = arith.index_cast %294 : i32 to index
      %c1_213 = arith.constant 1 : index
      %c0_214 = arith.constant 0 : index
      %296 = vector.load %arg1[%c0_211, %c2_212, %295, %c1_213, %c0_214] : memref<1x4x15x4x1xf32, #tpu.memory_space<vmem>>, vector<1x1x1x2x1xf32>
      %297 = vector.shape_cast %296 : vector<1x1x1x2x1xf32> to vector<2x1xf32>
      %298 = vector.extract_strided_slice %51 {offsets = [5, 0], sizes = [1, 64], strides = [1, 1]} : vector<9x64xf32> to vector<1x64xf32>
      %299 = vector.broadcast %297 : vector<2x1xf32> to vector<2x64xf32>
      %300 = vector.broadcast %298 : vector<1x64xf32> to vector<2x64xf32>
      %301 = arith.mulf %299, %300 : vector<2x64xf32>
      %302 = arith.addf %293, %301 : vector<2x64xf32>
      %c0_i32_215 = arith.constant 0 : i32
      %303 = arith.addi %arg14, %c0_i32_215 : i32
      %c0_216 = arith.constant 0 : index
      %c3_217 = arith.constant 3 : index
      %304 = arith.index_cast %303 : i32 to index
      %c1_218 = arith.constant 1 : index
      %c0_219 = arith.constant 0 : index
      %305 = vector.load %arg1[%c0_216, %c3_217, %304, %c1_218, %c0_219] : memref<1x4x15x4x1xf32, #tpu.memory_space<vmem>>, vector<1x1x1x2x1xf32>
      %306 = vector.shape_cast %305 : vector<1x1x1x2x1xf32> to vector<2x1xf32>
      %307 = vector.extract_strided_slice %51 {offsets = [6, 0], sizes = [1, 64], strides = [1, 1]} : vector<9x64xf32> to vector<1x64xf32>
      %308 = vector.broadcast %306 : vector<2x1xf32> to vector<2x64xf32>
      %309 = vector.broadcast %307 : vector<1x64xf32> to vector<2x64xf32>
      %310 = arith.mulf %308, %309 : vector<2x64xf32>
      %311 = arith.addf %302, %310 : vector<2x64xf32>
      %c1_i32_220 = arith.constant 1 : i32
      %312 = arith.addi %arg14, %c1_i32_220 : i32
      %c0_221 = arith.constant 0 : index
      %c3_222 = arith.constant 3 : index
      %313 = arith.index_cast %312 : i32 to index
      %c1_223 = arith.constant 1 : index
      %c0_224 = arith.constant 0 : index
      %314 = vector.load %arg1[%c0_221, %c3_222, %313, %c1_223, %c0_224] : memref<1x4x15x4x1xf32, #tpu.memory_space<vmem>>, vector<1x1x1x2x1xf32>
      %315 = vector.shape_cast %314 : vector<1x1x1x2x1xf32> to vector<2x1xf32>
      %316 = vector.extract_strided_slice %51 {offsets = [7, 0], sizes = [1, 64], strides = [1, 1]} : vector<9x64xf32> to vector<1x64xf32>
      %317 = vector.broadcast %315 : vector<2x1xf32> to vector<2x64xf32>
      %318 = vector.broadcast %316 : vector<1x64xf32> to vector<2x64xf32>
      %319 = arith.mulf %317, %318 : vector<2x64xf32>
      %320 = arith.addf %311, %319 : vector<2x64xf32>
      %c2_i32_225 = arith.constant 2 : i32
      %321 = arith.addi %arg14, %c2_i32_225 : i32
      %c0_226 = arith.constant 0 : index
      %c3_227 = arith.constant 3 : index
      %322 = arith.index_cast %321 : i32 to index
      %c1_228 = arith.constant 1 : index
      %c0_229 = arith.constant 0 : index
      %323 = vector.load %arg1[%c0_226, %c3_227, %322, %c1_228, %c0_229] : memref<1x4x15x4x1xf32, #tpu.memory_space<vmem>>, vector<1x1x1x2x1xf32>
      %324 = vector.shape_cast %323 : vector<1x1x1x2x1xf32> to vector<2x1xf32>
      %325 = vector.extract_strided_slice %51 {offsets = [8, 0], sizes = [1, 64], strides = [1, 1]} : vector<9x64xf32> to vector<1x64xf32>
      %326 = vector.broadcast %324 : vector<2x1xf32> to vector<2x64xf32>
      %327 = vector.broadcast %325 : vector<1x64xf32> to vector<2x64xf32>
      %328 = arith.mulf %326, %327 : vector<2x64xf32>
      %329 = arith.addf %320, %328 : vector<2x64xf32>
      %330 = vector.broadcast %52 : vector<1x64xf32> to vector<2x64xf32>
      %331 = arith.addf %329, %330 : vector<2x64xf32>
      %cst_230 = arith.constant 0.000000e+00 : f32
      %332 = vector.broadcast %cst_230 : f32 to vector<2x64xf32>
      %333 = arith.maximumf %331, %332 : vector<2x64xf32>
      %cst_231 = arith.constant 0.000000e+00 : f32
      %334 = vector.broadcast %cst_231 : f32 to vector<1x64xf32>
      %335 = tpu.concatenate %334, %333, %334 in 0 : vector<1x64xf32>, vector<2x64xf32>, vector<1x64xf32> -> vector<4x64xf32>
      %336 = arith.truncf %335 : vector<4x64xf32> to vector<4x64xbf16>
      %c1_i32_232 = arith.constant 1 : i32
      %337 = arith.addi %c1_i32_232, %arg14 : i32
      %c2_233 = arith.constant 2 : index
      %338 = arith.index_cast %337 : i32 to index
      %c0_234 = arith.constant 0 : index
      %c0_235 = arith.constant 0 : index
      %339 = vector.load %arg11[%c2_233, %338, %c0_234, %c0_235] : memref<4x15x4x64xbf16, #tpu.memory_space<vmem>>, vector<1x1x4x64xbf16>
      %340 = vector.shape_cast %339 : vector<1x1x4x64xbf16> to vector<4x64xbf16>
      %341 = vector.shape_cast %336 : vector<4x64xbf16> to vector<1x1x4x64xbf16>
      tpu.vector_store %arg11[%c2_233, %338, %c0_234, %c0_235], %341 {strides = array<i32>} : memref<4x15x4x64xbf16, #tpu.memory_space<vmem>>, vector<1x1x4x64xbf16>,
      %cst_236 = arith.constant 0.000000e+00 : f32
      %342 = vector.broadcast %cst_236 : f32 to vector<2x64xf32>
      %c0_i32_237 = arith.constant 0 : i32
      %343 = arith.addi %arg14, %c0_i32_237 : i32
      %c0_238 = arith.constant 0 : index
      %c2_239 = arith.constant 2 : index
      %344 = arith.index_cast %343 : i32 to index
      %c1_240 = arith.constant 1 : index
      %c0_241 = arith.constant 0 : index
      %345 = vector.load %arg1[%c0_238, %c2_239, %344, %c1_240, %c0_241] : memref<1x4x15x4x1xf32, #tpu.memory_space<vmem>>, vector<1x1x1x2x1xf32>
      %346 = vector.shape_cast %345 : vector<1x1x1x2x1xf32> to vector<2x1xf32>
      %347 = vector.extract_strided_slice %51 {offsets = [0, 0], sizes = [1, 64], strides = [1, 1]} : vector<9x64xf32> to vector<1x64xf32>
      %348 = vector.broadcast %346 : vector<2x1xf32> to vector<2x64xf32>
      %349 = vector.broadcast %347 : vector<1x64xf32> to vector<2x64xf32>
      %350 = arith.mulf %348, %349 : vector<2x64xf32>
      %351 = arith.addf %342, %350 : vector<2x64xf32>
      %c1_i32_242 = arith.constant 1 : i32
      %352 = arith.addi %arg14, %c1_i32_242 : i32
      %c0_243 = arith.constant 0 : index
      %c2_244 = arith.constant 2 : index
      %353 = arith.index_cast %352 : i32 to index
      %c1_245 = arith.constant 1 : index
      %c0_246 = arith.constant 0 : index
      %354 = vector.load %arg1[%c0_243, %c2_244, %353, %c1_245, %c0_246] : memref<1x4x15x4x1xf32, #tpu.memory_space<vmem>>, vector<1x1x1x2x1xf32>
      %355 = vector.shape_cast %354 : vector<1x1x1x2x1xf32> to vector<2x1xf32>
      %356 = vector.extract_strided_slice %51 {offsets = [1, 0], sizes = [1, 64], strides = [1, 1]} : vector<9x64xf32> to vector<1x64xf32>
      %357 = vector.broadcast %355 : vector<2x1xf32> to vector<2x64xf32>
      %358 = vector.broadcast %356 : vector<1x64xf32> to vector<2x64xf32>
      %359 = arith.mulf %357, %358 : vector<2x64xf32>
      %360 = arith.addf %351, %359 : vector<2x64xf32>
      %c2_i32_247 = arith.constant 2 : i32
      %361 = arith.addi %arg14, %c2_i32_247 : i32
      %c0_248 = arith.constant 0 : index
      %c2_249 = arith.constant 2 : index
      %362 = arith.index_cast %361 : i32 to index
      %c1_250 = arith.constant 1 : index
      %c0_251 = arith.constant 0 : index
      %363 = vector.load %arg1[%c0_248, %c2_249, %362, %c1_250, %c0_251] : memref<1x4x15x4x1xf32, #tpu.memory_space<vmem>>, vector<1x1x1x2x1xf32>
      %364 = vector.shape_cast %363 : vector<1x1x1x2x1xf32> to vector<2x1xf32>
      %365 = vector.extract_strided_slice %51 {offsets = [2, 0], sizes = [1, 64], strides = [1, 1]} : vector<9x64xf32> to vector<1x64xf32>
      %366 = vector.broadcast %364 : vector<2x1xf32> to vector<2x64xf32>
      %367 = vector.broadcast %365 : vector<1x64xf32> to vector<2x64xf32>
      %368 = arith.mulf %366, %367 : vector<2x64xf32>
      %369 = arith.addf %360, %368 : vector<2x64xf32>
      %c0_i32_252 = arith.constant 0 : i32
      %370 = arith.addi %arg14, %c0_i32_252 : i32
      %c0_253 = arith.constant 0 : index
      %c3_254 = arith.constant 3 : index
      %371 = arith.index_cast %370 : i32 to index
      %c1_255 = arith.constant 1 : index
      %c0_256 = arith.constant 0 : index
      %372 = vector.load %arg1[%c0_253, %c3_254, %371, %c1_255, %c0_256] : memref<1x4x15x4x1xf32, #tpu.memory_space<vmem>>, vector<1x1x1x2x1xf32>
      %373 = vector.shape_cast %372 : vector<1x1x1x2x1xf32> to vector<2x1xf32>
      %374 = vector.extract_strided_slice %51 {offsets = [3, 0], sizes = [1, 64], strides = [1, 1]} : vector<9x64xf32> to vector<1x64xf32>
      %375 = vector.broadcast %373 : vector<2x1xf32> to vector<2x64xf32>
      %376 = vector.broadcast %374 : vector<1x64xf32> to vector<2x64xf32>
      %377 = arith.mulf %375, %376 : vector<2x64xf32>
      %378 = arith.addf %369, %377 : vector<2x64xf32>
      %c1_i32_257 = arith.constant 1 : i32
      %379 = arith.addi %arg14, %c1_i32_257 : i32
      %c0_258 = arith.constant 0 : index
      %c3_259 = arith.constant 3 : index
      %380 = arith.index_cast %379 : i32 to index
      %c1_260 = arith.constant 1 : index
      %c0_261 = arith.constant 0 : index
      %381 = vector.load %arg1[%c0_258, %c3_259, %380, %c1_260, %c0_261] : memref<1x4x15x4x1xf32, #tpu.memory_space<vmem>>, vector<1x1x1x2x1xf32>
      %382 = vector.shape_cast %381 : vector<1x1x1x2x1xf32> to vector<2x1xf32>
      %383 = vector.extract_strided_slice %51 {offsets = [4, 0], sizes = [1, 64], strides = [1, 1]} : vector<9x64xf32> to vector<1x64xf32>
      %384 = vector.broadcast %382 : vector<2x1xf32> to vector<2x64xf32>
      %385 = vector.broadcast %383 : vector<1x64xf32> to vector<2x64xf32>
      %386 = arith.mulf %384, %385 : vector<2x64xf32>
      %387 = arith.addf %378, %386 : vector<2x64xf32>
      %c2_i32_262 = arith.constant 2 : i32
      %388 = arith.addi %arg14, %c2_i32_262 : i32
      %c0_263 = arith.constant 0 : index
      %c3_264 = arith.constant 3 : index
      %389 = arith.index_cast %388 : i32 to index
      %c1_265 = arith.constant 1 : index
      %c0_266 = arith.constant 0 : index
      %390 = vector.load %arg1[%c0_263, %c3_264, %389, %c1_265, %c0_266] : memref<1x4x15x4x1xf32, #tpu.memory_space<vmem>>, vector<1x1x1x2x1xf32>
      %391 = vector.shape_cast %390 : vector<1x1x1x2x1xf32> to vector<2x1xf32>
      %392 = vector.extract_strided_slice %51 {offsets = [5, 0], sizes = [1, 64], strides = [1, 1]} : vector<9x64xf32> to vector<1x64xf32>
      %393 = vector.broadcast %391 : vector<2x1xf32> to vector<2x64xf32>
      %394 = vector.broadcast %392 : vector<1x64xf32> to vector<2x64xf32>
      %395 = arith.mulf %393, %394 : vector<2x64xf32>
      %396 = arith.addf %387, %395 : vector<2x64xf32>
      %c0_i32_267 = arith.constant 0 : i32
      %397 = arith.addi %arg14, %c0_i32_267 : i32
      %c0_268 = arith.constant 0 : index
      %c0_269 = arith.constant 0 : index
      %398 = arith.index_cast %397 : i32 to index
      %c2_270 = arith.constant 2 : index
      %c0_271 = arith.constant 0 : index
      %399 = vector.load %arg1[%c0_268, %c0_269, %398, %c2_270, %c0_271] : memref<1x4x15x4x1xf32, #tpu.memory_space<vmem>>, vector<1x1x1x2x1xf32>
      %400 = vector.shape_cast %399 : vector<1x1x1x2x1xf32> to vector<2x1xf32>
      %401 = vector.extract_strided_slice %51 {offsets = [6, 0], sizes = [1, 64], strides = [1, 1]} : vector<9x64xf32> to vector<1x64xf32>
      %402 = vector.broadcast %400 : vector<2x1xf32> to vector<2x64xf32>
      %403 = vector.broadcast %401 : vector<1x64xf32> to vector<2x64xf32>
      %404 = arith.mulf %402, %403 : vector<2x64xf32>
      %405 = arith.addf %396, %404 : vector<2x64xf32>
      %c1_i32_272 = arith.constant 1 : i32
      %406 = arith.addi %arg14, %c1_i32_272 : i32
      %c0_273 = arith.constant 0 : index
      %c0_274 = arith.constant 0 : index
      %407 = arith.index_cast %406 : i32 to index
      %c2_275 = arith.constant 2 : index
      %c0_276 = arith.constant 0 : index
      %408 = vector.load %arg1[%c0_273, %c0_274, %407, %c2_275, %c0_276] : memref<1x4x15x4x1xf32, #tpu.memory_space<vmem>>, vector<1x1x1x2x1xf32>
      %409 = vector.shape_cast %408 : vector<1x1x1x2x1xf32> to vector<2x1xf32>
      %410 = vector.extract_strided_slice %51 {offsets = [7, 0], sizes = [1, 64], strides = [1, 1]} : vector<9x64xf32> to vector<1x64xf32>
      %411 = vector.broadcast %409 : vector<2x1xf32> to vector<2x64xf32>
      %412 = vector.broadcast %410 : vector<1x64xf32> to vector<2x64xf32>
      %413 = arith.mulf %411, %412 : vector<2x64xf32>
      %414 = arith.addf %405, %413 : vector<2x64xf32>
      %c2_i32_277 = arith.constant 2 : i32
      %415 = arith.addi %arg14, %c2_i32_277 : i32
      %c0_278 = arith.constant 0 : index
      %c0_279 = arith.constant 0 : index
      %416 = arith.index_cast %415 : i32 to index
      %c2_280 = arith.constant 2 : index
      %c0_281 = arith.constant 0 : index
      %417 = vector.load %arg1[%c0_278, %c0_279, %416, %c2_280, %c0_281] : memref<1x4x15x4x1xf32, #tpu.memory_space<vmem>>, vector<1x1x1x2x1xf32>
      %418 = vector.shape_cast %417 : vector<1x1x1x2x1xf32> to vector<2x1xf32>
      %419 = vector.extract_strided_slice %51 {offsets = [8, 0], sizes = [1, 64], strides = [1, 1]} : vector<9x64xf32> to vector<1x64xf32>
      %420 = vector.broadcast %418 : vector<2x1xf32> to vector<2x64xf32>
      %421 = vector.broadcast %419 : vector<1x64xf32> to vector<2x64xf32>
      %422 = arith.mulf %420, %421 : vector<2x64xf32>
      %423 = arith.addf %414, %422 : vector<2x64xf32>
      %424 = vector.broadcast %52 : vector<1x64xf32> to vector<2x64xf32>
      %425 = arith.addf %423, %424 : vector<2x64xf32>
      %cst_282 = arith.constant 0.000000e+00 : f32
      %426 = vector.broadcast %cst_282 : f32 to vector<2x64xf32>
      %427 = arith.maximumf %425, %426 : vector<2x64xf32>
      %cst_283 = arith.constant 0.000000e+00 : f32
      %428 = vector.broadcast %cst_283 : f32 to vector<1x64xf32>
      %429 = tpu.concatenate %428, %427, %428 in 0 : vector<1x64xf32>, vector<2x64xf32>, vector<1x64xf32> -> vector<4x64xf32>
      %430 = arith.truncf %429 : vector<4x64xf32> to vector<4x64xbf16>
      %c1_i32_284 = arith.constant 1 : i32
      %431 = arith.addi %c1_i32_284, %arg14 : i32
      %c3_285 = arith.constant 3 : index
      %432 = arith.index_cast %431 : i32 to index
      %c0_286 = arith.constant 0 : index
      %c0_287 = arith.constant 0 : index
      %433 = vector.load %arg11[%c3_285, %432, %c0_286, %c0_287] : memref<4x15x4x64xbf16, #tpu.memory_space<vmem>>, vector<1x1x4x64xbf16>
      %434 = vector.shape_cast %433 : vector<1x1x4x64xbf16> to vector<4x64xbf16>
      %435 = vector.shape_cast %430 : vector<4x64xbf16> to vector<1x1x4x64xbf16>
      tpu.vector_store %arg11[%c3_285, %432, %c0_286, %c0_287], %435 {strides = array<i32>} : memref<4x15x4x64xbf16, #tpu.memory_space<vmem>>, vector<1x1x4x64xbf16>,
    }
    %c13_i32_64 = arith.constant 13 : i32
    %c0_65 = arith.constant 0 : index
    %c0_66 = arith.constant 0 : index
    %54 = vector.load %arg5[%c0_65, %c0_66] : memref<1x64xf32, #tpu.memory_space<vmem>>, vector<1x64xf32>
    %c0_i32_67 = arith.constant 0 : i32
    %c6_i32 = arith.constant 6 : i32
    %55 = arith.addi %c0_i32_67, %c6_i32 : i32
    %c1_i32_68 = arith.constant 1 : i32
    scf.for %arg14 = %c0_i32_67 to %55 step %c1_i32_68  : i32 {
      %cst_81 = arith.constant 0.000000e+00 : f32
      %60 = vector.broadcast %cst_81 : f32 to vector<2x64xf32>
      %c2_i32 = arith.constant 2 : i32
      %61 = arith.muli %c2_i32, %arg14 : i32
      %c0_i32_82 = arith.constant 0 : i32
      %62 = arith.addi %61, %c0_i32_82 : i32
      %c0_i32_83 = arith.constant 0 : i32
      %63 = arith.addi %62, %c0_i32_83 : i32
      %c3_84 = arith.constant 3 : index
      %64 = arith.index_cast %63 : i32 to index
      %c0_85 = arith.constant 0 : index
      %c0_86 = arith.constant 0 : index
      %65 = vector.load %arg11[%c3_84, %64, %c0_85, %c0_86] : memref<4x15x4x64xbf16, #tpu.memory_space<vmem>>, vector<1x1x2x64xbf16>
      %66 = vector.shape_cast %65 : vector<1x1x2x64xbf16> to vector<2x64xbf16>
      %c0_87 = arith.constant 0 : index
      %c0_88 = arith.constant 0 : index
      %c0_89 = arith.constant 0 : index
      %67 = vector.load %arg4[%c0_87, %c0_88, %c0_89] : memref<9x64x64xbf16, #tpu.memory_space<vmem>>, vector<1x64x64xbf16>
      %68 = vector.shape_cast %67 : vector<1x64x64xbf16> to vector<64x64xbf16>
      %cst_90 = arith.constant dense<0.000000e+00> : vector<2x64xf32>
      %69 = tpu.matmul %66, %68, %cst_90 {dimension_numbers = #tpu.dot_dimension_numbers<[1], [0], [0], [1], [0, 0, 1, 1], [], []>} : vector<2x64xbf16>, vector<64x64xbf16>, vector<2x64xf32> -> vector<2x64xf32>
      %70 = arith.addf %60, %69 : vector<2x64xf32>
      %c2_i32_91 = arith.constant 2 : i32
      %71 = arith.muli %c2_i32_91, %arg14 : i32
      %c0_i32_92 = arith.constant 0 : i32
      %72 = arith.addi %71, %c0_i32_92 : i32
      %c1_i32_93 = arith.constant 1 : i32
      %73 = arith.addi %72, %c1_i32_93 : i32
      %c3_94 = arith.constant 3 : index
      %74 = arith.index_cast %73 : i32 to index
      %c0_95 = arith.constant 0 : index
      %c0_96 = arith.constant 0 : index
      %75 = vector.load %arg11[%c3_94, %74, %c0_95, %c0_96] : memref<4x15x4x64xbf16, #tpu.memory_space<vmem>>, vector<1x1x2x64xbf16>
      %76 = vector.shape_cast %75 : vector<1x1x2x64xbf16> to vector<2x64xbf16>
      %c1_97 = arith.constant 1 : index
      %c0_98 = arith.constant 0 : index
      %c0_99 = arith.constant 0 : index
      %77 = vector.load %arg4[%c1_97, %c0_98, %c0_99] : memref<9x64x64xbf16, #tpu.memory_space<vmem>>, vector<1x64x64xbf16>
      %78 = vector.shape_cast %77 : vector<1x64x64xbf16> to vector<64x64xbf16>
      %cst_100 = arith.constant dense<0.000000e+00> : vector<2x64xf32>
      %79 = tpu.matmul %76, %78, %cst_100 {dimension_numbers = #tpu.dot_dimension_numbers<[1], [0], [0], [1], [0, 0, 1, 1], [], []>} : vector<2x64xbf16>, vector<64x64xbf16>, vector<2x64xf32> -> vector<2x64xf32>
      %80 = arith.addf %70, %79 : vector<2x64xf32>
      %c2_i32_101 = arith.constant 2 : i32
      %81 = arith.muli %c2_i32_101, %arg14 : i32
      %c0_i32_102 = arith.constant 0 : i32
      %82 = arith.addi %81, %c0_i32_102 : i32
      %c2_i32_103 = arith.constant 2 : i32
      %83 = arith.addi %82, %c2_i32_103 : i32
      %c3_104 = arith.constant 3 : index
      %84 = arith.index_cast %83 : i32 to index
      %c0_105 = arith.constant 0 : index
      %c0_106 = arith.constant 0 : index
      %85 = vector.load %arg11[%c3_104, %84, %c0_105, %c0_106] : memref<4x15x4x64xbf16, #tpu.memory_space<vmem>>, vector<1x1x2x64xbf16>
      %86 = vector.shape_cast %85 : vector<1x1x2x64xbf16> to vector<2x64xbf16>
      %c2_107 = arith.constant 2 : index
      %c0_108 = arith.constant 0 : index
      %c0_109 = arith.constant 0 : index
      %87 = vector.load %arg4[%c2_107, %c0_108, %c0_109] : memref<9x64x64xbf16, #tpu.memory_space<vmem>>, vector<1x64x64xbf16>
      %88 = vector.shape_cast %87 : vector<1x64x64xbf16> to vector<64x64xbf16>
      %cst_110 = arith.constant dense<0.000000e+00> : vector<2x64xf32>
      %89 = tpu.matmul %86, %88, %cst_110 {dimension_numbers = #tpu.dot_dimension_numbers<[1], [0], [0], [1], [0, 0, 1, 1], [], []>} : vector<2x64xbf16>, vector<64x64xbf16>, vector<2x64xf32> -> vector<2x64xf32>
      %90 = arith.addf %80, %89 : vector<2x64xf32>
      %c2_i32_111 = arith.constant 2 : i32
      %91 = arith.muli %c2_i32_111, %arg14 : i32
      %c0_i32_112 = arith.constant 0 : i32
      %92 = arith.addi %91, %c0_i32_112 : i32
      %c0_i32_113 = arith.constant 0 : i32
      %93 = arith.addi %92, %c0_i32_113 : i32
      %c0_114 = arith.constant 0 : index
      %94 = arith.index_cast %93 : i32 to index
      %c1_115 = arith.constant 1 : index
      %c0_116 = arith.constant 0 : index
      %95 = vector.load %arg11[%c0_114, %94, %c1_115, %c0_116] : memref<4x15x4x64xbf16, #tpu.memory_space<vmem>>, vector<1x1x2x64xbf16>
      %96 = vector.shape_cast %95 : vector<1x1x2x64xbf16> to vector<2x64xbf16>
      %c3_117 = arith.constant 3 : index
      %c0_118 = arith.constant 0 : index
      %c0_119 = arith.constant 0 : index
      %97 = vector.load %arg4[%c3_117, %c0_118, %c0_119] : memref<9x64x64xbf16, #tpu.memory_space<vmem>>, vector<1x64x64xbf16>
      %98 = vector.shape_cast %97 : vector<1x64x64xbf16> to vector<64x64xbf16>
      %cst_120 = arith.constant dense<0.000000e+00> : vector<2x64xf32>
      %99 = tpu.matmul %96, %98, %cst_120 {dimension_numbers = #tpu.dot_dimension_numbers<[1], [0], [0], [1], [0, 0, 1, 1], [], []>} : vector<2x64xbf16>, vector<64x64xbf16>, vector<2x64xf32> -> vector<2x64xf32>
      %100 = arith.addf %90, %99 : vector<2x64xf32>
      %c2_i32_121 = arith.constant 2 : i32
      %101 = arith.muli %c2_i32_121, %arg14 : i32
      %c0_i32_122 = arith.constant 0 : i32
      %102 = arith.addi %101, %c0_i32_122 : i32
      %c1_i32_123 = arith.constant 1 : i32
      %103 = arith.addi %102, %c1_i32_123 : i32
      %c0_124 = arith.constant 0 : index
      %104 = arith.index_cast %103 : i32 to index
      %c1_125 = arith.constant 1 : index
      %c0_126 = arith.constant 0 : index
      %105 = vector.load %arg11[%c0_124, %104, %c1_125, %c0_126] : memref<4x15x4x64xbf16, #tpu.memory_space<vmem>>, vector<1x1x2x64xbf16>
      %106 = vector.shape_cast %105 : vector<1x1x2x64xbf16> to vector<2x64xbf16>
      %c4 = arith.constant 4 : index
      %c0_127 = arith.constant 0 : index
      %c0_128 = arith.constant 0 : index
      %107 = vector.load %arg4[%c4, %c0_127, %c0_128] : memref<9x64x64xbf16, #tpu.memory_space<vmem>>, vector<1x64x64xbf16>
      %108 = vector.shape_cast %107 : vector<1x64x64xbf16> to vector<64x64xbf16>
      %cst_129 = arith.constant dense<0.000000e+00> : vector<2x64xf32>
      %109 = tpu.matmul %106, %108, %cst_129 {dimension_numbers = #tpu.dot_dimension_numbers<[1], [0], [0], [1], [0, 0, 1, 1], [], []>} : vector<2x64xbf16>, vector<64x64xbf16>, vector<2x64xf32> -> vector<2x64xf32>
      %110 = arith.addf %100, %109 : vector<2x64xf32>
      %c2_i32_130 = arith.constant 2 : i32
      %111 = arith.muli %c2_i32_130, %arg14 : i32
      %c0_i32_131 = arith.constant 0 : i32
      %112 = arith.addi %111, %c0_i32_131 : i32
      %c2_i32_132 = arith.constant 2 : i32
      %113 = arith.addi %112, %c2_i32_132 : i32
      %c0_133 = arith.constant 0 : index
      %114 = arith.index_cast %113 : i32 to index
      %c1_134 = arith.constant 1 : index
      %c0_135 = arith.constant 0 : index
      %115 = vector.load %arg11[%c0_133, %114, %c1_134, %c0_135] : memref<4x15x4x64xbf16, #tpu.memory_space<vmem>>, vector<1x1x2x64xbf16>
      %116 = vector.shape_cast %115 : vector<1x1x2x64xbf16> to vector<2x64xbf16>
      %c5 = arith.constant 5 : index
      %c0_136 = arith.constant 0 : index
      %c0_137 = arith.constant 0 : index
      %117 = vector.load %arg4[%c5, %c0_136, %c0_137] : memref<9x64x64xbf16, #tpu.memory_space<vmem>>, vector<1x64x64xbf16>
      %118 = vector.shape_cast %117 : vector<1x64x64xbf16> to vector<64x64xbf16>
      %cst_138 = arith.constant dense<0.000000e+00> : vector<2x64xf32>
      %119 = tpu.matmul %116, %118, %cst_138 {dimension_numbers = #tpu.dot_dimension_numbers<[1], [0], [0], [1], [0, 0, 1, 1], [], []>} : vector<2x64xbf16>, vector<64x64xbf16>, vector<2x64xf32> -> vector<2x64xf32>
      %120 = arith.addf %110, %119 : vector<2x64xf32>
      %c2_i32_139 = arith.constant 2 : i32
      %121 = arith.muli %c2_i32_139, %arg14 : i32
      %c0_i32_140 = arith.constant 0 : i32
      %122 = arith.addi %121, %c0_i32_140 : i32
      %c0_i32_141 = arith.constant 0 : i32
      %123 = arith.addi %122, %c0_i32_141 : i32
      %c1_142 = arith.constant 1 : index
      %124 = arith.index_cast %123 : i32 to index
      %c1_143 = arith.constant 1 : index
      %c0_144 = arith.constant 0 : index
      %125 = vector.load %arg11[%c1_142, %124, %c1_143, %c0_144] : memref<4x15x4x64xbf16, #tpu.memory_space<vmem>>, vector<1x1x2x64xbf16>
      %126 = vector.shape_cast %125 : vector<1x1x2x64xbf16> to vector<2x64xbf16>
      %c6 = arith.constant 6 : index
      %c0_145 = arith.constant 0 : index
      %c0_146 = arith.constant 0 : index
      %127 = vector.load %arg4[%c6, %c0_145, %c0_146] : memref<9x64x64xbf16, #tpu.memory_space<vmem>>, vector<1x64x64xbf16>
      %128 = vector.shape_cast %127 : vector<1x64x64xbf16> to vector<64x64xbf16>
      %cst_147 = arith.constant dense<0.000000e+00> : vector<2x64xf32>
      %129 = tpu.matmul %126, %128, %cst_147 {dimension_numbers = #tpu.dot_dimension_numbers<[1], [0], [0], [1], [0, 0, 1, 1], [], []>} : vector<2x64xbf16>, vector<64x64xbf16>, vector<2x64xf32> -> vector<2x64xf32>
      %130 = arith.addf %120, %129 : vector<2x64xf32>
      %c2_i32_148 = arith.constant 2 : i32
      %131 = arith.muli %c2_i32_148, %arg14 : i32
      %c0_i32_149 = arith.constant 0 : i32
      %132 = arith.addi %131, %c0_i32_149 : i32
      %c1_i32_150 = arith.constant 1 : i32
      %133 = arith.addi %132, %c1_i32_150 : i32
      %c1_151 = arith.constant 1 : index
      %134 = arith.index_cast %133 : i32 to index
      %c1_152 = arith.constant 1 : index
      %c0_153 = arith.constant 0 : index
      %135 = vector.load %arg11[%c1_151, %134, %c1_152, %c0_153] : memref<4x15x4x64xbf16, #tpu.memory_space<vmem>>, vector<1x1x2x64xbf16>
      %136 = vector.shape_cast %135 : vector<1x1x2x64xbf16> to vector<2x64xbf16>
      %c7_154 = arith.constant 7 : index
      %c0_155 = arith.constant 0 : index
      %c0_156 = arith.constant 0 : index
      %137 = vector.load %arg4[%c7_154, %c0_155, %c0_156] : memref<9x64x64xbf16, #tpu.memory_space<vmem>>, vector<1x64x64xbf16>
      %138 = vector.shape_cast %137 : vector<1x64x64xbf16> to vector<64x64xbf16>
      %cst_157 = arith.constant dense<0.000000e+00> : vector<2x64xf32>
      %139 = tpu.matmul %136, %138, %cst_157 {dimension_numbers = #tpu.dot_dimension_numbers<[1], [0], [0], [1], [0, 0, 1, 1], [], []>} : vector<2x64xbf16>, vector<64x64xbf16>, vector<2x64xf32> -> vector<2x64xf32>
      %140 = arith.addf %130, %139 : vector<2x64xf32>
      %c2_i32_158 = arith.constant 2 : i32
      %141 = arith.muli %c2_i32_158, %arg14 : i32
      %c0_i32_159 = arith.constant 0 : i32
      %142 = arith.addi %141, %c0_i32_159 : i32
      %c2_i32_160 = arith.constant 2 : i32
      %143 = arith.addi %142, %c2_i32_160 : i32
      %c1_161 = arith.constant 1 : index
      %144 = arith.index_cast %143 : i32 to index
      %c1_162 = arith.constant 1 : index
      %c0_163 = arith.constant 0 : index
      %145 = vector.load %arg11[%c1_161, %144, %c1_162, %c0_163] : memref<4x15x4x64xbf16, #tpu.memory_space<vmem>>, vector<1x1x2x64xbf16>
      %146 = vector.shape_cast %145 : vector<1x1x2x64xbf16> to vector<2x64xbf16>
      %c8 = arith.constant 8 : index
      %c0_164 = arith.constant 0 : index
      %c0_165 = arith.constant 0 : index
      %147 = vector.load %arg4[%c8, %c0_164, %c0_165] : memref<9x64x64xbf16, #tpu.memory_space<vmem>>, vector<1x64x64xbf16>
      %148 = vector.shape_cast %147 : vector<1x64x64xbf16> to vector<64x64xbf16>
      %cst_166 = arith.constant dense<0.000000e+00> : vector<2x64xf32>
      %149 = tpu.matmul %146, %148, %cst_166 {dimension_numbers = #tpu.dot_dimension_numbers<[1], [0], [0], [1], [0, 0, 1, 1], [], []>} : vector<2x64xbf16>, vector<64x64xbf16>, vector<2x64xf32> -> vector<2x64xf32>
      %150 = arith.addf %140, %149 : vector<2x64xf32>
      %151 = vector.broadcast %54 : vector<1x64xf32> to vector<2x64xf32>
      %152 = arith.addf %150, %151 : vector<2x64xf32>
      %cst_167 = arith.constant 0.000000e+00 : f32
      %153 = vector.broadcast %cst_167 : f32 to vector<2x64xf32>
      %154 = arith.maximumf %152, %153 : vector<2x64xf32>
      %cst_168 = arith.constant 0.000000e+00 : f32
      %155 = vector.broadcast %cst_168 : f32 to vector<2x64xf32>
      %c2_i32_169 = arith.constant 2 : i32
      %156 = arith.muli %c2_i32_169, %arg14 : i32
      %c1_i32_170 = arith.constant 1 : i32
      %157 = arith.addi %156, %c1_i32_170 : i32
      %c0_i32_171 = arith.constant 0 : i32
      %158 = arith.addi %157, %c0_i32_171 : i32
      %c3_172 = arith.constant 3 : index
      %159 = arith.index_cast %158 : i32 to index
      %c0_173 = arith.constant 0 : index
      %c0_174 = arith.constant 0 : index
      %160 = vector.load %arg11[%c3_172, %159, %c0_173, %c0_174] : memref<4x15x4x64xbf16, #tpu.memory_space<vmem>>, vector<1x1x2x64xbf16>
      %161 = vector.shape_cast %160 : vector<1x1x2x64xbf16> to vector<2x64xbf16>
      %c0_175 = arith.constant 0 : index
      %c0_176 = arith.constant 0 : index
      %c0_177 = arith.constant 0 : index
      %162 = vector.load %arg4[%c0_175, %c0_176, %c0_177] : memref<9x64x64xbf16, #tpu.memory_space<vmem>>, vector<1x64x64xbf16>
      %163 = vector.shape_cast %162 : vector<1x64x64xbf16> to vector<64x64xbf16>
      %cst_178 = arith.constant dense<0.000000e+00> : vector<2x64xf32>
      %164 = tpu.matmul %161, %163, %cst_178 {dimension_numbers = #tpu.dot_dimension_numbers<[1], [0], [0], [1], [0, 0, 1, 1], [], []>} : vector<2x64xbf16>, vector<64x64xbf16>, vector<2x64xf32> -> vector<2x64xf32>
      %165 = arith.addf %155, %164 : vector<2x64xf32>
      %c2_i32_179 = arith.constant 2 : i32
      %166 = arith.muli %c2_i32_179, %arg14 : i32
      %c1_i32_180 = arith.constant 1 : i32
      %167 = arith.addi %166, %c1_i32_180 : i32
      %c1_i32_181 = arith.constant 1 : i32
      %168 = arith.addi %167, %c1_i32_181 : i32
      %c3_182 = arith.constant 3 : index
      %169 = arith.index_cast %168 : i32 to index
      %c0_183 = arith.constant 0 : index
      %c0_184 = arith.constant 0 : index
      %170 = vector.load %arg11[%c3_182, %169, %c0_183, %c0_184] : memref<4x15x4x64xbf16, #tpu.memory_space<vmem>>, vector<1x1x2x64xbf16>
      %171 = vector.shape_cast %170 : vector<1x1x2x64xbf16> to vector<2x64xbf16>
      %c1_185 = arith.constant 1 : index
      %c0_186 = arith.constant 0 : index
      %c0_187 = arith.constant 0 : index
      %172 = vector.load %arg4[%c1_185, %c0_186, %c0_187] : memref<9x64x64xbf16, #tpu.memory_space<vmem>>, vector<1x64x64xbf16>
      %173 = vector.shape_cast %172 : vector<1x64x64xbf16> to vector<64x64xbf16>
      %cst_188 = arith.constant dense<0.000000e+00> : vector<2x64xf32>
      %174 = tpu.matmul %171, %173, %cst_188 {dimension_numbers = #tpu.dot_dimension_numbers<[1], [0], [0], [1], [0, 0, 1, 1], [], []>} : vector<2x64xbf16>, vector<64x64xbf16>, vector<2x64xf32> -> vector<2x64xf32>
      %175 = arith.addf %165, %174 : vector<2x64xf32>
      %c2_i32_189 = arith.constant 2 : i32
      %176 = arith.muli %c2_i32_189, %arg14 : i32
      %c1_i32_190 = arith.constant 1 : i32
      %177 = arith.addi %176, %c1_i32_190 : i32
      %c2_i32_191 = arith.constant 2 : i32
      %178 = arith.addi %177, %c2_i32_191 : i32
      %c3_192 = arith.constant 3 : index
      %179 = arith.index_cast %178 : i32 to index
      %c0_193 = arith.constant 0 : index
      %c0_194 = arith.constant 0 : index
      %180 = vector.load %arg11[%c3_192, %179, %c0_193, %c0_194] : memref<4x15x4x64xbf16, #tpu.memory_space<vmem>>, vector<1x1x2x64xbf16>
      %181 = vector.shape_cast %180 : vector<1x1x2x64xbf16> to vector<2x64xbf16>
      %c2_195 = arith.constant 2 : index
      %c0_196 = arith.constant 0 : index
      %c0_197 = arith.constant 0 : index
      %182 = vector.load %arg4[%c2_195, %c0_196, %c0_197] : memref<9x64x64xbf16, #tpu.memory_space<vmem>>, vector<1x64x64xbf16>
      %183 = vector.shape_cast %182 : vector<1x64x64xbf16> to vector<64x64xbf16>
      %cst_198 = arith.constant dense<0.000000e+00> : vector<2x64xf32>
      %184 = tpu.matmul %181, %183, %cst_198 {dimension_numbers = #tpu.dot_dimension_numbers<[1], [0], [0], [1], [0, 0, 1, 1], [], []>} : vector<2x64xbf16>, vector<64x64xbf16>, vector<2x64xf32> -> vector<2x64xf32>
      %185 = arith.addf %175, %184 : vector<2x64xf32>
      %c2_i32_199 = arith.constant 2 : i32
      %186 = arith.muli %c2_i32_199, %arg14 : i32
      %c1_i32_200 = arith.constant 1 : i32
      %187 = arith.addi %186, %c1_i32_200 : i32
      %c0_i32_201 = arith.constant 0 : i32
      %188 = arith.addi %187, %c0_i32_201 : i32
      %c0_202 = arith.constant 0 : index
      %189 = arith.index_cast %188 : i32 to index
      %c1_203 = arith.constant 1 : index
      %c0_204 = arith.constant 0 : index
      %190 = vector.load %arg11[%c0_202, %189, %c1_203, %c0_204] : memref<4x15x4x64xbf16, #tpu.memory_space<vmem>>, vector<1x1x2x64xbf16>
      %191 = vector.shape_cast %190 : vector<1x1x2x64xbf16> to vector<2x64xbf16>
      %c3_205 = arith.constant 3 : index
      %c0_206 = arith.constant 0 : index
      %c0_207 = arith.constant 0 : index
      %192 = vector.load %arg4[%c3_205, %c0_206, %c0_207] : memref<9x64x64xbf16, #tpu.memory_space<vmem>>, vector<1x64x64xbf16>
      %193 = vector.shape_cast %192 : vector<1x64x64xbf16> to vector<64x64xbf16>
      %cst_208 = arith.constant dense<0.000000e+00> : vector<2x64xf32>
      %194 = tpu.matmul %191, %193, %cst_208 {dimension_numbers = #tpu.dot_dimension_numbers<[1], [0], [0], [1], [0, 0, 1, 1], [], []>} : vector<2x64xbf16>, vector<64x64xbf16>, vector<2x64xf32> -> vector<2x64xf32>
      %195 = arith.addf %185, %194 : vector<2x64xf32>
      %c2_i32_209 = arith.constant 2 : i32
      %196 = arith.muli %c2_i32_209, %arg14 : i32
      %c1_i32_210 = arith.constant 1 : i32
      %197 = arith.addi %196, %c1_i32_210 : i32
      %c1_i32_211 = arith.constant 1 : i32
      %198 = arith.addi %197, %c1_i32_211 : i32
      %c0_212 = arith.constant 0 : index
      %199 = arith.index_cast %198 : i32 to index
      %c1_213 = arith.constant 1 : index
      %c0_214 = arith.constant 0 : index
      %200 = vector.load %arg11[%c0_212, %199, %c1_213, %c0_214] : memref<4x15x4x64xbf16, #tpu.memory_space<vmem>>, vector<1x1x2x64xbf16>
      %201 = vector.shape_cast %200 : vector<1x1x2x64xbf16> to vector<2x64xbf16>
      %c4_215 = arith.constant 4 : index
      %c0_216 = arith.constant 0 : index
      %c0_217 = arith.constant 0 : index
      %202 = vector.load %arg4[%c4_215, %c0_216, %c0_217] : memref<9x64x64xbf16, #tpu.memory_space<vmem>>, vector<1x64x64xbf16>
      %203 = vector.shape_cast %202 : vector<1x64x64xbf16> to vector<64x64xbf16>
      %cst_218 = arith.constant dense<0.000000e+00> : vector<2x64xf32>
      %204 = tpu.matmul %201, %203, %cst_218 {dimension_numbers = #tpu.dot_dimension_numbers<[1], [0], [0], [1], [0, 0, 1, 1], [], []>} : vector<2x64xbf16>, vector<64x64xbf16>, vector<2x64xf32> -> vector<2x64xf32>
      %205 = arith.addf %195, %204 : vector<2x64xf32>
      %c2_i32_219 = arith.constant 2 : i32
      %206 = arith.muli %c2_i32_219, %arg14 : i32
      %c1_i32_220 = arith.constant 1 : i32
      %207 = arith.addi %206, %c1_i32_220 : i32
      %c2_i32_221 = arith.constant 2 : i32
      %208 = arith.addi %207, %c2_i32_221 : i32
      %c0_222 = arith.constant 0 : index
      %209 = arith.index_cast %208 : i32 to index
      %c1_223 = arith.constant 1 : index
      %c0_224 = arith.constant 0 : index
      %210 = vector.load %arg11[%c0_222, %209, %c1_223, %c0_224] : memref<4x15x4x64xbf16, #tpu.memory_space<vmem>>, vector<1x1x2x64xbf16>
      %211 = vector.shape_cast %210 : vector<1x1x2x64xbf16> to vector<2x64xbf16>
      %c5_225 = arith.constant 5 : index
      %c0_226 = arith.constant 0 : index
      %c0_227 = arith.constant 0 : index
      %212 = vector.load %arg4[%c5_225, %c0_226, %c0_227] : memref<9x64x64xbf16, #tpu.memory_space<vmem>>, vector<1x64x64xbf16>
      %213 = vector.shape_cast %212 : vector<1x64x64xbf16> to vector<64x64xbf16>
      %cst_228 = arith.constant dense<0.000000e+00> : vector<2x64xf32>
      %214 = tpu.matmul %211, %213, %cst_228 {dimension_numbers = #tpu.dot_dimension_numbers<[1], [0], [0], [1], [0, 0, 1, 1], [], []>} : vector<2x64xbf16>, vector<64x64xbf16>, vector<2x64xf32> -> vector<2x64xf32>
      %215 = arith.addf %205, %214 : vector<2x64xf32>
      %c2_i32_229 = arith.constant 2 : i32
      %216 = arith.muli %c2_i32_229, %arg14 : i32
      %c1_i32_230 = arith.constant 1 : i32
      %217 = arith.addi %216, %c1_i32_230 : i32
      %c0_i32_231 = arith.constant 0 : i32
      %218 = arith.addi %217, %c0_i32_231 : i32
      %c1_232 = arith.constant 1 : index
      %219 = arith.index_cast %218 : i32 to index
      %c1_233 = arith.constant 1 : index
      %c0_234 = arith.constant 0 : index
      %220 = vector.load %arg11[%c1_232, %219, %c1_233, %c0_234] : memref<4x15x4x64xbf16, #tpu.memory_space<vmem>>, vector<1x1x2x64xbf16>
      %221 = vector.shape_cast %220 : vector<1x1x2x64xbf16> to vector<2x64xbf16>
      %c6_235 = arith.constant 6 : index
      %c0_236 = arith.constant 0 : index
      %c0_237 = arith.constant 0 : index
      %222 = vector.load %arg4[%c6_235, %c0_236, %c0_237] : memref<9x64x64xbf16, #tpu.memory_space<vmem>>, vector<1x64x64xbf16>
      %223 = vector.shape_cast %222 : vector<1x64x64xbf16> to vector<64x64xbf16>
      %cst_238 = arith.constant dense<0.000000e+00> : vector<2x64xf32>
      %224 = tpu.matmul %221, %223, %cst_238 {dimension_numbers = #tpu.dot_dimension_numbers<[1], [0], [0], [1], [0, 0, 1, 1], [], []>} : vector<2x64xbf16>, vector<64x64xbf16>, vector<2x64xf32> -> vector<2x64xf32>
      %225 = arith.addf %215, %224 : vector<2x64xf32>
      %c2_i32_239 = arith.constant 2 : i32
      %226 = arith.muli %c2_i32_239, %arg14 : i32
      %c1_i32_240 = arith.constant 1 : i32
      %227 = arith.addi %226, %c1_i32_240 : i32
      %c1_i32_241 = arith.constant 1 : i32
      %228 = arith.addi %227, %c1_i32_241 : i32
      %c1_242 = arith.constant 1 : index
      %229 = arith.index_cast %228 : i32 to index
      %c1_243 = arith.constant 1 : index
      %c0_244 = arith.constant 0 : index
      %230 = vector.load %arg11[%c1_242, %229, %c1_243, %c0_244] : memref<4x15x4x64xbf16, #tpu.memory_space<vmem>>, vector<1x1x2x64xbf16>
      %231 = vector.shape_cast %230 : vector<1x1x2x64xbf16> to vector<2x64xbf16>
      %c7_245 = arith.constant 7 : index
      %c0_246 = arith.constant 0 : index
      %c0_247 = arith.constant 0 : index
      %232 = vector.load %arg4[%c7_245, %c0_246, %c0_247] : memref<9x64x64xbf16, #tpu.memory_space<vmem>>, vector<1x64x64xbf16>
      %233 = vector.shape_cast %232 : vector<1x64x64xbf16> to vector<64x64xbf16>
      %cst_248 = arith.constant dense<0.000000e+00> : vector<2x64xf32>
      %234 = tpu.matmul %231, %233, %cst_248 {dimension_numbers = #tpu.dot_dimension_numbers<[1], [0], [0], [1], [0, 0, 1, 1], [], []>} : vector<2x64xbf16>, vector<64x64xbf16>, vector<2x64xf32> -> vector<2x64xf32>
      %235 = arith.addf %225, %234 : vector<2x64xf32>
      %c2_i32_249 = arith.constant 2 : i32
      %236 = arith.muli %c2_i32_249, %arg14 : i32
      %c1_i32_250 = arith.constant 1 : i32
      %237 = arith.addi %236, %c1_i32_250 : i32
      %c2_i32_251 = arith.constant 2 : i32
      %238 = arith.addi %237, %c2_i32_251 : i32
      %c1_252 = arith.constant 1 : index
      %239 = arith.index_cast %238 : i32 to index
      %c1_253 = arith.constant 1 : index
      %c0_254 = arith.constant 0 : index
      %240 = vector.load %arg11[%c1_252, %239, %c1_253, %c0_254] : memref<4x15x4x64xbf16, #tpu.memory_space<vmem>>, vector<1x1x2x64xbf16>
      %241 = vector.shape_cast %240 : vector<1x1x2x64xbf16> to vector<2x64xbf16>
      %c8_255 = arith.constant 8 : index
      %c0_256 = arith.constant 0 : index
      %c0_257 = arith.constant 0 : index
      %242 = vector.load %arg4[%c8_255, %c0_256, %c0_257] : memref<9x64x64xbf16, #tpu.memory_space<vmem>>, vector<1x64x64xbf16>
      %243 = vector.shape_cast %242 : vector<1x64x64xbf16> to vector<64x64xbf16>
      %cst_258 = arith.constant dense<0.000000e+00> : vector<2x64xf32>
      %244 = tpu.matmul %241, %243, %cst_258 {dimension_numbers = #tpu.dot_dimension_numbers<[1], [0], [0], [1], [0, 0, 1, 1], [], []>} : vector<2x64xbf16>, vector<64x64xbf16>, vector<2x64xf32> -> vector<2x64xf32>
      %245 = arith.addf %235, %244 : vector<2x64xf32>
      %246 = vector.broadcast %54 : vector<1x64xf32> to vector<2x64xf32>
      %247 = arith.addf %245, %246 : vector<2x64xf32>
      %cst_259 = arith.constant 0.000000e+00 : f32
      %248 = vector.broadcast %cst_259 : f32 to vector<2x64xf32>
      %249 = arith.maximumf %247, %248 : vector<2x64xf32>
      %250 = arith.maximumf %154, %249 : vector<2x64xf32>
      %cst_260 = arith.constant 0.000000e+00 : f32
      %251 = vector.broadcast %cst_260 : f32 to vector<2x64xf32>
      %c2_i32_261 = arith.constant 2 : i32
      %252 = arith.muli %c2_i32_261, %arg14 : i32
      %c0_i32_262 = arith.constant 0 : i32
      %253 = arith.addi %252, %c0_i32_262 : i32
      %c0_i32_263 = arith.constant 0 : i32
      %254 = arith.addi %253, %c0_i32_263 : i32
      %c0_264 = arith.constant 0 : index
      %255 = arith.index_cast %254 : i32 to index
      %c1_265 = arith.constant 1 : index
      %c0_266 = arith.constant 0 : index
      %256 = vector.load %arg11[%c0_264, %255, %c1_265, %c0_266] : memref<4x15x4x64xbf16, #tpu.memory_space<vmem>>, vector<1x1x2x64xbf16>
      %257 = vector.shape_cast %256 : vector<1x1x2x64xbf16> to vector<2x64xbf16>
      %c0_267 = arith.constant 0 : index
      %c0_268 = arith.constant 0 : index
      %c0_269 = arith.constant 0 : index
      %258 = vector.load %arg4[%c0_267, %c0_268, %c0_269] : memref<9x64x64xbf16, #tpu.memory_space<vmem>>, vector<1x64x64xbf16>
      %259 = vector.shape_cast %258 : vector<1x64x64xbf16> to vector<64x64xbf16>
      %cst_270 = arith.constant dense<0.000000e+00> : vector<2x64xf32>
      %260 = tpu.matmul %257, %259, %cst_270 {dimension_numbers = #tpu.dot_dimension_numbers<[1], [0], [0], [1], [0, 0, 1, 1], [], []>} : vector<2x64xbf16>, vector<64x64xbf16>, vector<2x64xf32> -> vector<2x64xf32>
      %261 = arith.addf %251, %260 : vector<2x64xf32>
      %c2_i32_271 = arith.constant 2 : i32
      %262 = arith.muli %c2_i32_271, %arg14 : i32
      %c0_i32_272 = arith.constant 0 : i32
      %263 = arith.addi %262, %c0_i32_272 : i32
      %c1_i32_273 = arith.constant 1 : i32
      %264 = arith.addi %263, %c1_i32_273 : i32
      %c0_274 = arith.constant 0 : index
      %265 = arith.index_cast %264 : i32 to index
      %c1_275 = arith.constant 1 : index
      %c0_276 = arith.constant 0 : index
      %266 = vector.load %arg11[%c0_274, %265, %c1_275, %c0_276] : memref<4x15x4x64xbf16, #tpu.memory_space<vmem>>, vector<1x1x2x64xbf16>
      %267 = vector.shape_cast %266 : vector<1x1x2x64xbf16> to vector<2x64xbf16>
      %c1_277 = arith.constant 1 : index
      %c0_278 = arith.constant 0 : index
      %c0_279 = arith.constant 0 : index
      %268 = vector.load %arg4[%c1_277, %c0_278, %c0_279] : memref<9x64x64xbf16, #tpu.memory_space<vmem>>, vector<1x64x64xbf16>
      %269 = vector.shape_cast %268 : vector<1x64x64xbf16> to vector<64x64xbf16>
      %cst_280 = arith.constant dense<0.000000e+00> : vector<2x64xf32>
      %270 = tpu.matmul %267, %269, %cst_280 {dimension_numbers = #tpu.dot_dimension_numbers<[1], [0], [0], [1], [0, 0, 1, 1], [], []>} : vector<2x64xbf16>, vector<64x64xbf16>, vector<2x64xf32> -> vector<2x64xf32>
      %271 = arith.addf %261, %270 : vector<2x64xf32>
      %c2_i32_281 = arith.constant 2 : i32
      %272 = arith.muli %c2_i32_281, %arg14 : i32
      %c0_i32_282 = arith.constant 0 : i32
      %273 = arith.addi %272, %c0_i32_282 : i32
      %c2_i32_283 = arith.constant 2 : i32
      %274 = arith.addi %273, %c2_i32_283 : i32
      %c0_284 = arith.constant 0 : index
      %275 = arith.index_cast %274 : i32 to index
      %c1_285 = arith.constant 1 : index
      %c0_286 = arith.constant 0 : index
      %276 = vector.load %arg11[%c0_284, %275, %c1_285, %c0_286] : memref<4x15x4x64xbf16, #tpu.memory_space<vmem>>, vector<1x1x2x64xbf16>
      %277 = vector.shape_cast %276 : vector<1x1x2x64xbf16> to vector<2x64xbf16>
      %c2_287 = arith.constant 2 : index
      %c0_288 = arith.constant 0 : index
      %c0_289 = arith.constant 0 : index
      %278 = vector.load %arg4[%c2_287, %c0_288, %c0_289] : memref<9x64x64xbf16, #tpu.memory_space<vmem>>, vector<1x64x64xbf16>
      %279 = vector.shape_cast %278 : vector<1x64x64xbf16> to vector<64x64xbf16>
      %cst_290 = arith.constant dense<0.000000e+00> : vector<2x64xf32>
      %280 = tpu.matmul %277, %279, %cst_290 {dimension_numbers = #tpu.dot_dimension_numbers<[1], [0], [0], [1], [0, 0, 1, 1], [], []>} : vector<2x64xbf16>, vector<64x64xbf16>, vector<2x64xf32> -> vector<2x64xf32>
      %281 = arith.addf %271, %280 : vector<2x64xf32>
      %c2_i32_291 = arith.constant 2 : i32
      %282 = arith.muli %c2_i32_291, %arg14 : i32
      %c0_i32_292 = arith.constant 0 : i32
      %283 = arith.addi %282, %c0_i32_292 : i32
      %c0_i32_293 = arith.constant 0 : i32
      %284 = arith.addi %283, %c0_i32_293 : i32
      %c1_294 = arith.constant 1 : index
      %285 = arith.index_cast %284 : i32 to index
      %c1_295 = arith.constant 1 : index
      %c0_296 = arith.constant 0 : index
      %286 = vector.load %arg11[%c1_294, %285, %c1_295, %c0_296] : memref<4x15x4x64xbf16, #tpu.memory_space<vmem>>, vector<1x1x2x64xbf16>
      %287 = vector.shape_cast %286 : vector<1x1x2x64xbf16> to vector<2x64xbf16>
      %c3_297 = arith.constant 3 : index
      %c0_298 = arith.constant 0 : index
      %c0_299 = arith.constant 0 : index
      %288 = vector.load %arg4[%c3_297, %c0_298, %c0_299] : memref<9x64x64xbf16, #tpu.memory_space<vmem>>, vector<1x64x64xbf16>
      %289 = vector.shape_cast %288 : vector<1x64x64xbf16> to vector<64x64xbf16>
      %cst_300 = arith.constant dense<0.000000e+00> : vector<2x64xf32>
      %290 = tpu.matmul %287, %289, %cst_300 {dimension_numbers = #tpu.dot_dimension_numbers<[1], [0], [0], [1], [0, 0, 1, 1], [], []>} : vector<2x64xbf16>, vector<64x64xbf16>, vector<2x64xf32> -> vector<2x64xf32>
      %291 = arith.addf %281, %290 : vector<2x64xf32>
      %c2_i32_301 = arith.constant 2 : i32
      %292 = arith.muli %c2_i32_301, %arg14 : i32
      %c0_i32_302 = arith.constant 0 : i32
      %293 = arith.addi %292, %c0_i32_302 : i32
      %c1_i32_303 = arith.constant 1 : i32
      %294 = arith.addi %293, %c1_i32_303 : i32
      %c1_304 = arith.constant 1 : index
      %295 = arith.index_cast %294 : i32 to index
      %c1_305 = arith.constant 1 : index
      %c0_306 = arith.constant 0 : index
      %296 = vector.load %arg11[%c1_304, %295, %c1_305, %c0_306] : memref<4x15x4x64xbf16, #tpu.memory_space<vmem>>, vector<1x1x2x64xbf16>
      %297 = vector.shape_cast %296 : vector<1x1x2x64xbf16> to vector<2x64xbf16>
      %c4_307 = arith.constant 4 : index
      %c0_308 = arith.constant 0 : index
      %c0_309 = arith.constant 0 : index
      %298 = vector.load %arg4[%c4_307, %c0_308, %c0_309] : memref<9x64x64xbf16, #tpu.memory_space<vmem>>, vector<1x64x64xbf16>
      %299 = vector.shape_cast %298 : vector<1x64x64xbf16> to vector<64x64xbf16>
      %cst_310 = arith.constant dense<0.000000e+00> : vector<2x64xf32>
      %300 = tpu.matmul %297, %299, %cst_310 {dimension_numbers = #tpu.dot_dimension_numbers<[1], [0], [0], [1], [0, 0, 1, 1], [], []>} : vector<2x64xbf16>, vector<64x64xbf16>, vector<2x64xf32> -> vector<2x64xf32>
      %301 = arith.addf %291, %300 : vector<2x64xf32>
      %c2_i32_311 = arith.constant 2 : i32
      %302 = arith.muli %c2_i32_311, %arg14 : i32
      %c0_i32_312 = arith.constant 0 : i32
      %303 = arith.addi %302, %c0_i32_312 : i32
      %c2_i32_313 = arith.constant 2 : i32
      %304 = arith.addi %303, %c2_i32_313 : i32
      %c1_314 = arith.constant 1 : index
      %305 = arith.index_cast %304 : i32 to index
      %c1_315 = arith.constant 1 : index
      %c0_316 = arith.constant 0 : index
      %306 = vector.load %arg11[%c1_314, %305, %c1_315, %c0_316] : memref<4x15x4x64xbf16, #tpu.memory_space<vmem>>, vector<1x1x2x64xbf16>
      %307 = vector.shape_cast %306 : vector<1x1x2x64xbf16> to vector<2x64xbf16>
      %c5_317 = arith.constant 5 : index
      %c0_318 = arith.constant 0 : index
      %c0_319 = arith.constant 0 : index
      %308 = vector.load %arg4[%c5_317, %c0_318, %c0_319] : memref<9x64x64xbf16, #tpu.memory_space<vmem>>, vector<1x64x64xbf16>
      %309 = vector.shape_cast %308 : vector<1x64x64xbf16> to vector<64x64xbf16>
      %cst_320 = arith.constant dense<0.000000e+00> : vector<2x64xf32>
      %310 = tpu.matmul %307, %309, %cst_320 {dimension_numbers = #tpu.dot_dimension_numbers<[1], [0], [0], [1], [0, 0, 1, 1], [], []>} : vector<2x64xbf16>, vector<64x64xbf16>, vector<2x64xf32> -> vector<2x64xf32>
      %311 = arith.addf %301, %310 : vector<2x64xf32>
      %c2_i32_321 = arith.constant 2 : i32
      %312 = arith.muli %c2_i32_321, %arg14 : i32
      %c0_i32_322 = arith.constant 0 : i32
      %313 = arith.addi %312, %c0_i32_322 : i32
      %c0_i32_323 = arith.constant 0 : i32
      %314 = arith.addi %313, %c0_i32_323 : i32
      %c2_324 = arith.constant 2 : index
      %315 = arith.index_cast %314 : i32 to index
      %c1_325 = arith.constant 1 : index
      %c0_326 = arith.constant 0 : index
      %316 = vector.load %arg11[%c2_324, %315, %c1_325, %c0_326] : memref<4x15x4x64xbf16, #tpu.memory_space<vmem>>, vector<1x1x2x64xbf16>
      %317 = vector.shape_cast %316 : vector<1x1x2x64xbf16> to vector<2x64xbf16>
      %c6_327 = arith.constant 6 : index
      %c0_328 = arith.constant 0 : index
      %c0_329 = arith.constant 0 : index
      %318 = vector.load %arg4[%c6_327, %c0_328, %c0_329] : memref<9x64x64xbf16, #tpu.memory_space<vmem>>, vector<1x64x64xbf16>
      %319 = vector.shape_cast %318 : vector<1x64x64xbf16> to vector<64x64xbf16>
      %cst_330 = arith.constant dense<0.000000e+00> : vector<2x64xf32>
      %320 = tpu.matmul %317, %319, %cst_330 {dimension_numbers = #tpu.dot_dimension_numbers<[1], [0], [0], [1], [0, 0, 1, 1], [], []>} : vector<2x64xbf16>, vector<64x64xbf16>, vector<2x64xf32> -> vector<2x64xf32>
      %321 = arith.addf %311, %320 : vector<2x64xf32>
      %c2_i32_331 = arith.constant 2 : i32
      %322 = arith.muli %c2_i32_331, %arg14 : i32
      %c0_i32_332 = arith.constant 0 : i32
      %323 = arith.addi %322, %c0_i32_332 : i32
      %c1_i32_333 = arith.constant 1 : i32
      %324 = arith.addi %323, %c1_i32_333 : i32
      %c2_334 = arith.constant 2 : index
      %325 = arith.index_cast %324 : i32 to index
      %c1_335 = arith.constant 1 : index
      %c0_336 = arith.constant 0 : index
      %326 = vector.load %arg11[%c2_334, %325, %c1_335, %c0_336] : memref<4x15x4x64xbf16, #tpu.memory_space<vmem>>, vector<1x1x2x64xbf16>
      %327 = vector.shape_cast %326 : vector<1x1x2x64xbf16> to vector<2x64xbf16>
      %c7_337 = arith.constant 7 : index
      %c0_338 = arith.constant 0 : index
      %c0_339 = arith.constant 0 : index
      %328 = vector.load %arg4[%c7_337, %c0_338, %c0_339] : memref<9x64x64xbf16, #tpu.memory_space<vmem>>, vector<1x64x64xbf16>
      %329 = vector.shape_cast %328 : vector<1x64x64xbf16> to vector<64x64xbf16>
      %cst_340 = arith.constant dense<0.000000e+00> : vector<2x64xf32>
      %330 = tpu.matmul %327, %329, %cst_340 {dimension_numbers = #tpu.dot_dimension_numbers<[1], [0], [0], [1], [0, 0, 1, 1], [], []>} : vector<2x64xbf16>, vector<64x64xbf16>, vector<2x64xf32> -> vector<2x64xf32>
      %331 = arith.addf %321, %330 : vector<2x64xf32>
      %c2_i32_341 = arith.constant 2 : i32
      %332 = arith.muli %c2_i32_341, %arg14 : i32
      %c0_i32_342 = arith.constant 0 : i32
      %333 = arith.addi %332, %c0_i32_342 : i32
      %c2_i32_343 = arith.constant 2 : i32
      %334 = arith.addi %333, %c2_i32_343 : i32
      %c2_344 = arith.constant 2 : index
      %335 = arith.index_cast %334 : i32 to index
      %c1_345 = arith.constant 1 : index
      %c0_346 = arith.constant 0 : index
      %336 = vector.load %arg11[%c2_344, %335, %c1_345, %c0_346] : memref<4x15x4x64xbf16, #tpu.memory_space<vmem>>, vector<1x1x2x64xbf16>
      %337 = vector.shape_cast %336 : vector<1x1x2x64xbf16> to vector<2x64xbf16>
      %c8_347 = arith.constant 8 : index
      %c0_348 = arith.constant 0 : index
      %c0_349 = arith.constant 0 : index
      %338 = vector.load %arg4[%c8_347, %c0_348, %c0_349] : memref<9x64x64xbf16, #tpu.memory_space<vmem>>, vector<1x64x64xbf16>
      %339 = vector.shape_cast %338 : vector<1x64x64xbf16> to vector<64x64xbf16>
      %cst_350 = arith.constant dense<0.000000e+00> : vector<2x64xf32>
      %340 = tpu.matmul %337, %339, %cst_350 {dimension_numbers = #tpu.dot_dimension_numbers<[1], [0], [0], [1], [0, 0, 1, 1], [], []>} : vector<2x64xbf16>, vector<64x64xbf16>, vector<2x64xf32> -> vector<2x64xf32>
      %341 = arith.addf %331, %340 : vector<2x64xf32>
      %342 = vector.broadcast %54 : vector<1x64xf32> to vector<2x64xf32>
      %343 = arith.addf %341, %342 : vector<2x64xf32>
      %cst_351 = arith.constant 0.000000e+00 : f32
      %344 = vector.broadcast %cst_351 : f32 to vector<2x64xf32>
      %345 = arith.maximumf %343, %344 : vector<2x64xf32>
      %346 = arith.maximumf %250, %345 : vector<2x64xf32>
      %cst_352 = arith.constant 0.000000e+00 : f32
      %347 = vector.broadcast %cst_352 : f32 to vector<2x64xf32>
      %c2_i32_353 = arith.constant 2 : i32
      %348 = arith.muli %c2_i32_353, %arg14 : i32
      %c1_i32_354 = arith.constant 1 : i32
      %349 = arith.addi %348, %c1_i32_354 : i32
      %c0_i32_355 = arith.constant 0 : i32
      %350 = arith.addi %349, %c0_i32_355 : i32
      %c0_356 = arith.constant 0 : index
      %351 = arith.index_cast %350 : i32 to index
      %c1_357 = arith.constant 1 : index
      %c0_358 = arith.constant 0 : index
      %352 = vector.load %arg11[%c0_356, %351, %c1_357, %c0_358] : memref<4x15x4x64xbf16, #tpu.memory_space<vmem>>, vector<1x1x2x64xbf16>
      %353 = vector.shape_cast %352 : vector<1x1x2x64xbf16> to vector<2x64xbf16>
      %c0_359 = arith.constant 0 : index
      %c0_360 = arith.constant 0 : index
      %c0_361 = arith.constant 0 : index
      %354 = vector.load %arg4[%c0_359, %c0_360, %c0_361] : memref<9x64x64xbf16, #tpu.memory_space<vmem>>, vector<1x64x64xbf16>
      %355 = vector.shape_cast %354 : vector<1x64x64xbf16> to vector<64x64xbf16>
      %cst_362 = arith.constant dense<0.000000e+00> : vector<2x64xf32>
      %356 = tpu.matmul %353, %355, %cst_362 {dimension_numbers = #tpu.dot_dimension_numbers<[1], [0], [0], [1], [0, 0, 1, 1], [], []>} : vector<2x64xbf16>, vector<64x64xbf16>, vector<2x64xf32> -> vector<2x64xf32>
      %357 = arith.addf %347, %356 : vector<2x64xf32>
      %c2_i32_363 = arith.constant 2 : i32
      %358 = arith.muli %c2_i32_363, %arg14 : i32
      %c1_i32_364 = arith.constant 1 : i32
      %359 = arith.addi %358, %c1_i32_364 : i32
      %c1_i32_365 = arith.constant 1 : i32
      %360 = arith.addi %359, %c1_i32_365 : i32
      %c0_366 = arith.constant 0 : index
      %361 = arith.index_cast %360 : i32 to index
      %c1_367 = arith.constant 1 : index
      %c0_368 = arith.constant 0 : index
      %362 = vector.load %arg11[%c0_366, %361, %c1_367, %c0_368] : memref<4x15x4x64xbf16, #tpu.memory_space<vmem>>, vector<1x1x2x64xbf16>
      %363 = vector.shape_cast %362 : vector<1x1x2x64xbf16> to vector<2x64xbf16>
      %c1_369 = arith.constant 1 : index
      %c0_370 = arith.constant 0 : index
      %c0_371 = arith.constant 0 : index
      %364 = vector.load %arg4[%c1_369, %c0_370, %c0_371] : memref<9x64x64xbf16, #tpu.memory_space<vmem>>, vector<1x64x64xbf16>
      %365 = vector.shape_cast %364 : vector<1x64x64xbf16> to vector<64x64xbf16>
      %cst_372 = arith.constant dense<0.000000e+00> : vector<2x64xf32>
      %366 = tpu.matmul %363, %365, %cst_372 {dimension_numbers = #tpu.dot_dimension_numbers<[1], [0], [0], [1], [0, 0, 1, 1], [], []>} : vector<2x64xbf16>, vector<64x64xbf16>, vector<2x64xf32> -> vector<2x64xf32>
      %367 = arith.addf %357, %366 : vector<2x64xf32>
      %c2_i32_373 = arith.constant 2 : i32
      %368 = arith.muli %c2_i32_373, %arg14 : i32
      %c1_i32_374 = arith.constant 1 : i32
      %369 = arith.addi %368, %c1_i32_374 : i32
      %c2_i32_375 = arith.constant 2 : i32
      %370 = arith.addi %369, %c2_i32_375 : i32
      %c0_376 = arith.constant 0 : index
      %371 = arith.index_cast %370 : i32 to index
      %c1_377 = arith.constant 1 : index
      %c0_378 = arith.constant 0 : index
      %372 = vector.load %arg11[%c0_376, %371, %c1_377, %c0_378] : memref<4x15x4x64xbf16, #tpu.memory_space<vmem>>, vector<1x1x2x64xbf16>
      %373 = vector.shape_cast %372 : vector<1x1x2x64xbf16> to vector<2x64xbf16>
      %c2_379 = arith.constant 2 : index
      %c0_380 = arith.constant 0 : index
      %c0_381 = arith.constant 0 : index
      %374 = vector.load %arg4[%c2_379, %c0_380, %c0_381] : memref<9x64x64xbf16, #tpu.memory_space<vmem>>, vector<1x64x64xbf16>
      %375 = vector.shape_cast %374 : vector<1x64x64xbf16> to vector<64x64xbf16>
      %cst_382 = arith.constant dense<0.000000e+00> : vector<2x64xf32>
      %376 = tpu.matmul %373, %375, %cst_382 {dimension_numbers = #tpu.dot_dimension_numbers<[1], [0], [0], [1], [0, 0, 1, 1], [], []>} : vector<2x64xbf16>, vector<64x64xbf16>, vector<2x64xf32> -> vector<2x64xf32>
      %377 = arith.addf %367, %376 : vector<2x64xf32>
      %c2_i32_383 = arith.constant 2 : i32
      %378 = arith.muli %c2_i32_383, %arg14 : i32
      %c1_i32_384 = arith.constant 1 : i32
      %379 = arith.addi %378, %c1_i32_384 : i32
      %c0_i32_385 = arith.constant 0 : i32
      %380 = arith.addi %379, %c0_i32_385 : i32
      %c1_386 = arith.constant 1 : index
      %381 = arith.index_cast %380 : i32 to index
      %c1_387 = arith.constant 1 : index
      %c0_388 = arith.constant 0 : index
      %382 = vector.load %arg11[%c1_386, %381, %c1_387, %c0_388] : memref<4x15x4x64xbf16, #tpu.memory_space<vmem>>, vector<1x1x2x64xbf16>
      %383 = vector.shape_cast %382 : vector<1x1x2x64xbf16> to vector<2x64xbf16>
      %c3_389 = arith.constant 3 : index
      %c0_390 = arith.constant 0 : index
      %c0_391 = arith.constant 0 : index
      %384 = vector.load %arg4[%c3_389, %c0_390, %c0_391] : memref<9x64x64xbf16, #tpu.memory_space<vmem>>, vector<1x64x64xbf16>
      %385 = vector.shape_cast %384 : vector<1x64x64xbf16> to vector<64x64xbf16>
      %cst_392 = arith.constant dense<0.000000e+00> : vector<2x64xf32>
      %386 = tpu.matmul %383, %385, %cst_392 {dimension_numbers = #tpu.dot_dimension_numbers<[1], [0], [0], [1], [0, 0, 1, 1], [], []>} : vector<2x64xbf16>, vector<64x64xbf16>, vector<2x64xf32> -> vector<2x64xf32>
      %387 = arith.addf %377, %386 : vector<2x64xf32>
      %c2_i32_393 = arith.constant 2 : i32
      %388 = arith.muli %c2_i32_393, %arg14 : i32
      %c1_i32_394 = arith.constant 1 : i32
      %389 = arith.addi %388, %c1_i32_394 : i32
      %c1_i32_395 = arith.constant 1 : i32
      %390 = arith.addi %389, %c1_i32_395 : i32
      %c1_396 = arith.constant 1 : index
      %391 = arith.index_cast %390 : i32 to index
      %c1_397 = arith.constant 1 : index
      %c0_398 = arith.constant 0 : index
      %392 = vector.load %arg11[%c1_396, %391, %c1_397, %c0_398] : memref<4x15x4x64xbf16, #tpu.memory_space<vmem>>, vector<1x1x2x64xbf16>
      %393 = vector.shape_cast %392 : vector<1x1x2x64xbf16> to vector<2x64xbf16>
      %c4_399 = arith.constant 4 : index
      %c0_400 = arith.constant 0 : index
      %c0_401 = arith.constant 0 : index
      %394 = vector.load %arg4[%c4_399, %c0_400, %c0_401] : memref<9x64x64xbf16, #tpu.memory_space<vmem>>, vector<1x64x64xbf16>
      %395 = vector.shape_cast %394 : vector<1x64x64xbf16> to vector<64x64xbf16>
      %cst_402 = arith.constant dense<0.000000e+00> : vector<2x64xf32>
      %396 = tpu.matmul %393, %395, %cst_402 {dimension_numbers = #tpu.dot_dimension_numbers<[1], [0], [0], [1], [0, 0, 1, 1], [], []>} : vector<2x64xbf16>, vector<64x64xbf16>, vector<2x64xf32> -> vector<2x64xf32>
      %397 = arith.addf %387, %396 : vector<2x64xf32>
      %c2_i32_403 = arith.constant 2 : i32
      %398 = arith.muli %c2_i32_403, %arg14 : i32
      %c1_i32_404 = arith.constant 1 : i32
      %399 = arith.addi %398, %c1_i32_404 : i32
      %c2_i32_405 = arith.constant 2 : i32
      %400 = arith.addi %399, %c2_i32_405 : i32
      %c1_406 = arith.constant 1 : index
      %401 = arith.index_cast %400 : i32 to index
      %c1_407 = arith.constant 1 : index
      %c0_408 = arith.constant 0 : index
      %402 = vector.load %arg11[%c1_406, %401, %c1_407, %c0_408] : memref<4x15x4x64xbf16, #tpu.memory_space<vmem>>, vector<1x1x2x64xbf16>
      %403 = vector.shape_cast %402 : vector<1x1x2x64xbf16> to vector<2x64xbf16>
      %c5_409 = arith.constant 5 : index
      %c0_410 = arith.constant 0 : index
      %c0_411 = arith.constant 0 : index
      %404 = vector.load %arg4[%c5_409, %c0_410, %c0_411] : memref<9x64x64xbf16, #tpu.memory_space<vmem>>, vector<1x64x64xbf16>
      %405 = vector.shape_cast %404 : vector<1x64x64xbf16> to vector<64x64xbf16>
      %cst_412 = arith.constant dense<0.000000e+00> : vector<2x64xf32>
      %406 = tpu.matmul %403, %405, %cst_412 {dimension_numbers = #tpu.dot_dimension_numbers<[1], [0], [0], [1], [0, 0, 1, 1], [], []>} : vector<2x64xbf16>, vector<64x64xbf16>, vector<2x64xf32> -> vector<2x64xf32>
      %407 = arith.addf %397, %406 : vector<2x64xf32>
      %c2_i32_413 = arith.constant 2 : i32
      %408 = arith.muli %c2_i32_413, %arg14 : i32
      %c1_i32_414 = arith.constant 1 : i32
      %409 = arith.addi %408, %c1_i32_414 : i32
      %c0_i32_415 = arith.constant 0 : i32
      %410 = arith.addi %409, %c0_i32_415 : i32
      %c2_416 = arith.constant 2 : index
      %411 = arith.index_cast %410 : i32 to index
      %c1_417 = arith.constant 1 : index
      %c0_418 = arith.constant 0 : index
      %412 = vector.load %arg11[%c2_416, %411, %c1_417, %c0_418] : memref<4x15x4x64xbf16, #tpu.memory_space<vmem>>, vector<1x1x2x64xbf16>
      %413 = vector.shape_cast %412 : vector<1x1x2x64xbf16> to vector<2x64xbf16>
      %c6_419 = arith.constant 6 : index
      %c0_420 = arith.constant 0 : index
      %c0_421 = arith.constant 0 : index
      %414 = vector.load %arg4[%c6_419, %c0_420, %c0_421] : memref<9x64x64xbf16, #tpu.memory_space<vmem>>, vector<1x64x64xbf16>
      %415 = vector.shape_cast %414 : vector<1x64x64xbf16> to vector<64x64xbf16>
      %cst_422 = arith.constant dense<0.000000e+00> : vector<2x64xf32>
      %416 = tpu.matmul %413, %415, %cst_422 {dimension_numbers = #tpu.dot_dimension_numbers<[1], [0], [0], [1], [0, 0, 1, 1], [], []>} : vector<2x64xbf16>, vector<64x64xbf16>, vector<2x64xf32> -> vector<2x64xf32>
      %417 = arith.addf %407, %416 : vector<2x64xf32>
      %c2_i32_423 = arith.constant 2 : i32
      %418 = arith.muli %c2_i32_423, %arg14 : i32
      %c1_i32_424 = arith.constant 1 : i32
      %419 = arith.addi %418, %c1_i32_424 : i32
      %c1_i32_425 = arith.constant 1 : i32
      %420 = arith.addi %419, %c1_i32_425 : i32
      %c2_426 = arith.constant 2 : index
      %421 = arith.index_cast %420 : i32 to index
      %c1_427 = arith.constant 1 : index
      %c0_428 = arith.constant 0 : index
      %422 = vector.load %arg11[%c2_426, %421, %c1_427, %c0_428] : memref<4x15x4x64xbf16, #tpu.memory_space<vmem>>, vector<1x1x2x64xbf16>
      %423 = vector.shape_cast %422 : vector<1x1x2x64xbf16> to vector<2x64xbf16>
      %c7_429 = arith.constant 7 : index
      %c0_430 = arith.constant 0 : index
      %c0_431 = arith.constant 0 : index
      %424 = vector.load %arg4[%c7_429, %c0_430, %c0_431] : memref<9x64x64xbf16, #tpu.memory_space<vmem>>, vector<1x64x64xbf16>
      %425 = vector.shape_cast %424 : vector<1x64x64xbf16> to vector<64x64xbf16>
      %cst_432 = arith.constant dense<0.000000e+00> : vector<2x64xf32>
      %426 = tpu.matmul %423, %425, %cst_432 {dimension_numbers = #tpu.dot_dimension_numbers<[1], [0], [0], [1], [0, 0, 1, 1], [], []>} : vector<2x64xbf16>, vector<64x64xbf16>, vector<2x64xf32> -> vector<2x64xf32>
      %427 = arith.addf %417, %426 : vector<2x64xf32>
      %c2_i32_433 = arith.constant 2 : i32
      %428 = arith.muli %c2_i32_433, %arg14 : i32
      %c1_i32_434 = arith.constant 1 : i32
      %429 = arith.addi %428, %c1_i32_434 : i32
      %c2_i32_435 = arith.constant 2 : i32
      %430 = arith.addi %429, %c2_i32_435 : i32
      %c2_436 = arith.constant 2 : index
      %431 = arith.index_cast %430 : i32 to index
      %c1_437 = arith.constant 1 : index
      %c0_438 = arith.constant 0 : index
      %432 = vector.load %arg11[%c2_436, %431, %c1_437, %c0_438] : memref<4x15x4x64xbf16, #tpu.memory_space<vmem>>, vector<1x1x2x64xbf16>
      %433 = vector.shape_cast %432 : vector<1x1x2x64xbf16> to vector<2x64xbf16>
      %c8_439 = arith.constant 8 : index
      %c0_440 = arith.constant 0 : index
      %c0_441 = arith.constant 0 : index
      %434 = vector.load %arg4[%c8_439, %c0_440, %c0_441] : memref<9x64x64xbf16, #tpu.memory_space<vmem>>, vector<1x64x64xbf16>
      %435 = vector.shape_cast %434 : vector<1x64x64xbf16> to vector<64x64xbf16>
      %cst_442 = arith.constant dense<0.000000e+00> : vector<2x64xf32>
      %436 = tpu.matmul %433, %435, %cst_442 {dimension_numbers = #tpu.dot_dimension_numbers<[1], [0], [0], [1], [0, 0, 1, 1], [], []>} : vector<2x64xbf16>, vector<64x64xbf16>, vector<2x64xf32> -> vector<2x64xf32>
      %437 = arith.addf %427, %436 : vector<2x64xf32>
      %438 = vector.broadcast %54 : vector<1x64xf32> to vector<2x64xf32>
      %439 = arith.addf %437, %438 : vector<2x64xf32>
      %cst_443 = arith.constant 0.000000e+00 : f32
      %440 = vector.broadcast %cst_443 : f32 to vector<2x64xf32>
      %441 = arith.maximumf %439, %440 : vector<2x64xf32>
      %442 = arith.maximumf %346, %441 : vector<2x64xf32>
      %cst_444 = arith.constant 0.000000e+00 : f32
      %443 = vector.broadcast %cst_444 : f32 to vector<1x64xf32>
      %444 = tpu.concatenate %443, %442, %443 in 0 : vector<1x64xf32>, vector<2x64xf32>, vector<1x64xf32> -> vector<4x64xf32>
      %445 = arith.truncf %444 : vector<4x64xf32> to vector<4x64xbf16>
      %c1_i32_445 = arith.constant 1 : i32
      %446 = arith.addi %c1_i32_445, %arg14 : i32
      %c0_446 = arith.constant 0 : index
      %447 = arith.index_cast %446 : i32 to index
      %c0_447 = arith.constant 0 : index
      %c0_448 = arith.constant 0 : index
      %448 = vector.load %arg12[%c0_446, %447, %c0_447, %c0_448] : memref<2x8x4x64xbf16, #tpu.memory_space<vmem>>, vector<1x1x4x64xbf16>
      %449 = vector.shape_cast %448 : vector<1x1x4x64xbf16> to vector<4x64xbf16>
      %450 = vector.shape_cast %445 : vector<4x64xbf16> to vector<1x1x4x64xbf16>
      tpu.vector_store %arg12[%c0_446, %447, %c0_447, %c0_448], %450 {strides = array<i32>} : memref<2x8x4x64xbf16, #tpu.memory_space<vmem>>, vector<1x1x4x64xbf16>,
      %cst_449 = arith.constant 0.000000e+00 : f32
      %451 = vector.broadcast %cst_449 : f32 to vector<2x64xf32>
      %c2_i32_450 = arith.constant 2 : i32
      %452 = arith.muli %c2_i32_450, %arg14 : i32
      %c0_i32_451 = arith.constant 0 : i32
      %453 = arith.addi %452, %c0_i32_451 : i32
      %c0_i32_452 = arith.constant 0 : i32
      %454 = arith.addi %453, %c0_i32_452 : i32
      %c1_453 = arith.constant 1 : index
      %455 = arith.index_cast %454 : i32 to index
      %c1_454 = arith.constant 1 : index
      %c0_455 = arith.constant 0 : index
      %456 = vector.load %arg11[%c1_453, %455, %c1_454, %c0_455] : memref<4x15x4x64xbf16, #tpu.memory_space<vmem>>, vector<1x1x2x64xbf16>
      %457 = vector.shape_cast %456 : vector<1x1x2x64xbf16> to vector<2x64xbf16>
      %c0_456 = arith.constant 0 : index
      %c0_457 = arith.constant 0 : index
      %c0_458 = arith.constant 0 : index
      %458 = vector.load %arg4[%c0_456, %c0_457, %c0_458] : memref<9x64x64xbf16, #tpu.memory_space<vmem>>, vector<1x64x64xbf16>
      %459 = vector.shape_cast %458 : vector<1x64x64xbf16> to vector<64x64xbf16>
      %cst_459 = arith.constant dense<0.000000e+00> : vector<2x64xf32>
      %460 = tpu.matmul %457, %459, %cst_459 {dimension_numbers = #tpu.dot_dimension_numbers<[1], [0], [0], [1], [0, 0, 1, 1], [], []>} : vector<2x64xbf16>, vector<64x64xbf16>, vector<2x64xf32> -> vector<2x64xf32>
      %461 = arith.addf %451, %460 : vector<2x64xf32>
      %c2_i32_460 = arith.constant 2 : i32
      %462 = arith.muli %c2_i32_460, %arg14 : i32
      %c0_i32_461 = arith.constant 0 : i32
      %463 = arith.addi %462, %c0_i32_461 : i32
      %c1_i32_462 = arith.constant 1 : i32
      %464 = arith.addi %463, %c1_i32_462 : i32
      %c1_463 = arith.constant 1 : index
      %465 = arith.index_cast %464 : i32 to index
      %c1_464 = arith.constant 1 : index
      %c0_465 = arith.constant 0 : index
      %466 = vector.load %arg11[%c1_463, %465, %c1_464, %c0_465] : memref<4x15x4x64xbf16, #tpu.memory_space<vmem>>, vector<1x1x2x64xbf16>
      %467 = vector.shape_cast %466 : vector<1x1x2x64xbf16> to vector<2x64xbf16>
      %c1_466 = arith.constant 1 : index
      %c0_467 = arith.constant 0 : index
      %c0_468 = arith.constant 0 : index
      %468 = vector.load %arg4[%c1_466, %c0_467, %c0_468] : memref<9x64x64xbf16, #tpu.memory_space<vmem>>, vector<1x64x64xbf16>
      %469 = vector.shape_cast %468 : vector<1x64x64xbf16> to vector<64x64xbf16>
      %cst_469 = arith.constant dense<0.000000e+00> : vector<2x64xf32>
      %470 = tpu.matmul %467, %469, %cst_469 {dimension_numbers = #tpu.dot_dimension_numbers<[1], [0], [0], [1], [0, 0, 1, 1], [], []>} : vector<2x64xbf16>, vector<64x64xbf16>, vector<2x64xf32> -> vector<2x64xf32>
      %471 = arith.addf %461, %470 : vector<2x64xf32>
      %c2_i32_470 = arith.constant 2 : i32
      %472 = arith.muli %c2_i32_470, %arg14 : i32
      %c0_i32_471 = arith.constant 0 : i32
      %473 = arith.addi %472, %c0_i32_471 : i32
      %c2_i32_472 = arith.constant 2 : i32
      %474 = arith.addi %473, %c2_i32_472 : i32
      %c1_473 = arith.constant 1 : index
      %475 = arith.index_cast %474 : i32 to index
      %c1_474 = arith.constant 1 : index
      %c0_475 = arith.constant 0 : index
      %476 = vector.load %arg11[%c1_473, %475, %c1_474, %c0_475] : memref<4x15x4x64xbf16, #tpu.memory_space<vmem>>, vector<1x1x2x64xbf16>
      %477 = vector.shape_cast %476 : vector<1x1x2x64xbf16> to vector<2x64xbf16>
      %c2_476 = arith.constant 2 : index
      %c0_477 = arith.constant 0 : index
      %c0_478 = arith.constant 0 : index
      %478 = vector.load %arg4[%c2_476, %c0_477, %c0_478] : memref<9x64x64xbf16, #tpu.memory_space<vmem>>, vector<1x64x64xbf16>
      %479 = vector.shape_cast %478 : vector<1x64x64xbf16> to vector<64x64xbf16>
      %cst_479 = arith.constant dense<0.000000e+00> : vector<2x64xf32>
      %480 = tpu.matmul %477, %479, %cst_479 {dimension_numbers = #tpu.dot_dimension_numbers<[1], [0], [0], [1], [0, 0, 1, 1], [], []>} : vector<2x64xbf16>, vector<64x64xbf16>, vector<2x64xf32> -> vector<2x64xf32>
      %481 = arith.addf %471, %480 : vector<2x64xf32>
      %c2_i32_480 = arith.constant 2 : i32
      %482 = arith.muli %c2_i32_480, %arg14 : i32
      %c0_i32_481 = arith.constant 0 : i32
      %483 = arith.addi %482, %c0_i32_481 : i32
      %c0_i32_482 = arith.constant 0 : i32
      %484 = arith.addi %483, %c0_i32_482 : i32
      %c2_483 = arith.constant 2 : index
      %485 = arith.index_cast %484 : i32 to index
      %c1_484 = arith.constant 1 : index
      %c0_485 = arith.constant 0 : index
      %486 = vector.load %arg11[%c2_483, %485, %c1_484, %c0_485] : memref<4x15x4x64xbf16, #tpu.memory_space<vmem>>, vector<1x1x2x64xbf16>
      %487 = vector.shape_cast %486 : vector<1x1x2x64xbf16> to vector<2x64xbf16>
      %c3_486 = arith.constant 3 : index
      %c0_487 = arith.constant 0 : index
      %c0_488 = arith.constant 0 : index
      %488 = vector.load %arg4[%c3_486, %c0_487, %c0_488] : memref<9x64x64xbf16, #tpu.memory_space<vmem>>, vector<1x64x64xbf16>
      %489 = vector.shape_cast %488 : vector<1x64x64xbf16> to vector<64x64xbf16>
      %cst_489 = arith.constant dense<0.000000e+00> : vector<2x64xf32>
      %490 = tpu.matmul %487, %489, %cst_489 {dimension_numbers = #tpu.dot_dimension_numbers<[1], [0], [0], [1], [0, 0, 1, 1], [], []>} : vector<2x64xbf16>, vector<64x64xbf16>, vector<2x64xf32> -> vector<2x64xf32>
      %491 = arith.addf %481, %490 : vector<2x64xf32>
      %c2_i32_490 = arith.constant 2 : i32
      %492 = arith.muli %c2_i32_490, %arg14 : i32
      %c0_i32_491 = arith.constant 0 : i32
      %493 = arith.addi %492, %c0_i32_491 : i32
      %c1_i32_492 = arith.constant 1 : i32
      %494 = arith.addi %493, %c1_i32_492 : i32
      %c2_493 = arith.constant 2 : index
      %495 = arith.index_cast %494 : i32 to index
      %c1_494 = arith.constant 1 : index
      %c0_495 = arith.constant 0 : index
      %496 = vector.load %arg11[%c2_493, %495, %c1_494, %c0_495] : memref<4x15x4x64xbf16, #tpu.memory_space<vmem>>, vector<1x1x2x64xbf16>
      %497 = vector.shape_cast %496 : vector<1x1x2x64xbf16> to vector<2x64xbf16>
      %c4_496 = arith.constant 4 : index
      %c0_497 = arith.constant 0 : index
      %c0_498 = arith.constant 0 : index
      %498 = vector.load %arg4[%c4_496, %c0_497, %c0_498] : memref<9x64x64xbf16, #tpu.memory_space<vmem>>, vector<1x64x64xbf16>
      %499 = vector.shape_cast %498 : vector<1x64x64xbf16> to vector<64x64xbf16>
      %cst_499 = arith.constant dense<0.000000e+00> : vector<2x64xf32>
      %500 = tpu.matmul %497, %499, %cst_499 {dimension_numbers = #tpu.dot_dimension_numbers<[1], [0], [0], [1], [0, 0, 1, 1], [], []>} : vector<2x64xbf16>, vector<64x64xbf16>, vector<2x64xf32> -> vector<2x64xf32>
      %501 = arith.addf %491, %500 : vector<2x64xf32>
      %c2_i32_500 = arith.constant 2 : i32
      %502 = arith.muli %c2_i32_500, %arg14 : i32
      %c0_i32_501 = arith.constant 0 : i32
      %503 = arith.addi %502, %c0_i32_501 : i32
      %c2_i32_502 = arith.constant 2 : i32
      %504 = arith.addi %503, %c2_i32_502 : i32
      %c2_503 = arith.constant 2 : index
      %505 = arith.index_cast %504 : i32 to index
      %c1_504 = arith.constant 1 : index
      %c0_505 = arith.constant 0 : index
      %506 = vector.load %arg11[%c2_503, %505, %c1_504, %c0_505] : memref<4x15x4x64xbf16, #tpu.memory_space<vmem>>, vector<1x1x2x64xbf16>
      %507 = vector.shape_cast %506 : vector<1x1x2x64xbf16> to vector<2x64xbf16>
      %c5_506 = arith.constant 5 : index
      %c0_507 = arith.constant 0 : index
      %c0_508 = arith.constant 0 : index
      %508 = vector.load %arg4[%c5_506, %c0_507, %c0_508] : memref<9x64x64xbf16, #tpu.memory_space<vmem>>, vector<1x64x64xbf16>
      %509 = vector.shape_cast %508 : vector<1x64x64xbf16> to vector<64x64xbf16>
      %cst_509 = arith.constant dense<0.000000e+00> : vector<2x64xf32>
      %510 = tpu.matmul %507, %509, %cst_509 {dimension_numbers = #tpu.dot_dimension_numbers<[1], [0], [0], [1], [0, 0, 1, 1], [], []>} : vector<2x64xbf16>, vector<64x64xbf16>, vector<2x64xf32> -> vector<2x64xf32>
      %511 = arith.addf %501, %510 : vector<2x64xf32>
      %c2_i32_510 = arith.constant 2 : i32
      %512 = arith.muli %c2_i32_510, %arg14 : i32
      %c0_i32_511 = arith.constant 0 : i32
      %513 = arith.addi %512, %c0_i32_511 : i32
      %c0_i32_512 = arith.constant 0 : i32
      %514 = arith.addi %513, %c0_i32_512 : i32
      %c3_513 = arith.constant 3 : index
      %515 = arith.index_cast %514 : i32 to index
      %c1_514 = arith.constant 1 : index
      %c0_515 = arith.constant 0 : index
      %516 = vector.load %arg11[%c3_513, %515, %c1_514, %c0_515] : memref<4x15x4x64xbf16, #tpu.memory_space<vmem>>, vector<1x1x2x64xbf16>
      %517 = vector.shape_cast %516 : vector<1x1x2x64xbf16> to vector<2x64xbf16>
      %c6_516 = arith.constant 6 : index
      %c0_517 = arith.constant 0 : index
      %c0_518 = arith.constant 0 : index
      %518 = vector.load %arg4[%c6_516, %c0_517, %c0_518] : memref<9x64x64xbf16, #tpu.memory_space<vmem>>, vector<1x64x64xbf16>
      %519 = vector.shape_cast %518 : vector<1x64x64xbf16> to vector<64x64xbf16>
      %cst_519 = arith.constant dense<0.000000e+00> : vector<2x64xf32>
      %520 = tpu.matmul %517, %519, %cst_519 {dimension_numbers = #tpu.dot_dimension_numbers<[1], [0], [0], [1], [0, 0, 1, 1], [], []>} : vector<2x64xbf16>, vector<64x64xbf16>, vector<2x64xf32> -> vector<2x64xf32>
      %521 = arith.addf %511, %520 : vector<2x64xf32>
      %c2_i32_520 = arith.constant 2 : i32
      %522 = arith.muli %c2_i32_520, %arg14 : i32
      %c0_i32_521 = arith.constant 0 : i32
      %523 = arith.addi %522, %c0_i32_521 : i32
      %c1_i32_522 = arith.constant 1 : i32
      %524 = arith.addi %523, %c1_i32_522 : i32
      %c3_523 = arith.constant 3 : index
      %525 = arith.index_cast %524 : i32 to index
      %c1_524 = arith.constant 1 : index
      %c0_525 = arith.constant 0 : index
      %526 = vector.load %arg11[%c3_523, %525, %c1_524, %c0_525] : memref<4x15x4x64xbf16, #tpu.memory_space<vmem>>, vector<1x1x2x64xbf16>
      %527 = vector.shape_cast %526 : vector<1x1x2x64xbf16> to vector<2x64xbf16>
      %c7_526 = arith.constant 7 : index
      %c0_527 = arith.constant 0 : index
      %c0_528 = arith.constant 0 : index
      %528 = vector.load %arg4[%c7_526, %c0_527, %c0_528] : memref<9x64x64xbf16, #tpu.memory_space<vmem>>, vector<1x64x64xbf16>
      %529 = vector.shape_cast %528 : vector<1x64x64xbf16> to vector<64x64xbf16>
      %cst_529 = arith.constant dense<0.000000e+00> : vector<2x64xf32>
      %530 = tpu.matmul %527, %529, %cst_529 {dimension_numbers = #tpu.dot_dimension_numbers<[1], [0], [0], [1], [0, 0, 1, 1], [], []>} : vector<2x64xbf16>, vector<64x64xbf16>, vector<2x64xf32> -> vector<2x64xf32>
      %531 = arith.addf %521, %530 : vector<2x64xf32>
      %c2_i32_530 = arith.constant 2 : i32
      %532 = arith.muli %c2_i32_530, %arg14 : i32
      %c0_i32_531 = arith.constant 0 : i32
      %533 = arith.addi %532, %c0_i32_531 : i32
      %c2_i32_532 = arith.constant 2 : i32
      %534 = arith.addi %533, %c2_i32_532 : i32
      %c3_533 = arith.constant 3 : index
      %535 = arith.index_cast %534 : i32 to index
      %c1_534 = arith.constant 1 : index
      %c0_535 = arith.constant 0 : index
      %536 = vector.load %arg11[%c3_533, %535, %c1_534, %c0_535] : memref<4x15x4x64xbf16, #tpu.memory_space<vmem>>, vector<1x1x2x64xbf16>
      %537 = vector.shape_cast %536 : vector<1x1x2x64xbf16> to vector<2x64xbf16>
      %c8_536 = arith.constant 8 : index
      %c0_537 = arith.constant 0 : index
      %c0_538 = arith.constant 0 : index
      %538 = vector.load %arg4[%c8_536, %c0_537, %c0_538] : memref<9x64x64xbf16, #tpu.memory_space<vmem>>, vector<1x64x64xbf16>
      %539 = vector.shape_cast %538 : vector<1x64x64xbf16> to vector<64x64xbf16>
      %cst_539 = arith.constant dense<0.000000e+00> : vector<2x64xf32>
      %540 = tpu.matmul %537, %539, %cst_539 {dimension_numbers = #tpu.dot_dimension_numbers<[1], [0], [0], [1], [0, 0, 1, 1], [], []>} : vector<2x64xbf16>, vector<64x64xbf16>, vector<2x64xf32> -> vector<2x64xf32>
      %541 = arith.addf %531, %540 : vector<2x64xf32>
      %542 = vector.broadcast %54 : vector<1x64xf32> to vector<2x64xf32>
      %543 = arith.addf %541, %542 : vector<2x64xf32>
      %cst_540 = arith.constant 0.000000e+00 : f32
      %544 = vector.broadcast %cst_540 : f32 to vector<2x64xf32>
      %545 = arith.maximumf %543, %544 : vector<2x64xf32>
      %cst_541 = arith.constant 0.000000e+00 : f32
      %546 = vector.broadcast %cst_541 : f32 to vector<2x64xf32>
      %c2_i32_542 = arith.constant 2 : i32
      %547 = arith.muli %c2_i32_542, %arg14 : i32
      %c1_i32_543 = arith.constant 1 : i32
      %548 = arith.addi %547, %c1_i32_543 : i32
      %c0_i32_544 = arith.constant 0 : i32
      %549 = arith.addi %548, %c0_i32_544 : i32
      %c1_545 = arith.constant 1 : index
      %550 = arith.index_cast %549 : i32 to index
      %c1_546 = arith.constant 1 : index
      %c0_547 = arith.constant 0 : index
      %551 = vector.load %arg11[%c1_545, %550, %c1_546, %c0_547] : memref<4x15x4x64xbf16, #tpu.memory_space<vmem>>, vector<1x1x2x64xbf16>
      %552 = vector.shape_cast %551 : vector<1x1x2x64xbf16> to vector<2x64xbf16>
      %c0_548 = arith.constant 0 : index
      %c0_549 = arith.constant 0 : index
      %c0_550 = arith.constant 0 : index
      %553 = vector.load %arg4[%c0_548, %c0_549, %c0_550] : memref<9x64x64xbf16, #tpu.memory_space<vmem>>, vector<1x64x64xbf16>
      %554 = vector.shape_cast %553 : vector<1x64x64xbf16> to vector<64x64xbf16>
      %cst_551 = arith.constant dense<0.000000e+00> : vector<2x64xf32>
      %555 = tpu.matmul %552, %554, %cst_551 {dimension_numbers = #tpu.dot_dimension_numbers<[1], [0], [0], [1], [0, 0, 1, 1], [], []>} : vector<2x64xbf16>, vector<64x64xbf16>, vector<2x64xf32> -> vector<2x64xf32>
      %556 = arith.addf %546, %555 : vector<2x64xf32>
      %c2_i32_552 = arith.constant 2 : i32
      %557 = arith.muli %c2_i32_552, %arg14 : i32
      %c1_i32_553 = arith.constant 1 : i32
      %558 = arith.addi %557, %c1_i32_553 : i32
      %c1_i32_554 = arith.constant 1 : i32
      %559 = arith.addi %558, %c1_i32_554 : i32
      %c1_555 = arith.constant 1 : index
      %560 = arith.index_cast %559 : i32 to index
      %c1_556 = arith.constant 1 : index
      %c0_557 = arith.constant 0 : index
      %561 = vector.load %arg11[%c1_555, %560, %c1_556, %c0_557] : memref<4x15x4x64xbf16, #tpu.memory_space<vmem>>, vector<1x1x2x64xbf16>
      %562 = vector.shape_cast %561 : vector<1x1x2x64xbf16> to vector<2x64xbf16>
      %c1_558 = arith.constant 1 : index
      %c0_559 = arith.constant 0 : index
      %c0_560 = arith.constant 0 : index
      %563 = vector.load %arg4[%c1_558, %c0_559, %c0_560] : memref<9x64x64xbf16, #tpu.memory_space<vmem>>, vector<1x64x64xbf16>
      %564 = vector.shape_cast %563 : vector<1x64x64xbf16> to vector<64x64xbf16>
      %cst_561 = arith.constant dense<0.000000e+00> : vector<2x64xf32>
      %565 = tpu.matmul %562, %564, %cst_561 {dimension_numbers = #tpu.dot_dimension_numbers<[1], [0], [0], [1], [0, 0, 1, 1], [], []>} : vector<2x64xbf16>, vector<64x64xbf16>, vector<2x64xf32> -> vector<2x64xf32>
      %566 = arith.addf %556, %565 : vector<2x64xf32>
      %c2_i32_562 = arith.constant 2 : i32
      %567 = arith.muli %c2_i32_562, %arg14 : i32
      %c1_i32_563 = arith.constant 1 : i32
      %568 = arith.addi %567, %c1_i32_563 : i32
      %c2_i32_564 = arith.constant 2 : i32
      %569 = arith.addi %568, %c2_i32_564 : i32
      %c1_565 = arith.constant 1 : index
      %570 = arith.index_cast %569 : i32 to index
      %c1_566 = arith.constant 1 : index
      %c0_567 = arith.constant 0 : index
      %571 = vector.load %arg11[%c1_565, %570, %c1_566, %c0_567] : memref<4x15x4x64xbf16, #tpu.memory_space<vmem>>, vector<1x1x2x64xbf16>
      %572 = vector.shape_cast %571 : vector<1x1x2x64xbf16> to vector<2x64xbf16>
      %c2_568 = arith.constant 2 : index
      %c0_569 = arith.constant 0 : index
      %c0_570 = arith.constant 0 : index
      %573 = vector.load %arg4[%c2_568, %c0_569, %c0_570] : memref<9x64x64xbf16, #tpu.memory_space<vmem>>, vector<1x64x64xbf16>
      %574 = vector.shape_cast %573 : vector<1x64x64xbf16> to vector<64x64xbf16>
      %cst_571 = arith.constant dense<0.000000e+00> : vector<2x64xf32>
      %575 = tpu.matmul %572, %574, %cst_571 {dimension_numbers = #tpu.dot_dimension_numbers<[1], [0], [0], [1], [0, 0, 1, 1], [], []>} : vector<2x64xbf16>, vector<64x64xbf16>, vector<2x64xf32> -> vector<2x64xf32>
      %576 = arith.addf %566, %575 : vector<2x64xf32>
      %c2_i32_572 = arith.constant 2 : i32
      %577 = arith.muli %c2_i32_572, %arg14 : i32
      %c1_i32_573 = arith.constant 1 : i32
      %578 = arith.addi %577, %c1_i32_573 : i32
      %c0_i32_574 = arith.constant 0 : i32
      %579 = arith.addi %578, %c0_i32_574 : i32
      %c2_575 = arith.constant 2 : index
      %580 = arith.index_cast %579 : i32 to index
      %c1_576 = arith.constant 1 : index
      %c0_577 = arith.constant 0 : index
      %581 = vector.load %arg11[%c2_575, %580, %c1_576, %c0_577] : memref<4x15x4x64xbf16, #tpu.memory_space<vmem>>, vector<1x1x2x64xbf16>
      %582 = vector.shape_cast %581 : vector<1x1x2x64xbf16> to vector<2x64xbf16>
      %c3_578 = arith.constant 3 : index
      %c0_579 = arith.constant 0 : index
      %c0_580 = arith.constant 0 : index
      %583 = vector.load %arg4[%c3_578, %c0_579, %c0_580] : memref<9x64x64xbf16, #tpu.memory_space<vmem>>, vector<1x64x64xbf16>
      %584 = vector.shape_cast %583 : vector<1x64x64xbf16> to vector<64x64xbf16>
      %cst_581 = arith.constant dense<0.000000e+00> : vector<2x64xf32>
      %585 = tpu.matmul %582, %584, %cst_581 {dimension_numbers = #tpu.dot_dimension_numbers<[1], [0], [0], [1], [0, 0, 1, 1], [], []>} : vector<2x64xbf16>, vector<64x64xbf16>, vector<2x64xf32> -> vector<2x64xf32>
      %586 = arith.addf %576, %585 : vector<2x64xf32>
      %c2_i32_582 = arith.constant 2 : i32
      %587 = arith.muli %c2_i32_582, %arg14 : i32
      %c1_i32_583 = arith.constant 1 : i32
      %588 = arith.addi %587, %c1_i32_583 : i32
      %c1_i32_584 = arith.constant 1 : i32
      %589 = arith.addi %588, %c1_i32_584 : i32
      %c2_585 = arith.constant 2 : index
      %590 = arith.index_cast %589 : i32 to index
      %c1_586 = arith.constant 1 : index
      %c0_587 = arith.constant 0 : index
      %591 = vector.load %arg11[%c2_585, %590, %c1_586, %c0_587] : memref<4x15x4x64xbf16, #tpu.memory_space<vmem>>, vector<1x1x2x64xbf16>
      %592 = vector.shape_cast %591 : vector<1x1x2x64xbf16> to vector<2x64xbf16>
      %c4_588 = arith.constant 4 : index
      %c0_589 = arith.constant 0 : index
      %c0_590 = arith.constant 0 : index
      %593 = vector.load %arg4[%c4_588, %c0_589, %c0_590] : memref<9x64x64xbf16, #tpu.memory_space<vmem>>, vector<1x64x64xbf16>
      %594 = vector.shape_cast %593 : vector<1x64x64xbf16> to vector<64x64xbf16>
      %cst_591 = arith.constant dense<0.000000e+00> : vector<2x64xf32>
      %595 = tpu.matmul %592, %594, %cst_591 {dimension_numbers = #tpu.dot_dimension_numbers<[1], [0], [0], [1], [0, 0, 1, 1], [], []>} : vector<2x64xbf16>, vector<64x64xbf16>, vector<2x64xf32> -> vector<2x64xf32>
      %596 = arith.addf %586, %595 : vector<2x64xf32>
      %c2_i32_592 = arith.constant 2 : i32
      %597 = arith.muli %c2_i32_592, %arg14 : i32
      %c1_i32_593 = arith.constant 1 : i32
      %598 = arith.addi %597, %c1_i32_593 : i32
      %c2_i32_594 = arith.constant 2 : i32
      %599 = arith.addi %598, %c2_i32_594 : i32
      %c2_595 = arith.constant 2 : index
      %600 = arith.index_cast %599 : i32 to index
      %c1_596 = arith.constant 1 : index
      %c0_597 = arith.constant 0 : index
      %601 = vector.load %arg11[%c2_595, %600, %c1_596, %c0_597] : memref<4x15x4x64xbf16, #tpu.memory_space<vmem>>, vector<1x1x2x64xbf16>
      %602 = vector.shape_cast %601 : vector<1x1x2x64xbf16> to vector<2x64xbf16>
      %c5_598 = arith.constant 5 : index
      %c0_599 = arith.constant 0 : index
      %c0_600 = arith.constant 0 : index
      %603 = vector.load %arg4[%c5_598, %c0_599, %c0_600] : memref<9x64x64xbf16, #tpu.memory_space<vmem>>, vector<1x64x64xbf16>
      %604 = vector.shape_cast %603 : vector<1x64x64xbf16> to vector<64x64xbf16>
      %cst_601 = arith.constant dense<0.000000e+00> : vector<2x64xf32>
      %605 = tpu.matmul %602, %604, %cst_601 {dimension_numbers = #tpu.dot_dimension_numbers<[1], [0], [0], [1], [0, 0, 1, 1], [], []>} : vector<2x64xbf16>, vector<64x64xbf16>, vector<2x64xf32> -> vector<2x64xf32>
      %606 = arith.addf %596, %605 : vector<2x64xf32>
      %c2_i32_602 = arith.constant 2 : i32
      %607 = arith.muli %c2_i32_602, %arg14 : i32
      %c1_i32_603 = arith.constant 1 : i32
      %608 = arith.addi %607, %c1_i32_603 : i32
      %c0_i32_604 = arith.constant 0 : i32
      %609 = arith.addi %608, %c0_i32_604 : i32
      %c3_605 = arith.constant 3 : index
      %610 = arith.index_cast %609 : i32 to index
      %c1_606 = arith.constant 1 : index
      %c0_607 = arith.constant 0 : index
      %611 = vector.load %arg11[%c3_605, %610, %c1_606, %c0_607] : memref<4x15x4x64xbf16, #tpu.memory_space<vmem>>, vector<1x1x2x64xbf16>
      %612 = vector.shape_cast %611 : vector<1x1x2x64xbf16> to vector<2x64xbf16>
      %c6_608 = arith.constant 6 : index
      %c0_609 = arith.constant 0 : index
      %c0_610 = arith.constant 0 : index
      %613 = vector.load %arg4[%c6_608, %c0_609, %c0_610] : memref<9x64x64xbf16, #tpu.memory_space<vmem>>, vector<1x64x64xbf16>
      %614 = vector.shape_cast %613 : vector<1x64x64xbf16> to vector<64x64xbf16>
      %cst_611 = arith.constant dense<0.000000e+00> : vector<2x64xf32>
      %615 = tpu.matmul %612, %614, %cst_611 {dimension_numbers = #tpu.dot_dimension_numbers<[1], [0], [0], [1], [0, 0, 1, 1], [], []>} : vector<2x64xbf16>, vector<64x64xbf16>, vector<2x64xf32> -> vector<2x64xf32>
      %616 = arith.addf %606, %615 : vector<2x64xf32>
      %c2_i32_612 = arith.constant 2 : i32
      %617 = arith.muli %c2_i32_612, %arg14 : i32
      %c1_i32_613 = arith.constant 1 : i32
      %618 = arith.addi %617, %c1_i32_613 : i32
      %c1_i32_614 = arith.constant 1 : i32
      %619 = arith.addi %618, %c1_i32_614 : i32
      %c3_615 = arith.constant 3 : index
      %620 = arith.index_cast %619 : i32 to index
      %c1_616 = arith.constant 1 : index
      %c0_617 = arith.constant 0 : index
      %621 = vector.load %arg11[%c3_615, %620, %c1_616, %c0_617] : memref<4x15x4x64xbf16, #tpu.memory_space<vmem>>, vector<1x1x2x64xbf16>
      %622 = vector.shape_cast %621 : vector<1x1x2x64xbf16> to vector<2x64xbf16>
      %c7_618 = arith.constant 7 : index
      %c0_619 = arith.constant 0 : index
      %c0_620 = arith.constant 0 : index
      %623 = vector.load %arg4[%c7_618, %c0_619, %c0_620] : memref<9x64x64xbf16, #tpu.memory_space<vmem>>, vector<1x64x64xbf16>
      %624 = vector.shape_cast %623 : vector<1x64x64xbf16> to vector<64x64xbf16>
      %cst_621 = arith.constant dense<0.000000e+00> : vector<2x64xf32>
      %625 = tpu.matmul %622, %624, %cst_621 {dimension_numbers = #tpu.dot_dimension_numbers<[1], [0], [0], [1], [0, 0, 1, 1], [], []>} : vector<2x64xbf16>, vector<64x64xbf16>, vector<2x64xf32> -> vector<2x64xf32>
      %626 = arith.addf %616, %625 : vector<2x64xf32>
      %c2_i32_622 = arith.constant 2 : i32
      %627 = arith.muli %c2_i32_622, %arg14 : i32
      %c1_i32_623 = arith.constant 1 : i32
      %628 = arith.addi %627, %c1_i32_623 : i32
      %c2_i32_624 = arith.constant 2 : i32
      %629 = arith.addi %628, %c2_i32_624 : i32
      %c3_625 = arith.constant 3 : index
      %630 = arith.index_cast %629 : i32 to index
      %c1_626 = arith.constant 1 : index
      %c0_627 = arith.constant 0 : index
      %631 = vector.load %arg11[%c3_625, %630, %c1_626, %c0_627] : memref<4x15x4x64xbf16, #tpu.memory_space<vmem>>, vector<1x1x2x64xbf16>
      %632 = vector.shape_cast %631 : vector<1x1x2x64xbf16> to vector<2x64xbf16>
      %c8_628 = arith.constant 8 : index
      %c0_629 = arith.constant 0 : index
      %c0_630 = arith.constant 0 : index
      %633 = vector.load %arg4[%c8_628, %c0_629, %c0_630] : memref<9x64x64xbf16, #tpu.memory_space<vmem>>, vector<1x64x64xbf16>
      %634 = vector.shape_cast %633 : vector<1x64x64xbf16> to vector<64x64xbf16>
      %cst_631 = arith.constant dense<0.000000e+00> : vector<2x64xf32>
      %635 = tpu.matmul %632, %634, %cst_631 {dimension_numbers = #tpu.dot_dimension_numbers<[1], [0], [0], [1], [0, 0, 1, 1], [], []>} : vector<2x64xbf16>, vector<64x64xbf16>, vector<2x64xf32> -> vector<2x64xf32>
      %636 = arith.addf %626, %635 : vector<2x64xf32>
      %637 = vector.broadcast %54 : vector<1x64xf32> to vector<2x64xf32>
      %638 = arith.addf %636, %637 : vector<2x64xf32>
      %cst_632 = arith.constant 0.000000e+00 : f32
      %639 = vector.broadcast %cst_632 : f32 to vector<2x64xf32>
      %640 = arith.maximumf %638, %639 : vector<2x64xf32>
      %641 = arith.maximumf %545, %640 : vector<2x64xf32>
      %cst_633 = arith.constant 0.000000e+00 : f32
      %642 = vector.broadcast %cst_633 : f32 to vector<2x64xf32>
      %c2_i32_634 = arith.constant 2 : i32
      %643 = arith.muli %c2_i32_634, %arg14 : i32
      %c0_i32_635 = arith.constant 0 : i32
      %644 = arith.addi %643, %c0_i32_635 : i32
      %c0_i32_636 = arith.constant 0 : i32
      %645 = arith.addi %644, %c0_i32_636 : i32
      %c2_637 = arith.constant 2 : index
      %646 = arith.index_cast %645 : i32 to index
      %c1_638 = arith.constant 1 : index
      %c0_639 = arith.constant 0 : index
      %647 = vector.load %arg11[%c2_637, %646, %c1_638, %c0_639] : memref<4x15x4x64xbf16, #tpu.memory_space<vmem>>, vector<1x1x2x64xbf16>
      %648 = vector.shape_cast %647 : vector<1x1x2x64xbf16> to vector<2x64xbf16>
      %c0_640 = arith.constant 0 : index
      %c0_641 = arith.constant 0 : index
      %c0_642 = arith.constant 0 : index
      %649 = vector.load %arg4[%c0_640, %c0_641, %c0_642] : memref<9x64x64xbf16, #tpu.memory_space<vmem>>, vector<1x64x64xbf16>
      %650 = vector.shape_cast %649 : vector<1x64x64xbf16> to vector<64x64xbf16>
      %cst_643 = arith.constant dense<0.000000e+00> : vector<2x64xf32>
      %651 = tpu.matmul %648, %650, %cst_643 {dimension_numbers = #tpu.dot_dimension_numbers<[1], [0], [0], [1], [0, 0, 1, 1], [], []>} : vector<2x64xbf16>, vector<64x64xbf16>, vector<2x64xf32> -> vector<2x64xf32>
      %652 = arith.addf %642, %651 : vector<2x64xf32>
      %c2_i32_644 = arith.constant 2 : i32
      %653 = arith.muli %c2_i32_644, %arg14 : i32
      %c0_i32_645 = arith.constant 0 : i32
      %654 = arith.addi %653, %c0_i32_645 : i32
      %c1_i32_646 = arith.constant 1 : i32
      %655 = arith.addi %654, %c1_i32_646 : i32
      %c2_647 = arith.constant 2 : index
      %656 = arith.index_cast %655 : i32 to index
      %c1_648 = arith.constant 1 : index
      %c0_649 = arith.constant 0 : index
      %657 = vector.load %arg11[%c2_647, %656, %c1_648, %c0_649] : memref<4x15x4x64xbf16, #tpu.memory_space<vmem>>, vector<1x1x2x64xbf16>
      %658 = vector.shape_cast %657 : vector<1x1x2x64xbf16> to vector<2x64xbf16>
      %c1_650 = arith.constant 1 : index
      %c0_651 = arith.constant 0 : index
      %c0_652 = arith.constant 0 : index
      %659 = vector.load %arg4[%c1_650, %c0_651, %c0_652] : memref<9x64x64xbf16, #tpu.memory_space<vmem>>, vector<1x64x64xbf16>
      %660 = vector.shape_cast %659 : vector<1x64x64xbf16> to vector<64x64xbf16>
      %cst_653 = arith.constant dense<0.000000e+00> : vector<2x64xf32>
      %661 = tpu.matmul %658, %660, %cst_653 {dimension_numbers = #tpu.dot_dimension_numbers<[1], [0], [0], [1], [0, 0, 1, 1], [], []>} : vector<2x64xbf16>, vector<64x64xbf16>, vector<2x64xf32> -> vector<2x64xf32>
      %662 = arith.addf %652, %661 : vector<2x64xf32>
      %c2_i32_654 = arith.constant 2 : i32
      %663 = arith.muli %c2_i32_654, %arg14 : i32
      %c0_i32_655 = arith.constant 0 : i32
      %664 = arith.addi %663, %c0_i32_655 : i32
      %c2_i32_656 = arith.constant 2 : i32
      %665 = arith.addi %664, %c2_i32_656 : i32
      %c2_657 = arith.constant 2 : index
      %666 = arith.index_cast %665 : i32 to index
      %c1_658 = arith.constant 1 : index
      %c0_659 = arith.constant 0 : index
      %667 = vector.load %arg11[%c2_657, %666, %c1_658, %c0_659] : memref<4x15x4x64xbf16, #tpu.memory_space<vmem>>, vector<1x1x2x64xbf16>
      %668 = vector.shape_cast %667 : vector<1x1x2x64xbf16> to vector<2x64xbf16>
      %c2_660 = arith.constant 2 : index
      %c0_661 = arith.constant 0 : index
      %c0_662 = arith.constant 0 : index
      %669 = vector.load %arg4[%c2_660, %c0_661, %c0_662] : memref<9x64x64xbf16, #tpu.memory_space<vmem>>, vector<1x64x64xbf16>
      %670 = vector.shape_cast %669 : vector<1x64x64xbf16> to vector<64x64xbf16>
      %cst_663 = arith.constant dense<0.000000e+00> : vector<2x64xf32>
      %671 = tpu.matmul %668, %670, %cst_663 {dimension_numbers = #tpu.dot_dimension_numbers<[1], [0], [0], [1], [0, 0, 1, 1], [], []>} : vector<2x64xbf16>, vector<64x64xbf16>, vector<2x64xf32> -> vector<2x64xf32>
      %672 = arith.addf %662, %671 : vector<2x64xf32>
      %c2_i32_664 = arith.constant 2 : i32
      %673 = arith.muli %c2_i32_664, %arg14 : i32
      %c0_i32_665 = arith.constant 0 : i32
      %674 = arith.addi %673, %c0_i32_665 : i32
      %c0_i32_666 = arith.constant 0 : i32
      %675 = arith.addi %674, %c0_i32_666 : i32
      %c3_667 = arith.constant 3 : index
      %676 = arith.index_cast %675 : i32 to index
      %c1_668 = arith.constant 1 : index
      %c0_669 = arith.constant 0 : index
      %677 = vector.load %arg11[%c3_667, %676, %c1_668, %c0_669] : memref<4x15x4x64xbf16, #tpu.memory_space<vmem>>, vector<1x1x2x64xbf16>
      %678 = vector.shape_cast %677 : vector<1x1x2x64xbf16> to vector<2x64xbf16>
      %c3_670 = arith.constant 3 : index
      %c0_671 = arith.constant 0 : index
      %c0_672 = arith.constant 0 : index
      %679 = vector.load %arg4[%c3_670, %c0_671, %c0_672] : memref<9x64x64xbf16, #tpu.memory_space<vmem>>, vector<1x64x64xbf16>
      %680 = vector.shape_cast %679 : vector<1x64x64xbf16> to vector<64x64xbf16>
      %cst_673 = arith.constant dense<0.000000e+00> : vector<2x64xf32>
      %681 = tpu.matmul %678, %680, %cst_673 {dimension_numbers = #tpu.dot_dimension_numbers<[1], [0], [0], [1], [0, 0, 1, 1], [], []>} : vector<2x64xbf16>, vector<64x64xbf16>, vector<2x64xf32> -> vector<2x64xf32>
      %682 = arith.addf %672, %681 : vector<2x64xf32>
      %c2_i32_674 = arith.constant 2 : i32
      %683 = arith.muli %c2_i32_674, %arg14 : i32
      %c0_i32_675 = arith.constant 0 : i32
      %684 = arith.addi %683, %c0_i32_675 : i32
      %c1_i32_676 = arith.constant 1 : i32
      %685 = arith.addi %684, %c1_i32_676 : i32
      %c3_677 = arith.constant 3 : index
      %686 = arith.index_cast %685 : i32 to index
      %c1_678 = arith.constant 1 : index
      %c0_679 = arith.constant 0 : index
      %687 = vector.load %arg11[%c3_677, %686, %c1_678, %c0_679] : memref<4x15x4x64xbf16, #tpu.memory_space<vmem>>, vector<1x1x2x64xbf16>
      %688 = vector.shape_cast %687 : vector<1x1x2x64xbf16> to vector<2x64xbf16>
      %c4_680 = arith.constant 4 : index
      %c0_681 = arith.constant 0 : index
      %c0_682 = arith.constant 0 : index
      %689 = vector.load %arg4[%c4_680, %c0_681, %c0_682] : memref<9x64x64xbf16, #tpu.memory_space<vmem>>, vector<1x64x64xbf16>
      %690 = vector.shape_cast %689 : vector<1x64x64xbf16> to vector<64x64xbf16>
      %cst_683 = arith.constant dense<0.000000e+00> : vector<2x64xf32>
      %691 = tpu.matmul %688, %690, %cst_683 {dimension_numbers = #tpu.dot_dimension_numbers<[1], [0], [0], [1], [0, 0, 1, 1], [], []>} : vector<2x64xbf16>, vector<64x64xbf16>, vector<2x64xf32> -> vector<2x64xf32>
      %692 = arith.addf %682, %691 : vector<2x64xf32>
      %c2_i32_684 = arith.constant 2 : i32
      %693 = arith.muli %c2_i32_684, %arg14 : i32
      %c0_i32_685 = arith.constant 0 : i32
      %694 = arith.addi %693, %c0_i32_685 : i32
      %c2_i32_686 = arith.constant 2 : i32
      %695 = arith.addi %694, %c2_i32_686 : i32
      %c3_687 = arith.constant 3 : index
      %696 = arith.index_cast %695 : i32 to index
      %c1_688 = arith.constant 1 : index
      %c0_689 = arith.constant 0 : index
      %697 = vector.load %arg11[%c3_687, %696, %c1_688, %c0_689] : memref<4x15x4x64xbf16, #tpu.memory_space<vmem>>, vector<1x1x2x64xbf16>
      %698 = vector.shape_cast %697 : vector<1x1x2x64xbf16> to vector<2x64xbf16>
      %c5_690 = arith.constant 5 : index
      %c0_691 = arith.constant 0 : index
      %c0_692 = arith.constant 0 : index
      %699 = vector.load %arg4[%c5_690, %c0_691, %c0_692] : memref<9x64x64xbf16, #tpu.memory_space<vmem>>, vector<1x64x64xbf16>
      %700 = vector.shape_cast %699 : vector<1x64x64xbf16> to vector<64x64xbf16>
      %cst_693 = arith.constant dense<0.000000e+00> : vector<2x64xf32>
      %701 = tpu.matmul %698, %700, %cst_693 {dimension_numbers = #tpu.dot_dimension_numbers<[1], [0], [0], [1], [0, 0, 1, 1], [], []>} : vector<2x64xbf16>, vector<64x64xbf16>, vector<2x64xf32> -> vector<2x64xf32>
      %702 = arith.addf %692, %701 : vector<2x64xf32>
      %c2_i32_694 = arith.constant 2 : i32
      %703 = arith.muli %c2_i32_694, %arg14 : i32
      %c0_i32_695 = arith.constant 0 : i32
      %704 = arith.addi %703, %c0_i32_695 : i32
      %c0_i32_696 = arith.constant 0 : i32
      %705 = arith.addi %704, %c0_i32_696 : i32
      %c0_697 = arith.constant 0 : index
      %706 = arith.index_cast %705 : i32 to index
      %c2_698 = arith.constant 2 : index
      %c0_699 = arith.constant 0 : index
      %707 = vector.load %arg11[%c0_697, %706, %c2_698, %c0_699] : memref<4x15x4x64xbf16, #tpu.memory_space<vmem>>, vector<1x1x2x64xbf16>
      %708 = vector.shape_cast %707 : vector<1x1x2x64xbf16> to vector<2x64xbf16>
      %c6_700 = arith.constant 6 : index
      %c0_701 = arith.constant 0 : index
      %c0_702 = arith.constant 0 : index
      %709 = vector.load %arg4[%c6_700, %c0_701, %c0_702] : memref<9x64x64xbf16, #tpu.memory_space<vmem>>, vector<1x64x64xbf16>
      %710 = vector.shape_cast %709 : vector<1x64x64xbf16> to vector<64x64xbf16>
      %cst_703 = arith.constant dense<0.000000e+00> : vector<2x64xf32>
      %711 = tpu.matmul %708, %710, %cst_703 {dimension_numbers = #tpu.dot_dimension_numbers<[1], [0], [0], [1], [0, 0, 1, 1], [], []>} : vector<2x64xbf16>, vector<64x64xbf16>, vector<2x64xf32> -> vector<2x64xf32>
      %712 = arith.addf %702, %711 : vector<2x64xf32>
      %c2_i32_704 = arith.constant 2 : i32
      %713 = arith.muli %c2_i32_704, %arg14 : i32
      %c0_i32_705 = arith.constant 0 : i32
      %714 = arith.addi %713, %c0_i32_705 : i32
      %c1_i32_706 = arith.constant 1 : i32
      %715 = arith.addi %714, %c1_i32_706 : i32
      %c0_707 = arith.constant 0 : index
      %716 = arith.index_cast %715 : i32 to index
      %c2_708 = arith.constant 2 : index
      %c0_709 = arith.constant 0 : index
      %717 = vector.load %arg11[%c0_707, %716, %c2_708, %c0_709] : memref<4x15x4x64xbf16, #tpu.memory_space<vmem>>, vector<1x1x2x64xbf16>
      %718 = vector.shape_cast %717 : vector<1x1x2x64xbf16> to vector<2x64xbf16>
      %c7_710 = arith.constant 7 : index
      %c0_711 = arith.constant 0 : index
      %c0_712 = arith.constant 0 : index
      %719 = vector.load %arg4[%c7_710, %c0_711, %c0_712] : memref<9x64x64xbf16, #tpu.memory_space<vmem>>, vector<1x64x64xbf16>
      %720 = vector.shape_cast %719 : vector<1x64x64xbf16> to vector<64x64xbf16>
      %cst_713 = arith.constant dense<0.000000e+00> : vector<2x64xf32>
      %721 = tpu.matmul %718, %720, %cst_713 {dimension_numbers = #tpu.dot_dimension_numbers<[1], [0], [0], [1], [0, 0, 1, 1], [], []>} : vector<2x64xbf16>, vector<64x64xbf16>, vector<2x64xf32> -> vector<2x64xf32>
      %722 = arith.addf %712, %721 : vector<2x64xf32>
      %c2_i32_714 = arith.constant 2 : i32
      %723 = arith.muli %c2_i32_714, %arg14 : i32
      %c0_i32_715 = arith.constant 0 : i32
      %724 = arith.addi %723, %c0_i32_715 : i32
      %c2_i32_716 = arith.constant 2 : i32
      %725 = arith.addi %724, %c2_i32_716 : i32
      %c0_717 = arith.constant 0 : index
      %726 = arith.index_cast %725 : i32 to index
      %c2_718 = arith.constant 2 : index
      %c0_719 = arith.constant 0 : index
      %727 = vector.load %arg11[%c0_717, %726, %c2_718, %c0_719] : memref<4x15x4x64xbf16, #tpu.memory_space<vmem>>, vector<1x1x2x64xbf16>
      %728 = vector.shape_cast %727 : vector<1x1x2x64xbf16> to vector<2x64xbf16>
      %c8_720 = arith.constant 8 : index
      %c0_721 = arith.constant 0 : index
      %c0_722 = arith.constant 0 : index
      %729 = vector.load %arg4[%c8_720, %c0_721, %c0_722] : memref<9x64x64xbf16, #tpu.memory_space<vmem>>, vector<1x64x64xbf16>
      %730 = vector.shape_cast %729 : vector<1x64x64xbf16> to vector<64x64xbf16>
      %cst_723 = arith.constant dense<0.000000e+00> : vector<2x64xf32>
      %731 = tpu.matmul %728, %730, %cst_723 {dimension_numbers = #tpu.dot_dimension_numbers<[1], [0], [0], [1], [0, 0, 1, 1], [], []>} : vector<2x64xbf16>, vector<64x64xbf16>, vector<2x64xf32> -> vector<2x64xf32>
      %732 = arith.addf %722, %731 : vector<2x64xf32>
      %733 = vector.broadcast %54 : vector<1x64xf32> to vector<2x64xf32>
      %734 = arith.addf %732, %733 : vector<2x64xf32>
      %cst_724 = arith.constant 0.000000e+00 : f32
      %735 = vector.broadcast %cst_724 : f32 to vector<2x64xf32>
      %736 = arith.maximumf %734, %735 : vector<2x64xf32>
      %737 = arith.maximumf %641, %736 : vector<2x64xf32>
      %cst_725 = arith.constant 0.000000e+00 : f32
      %738 = vector.broadcast %cst_725 : f32 to vector<2x64xf32>
      %c2_i32_726 = arith.constant 2 : i32
      %739 = arith.muli %c2_i32_726, %arg14 : i32
      %c1_i32_727 = arith.constant 1 : i32
      %740 = arith.addi %739, %c1_i32_727 : i32
      %c0_i32_728 = arith.constant 0 : i32
      %741 = arith.addi %740, %c0_i32_728 : i32
      %c2_729 = arith.constant 2 : index
      %742 = arith.index_cast %741 : i32 to index
      %c1_730 = arith.constant 1 : index
      %c0_731 = arith.constant 0 : index
      %743 = vector.load %arg11[%c2_729, %742, %c1_730, %c0_731] : memref<4x15x4x64xbf16, #tpu.memory_space<vmem>>, vector<1x1x2x64xbf16>
      %744 = vector.shape_cast %743 : vector<1x1x2x64xbf16> to vector<2x64xbf16>
      %c0_732 = arith.constant 0 : index
      %c0_733 = arith.constant 0 : index
      %c0_734 = arith.constant 0 : index
      %745 = vector.load %arg4[%c0_732, %c0_733, %c0_734] : memref<9x64x64xbf16, #tpu.memory_space<vmem>>, vector<1x64x64xbf16>
      %746 = vector.shape_cast %745 : vector<1x64x64xbf16> to vector<64x64xbf16>
      %cst_735 = arith.constant dense<0.000000e+00> : vector<2x64xf32>
      %747 = tpu.matmul %744, %746, %cst_735 {dimension_numbers = #tpu.dot_dimension_numbers<[1], [0], [0], [1], [0, 0, 1, 1], [], []>} : vector<2x64xbf16>, vector<64x64xbf16>, vector<2x64xf32> -> vector<2x64xf32>
      %748 = arith.addf %738, %747 : vector<2x64xf32>
      %c2_i32_736 = arith.constant 2 : i32
      %749 = arith.muli %c2_i32_736, %arg14 : i32
      %c1_i32_737 = arith.constant 1 : i32
      %750 = arith.addi %749, %c1_i32_737 : i32
      %c1_i32_738 = arith.constant 1 : i32
      %751 = arith.addi %750, %c1_i32_738 : i32
      %c2_739 = arith.constant 2 : index
      %752 = arith.index_cast %751 : i32 to index
      %c1_740 = arith.constant 1 : index
      %c0_741 = arith.constant 0 : index
      %753 = vector.load %arg11[%c2_739, %752, %c1_740, %c0_741] : memref<4x15x4x64xbf16, #tpu.memory_space<vmem>>, vector<1x1x2x64xbf16>
      %754 = vector.shape_cast %753 : vector<1x1x2x64xbf16> to vector<2x64xbf16>
      %c1_742 = arith.constant 1 : index
      %c0_743 = arith.constant 0 : index
      %c0_744 = arith.constant 0 : index
      %755 = vector.load %arg4[%c1_742, %c0_743, %c0_744] : memref<9x64x64xbf16, #tpu.memory_space<vmem>>, vector<1x64x64xbf16>
      %756 = vector.shape_cast %755 : vector<1x64x64xbf16> to vector<64x64xbf16>
      %cst_745 = arith.constant dense<0.000000e+00> : vector<2x64xf32>
      %757 = tpu.matmul %754, %756, %cst_745 {dimension_numbers = #tpu.dot_dimension_numbers<[1], [0], [0], [1], [0, 0, 1, 1], [], []>} : vector<2x64xbf16>, vector<64x64xbf16>, vector<2x64xf32> -> vector<2x64xf32>
      %758 = arith.addf %748, %757 : vector<2x64xf32>
      %c2_i32_746 = arith.constant 2 : i32
      %759 = arith.muli %c2_i32_746, %arg14 : i32
      %c1_i32_747 = arith.constant 1 : i32
      %760 = arith.addi %759, %c1_i32_747 : i32
      %c2_i32_748 = arith.constant 2 : i32
      %761 = arith.addi %760, %c2_i32_748 : i32
      %c2_749 = arith.constant 2 : index
      %762 = arith.index_cast %761 : i32 to index
      %c1_750 = arith.constant 1 : index
      %c0_751 = arith.constant 0 : index
      %763 = vector.load %arg11[%c2_749, %762, %c1_750, %c0_751] : memref<4x15x4x64xbf16, #tpu.memory_space<vmem>>, vector<1x1x2x64xbf16>
      %764 = vector.shape_cast %763 : vector<1x1x2x64xbf16> to vector<2x64xbf16>
      %c2_752 = arith.constant 2 : index
      %c0_753 = arith.constant 0 : index
      %c0_754 = arith.constant 0 : index
      %765 = vector.load %arg4[%c2_752, %c0_753, %c0_754] : memref<9x64x64xbf16, #tpu.memory_space<vmem>>, vector<1x64x64xbf16>
      %766 = vector.shape_cast %765 : vector<1x64x64xbf16> to vector<64x64xbf16>
      %cst_755 = arith.constant dense<0.000000e+00> : vector<2x64xf32>
      %767 = tpu.matmul %764, %766, %cst_755 {dimension_numbers = #tpu.dot_dimension_numbers<[1], [0], [0], [1], [0, 0, 1, 1], [], []>} : vector<2x64xbf16>, vector<64x64xbf16>, vector<2x64xf32> -> vector<2x64xf32>
      %768 = arith.addf %758, %767 : vector<2x64xf32>
      %c2_i32_756 = arith.constant 2 : i32
      %769 = arith.muli %c2_i32_756, %arg14 : i32
      %c1_i32_757 = arith.constant 1 : i32
      %770 = arith.addi %769, %c1_i32_757 : i32
      %c0_i32_758 = arith.constant 0 : i32
      %771 = arith.addi %770, %c0_i32_758 : i32
      %c3_759 = arith.constant 3 : index
      %772 = arith.index_cast %771 : i32 to index
      %c1_760 = arith.constant 1 : index
      %c0_761 = arith.constant 0 : index
      %773 = vector.load %arg11[%c3_759, %772, %c1_760, %c0_761] : memref<4x15x4x64xbf16, #tpu.memory_space<vmem>>, vector<1x1x2x64xbf16>
      %774 = vector.shape_cast %773 : vector<1x1x2x64xbf16> to vector<2x64xbf16>
      %c3_762 = arith.constant 3 : index
      %c0_763 = arith.constant 0 : index
      %c0_764 = arith.constant 0 : index
      %775 = vector.load %arg4[%c3_762, %c0_763, %c0_764] : memref<9x64x64xbf16, #tpu.memory_space<vmem>>, vector<1x64x64xbf16>
      %776 = vector.shape_cast %775 : vector<1x64x64xbf16> to vector<64x64xbf16>
      %cst_765 = arith.constant dense<0.000000e+00> : vector<2x64xf32>
      %777 = tpu.matmul %774, %776, %cst_765 {dimension_numbers = #tpu.dot_dimension_numbers<[1], [0], [0], [1], [0, 0, 1, 1], [], []>} : vector<2x64xbf16>, vector<64x64xbf16>, vector<2x64xf32> -> vector<2x64xf32>
      %778 = arith.addf %768, %777 : vector<2x64xf32>
      %c2_i32_766 = arith.constant 2 : i32
      %779 = arith.muli %c2_i32_766, %arg14 : i32
      %c1_i32_767 = arith.constant 1 : i32
      %780 = arith.addi %779, %c1_i32_767 : i32
      %c1_i32_768 = arith.constant 1 : i32
      %781 = arith.addi %780, %c1_i32_768 : i32
      %c3_769 = arith.constant 3 : index
      %782 = arith.index_cast %781 : i32 to index
      %c1_770 = arith.constant 1 : index
      %c0_771 = arith.constant 0 : index
      %783 = vector.load %arg11[%c3_769, %782, %c1_770, %c0_771] : memref<4x15x4x64xbf16, #tpu.memory_space<vmem>>, vector<1x1x2x64xbf16>
      %784 = vector.shape_cast %783 : vector<1x1x2x64xbf16> to vector<2x64xbf16>
      %c4_772 = arith.constant 4 : index
      %c0_773 = arith.constant 0 : index
      %c0_774 = arith.constant 0 : index
      %785 = vector.load %arg4[%c4_772, %c0_773, %c0_774] : memref<9x64x64xbf16, #tpu.memory_space<vmem>>, vector<1x64x64xbf16>
      %786 = vector.shape_cast %785 : vector<1x64x64xbf16> to vector<64x64xbf16>
      %cst_775 = arith.constant dense<0.000000e+00> : vector<2x64xf32>
      %787 = tpu.matmul %784, %786, %cst_775 {dimension_numbers = #tpu.dot_dimension_numbers<[1], [0], [0], [1], [0, 0, 1, 1], [], []>} : vector<2x64xbf16>, vector<64x64xbf16>, vector<2x64xf32> -> vector<2x64xf32>
      %788 = arith.addf %778, %787 : vector<2x64xf32>
      %c2_i32_776 = arith.constant 2 : i32
      %789 = arith.muli %c2_i32_776, %arg14 : i32
      %c1_i32_777 = arith.constant 1 : i32
      %790 = arith.addi %789, %c1_i32_777 : i32
      %c2_i32_778 = arith.constant 2 : i32
      %791 = arith.addi %790, %c2_i32_778 : i32
      %c3_779 = arith.constant 3 : index
      %792 = arith.index_cast %791 : i32 to index
      %c1_780 = arith.constant 1 : index
      %c0_781 = arith.constant 0 : index
      %793 = vector.load %arg11[%c3_779, %792, %c1_780, %c0_781] : memref<4x15x4x64xbf16, #tpu.memory_space<vmem>>, vector<1x1x2x64xbf16>
      %794 = vector.shape_cast %793 : vector<1x1x2x64xbf16> to vector<2x64xbf16>
      %c5_782 = arith.constant 5 : index
      %c0_783 = arith.constant 0 : index
      %c0_784 = arith.constant 0 : index
      %795 = vector.load %arg4[%c5_782, %c0_783, %c0_784] : memref<9x64x64xbf16, #tpu.memory_space<vmem>>, vector<1x64x64xbf16>
      %796 = vector.shape_cast %795 : vector<1x64x64xbf16> to vector<64x64xbf16>
      %cst_785 = arith.constant dense<0.000000e+00> : vector<2x64xf32>
      %797 = tpu.matmul %794, %796, %cst_785 {dimension_numbers = #tpu.dot_dimension_numbers<[1], [0], [0], [1], [0, 0, 1, 1], [], []>} : vector<2x64xbf16>, vector<64x64xbf16>, vector<2x64xf32> -> vector<2x64xf32>
      %798 = arith.addf %788, %797 : vector<2x64xf32>
      %c2_i32_786 = arith.constant 2 : i32
      %799 = arith.muli %c2_i32_786, %arg14 : i32
      %c1_i32_787 = arith.constant 1 : i32
      %800 = arith.addi %799, %c1_i32_787 : i32
      %c0_i32_788 = arith.constant 0 : i32
      %801 = arith.addi %800, %c0_i32_788 : i32
      %c0_789 = arith.constant 0 : index
      %802 = arith.index_cast %801 : i32 to index
      %c2_790 = arith.constant 2 : index
      %c0_791 = arith.constant 0 : index
      %803 = vector.load %arg11[%c0_789, %802, %c2_790, %c0_791] : memref<4x15x4x64xbf16, #tpu.memory_space<vmem>>, vector<1x1x2x64xbf16>
      %804 = vector.shape_cast %803 : vector<1x1x2x64xbf16> to vector<2x64xbf16>
      %c6_792 = arith.constant 6 : index
      %c0_793 = arith.constant 0 : index
      %c0_794 = arith.constant 0 : index
      %805 = vector.load %arg4[%c6_792, %c0_793, %c0_794] : memref<9x64x64xbf16, #tpu.memory_space<vmem>>, vector<1x64x64xbf16>
      %806 = vector.shape_cast %805 : vector<1x64x64xbf16> to vector<64x64xbf16>
      %cst_795 = arith.constant dense<0.000000e+00> : vector<2x64xf32>
      %807 = tpu.matmul %804, %806, %cst_795 {dimension_numbers = #tpu.dot_dimension_numbers<[1], [0], [0], [1], [0, 0, 1, 1], [], []>} : vector<2x64xbf16>, vector<64x64xbf16>, vector<2x64xf32> -> vector<2x64xf32>
      %808 = arith.addf %798, %807 : vector<2x64xf32>
      %c2_i32_796 = arith.constant 2 : i32
      %809 = arith.muli %c2_i32_796, %arg14 : i32
      %c1_i32_797 = arith.constant 1 : i32
      %810 = arith.addi %809, %c1_i32_797 : i32
      %c1_i32_798 = arith.constant 1 : i32
      %811 = arith.addi %810, %c1_i32_798 : i32
      %c0_799 = arith.constant 0 : index
      %812 = arith.index_cast %811 : i32 to index
      %c2_800 = arith.constant 2 : index
      %c0_801 = arith.constant 0 : index
      %813 = vector.load %arg11[%c0_799, %812, %c2_800, %c0_801] : memref<4x15x4x64xbf16, #tpu.memory_space<vmem>>, vector<1x1x2x64xbf16>
      %814 = vector.shape_cast %813 : vector<1x1x2x64xbf16> to vector<2x64xbf16>
      %c7_802 = arith.constant 7 : index
      %c0_803 = arith.constant 0 : index
      %c0_804 = arith.constant 0 : index
      %815 = vector.load %arg4[%c7_802, %c0_803, %c0_804] : memref<9x64x64xbf16, #tpu.memory_space<vmem>>, vector<1x64x64xbf16>
      %816 = vector.shape_cast %815 : vector<1x64x64xbf16> to vector<64x64xbf16>
      %cst_805 = arith.constant dense<0.000000e+00> : vector<2x64xf32>
      %817 = tpu.matmul %814, %816, %cst_805 {dimension_numbers = #tpu.dot_dimension_numbers<[1], [0], [0], [1], [0, 0, 1, 1], [], []>} : vector<2x64xbf16>, vector<64x64xbf16>, vector<2x64xf32> -> vector<2x64xf32>
      %818 = arith.addf %808, %817 : vector<2x64xf32>
      %c2_i32_806 = arith.constant 2 : i32
      %819 = arith.muli %c2_i32_806, %arg14 : i32
      %c1_i32_807 = arith.constant 1 : i32
      %820 = arith.addi %819, %c1_i32_807 : i32
      %c2_i32_808 = arith.constant 2 : i32
      %821 = arith.addi %820, %c2_i32_808 : i32
      %c0_809 = arith.constant 0 : index
      %822 = arith.index_cast %821 : i32 to index
      %c2_810 = arith.constant 2 : index
      %c0_811 = arith.constant 0 : index
      %823 = vector.load %arg11[%c0_809, %822, %c2_810, %c0_811] : memref<4x15x4x64xbf16, #tpu.memory_space<vmem>>, vector<1x1x2x64xbf16>
      %824 = vector.shape_cast %823 : vector<1x1x2x64xbf16> to vector<2x64xbf16>
      %c8_812 = arith.constant 8 : index
      %c0_813 = arith.constant 0 : index
      %c0_814 = arith.constant 0 : index
      %825 = vector.load %arg4[%c8_812, %c0_813, %c0_814] : memref<9x64x64xbf16, #tpu.memory_space<vmem>>, vector<1x64x64xbf16>
      %826 = vector.shape_cast %825 : vector<1x64x64xbf16> to vector<64x64xbf16>
      %cst_815 = arith.constant dense<0.000000e+00> : vector<2x64xf32>
      %827 = tpu.matmul %824, %826, %cst_815 {dimension_numbers = #tpu.dot_dimension_numbers<[1], [0], [0], [1], [0, 0, 1, 1], [], []>} : vector<2x64xbf16>, vector<64x64xbf16>, vector<2x64xf32> -> vector<2x64xf32>
      %828 = arith.addf %818, %827 : vector<2x64xf32>
      %829 = vector.broadcast %54 : vector<1x64xf32> to vector<2x64xf32>
      %830 = arith.addf %828, %829 : vector<2x64xf32>
      %cst_816 = arith.constant 0.000000e+00 : f32
      %831 = vector.broadcast %cst_816 : f32 to vector<2x64xf32>
      %832 = arith.maximumf %830, %831 : vector<2x64xf32>
      %833 = arith.maximumf %737, %832 : vector<2x64xf32>
      %cst_817 = arith.constant 0.000000e+00 : f32
      %834 = vector.broadcast %cst_817 : f32 to vector<1x64xf32>
      %835 = tpu.concatenate %834, %833, %834 in 0 : vector<1x64xf32>, vector<2x64xf32>, vector<1x64xf32> -> vector<4x64xf32>
      %836 = arith.truncf %835 : vector<4x64xf32> to vector<4x64xbf16>
      %c1_i32_818 = arith.constant 1 : i32
      %837 = arith.addi %c1_i32_818, %arg14 : i32
      %c1_819 = arith.constant 1 : index
      %838 = arith.index_cast %837 : i32 to index
      %c0_820 = arith.constant 0 : index
      %c0_821 = arith.constant 0 : index
      %839 = vector.load %arg12[%c1_819, %838, %c0_820, %c0_821] : memref<2x8x4x64xbf16, #tpu.memory_space<vmem>>, vector<1x1x4x64xbf16>
      %840 = vector.shape_cast %839 : vector<1x1x4x64xbf16> to vector<4x64xbf16>
      %841 = vector.shape_cast %836 : vector<4x64xbf16> to vector<1x1x4x64xbf16>
      tpu.vector_store %arg12[%c1_819, %838, %c0_820, %c0_821], %841 {strides = array<i32>} : memref<2x8x4x64xbf16, #tpu.memory_space<vmem>>, vector<1x1x4x64xbf16>,
    }
    %c6_i32_69 = arith.constant 6 : i32
    %c0_70 = arith.constant 0 : index
    %c0_71 = arith.constant 0 : index
    %56 = vector.load %arg7[%c0_70, %c0_71] : memref<1x128xf32, #tpu.memory_space<vmem>>, vector<1x128xf32>
    %c0_i32_72 = arith.constant 0 : i32
    %c6_i32_73 = arith.constant 6 : i32
    %57 = arith.addi %c0_i32_72, %c6_i32_73 : i32
    %c1_i32_74 = arith.constant 1 : i32
    scf.for %arg14 = %c0_i32_72 to %57 step %c1_i32_74  : i32 {
      %cst_81 = arith.constant 0.000000e+00 : f32
      %60 = vector.broadcast %cst_81 : f32 to vector<2x128xf32>
      %c0_i32_82 = arith.constant 0 : i32
      %61 = arith.addi %arg14, %c0_i32_82 : i32
      %c1_83 = arith.constant 1 : index
      %62 = arith.index_cast %61 : i32 to index
      %c0_84 = arith.constant 0 : index
      %c0_85 = arith.constant 0 : index
      %63 = vector.load %arg12[%c1_83, %62, %c0_84, %c0_85] : memref<2x8x4x64xbf16, #tpu.memory_space<vmem>>, vector<1x1x2x64xbf16>
      %64 = vector.shape_cast %63 : vector<1x1x2x64xbf16> to vector<2x64xbf16>
      %c0_86 = arith.constant 0 : index
      %c0_87 = arith.constant 0 : index
      %c0_88 = arith.constant 0 : index
      %65 = vector.load %arg6[%c0_86, %c0_87, %c0_88] : memref<9x64x128xbf16, #tpu.memory_space<vmem>>, vector<1x64x128xbf16>
      %66 = vector.shape_cast %65 : vector<1x64x128xbf16> to vector<64x128xbf16>
      %cst_89 = arith.constant dense<0.000000e+00> : vector<2x128xf32>
      %67 = tpu.matmul %64, %66, %cst_89 {dimension_numbers = #tpu.dot_dimension_numbers<[1], [0], [0], [1], [0, 0, 1, 1], [], []>} : vector<2x64xbf16>, vector<64x128xbf16>, vector<2x128xf32> -> vector<2x128xf32>
      %68 = arith.addf %60, %67 : vector<2x128xf32>
      %c1_i32_90 = arith.constant 1 : i32
      %69 = arith.addi %arg14, %c1_i32_90 : i32
      %c1_91 = arith.constant 1 : index
      %70 = arith.index_cast %69 : i32 to index
      %c0_92 = arith.constant 0 : index
      %c0_93 = arith.constant 0 : index
      %71 = vector.load %arg12[%c1_91, %70, %c0_92, %c0_93] : memref<2x8x4x64xbf16, #tpu.memory_space<vmem>>, vector<1x1x2x64xbf16>
      %72 = vector.shape_cast %71 : vector<1x1x2x64xbf16> to vector<2x64xbf16>
      %c1_94 = arith.constant 1 : index
      %c0_95 = arith.constant 0 : index
      %c0_96 = arith.constant 0 : index
      %73 = vector.load %arg6[%c1_94, %c0_95, %c0_96] : memref<9x64x128xbf16, #tpu.memory_space<vmem>>, vector<1x64x128xbf16>
      %74 = vector.shape_cast %73 : vector<1x64x128xbf16> to vector<64x128xbf16>
      %cst_97 = arith.constant dense<0.000000e+00> : vector<2x128xf32>
      %75 = tpu.matmul %72, %74, %cst_97 {dimension_numbers = #tpu.dot_dimension_numbers<[1], [0], [0], [1], [0, 0, 1, 1], [], []>} : vector<2x64xbf16>, vector<64x128xbf16>, vector<2x128xf32> -> vector<2x128xf32>
      %76 = arith.addf %68, %75 : vector<2x128xf32>
      %c2_i32 = arith.constant 2 : i32
      %77 = arith.addi %arg14, %c2_i32 : i32
      %c1_98 = arith.constant 1 : index
      %78 = arith.index_cast %77 : i32 to index
      %c0_99 = arith.constant 0 : index
      %c0_100 = arith.constant 0 : index
      %79 = vector.load %arg12[%c1_98, %78, %c0_99, %c0_100] : memref<2x8x4x64xbf16, #tpu.memory_space<vmem>>, vector<1x1x2x64xbf16>
      %80 = vector.shape_cast %79 : vector<1x1x2x64xbf16> to vector<2x64xbf16>
      %c2_101 = arith.constant 2 : index
      %c0_102 = arith.constant 0 : index
      %c0_103 = arith.constant 0 : index
      %81 = vector.load %arg6[%c2_101, %c0_102, %c0_103] : memref<9x64x128xbf16, #tpu.memory_space<vmem>>, vector<1x64x128xbf16>
      %82 = vector.shape_cast %81 : vector<1x64x128xbf16> to vector<64x128xbf16>
      %cst_104 = arith.constant dense<0.000000e+00> : vector<2x128xf32>
      %83 = tpu.matmul %80, %82, %cst_104 {dimension_numbers = #tpu.dot_dimension_numbers<[1], [0], [0], [1], [0, 0, 1, 1], [], []>} : vector<2x64xbf16>, vector<64x128xbf16>, vector<2x128xf32> -> vector<2x128xf32>
      %84 = arith.addf %76, %83 : vector<2x128xf32>
      %c0_i32_105 = arith.constant 0 : i32
      %85 = arith.addi %arg14, %c0_i32_105 : i32
      %c0_106 = arith.constant 0 : index
      %86 = arith.index_cast %85 : i32 to index
      %c1_107 = arith.constant 1 : index
      %c0_108 = arith.constant 0 : index
      %87 = vector.load %arg12[%c0_106, %86, %c1_107, %c0_108] : memref<2x8x4x64xbf16, #tpu.memory_space<vmem>>, vector<1x1x2x64xbf16>
      %88 = vector.shape_cast %87 : vector<1x1x2x64xbf16> to vector<2x64xbf16>
      %c3_109 = arith.constant 3 : index
      %c0_110 = arith.constant 0 : index
      %c0_111 = arith.constant 0 : index
      %89 = vector.load %arg6[%c3_109, %c0_110, %c0_111] : memref<9x64x128xbf16, #tpu.memory_space<vmem>>, vector<1x64x128xbf16>
      %90 = vector.shape_cast %89 : vector<1x64x128xbf16> to vector<64x128xbf16>
      %cst_112 = arith.constant dense<0.000000e+00> : vector<2x128xf32>
      %91 = tpu.matmul %88, %90, %cst_112 {dimension_numbers = #tpu.dot_dimension_numbers<[1], [0], [0], [1], [0, 0, 1, 1], [], []>} : vector<2x64xbf16>, vector<64x128xbf16>, vector<2x128xf32> -> vector<2x128xf32>
      %92 = arith.addf %84, %91 : vector<2x128xf32>
      %c1_i32_113 = arith.constant 1 : i32
      %93 = arith.addi %arg14, %c1_i32_113 : i32
      %c0_114 = arith.constant 0 : index
      %94 = arith.index_cast %93 : i32 to index
      %c1_115 = arith.constant 1 : index
      %c0_116 = arith.constant 0 : index
      %95 = vector.load %arg12[%c0_114, %94, %c1_115, %c0_116] : memref<2x8x4x64xbf16, #tpu.memory_space<vmem>>, vector<1x1x2x64xbf16>
      %96 = vector.shape_cast %95 : vector<1x1x2x64xbf16> to vector<2x64xbf16>
      %c4 = arith.constant 4 : index
      %c0_117 = arith.constant 0 : index
      %c0_118 = arith.constant 0 : index
      %97 = vector.load %arg6[%c4, %c0_117, %c0_118] : memref<9x64x128xbf16, #tpu.memory_space<vmem>>, vector<1x64x128xbf16>
      %98 = vector.shape_cast %97 : vector<1x64x128xbf16> to vector<64x128xbf16>
      %cst_119 = arith.constant dense<0.000000e+00> : vector<2x128xf32>
      %99 = tpu.matmul %96, %98, %cst_119 {dimension_numbers = #tpu.dot_dimension_numbers<[1], [0], [0], [1], [0, 0, 1, 1], [], []>} : vector<2x64xbf16>, vector<64x128xbf16>, vector<2x128xf32> -> vector<2x128xf32>
      %100 = arith.addf %92, %99 : vector<2x128xf32>
      %c2_i32_120 = arith.constant 2 : i32
      %101 = arith.addi %arg14, %c2_i32_120 : i32
      %c0_121 = arith.constant 0 : index
      %102 = arith.index_cast %101 : i32 to index
      %c1_122 = arith.constant 1 : index
      %c0_123 = arith.constant 0 : index
      %103 = vector.load %arg12[%c0_121, %102, %c1_122, %c0_123] : memref<2x8x4x64xbf16, #tpu.memory_space<vmem>>, vector<1x1x2x64xbf16>
      %104 = vector.shape_cast %103 : vector<1x1x2x64xbf16> to vector<2x64xbf16>
      %c5 = arith.constant 5 : index
      %c0_124 = arith.constant 0 : index
      %c0_125 = arith.constant 0 : index
      %105 = vector.load %arg6[%c5, %c0_124, %c0_125] : memref<9x64x128xbf16, #tpu.memory_space<vmem>>, vector<1x64x128xbf16>
      %106 = vector.shape_cast %105 : vector<1x64x128xbf16> to vector<64x128xbf16>
      %cst_126 = arith.constant dense<0.000000e+00> : vector<2x128xf32>
      %107 = tpu.matmul %104, %106, %cst_126 {dimension_numbers = #tpu.dot_dimension_numbers<[1], [0], [0], [1], [0, 0, 1, 1], [], []>} : vector<2x64xbf16>, vector<64x128xbf16>, vector<2x128xf32> -> vector<2x128xf32>
      %108 = arith.addf %100, %107 : vector<2x128xf32>
      %c0_i32_127 = arith.constant 0 : i32
      %109 = arith.addi %arg14, %c0_i32_127 : i32
      %c1_128 = arith.constant 1 : index
      %110 = arith.index_cast %109 : i32 to index
      %c1_129 = arith.constant 1 : index
      %c0_130 = arith.constant 0 : index
      %111 = vector.load %arg12[%c1_128, %110, %c1_129, %c0_130] : memref<2x8x4x64xbf16, #tpu.memory_space<vmem>>, vector<1x1x2x64xbf16>
      %112 = vector.shape_cast %111 : vector<1x1x2x64xbf16> to vector<2x64xbf16>
      %c6 = arith.constant 6 : index
      %c0_131 = arith.constant 0 : index
      %c0_132 = arith.constant 0 : index
      %113 = vector.load %arg6[%c6, %c0_131, %c0_132] : memref<9x64x128xbf16, #tpu.memory_space<vmem>>, vector<1x64x128xbf16>
      %114 = vector.shape_cast %113 : vector<1x64x128xbf16> to vector<64x128xbf16>
      %cst_133 = arith.constant dense<0.000000e+00> : vector<2x128xf32>
      %115 = tpu.matmul %112, %114, %cst_133 {dimension_numbers = #tpu.dot_dimension_numbers<[1], [0], [0], [1], [0, 0, 1, 1], [], []>} : vector<2x64xbf16>, vector<64x128xbf16>, vector<2x128xf32> -> vector<2x128xf32>
      %116 = arith.addf %108, %115 : vector<2x128xf32>
      %c1_i32_134 = arith.constant 1 : i32
      %117 = arith.addi %arg14, %c1_i32_134 : i32
      %c1_135 = arith.constant 1 : index
      %118 = arith.index_cast %117 : i32 to index
      %c1_136 = arith.constant 1 : index
      %c0_137 = arith.constant 0 : index
      %119 = vector.load %arg12[%c1_135, %118, %c1_136, %c0_137] : memref<2x8x4x64xbf16, #tpu.memory_space<vmem>>, vector<1x1x2x64xbf16>
      %120 = vector.shape_cast %119 : vector<1x1x2x64xbf16> to vector<2x64xbf16>
      %c7_138 = arith.constant 7 : index
      %c0_139 = arith.constant 0 : index
      %c0_140 = arith.constant 0 : index
      %121 = vector.load %arg6[%c7_138, %c0_139, %c0_140] : memref<9x64x128xbf16, #tpu.memory_space<vmem>>, vector<1x64x128xbf16>
      %122 = vector.shape_cast %121 : vector<1x64x128xbf16> to vector<64x128xbf16>
      %cst_141 = arith.constant dense<0.000000e+00> : vector<2x128xf32>
      %123 = tpu.matmul %120, %122, %cst_141 {dimension_numbers = #tpu.dot_dimension_numbers<[1], [0], [0], [1], [0, 0, 1, 1], [], []>} : vector<2x64xbf16>, vector<64x128xbf16>, vector<2x128xf32> -> vector<2x128xf32>
      %124 = arith.addf %116, %123 : vector<2x128xf32>
      %c2_i32_142 = arith.constant 2 : i32
      %125 = arith.addi %arg14, %c2_i32_142 : i32
      %c1_143 = arith.constant 1 : index
      %126 = arith.index_cast %125 : i32 to index
      %c1_144 = arith.constant 1 : index
      %c0_145 = arith.constant 0 : index
      %127 = vector.load %arg12[%c1_143, %126, %c1_144, %c0_145] : memref<2x8x4x64xbf16, #tpu.memory_space<vmem>>, vector<1x1x2x64xbf16>
      %128 = vector.shape_cast %127 : vector<1x1x2x64xbf16> to vector<2x64xbf16>
      %c8 = arith.constant 8 : index
      %c0_146 = arith.constant 0 : index
      %c0_147 = arith.constant 0 : index
      %129 = vector.load %arg6[%c8, %c0_146, %c0_147] : memref<9x64x128xbf16, #tpu.memory_space<vmem>>, vector<1x64x128xbf16>
      %130 = vector.shape_cast %129 : vector<1x64x128xbf16> to vector<64x128xbf16>
      %cst_148 = arith.constant dense<0.000000e+00> : vector<2x128xf32>
      %131 = tpu.matmul %128, %130, %cst_148 {dimension_numbers = #tpu.dot_dimension_numbers<[1], [0], [0], [1], [0, 0, 1, 1], [], []>} : vector<2x64xbf16>, vector<64x128xbf16>, vector<2x128xf32> -> vector<2x128xf32>
      %132 = arith.addf %124, %131 : vector<2x128xf32>
      %133 = vector.broadcast %56 : vector<1x128xf32> to vector<2x128xf32>
      %134 = arith.addf %132, %133 : vector<2x128xf32>
      %cst_149 = arith.constant 0.000000e+00 : f32
      %135 = vector.broadcast %cst_149 : f32 to vector<2x128xf32>
      %136 = arith.maximumf %134, %135 : vector<2x128xf32>
      %cst_150 = arith.constant 0.000000e+00 : f32
      %137 = vector.broadcast %cst_150 : f32 to vector<1x128xf32>
      %138 = tpu.concatenate %137, %136, %137 in 0 : vector<1x128xf32>, vector<2x128xf32>, vector<1x128xf32> -> vector<4x128xf32>
      %139 = arith.truncf %138 : vector<4x128xf32> to vector<4x128xbf16>
      %c1_i32_151 = arith.constant 1 : i32
      %140 = arith.addi %c1_i32_151, %arg14 : i32
      %c0_152 = arith.constant 0 : index
      %141 = arith.index_cast %140 : i32 to index
      %c0_153 = arith.constant 0 : index
      %c0_154 = arith.constant 0 : index
      %142 = vector.load %arg13[%c0_152, %141, %c0_153, %c0_154] : memref<2x8x4x128xbf16, #tpu.memory_space<vmem>>, vector<1x1x4x128xbf16>
      %143 = vector.shape_cast %142 : vector<1x1x4x128xbf16> to vector<4x128xbf16>
      %144 = vector.shape_cast %139 : vector<4x128xbf16> to vector<1x1x4x128xbf16>
      tpu.vector_store %arg13[%c0_152, %141, %c0_153, %c0_154], %144 {strides = array<i32>} : memref<2x8x4x128xbf16, #tpu.memory_space<vmem>>, vector<1x1x4x128xbf16>,
      %cst_155 = arith.constant 0.000000e+00 : f32
      %145 = vector.broadcast %cst_155 : f32 to vector<2x128xf32>
      %c0_i32_156 = arith.constant 0 : i32
      %146 = arith.addi %arg14, %c0_i32_156 : i32
      %c0_157 = arith.constant 0 : index
      %147 = arith.index_cast %146 : i32 to index
      %c1_158 = arith.constant 1 : index
      %c0_159 = arith.constant 0 : index
      %148 = vector.load %arg12[%c0_157, %147, %c1_158, %c0_159] : memref<2x8x4x64xbf16, #tpu.memory_space<vmem>>, vector<1x1x2x64xbf16>
      %149 = vector.shape_cast %148 : vector<1x1x2x64xbf16> to vector<2x64xbf16>
      %c0_160 = arith.constant 0 : index
      %c0_161 = arith.constant 0 : index
      %c0_162 = arith.constant 0 : index
      %150 = vector.load %arg6[%c0_160, %c0_161, %c0_162] : memref<9x64x128xbf16, #tpu.memory_space<vmem>>, vector<1x64x128xbf16>
      %151 = vector.shape_cast %150 : vector<1x64x128xbf16> to vector<64x128xbf16>
      %cst_163 = arith.constant dense<0.000000e+00> : vector<2x128xf32>
      %152 = tpu.matmul %149, %151, %cst_163 {dimension_numbers = #tpu.dot_dimension_numbers<[1], [0], [0], [1], [0, 0, 1, 1], [], []>} : vector<2x64xbf16>, vector<64x128xbf16>, vector<2x128xf32> -> vector<2x128xf32>
      %153 = arith.addf %145, %152 : vector<2x128xf32>
      %c1_i32_164 = arith.constant 1 : i32
      %154 = arith.addi %arg14, %c1_i32_164 : i32
      %c0_165 = arith.constant 0 : index
      %155 = arith.index_cast %154 : i32 to index
      %c1_166 = arith.constant 1 : index
      %c0_167 = arith.constant 0 : index
      %156 = vector.load %arg12[%c0_165, %155, %c1_166, %c0_167] : memref<2x8x4x64xbf16, #tpu.memory_space<vmem>>, vector<1x1x2x64xbf16>
      %157 = vector.shape_cast %156 : vector<1x1x2x64xbf16> to vector<2x64xbf16>
      %c1_168 = arith.constant 1 : index
      %c0_169 = arith.constant 0 : index
      %c0_170 = arith.constant 0 : index
      %158 = vector.load %arg6[%c1_168, %c0_169, %c0_170] : memref<9x64x128xbf16, #tpu.memory_space<vmem>>, vector<1x64x128xbf16>
      %159 = vector.shape_cast %158 : vector<1x64x128xbf16> to vector<64x128xbf16>
      %cst_171 = arith.constant dense<0.000000e+00> : vector<2x128xf32>
      %160 = tpu.matmul %157, %159, %cst_171 {dimension_numbers = #tpu.dot_dimension_numbers<[1], [0], [0], [1], [0, 0, 1, 1], [], []>} : vector<2x64xbf16>, vector<64x128xbf16>, vector<2x128xf32> -> vector<2x128xf32>
      %161 = arith.addf %153, %160 : vector<2x128xf32>
      %c2_i32_172 = arith.constant 2 : i32
      %162 = arith.addi %arg14, %c2_i32_172 : i32
      %c0_173 = arith.constant 0 : index
      %163 = arith.index_cast %162 : i32 to index
      %c1_174 = arith.constant 1 : index
      %c0_175 = arith.constant 0 : index
      %164 = vector.load %arg12[%c0_173, %163, %c1_174, %c0_175] : memref<2x8x4x64xbf16, #tpu.memory_space<vmem>>, vector<1x1x2x64xbf16>
      %165 = vector.shape_cast %164 : vector<1x1x2x64xbf16> to vector<2x64xbf16>
      %c2_176 = arith.constant 2 : index
      %c0_177 = arith.constant 0 : index
      %c0_178 = arith.constant 0 : index
      %166 = vector.load %arg6[%c2_176, %c0_177, %c0_178] : memref<9x64x128xbf16, #tpu.memory_space<vmem>>, vector<1x64x128xbf16>
      %167 = vector.shape_cast %166 : vector<1x64x128xbf16> to vector<64x128xbf16>
      %cst_179 = arith.constant dense<0.000000e+00> : vector<2x128xf32>
      %168 = tpu.matmul %165, %167, %cst_179 {dimension_numbers = #tpu.dot_dimension_numbers<[1], [0], [0], [1], [0, 0, 1, 1], [], []>} : vector<2x64xbf16>, vector<64x128xbf16>, vector<2x128xf32> -> vector<2x128xf32>
      %169 = arith.addf %161, %168 : vector<2x128xf32>
      %c0_i32_180 = arith.constant 0 : i32
      %170 = arith.addi %arg14, %c0_i32_180 : i32
      %c1_181 = arith.constant 1 : index
      %171 = arith.index_cast %170 : i32 to index
      %c1_182 = arith.constant 1 : index
      %c0_183 = arith.constant 0 : index
      %172 = vector.load %arg12[%c1_181, %171, %c1_182, %c0_183] : memref<2x8x4x64xbf16, #tpu.memory_space<vmem>>, vector<1x1x2x64xbf16>
      %173 = vector.shape_cast %172 : vector<1x1x2x64xbf16> to vector<2x64xbf16>
      %c3_184 = arith.constant 3 : index
      %c0_185 = arith.constant 0 : index
      %c0_186 = arith.constant 0 : index
      %174 = vector.load %arg6[%c3_184, %c0_185, %c0_186] : memref<9x64x128xbf16, #tpu.memory_space<vmem>>, vector<1x64x128xbf16>
      %175 = vector.shape_cast %174 : vector<1x64x128xbf16> to vector<64x128xbf16>
      %cst_187 = arith.constant dense<0.000000e+00> : vector<2x128xf32>
      %176 = tpu.matmul %173, %175, %cst_187 {dimension_numbers = #tpu.dot_dimension_numbers<[1], [0], [0], [1], [0, 0, 1, 1], [], []>} : vector<2x64xbf16>, vector<64x128xbf16>, vector<2x128xf32> -> vector<2x128xf32>
      %177 = arith.addf %169, %176 : vector<2x128xf32>
      %c1_i32_188 = arith.constant 1 : i32
      %178 = arith.addi %arg14, %c1_i32_188 : i32
      %c1_189 = arith.constant 1 : index
      %179 = arith.index_cast %178 : i32 to index
      %c1_190 = arith.constant 1 : index
      %c0_191 = arith.constant 0 : index
      %180 = vector.load %arg12[%c1_189, %179, %c1_190, %c0_191] : memref<2x8x4x64xbf16, #tpu.memory_space<vmem>>, vector<1x1x2x64xbf16>
      %181 = vector.shape_cast %180 : vector<1x1x2x64xbf16> to vector<2x64xbf16>
      %c4_192 = arith.constant 4 : index
      %c0_193 = arith.constant 0 : index
      %c0_194 = arith.constant 0 : index
      %182 = vector.load %arg6[%c4_192, %c0_193, %c0_194] : memref<9x64x128xbf16, #tpu.memory_space<vmem>>, vector<1x64x128xbf16>
      %183 = vector.shape_cast %182 : vector<1x64x128xbf16> to vector<64x128xbf16>
      %cst_195 = arith.constant dense<0.000000e+00> : vector<2x128xf32>
      %184 = tpu.matmul %181, %183, %cst_195 {dimension_numbers = #tpu.dot_dimension_numbers<[1], [0], [0], [1], [0, 0, 1, 1], [], []>} : vector<2x64xbf16>, vector<64x128xbf16>, vector<2x128xf32> -> vector<2x128xf32>
      %185 = arith.addf %177, %184 : vector<2x128xf32>
      %c2_i32_196 = arith.constant 2 : i32
      %186 = arith.addi %arg14, %c2_i32_196 : i32
      %c1_197 = arith.constant 1 : index
      %187 = arith.index_cast %186 : i32 to index
      %c1_198 = arith.constant 1 : index
      %c0_199 = arith.constant 0 : index
      %188 = vector.load %arg12[%c1_197, %187, %c1_198, %c0_199] : memref<2x8x4x64xbf16, #tpu.memory_space<vmem>>, vector<1x1x2x64xbf16>
      %189 = vector.shape_cast %188 : vector<1x1x2x64xbf16> to vector<2x64xbf16>
      %c5_200 = arith.constant 5 : index
      %c0_201 = arith.constant 0 : index
      %c0_202 = arith.constant 0 : index
      %190 = vector.load %arg6[%c5_200, %c0_201, %c0_202] : memref<9x64x128xbf16, #tpu.memory_space<vmem>>, vector<1x64x128xbf16>
      %191 = vector.shape_cast %190 : vector<1x64x128xbf16> to vector<64x128xbf16>
      %cst_203 = arith.constant dense<0.000000e+00> : vector<2x128xf32>
      %192 = tpu.matmul %189, %191, %cst_203 {dimension_numbers = #tpu.dot_dimension_numbers<[1], [0], [0], [1], [0, 0, 1, 1], [], []>} : vector<2x64xbf16>, vector<64x128xbf16>, vector<2x128xf32> -> vector<2x128xf32>
      %193 = arith.addf %185, %192 : vector<2x128xf32>
      %c0_i32_204 = arith.constant 0 : i32
      %194 = arith.addi %arg14, %c0_i32_204 : i32
      %c0_205 = arith.constant 0 : index
      %195 = arith.index_cast %194 : i32 to index
      %c2_206 = arith.constant 2 : index
      %c0_207 = arith.constant 0 : index
      %196 = vector.load %arg12[%c0_205, %195, %c2_206, %c0_207] : memref<2x8x4x64xbf16, #tpu.memory_space<vmem>>, vector<1x1x2x64xbf16>
      %197 = vector.shape_cast %196 : vector<1x1x2x64xbf16> to vector<2x64xbf16>
      %c6_208 = arith.constant 6 : index
      %c0_209 = arith.constant 0 : index
      %c0_210 = arith.constant 0 : index
      %198 = vector.load %arg6[%c6_208, %c0_209, %c0_210] : memref<9x64x128xbf16, #tpu.memory_space<vmem>>, vector<1x64x128xbf16>
      %199 = vector.shape_cast %198 : vector<1x64x128xbf16> to vector<64x128xbf16>
      %cst_211 = arith.constant dense<0.000000e+00> : vector<2x128xf32>
      %200 = tpu.matmul %197, %199, %cst_211 {dimension_numbers = #tpu.dot_dimension_numbers<[1], [0], [0], [1], [0, 0, 1, 1], [], []>} : vector<2x64xbf16>, vector<64x128xbf16>, vector<2x128xf32> -> vector<2x128xf32>
      %201 = arith.addf %193, %200 : vector<2x128xf32>
      %c1_i32_212 = arith.constant 1 : i32
      %202 = arith.addi %arg14, %c1_i32_212 : i32
      %c0_213 = arith.constant 0 : index
      %203 = arith.index_cast %202 : i32 to index
      %c2_214 = arith.constant 2 : index
      %c0_215 = arith.constant 0 : index
      %204 = vector.load %arg12[%c0_213, %203, %c2_214, %c0_215] : memref<2x8x4x64xbf16, #tpu.memory_space<vmem>>, vector<1x1x2x64xbf16>
      %205 = vector.shape_cast %204 : vector<1x1x2x64xbf16> to vector<2x64xbf16>
      %c7_216 = arith.constant 7 : index
      %c0_217 = arith.constant 0 : index
      %c0_218 = arith.constant 0 : index
      %206 = vector.load %arg6[%c7_216, %c0_217, %c0_218] : memref<9x64x128xbf16, #tpu.memory_space<vmem>>, vector<1x64x128xbf16>
      %207 = vector.shape_cast %206 : vector<1x64x128xbf16> to vector<64x128xbf16>
      %cst_219 = arith.constant dense<0.000000e+00> : vector<2x128xf32>
      %208 = tpu.matmul %205, %207, %cst_219 {dimension_numbers = #tpu.dot_dimension_numbers<[1], [0], [0], [1], [0, 0, 1, 1], [], []>} : vector<2x64xbf16>, vector<64x128xbf16>, vector<2x128xf32> -> vector<2x128xf32>
      %209 = arith.addf %201, %208 : vector<2x128xf32>
      %c2_i32_220 = arith.constant 2 : i32
      %210 = arith.addi %arg14, %c2_i32_220 : i32
      %c0_221 = arith.constant 0 : index
      %211 = arith.index_cast %210 : i32 to index
      %c2_222 = arith.constant 2 : index
      %c0_223 = arith.constant 0 : index
      %212 = vector.load %arg12[%c0_221, %211, %c2_222, %c0_223] : memref<2x8x4x64xbf16, #tpu.memory_space<vmem>>, vector<1x1x2x64xbf16>
      %213 = vector.shape_cast %212 : vector<1x1x2x64xbf16> to vector<2x64xbf16>
      %c8_224 = arith.constant 8 : index
      %c0_225 = arith.constant 0 : index
      %c0_226 = arith.constant 0 : index
      %214 = vector.load %arg6[%c8_224, %c0_225, %c0_226] : memref<9x64x128xbf16, #tpu.memory_space<vmem>>, vector<1x64x128xbf16>
      %215 = vector.shape_cast %214 : vector<1x64x128xbf16> to vector<64x128xbf16>
      %cst_227 = arith.constant dense<0.000000e+00> : vector<2x128xf32>
      %216 = tpu.matmul %213, %215, %cst_227 {dimension_numbers = #tpu.dot_dimension_numbers<[1], [0], [0], [1], [0, 0, 1, 1], [], []>} : vector<2x64xbf16>, vector<64x128xbf16>, vector<2x128xf32> -> vector<2x128xf32>
      %217 = arith.addf %209, %216 : vector<2x128xf32>
      %218 = vector.broadcast %56 : vector<1x128xf32> to vector<2x128xf32>
      %219 = arith.addf %217, %218 : vector<2x128xf32>
      %cst_228 = arith.constant 0.000000e+00 : f32
      %220 = vector.broadcast %cst_228 : f32 to vector<2x128xf32>
      %221 = arith.maximumf %219, %220 : vector<2x128xf32>
      %cst_229 = arith.constant 0.000000e+00 : f32
      %222 = vector.broadcast %cst_229 : f32 to vector<1x128xf32>
      %223 = tpu.concatenate %222, %221, %222 in 0 : vector<1x128xf32>, vector<2x128xf32>, vector<1x128xf32> -> vector<4x128xf32>
      %224 = arith.truncf %223 : vector<4x128xf32> to vector<4x128xbf16>
      %c1_i32_230 = arith.constant 1 : i32
      %225 = arith.addi %c1_i32_230, %arg14 : i32
      %c1_231 = arith.constant 1 : index
      %226 = arith.index_cast %225 : i32 to index
      %c0_232 = arith.constant 0 : index
      %c0_233 = arith.constant 0 : index
      %227 = vector.load %arg13[%c1_231, %226, %c0_232, %c0_233] : memref<2x8x4x128xbf16, #tpu.memory_space<vmem>>, vector<1x1x4x128xbf16>
      %228 = vector.shape_cast %227 : vector<1x1x4x128xbf16> to vector<4x128xbf16>
      %229 = vector.shape_cast %224 : vector<4x128xbf16> to vector<1x1x4x128xbf16>
      tpu.vector_store %arg13[%c1_231, %226, %c0_232, %c0_233], %229 {strides = array<i32>} : memref<2x8x4x128xbf16, #tpu.memory_space<vmem>>, vector<1x1x4x128xbf16>,
    }
    %c6_i32_75 = arith.constant 6 : i32
    %c0_76 = arith.constant 0 : index
    %c0_77 = arith.constant 0 : index
    %58 = vector.load %arg9[%c0_76, %c0_77] : memref<1x128xf32, #tpu.memory_space<vmem>>, vector<1x128xf32>
    %c0_i32_78 = arith.constant 0 : i32
    %c3_i32 = arith.constant 3 : i32
    %59 = arith.addi %c0_i32_78, %c3_i32 : i32
    %c1_i32_79 = arith.constant 1 : i32
    scf.for %arg14 = %c0_i32_78 to %59 step %c1_i32_79  : i32 {
      %cst_81 = arith.constant 0.000000e+00 : f32
      %60 = vector.broadcast %cst_81 : f32 to vector<2x128xf32>
      %c2_i32 = arith.constant 2 : i32
      %61 = arith.muli %c2_i32, %arg14 : i32
      %c0_i32_82 = arith.constant 0 : i32
      %62 = arith.addi %61, %c0_i32_82 : i32
      %c0_i32_83 = arith.constant 0 : i32
      %63 = arith.addi %62, %c0_i32_83 : i32
      %c1_84 = arith.constant 1 : index
      %64 = arith.index_cast %63 : i32 to index
      %c0_85 = arith.constant 0 : index
      %c0_86 = arith.constant 0 : index
      %65 = vector.load %arg13[%c1_84, %64, %c0_85, %c0_86] : memref<2x8x4x128xbf16, #tpu.memory_space<vmem>>, vector<1x1x2x128xbf16>
      %66 = vector.shape_cast %65 : vector<1x1x2x128xbf16> to vector<2x128xbf16>
      %c0_87 = arith.constant 0 : index
      %c0_88 = arith.constant 0 : index
      %c0_89 = arith.constant 0 : index
      %67 = vector.load %arg8[%c0_87, %c0_88, %c0_89] : memref<9x128x128xbf16, #tpu.memory_space<vmem>>, vector<1x128x128xbf16>
      %68 = vector.shape_cast %67 : vector<1x128x128xbf16> to vector<128x128xbf16>
      %cst_90 = arith.constant dense<0.000000e+00> : vector<2x128xf32>
      %69 = tpu.matmul %66, %68, %cst_90 {dimension_numbers = #tpu.dot_dimension_numbers<[1], [0], [0], [1], [0, 0, 1, 1], [], []>} : vector<2x128xbf16>, vector<128x128xbf16>, vector<2x128xf32> -> vector<2x128xf32>
      %70 = arith.addf %60, %69 : vector<2x128xf32>
      %c2_i32_91 = arith.constant 2 : i32
      %71 = arith.muli %c2_i32_91, %arg14 : i32
      %c0_i32_92 = arith.constant 0 : i32
      %72 = arith.addi %71, %c0_i32_92 : i32
      %c1_i32_93 = arith.constant 1 : i32
      %73 = arith.addi %72, %c1_i32_93 : i32
      %c1_94 = arith.constant 1 : index
      %74 = arith.index_cast %73 : i32 to index
      %c0_95 = arith.constant 0 : index
      %c0_96 = arith.constant 0 : index
      %75 = vector.load %arg13[%c1_94, %74, %c0_95, %c0_96] : memref<2x8x4x128xbf16, #tpu.memory_space<vmem>>, vector<1x1x2x128xbf16>
      %76 = vector.shape_cast %75 : vector<1x1x2x128xbf16> to vector<2x128xbf16>
      %c1_97 = arith.constant 1 : index
      %c0_98 = arith.constant 0 : index
      %c0_99 = arith.constant 0 : index
      %77 = vector.load %arg8[%c1_97, %c0_98, %c0_99] : memref<9x128x128xbf16, #tpu.memory_space<vmem>>, vector<1x128x128xbf16>
      %78 = vector.shape_cast %77 : vector<1x128x128xbf16> to vector<128x128xbf16>
      %cst_100 = arith.constant dense<0.000000e+00> : vector<2x128xf32>
      %79 = tpu.matmul %76, %78, %cst_100 {dimension_numbers = #tpu.dot_dimension_numbers<[1], [0], [0], [1], [0, 0, 1, 1], [], []>} : vector<2x128xbf16>, vector<128x128xbf16>, vector<2x128xf32> -> vector<2x128xf32>
      %80 = arith.addf %70, %79 : vector<2x128xf32>
      %c2_i32_101 = arith.constant 2 : i32
      %81 = arith.muli %c2_i32_101, %arg14 : i32
      %c0_i32_102 = arith.constant 0 : i32
      %82 = arith.addi %81, %c0_i32_102 : i32
      %c2_i32_103 = arith.constant 2 : i32
      %83 = arith.addi %82, %c2_i32_103 : i32
      %c1_104 = arith.constant 1 : index
      %84 = arith.index_cast %83 : i32 to index
      %c0_105 = arith.constant 0 : index
      %c0_106 = arith.constant 0 : index
      %85 = vector.load %arg13[%c1_104, %84, %c0_105, %c0_106] : memref<2x8x4x128xbf16, #tpu.memory_space<vmem>>, vector<1x1x2x128xbf16>
      %86 = vector.shape_cast %85 : vector<1x1x2x128xbf16> to vector<2x128xbf16>
      %c2_107 = arith.constant 2 : index
      %c0_108 = arith.constant 0 : index
      %c0_109 = arith.constant 0 : index
      %87 = vector.load %arg8[%c2_107, %c0_108, %c0_109] : memref<9x128x128xbf16, #tpu.memory_space<vmem>>, vector<1x128x128xbf16>
      %88 = vector.shape_cast %87 : vector<1x128x128xbf16> to vector<128x128xbf16>
      %cst_110 = arith.constant dense<0.000000e+00> : vector<2x128xf32>
      %89 = tpu.matmul %86, %88, %cst_110 {dimension_numbers = #tpu.dot_dimension_numbers<[1], [0], [0], [1], [0, 0, 1, 1], [], []>} : vector<2x128xbf16>, vector<128x128xbf16>, vector<2x128xf32> -> vector<2x128xf32>
      %90 = arith.addf %80, %89 : vector<2x128xf32>
      %c2_i32_111 = arith.constant 2 : i32
      %91 = arith.muli %c2_i32_111, %arg14 : i32
      %c0_i32_112 = arith.constant 0 : i32
      %92 = arith.addi %91, %c0_i32_112 : i32
      %c0_i32_113 = arith.constant 0 : i32
      %93 = arith.addi %92, %c0_i32_113 : i32
      %c0_114 = arith.constant 0 : index
      %94 = arith.index_cast %93 : i32 to index
      %c1_115 = arith.constant 1 : index
      %c0_116 = arith.constant 0 : index
      %95 = vector.load %arg13[%c0_114, %94, %c1_115, %c0_116] : memref<2x8x4x128xbf16, #tpu.memory_space<vmem>>, vector<1x1x2x128xbf16>
      %96 = vector.shape_cast %95 : vector<1x1x2x128xbf16> to vector<2x128xbf16>
      %c3_117 = arith.constant 3 : index
      %c0_118 = arith.constant 0 : index
      %c0_119 = arith.constant 0 : index
      %97 = vector.load %arg8[%c3_117, %c0_118, %c0_119] : memref<9x128x128xbf16, #tpu.memory_space<vmem>>, vector<1x128x128xbf16>
      %98 = vector.shape_cast %97 : vector<1x128x128xbf16> to vector<128x128xbf16>
      %cst_120 = arith.constant dense<0.000000e+00> : vector<2x128xf32>
      %99 = tpu.matmul %96, %98, %cst_120 {dimension_numbers = #tpu.dot_dimension_numbers<[1], [0], [0], [1], [0, 0, 1, 1], [], []>} : vector<2x128xbf16>, vector<128x128xbf16>, vector<2x128xf32> -> vector<2x128xf32>
      %100 = arith.addf %90, %99 : vector<2x128xf32>
      %c2_i32_121 = arith.constant 2 : i32
      %101 = arith.muli %c2_i32_121, %arg14 : i32
      %c0_i32_122 = arith.constant 0 : i32
      %102 = arith.addi %101, %c0_i32_122 : i32
      %c1_i32_123 = arith.constant 1 : i32
      %103 = arith.addi %102, %c1_i32_123 : i32
      %c0_124 = arith.constant 0 : index
      %104 = arith.index_cast %103 : i32 to index
      %c1_125 = arith.constant 1 : index
      %c0_126 = arith.constant 0 : index
      %105 = vector.load %arg13[%c0_124, %104, %c1_125, %c0_126] : memref<2x8x4x128xbf16, #tpu.memory_space<vmem>>, vector<1x1x2x128xbf16>
      %106 = vector.shape_cast %105 : vector<1x1x2x128xbf16> to vector<2x128xbf16>
      %c4 = arith.constant 4 : index
      %c0_127 = arith.constant 0 : index
      %c0_128 = arith.constant 0 : index
      %107 = vector.load %arg8[%c4, %c0_127, %c0_128] : memref<9x128x128xbf16, #tpu.memory_space<vmem>>, vector<1x128x128xbf16>
      %108 = vector.shape_cast %107 : vector<1x128x128xbf16> to vector<128x128xbf16>
      %cst_129 = arith.constant dense<0.000000e+00> : vector<2x128xf32>
      %109 = tpu.matmul %106, %108, %cst_129 {dimension_numbers = #tpu.dot_dimension_numbers<[1], [0], [0], [1], [0, 0, 1, 1], [], []>} : vector<2x128xbf16>, vector<128x128xbf16>, vector<2x128xf32> -> vector<2x128xf32>
      %110 = arith.addf %100, %109 : vector<2x128xf32>
      %c2_i32_130 = arith.constant 2 : i32
      %111 = arith.muli %c2_i32_130, %arg14 : i32
      %c0_i32_131 = arith.constant 0 : i32
      %112 = arith.addi %111, %c0_i32_131 : i32
      %c2_i32_132 = arith.constant 2 : i32
      %113 = arith.addi %112, %c2_i32_132 : i32
      %c0_133 = arith.constant 0 : index
      %114 = arith.index_cast %113 : i32 to index
      %c1_134 = arith.constant 1 : index
      %c0_135 = arith.constant 0 : index
      %115 = vector.load %arg13[%c0_133, %114, %c1_134, %c0_135] : memref<2x8x4x128xbf16, #tpu.memory_space<vmem>>, vector<1x1x2x128xbf16>
      %116 = vector.shape_cast %115 : vector<1x1x2x128xbf16> to vector<2x128xbf16>
      %c5 = arith.constant 5 : index
      %c0_136 = arith.constant 0 : index
      %c0_137 = arith.constant 0 : index
      %117 = vector.load %arg8[%c5, %c0_136, %c0_137] : memref<9x128x128xbf16, #tpu.memory_space<vmem>>, vector<1x128x128xbf16>
      %118 = vector.shape_cast %117 : vector<1x128x128xbf16> to vector<128x128xbf16>
      %cst_138 = arith.constant dense<0.000000e+00> : vector<2x128xf32>
      %119 = tpu.matmul %116, %118, %cst_138 {dimension_numbers = #tpu.dot_dimension_numbers<[1], [0], [0], [1], [0, 0, 1, 1], [], []>} : vector<2x128xbf16>, vector<128x128xbf16>, vector<2x128xf32> -> vector<2x128xf32>
      %120 = arith.addf %110, %119 : vector<2x128xf32>
      %c2_i32_139 = arith.constant 2 : i32
      %121 = arith.muli %c2_i32_139, %arg14 : i32
      %c0_i32_140 = arith.constant 0 : i32
      %122 = arith.addi %121, %c0_i32_140 : i32
      %c0_i32_141 = arith.constant 0 : i32
      %123 = arith.addi %122, %c0_i32_141 : i32
      %c1_142 = arith.constant 1 : index
      %124 = arith.index_cast %123 : i32 to index
      %c1_143 = arith.constant 1 : index
      %c0_144 = arith.constant 0 : index
      %125 = vector.load %arg13[%c1_142, %124, %c1_143, %c0_144] : memref<2x8x4x128xbf16, #tpu.memory_space<vmem>>, vector<1x1x2x128xbf16>
      %126 = vector.shape_cast %125 : vector<1x1x2x128xbf16> to vector<2x128xbf16>
      %c6 = arith.constant 6 : index
      %c0_145 = arith.constant 0 : index
      %c0_146 = arith.constant 0 : index
      %127 = vector.load %arg8[%c6, %c0_145, %c0_146] : memref<9x128x128xbf16, #tpu.memory_space<vmem>>, vector<1x128x128xbf16>
      %128 = vector.shape_cast %127 : vector<1x128x128xbf16> to vector<128x128xbf16>
      %cst_147 = arith.constant dense<0.000000e+00> : vector<2x128xf32>
      %129 = tpu.matmul %126, %128, %cst_147 {dimension_numbers = #tpu.dot_dimension_numbers<[1], [0], [0], [1], [0, 0, 1, 1], [], []>} : vector<2x128xbf16>, vector<128x128xbf16>, vector<2x128xf32> -> vector<2x128xf32>
      %130 = arith.addf %120, %129 : vector<2x128xf32>
      %c2_i32_148 = arith.constant 2 : i32
      %131 = arith.muli %c2_i32_148, %arg14 : i32
      %c0_i32_149 = arith.constant 0 : i32
      %132 = arith.addi %131, %c0_i32_149 : i32
      %c1_i32_150 = arith.constant 1 : i32
      %133 = arith.addi %132, %c1_i32_150 : i32
      %c1_151 = arith.constant 1 : index
      %134 = arith.index_cast %133 : i32 to index
      %c1_152 = arith.constant 1 : index
      %c0_153 = arith.constant 0 : index
      %135 = vector.load %arg13[%c1_151, %134, %c1_152, %c0_153] : memref<2x8x4x128xbf16, #tpu.memory_space<vmem>>, vector<1x1x2x128xbf16>
      %136 = vector.shape_cast %135 : vector<1x1x2x128xbf16> to vector<2x128xbf16>
      %c7_154 = arith.constant 7 : index
      %c0_155 = arith.constant 0 : index
      %c0_156 = arith.constant 0 : index
      %137 = vector.load %arg8[%c7_154, %c0_155, %c0_156] : memref<9x128x128xbf16, #tpu.memory_space<vmem>>, vector<1x128x128xbf16>
      %138 = vector.shape_cast %137 : vector<1x128x128xbf16> to vector<128x128xbf16>
      %cst_157 = arith.constant dense<0.000000e+00> : vector<2x128xf32>
      %139 = tpu.matmul %136, %138, %cst_157 {dimension_numbers = #tpu.dot_dimension_numbers<[1], [0], [0], [1], [0, 0, 1, 1], [], []>} : vector<2x128xbf16>, vector<128x128xbf16>, vector<2x128xf32> -> vector<2x128xf32>
      %140 = arith.addf %130, %139 : vector<2x128xf32>
      %c2_i32_158 = arith.constant 2 : i32
      %141 = arith.muli %c2_i32_158, %arg14 : i32
      %c0_i32_159 = arith.constant 0 : i32
      %142 = arith.addi %141, %c0_i32_159 : i32
      %c2_i32_160 = arith.constant 2 : i32
      %143 = arith.addi %142, %c2_i32_160 : i32
      %c1_161 = arith.constant 1 : index
      %144 = arith.index_cast %143 : i32 to index
      %c1_162 = arith.constant 1 : index
      %c0_163 = arith.constant 0 : index
      %145 = vector.load %arg13[%c1_161, %144, %c1_162, %c0_163] : memref<2x8x4x128xbf16, #tpu.memory_space<vmem>>, vector<1x1x2x128xbf16>
      %146 = vector.shape_cast %145 : vector<1x1x2x128xbf16> to vector<2x128xbf16>
      %c8 = arith.constant 8 : index
      %c0_164 = arith.constant 0 : index
      %c0_165 = arith.constant 0 : index
      %147 = vector.load %arg8[%c8, %c0_164, %c0_165] : memref<9x128x128xbf16, #tpu.memory_space<vmem>>, vector<1x128x128xbf16>
      %148 = vector.shape_cast %147 : vector<1x128x128xbf16> to vector<128x128xbf16>
      %cst_166 = arith.constant dense<0.000000e+00> : vector<2x128xf32>
      %149 = tpu.matmul %146, %148, %cst_166 {dimension_numbers = #tpu.dot_dimension_numbers<[1], [0], [0], [1], [0, 0, 1, 1], [], []>} : vector<2x128xbf16>, vector<128x128xbf16>, vector<2x128xf32> -> vector<2x128xf32>
      %150 = arith.addf %140, %149 : vector<2x128xf32>
      %151 = vector.broadcast %58 : vector<1x128xf32> to vector<2x128xf32>
      %152 = arith.addf %150, %151 : vector<2x128xf32>
      %cst_167 = arith.constant 0.000000e+00 : f32
      %153 = vector.broadcast %cst_167 : f32 to vector<2x128xf32>
      %154 = arith.maximumf %152, %153 : vector<2x128xf32>
      %cst_168 = arith.constant 0.000000e+00 : f32
      %155 = vector.broadcast %cst_168 : f32 to vector<2x128xf32>
      %c2_i32_169 = arith.constant 2 : i32
      %156 = arith.muli %c2_i32_169, %arg14 : i32
      %c1_i32_170 = arith.constant 1 : i32
      %157 = arith.addi %156, %c1_i32_170 : i32
      %c0_i32_171 = arith.constant 0 : i32
      %158 = arith.addi %157, %c0_i32_171 : i32
      %c1_172 = arith.constant 1 : index
      %159 = arith.index_cast %158 : i32 to index
      %c0_173 = arith.constant 0 : index
      %c0_174 = arith.constant 0 : index
      %160 = vector.load %arg13[%c1_172, %159, %c0_173, %c0_174] : memref<2x8x4x128xbf16, #tpu.memory_space<vmem>>, vector<1x1x2x128xbf16>
      %161 = vector.shape_cast %160 : vector<1x1x2x128xbf16> to vector<2x128xbf16>
      %c0_175 = arith.constant 0 : index
      %c0_176 = arith.constant 0 : index
      %c0_177 = arith.constant 0 : index
      %162 = vector.load %arg8[%c0_175, %c0_176, %c0_177] : memref<9x128x128xbf16, #tpu.memory_space<vmem>>, vector<1x128x128xbf16>
      %163 = vector.shape_cast %162 : vector<1x128x128xbf16> to vector<128x128xbf16>
      %cst_178 = arith.constant dense<0.000000e+00> : vector<2x128xf32>
      %164 = tpu.matmul %161, %163, %cst_178 {dimension_numbers = #tpu.dot_dimension_numbers<[1], [0], [0], [1], [0, 0, 1, 1], [], []>} : vector<2x128xbf16>, vector<128x128xbf16>, vector<2x128xf32> -> vector<2x128xf32>
      %165 = arith.addf %155, %164 : vector<2x128xf32>
      %c2_i32_179 = arith.constant 2 : i32
      %166 = arith.muli %c2_i32_179, %arg14 : i32
      %c1_i32_180 = arith.constant 1 : i32
      %167 = arith.addi %166, %c1_i32_180 : i32
      %c1_i32_181 = arith.constant 1 : i32
      %168 = arith.addi %167, %c1_i32_181 : i32
      %c1_182 = arith.constant 1 : index
      %169 = arith.index_cast %168 : i32 to index
      %c0_183 = arith.constant 0 : index
      %c0_184 = arith.constant 0 : index
      %170 = vector.load %arg13[%c1_182, %169, %c0_183, %c0_184] : memref<2x8x4x128xbf16, #tpu.memory_space<vmem>>, vector<1x1x2x128xbf16>
      %171 = vector.shape_cast %170 : vector<1x1x2x128xbf16> to vector<2x128xbf16>
      %c1_185 = arith.constant 1 : index
      %c0_186 = arith.constant 0 : index
      %c0_187 = arith.constant 0 : index
      %172 = vector.load %arg8[%c1_185, %c0_186, %c0_187] : memref<9x128x128xbf16, #tpu.memory_space<vmem>>, vector<1x128x128xbf16>
      %173 = vector.shape_cast %172 : vector<1x128x128xbf16> to vector<128x128xbf16>
      %cst_188 = arith.constant dense<0.000000e+00> : vector<2x128xf32>
      %174 = tpu.matmul %171, %173, %cst_188 {dimension_numbers = #tpu.dot_dimension_numbers<[1], [0], [0], [1], [0, 0, 1, 1], [], []>} : vector<2x128xbf16>, vector<128x128xbf16>, vector<2x128xf32> -> vector<2x128xf32>
      %175 = arith.addf %165, %174 : vector<2x128xf32>
      %c2_i32_189 = arith.constant 2 : i32
      %176 = arith.muli %c2_i32_189, %arg14 : i32
      %c1_i32_190 = arith.constant 1 : i32
      %177 = arith.addi %176, %c1_i32_190 : i32
      %c2_i32_191 = arith.constant 2 : i32
      %178 = arith.addi %177, %c2_i32_191 : i32
      %c1_192 = arith.constant 1 : index
      %179 = arith.index_cast %178 : i32 to index
      %c0_193 = arith.constant 0 : index
      %c0_194 = arith.constant 0 : index
      %180 = vector.load %arg13[%c1_192, %179, %c0_193, %c0_194] : memref<2x8x4x128xbf16, #tpu.memory_space<vmem>>, vector<1x1x2x128xbf16>
      %181 = vector.shape_cast %180 : vector<1x1x2x128xbf16> to vector<2x128xbf16>
      %c2_195 = arith.constant 2 : index
      %c0_196 = arith.constant 0 : index
      %c0_197 = arith.constant 0 : index
      %182 = vector.load %arg8[%c2_195, %c0_196, %c0_197] : memref<9x128x128xbf16, #tpu.memory_space<vmem>>, vector<1x128x128xbf16>
      %183 = vector.shape_cast %182 : vector<1x128x128xbf16> to vector<128x128xbf16>
      %cst_198 = arith.constant dense<0.000000e+00> : vector<2x128xf32>
      %184 = tpu.matmul %181, %183, %cst_198 {dimension_numbers = #tpu.dot_dimension_numbers<[1], [0], [0], [1], [0, 0, 1, 1], [], []>} : vector<2x128xbf16>, vector<128x128xbf16>, vector<2x128xf32> -> vector<2x128xf32>
      %185 = arith.addf %175, %184 : vector<2x128xf32>
      %c2_i32_199 = arith.constant 2 : i32
      %186 = arith.muli %c2_i32_199, %arg14 : i32
      %c1_i32_200 = arith.constant 1 : i32
      %187 = arith.addi %186, %c1_i32_200 : i32
      %c0_i32_201 = arith.constant 0 : i32
      %188 = arith.addi %187, %c0_i32_201 : i32
      %c0_202 = arith.constant 0 : index
      %189 = arith.index_cast %188 : i32 to index
      %c1_203 = arith.constant 1 : index
      %c0_204 = arith.constant 0 : index
      %190 = vector.load %arg13[%c0_202, %189, %c1_203, %c0_204] : memref<2x8x4x128xbf16, #tpu.memory_space<vmem>>, vector<1x1x2x128xbf16>
      %191 = vector.shape_cast %190 : vector<1x1x2x128xbf16> to vector<2x128xbf16>
      %c3_205 = arith.constant 3 : index
      %c0_206 = arith.constant 0 : index
      %c0_207 = arith.constant 0 : index
      %192 = vector.load %arg8[%c3_205, %c0_206, %c0_207] : memref<9x128x128xbf16, #tpu.memory_space<vmem>>, vector<1x128x128xbf16>
      %193 = vector.shape_cast %192 : vector<1x128x128xbf16> to vector<128x128xbf16>
      %cst_208 = arith.constant dense<0.000000e+00> : vector<2x128xf32>
      %194 = tpu.matmul %191, %193, %cst_208 {dimension_numbers = #tpu.dot_dimension_numbers<[1], [0], [0], [1], [0, 0, 1, 1], [], []>} : vector<2x128xbf16>, vector<128x128xbf16>, vector<2x128xf32> -> vector<2x128xf32>
      %195 = arith.addf %185, %194 : vector<2x128xf32>
      %c2_i32_209 = arith.constant 2 : i32
      %196 = arith.muli %c2_i32_209, %arg14 : i32
      %c1_i32_210 = arith.constant 1 : i32
      %197 = arith.addi %196, %c1_i32_210 : i32
      %c1_i32_211 = arith.constant 1 : i32
      %198 = arith.addi %197, %c1_i32_211 : i32
      %c0_212 = arith.constant 0 : index
      %199 = arith.index_cast %198 : i32 to index
      %c1_213 = arith.constant 1 : index
      %c0_214 = arith.constant 0 : index
      %200 = vector.load %arg13[%c0_212, %199, %c1_213, %c0_214] : memref<2x8x4x128xbf16, #tpu.memory_space<vmem>>, vector<1x1x2x128xbf16>
      %201 = vector.shape_cast %200 : vector<1x1x2x128xbf16> to vector<2x128xbf16>
      %c4_215 = arith.constant 4 : index
      %c0_216 = arith.constant 0 : index
      %c0_217 = arith.constant 0 : index
      %202 = vector.load %arg8[%c4_215, %c0_216, %c0_217] : memref<9x128x128xbf16, #tpu.memory_space<vmem>>, vector<1x128x128xbf16>
      %203 = vector.shape_cast %202 : vector<1x128x128xbf16> to vector<128x128xbf16>
      %cst_218 = arith.constant dense<0.000000e+00> : vector<2x128xf32>
      %204 = tpu.matmul %201, %203, %cst_218 {dimension_numbers = #tpu.dot_dimension_numbers<[1], [0], [0], [1], [0, 0, 1, 1], [], []>} : vector<2x128xbf16>, vector<128x128xbf16>, vector<2x128xf32> -> vector<2x128xf32>
      %205 = arith.addf %195, %204 : vector<2x128xf32>
      %c2_i32_219 = arith.constant 2 : i32
      %206 = arith.muli %c2_i32_219, %arg14 : i32
      %c1_i32_220 = arith.constant 1 : i32
      %207 = arith.addi %206, %c1_i32_220 : i32
      %c2_i32_221 = arith.constant 2 : i32
      %208 = arith.addi %207, %c2_i32_221 : i32
      %c0_222 = arith.constant 0 : index
      %209 = arith.index_cast %208 : i32 to index
      %c1_223 = arith.constant 1 : index
      %c0_224 = arith.constant 0 : index
      %210 = vector.load %arg13[%c0_222, %209, %c1_223, %c0_224] : memref<2x8x4x128xbf16, #tpu.memory_space<vmem>>, vector<1x1x2x128xbf16>
      %211 = vector.shape_cast %210 : vector<1x1x2x128xbf16> to vector<2x128xbf16>
      %c5_225 = arith.constant 5 : index
      %c0_226 = arith.constant 0 : index
      %c0_227 = arith.constant 0 : index
      %212 = vector.load %arg8[%c5_225, %c0_226, %c0_227] : memref<9x128x128xbf16, #tpu.memory_space<vmem>>, vector<1x128x128xbf16>
      %213 = vector.shape_cast %212 : vector<1x128x128xbf16> to vector<128x128xbf16>
      %cst_228 = arith.constant dense<0.000000e+00> : vector<2x128xf32>
      %214 = tpu.matmul %211, %213, %cst_228 {dimension_numbers = #tpu.dot_dimension_numbers<[1], [0], [0], [1], [0, 0, 1, 1], [], []>} : vector<2x128xbf16>, vector<128x128xbf16>, vector<2x128xf32> -> vector<2x128xf32>
      %215 = arith.addf %205, %214 : vector<2x128xf32>
      %c2_i32_229 = arith.constant 2 : i32
      %216 = arith.muli %c2_i32_229, %arg14 : i32
      %c1_i32_230 = arith.constant 1 : i32
      %217 = arith.addi %216, %c1_i32_230 : i32
      %c0_i32_231 = arith.constant 0 : i32
      %218 = arith.addi %217, %c0_i32_231 : i32
      %c1_232 = arith.constant 1 : index
      %219 = arith.index_cast %218 : i32 to index
      %c1_233 = arith.constant 1 : index
      %c0_234 = arith.constant 0 : index
      %220 = vector.load %arg13[%c1_232, %219, %c1_233, %c0_234] : memref<2x8x4x128xbf16, #tpu.memory_space<vmem>>, vector<1x1x2x128xbf16>
      %221 = vector.shape_cast %220 : vector<1x1x2x128xbf16> to vector<2x128xbf16>
      %c6_235 = arith.constant 6 : index
      %c0_236 = arith.constant 0 : index
      %c0_237 = arith.constant 0 : index
      %222 = vector.load %arg8[%c6_235, %c0_236, %c0_237] : memref<9x128x128xbf16, #tpu.memory_space<vmem>>, vector<1x128x128xbf16>
      %223 = vector.shape_cast %222 : vector<1x128x128xbf16> to vector<128x128xbf16>
      %cst_238 = arith.constant dense<0.000000e+00> : vector<2x128xf32>
      %224 = tpu.matmul %221, %223, %cst_238 {dimension_numbers = #tpu.dot_dimension_numbers<[1], [0], [0], [1], [0, 0, 1, 1], [], []>} : vector<2x128xbf16>, vector<128x128xbf16>, vector<2x128xf32> -> vector<2x128xf32>
      %225 = arith.addf %215, %224 : vector<2x128xf32>
      %c2_i32_239 = arith.constant 2 : i32
      %226 = arith.muli %c2_i32_239, %arg14 : i32
      %c1_i32_240 = arith.constant 1 : i32
      %227 = arith.addi %226, %c1_i32_240 : i32
      %c1_i32_241 = arith.constant 1 : i32
      %228 = arith.addi %227, %c1_i32_241 : i32
      %c1_242 = arith.constant 1 : index
      %229 = arith.index_cast %228 : i32 to index
      %c1_243 = arith.constant 1 : index
      %c0_244 = arith.constant 0 : index
      %230 = vector.load %arg13[%c1_242, %229, %c1_243, %c0_244] : memref<2x8x4x128xbf16, #tpu.memory_space<vmem>>, vector<1x1x2x128xbf16>
      %231 = vector.shape_cast %230 : vector<1x1x2x128xbf16> to vector<2x128xbf16>
      %c7_245 = arith.constant 7 : index
      %c0_246 = arith.constant 0 : index
      %c0_247 = arith.constant 0 : index
      %232 = vector.load %arg8[%c7_245, %c0_246, %c0_247] : memref<9x128x128xbf16, #tpu.memory_space<vmem>>, vector<1x128x128xbf16>
      %233 = vector.shape_cast %232 : vector<1x128x128xbf16> to vector<128x128xbf16>
      %cst_248 = arith.constant dense<0.000000e+00> : vector<2x128xf32>
      %234 = tpu.matmul %231, %233, %cst_248 {dimension_numbers = #tpu.dot_dimension_numbers<[1], [0], [0], [1], [0, 0, 1, 1], [], []>} : vector<2x128xbf16>, vector<128x128xbf16>, vector<2x128xf32> -> vector<2x128xf32>
      %235 = arith.addf %225, %234 : vector<2x128xf32>
      %c2_i32_249 = arith.constant 2 : i32
      %236 = arith.muli %c2_i32_249, %arg14 : i32
      %c1_i32_250 = arith.constant 1 : i32
      %237 = arith.addi %236, %c1_i32_250 : i32
      %c2_i32_251 = arith.constant 2 : i32
      %238 = arith.addi %237, %c2_i32_251 : i32
      %c1_252 = arith.constant 1 : index
      %239 = arith.index_cast %238 : i32 to index
      %c1_253 = arith.constant 1 : index
      %c0_254 = arith.constant 0 : index
      %240 = vector.load %arg13[%c1_252, %239, %c1_253, %c0_254] : memref<2x8x4x128xbf16, #tpu.memory_space<vmem>>, vector<1x1x2x128xbf16>
      %241 = vector.shape_cast %240 : vector<1x1x2x128xbf16> to vector<2x128xbf16>
      %c8_255 = arith.constant 8 : index
      %c0_256 = arith.constant 0 : index
      %c0_257 = arith.constant 0 : index
      %242 = vector.load %arg8[%c8_255, %c0_256, %c0_257] : memref<9x128x128xbf16, #tpu.memory_space<vmem>>, vector<1x128x128xbf16>
      %243 = vector.shape_cast %242 : vector<1x128x128xbf16> to vector<128x128xbf16>
      %cst_258 = arith.constant dense<0.000000e+00> : vector<2x128xf32>
      %244 = tpu.matmul %241, %243, %cst_258 {dimension_numbers = #tpu.dot_dimension_numbers<[1], [0], [0], [1], [0, 0, 1, 1], [], []>} : vector<2x128xbf16>, vector<128x128xbf16>, vector<2x128xf32> -> vector<2x128xf32>
      %245 = arith.addf %235, %244 : vector<2x128xf32>
      %246 = vector.broadcast %58 : vector<1x128xf32> to vector<2x128xf32>
      %247 = arith.addf %245, %246 : vector<2x128xf32>
      %cst_259 = arith.constant 0.000000e+00 : f32
      %248 = vector.broadcast %cst_259 : f32 to vector<2x128xf32>
      %249 = arith.maximumf %247, %248 : vector<2x128xf32>
      %250 = arith.maximumf %154, %249 : vector<2x128xf32>
      %cst_260 = arith.constant 0.000000e+00 : f32
      %251 = vector.broadcast %cst_260 : f32 to vector<2x128xf32>
      %c2_i32_261 = arith.constant 2 : i32
      %252 = arith.muli %c2_i32_261, %arg14 : i32
      %c0_i32_262 = arith.constant 0 : i32
      %253 = arith.addi %252, %c0_i32_262 : i32
      %c0_i32_263 = arith.constant 0 : i32
      %254 = arith.addi %253, %c0_i32_263 : i32
      %c0_264 = arith.constant 0 : index
      %255 = arith.index_cast %254 : i32 to index
      %c1_265 = arith.constant 1 : index
      %c0_266 = arith.constant 0 : index
      %256 = vector.load %arg13[%c0_264, %255, %c1_265, %c0_266] : memref<2x8x4x128xbf16, #tpu.memory_space<vmem>>, vector<1x1x2x128xbf16>
      %257 = vector.shape_cast %256 : vector<1x1x2x128xbf16> to vector<2x128xbf16>
      %c0_267 = arith.constant 0 : index
      %c0_268 = arith.constant 0 : index
      %c0_269 = arith.constant 0 : index
      %258 = vector.load %arg8[%c0_267, %c0_268, %c0_269] : memref<9x128x128xbf16, #tpu.memory_space<vmem>>, vector<1x128x128xbf16>
      %259 = vector.shape_cast %258 : vector<1x128x128xbf16> to vector<128x128xbf16>
      %cst_270 = arith.constant dense<0.000000e+00> : vector<2x128xf32>
      %260 = tpu.matmul %257, %259, %cst_270 {dimension_numbers = #tpu.dot_dimension_numbers<[1], [0], [0], [1], [0, 0, 1, 1], [], []>} : vector<2x128xbf16>, vector<128x128xbf16>, vector<2x128xf32> -> vector<2x128xf32>
      %261 = arith.addf %251, %260 : vector<2x128xf32>
      %c2_i32_271 = arith.constant 2 : i32
      %262 = arith.muli %c2_i32_271, %arg14 : i32
      %c0_i32_272 = arith.constant 0 : i32
      %263 = arith.addi %262, %c0_i32_272 : i32
      %c1_i32_273 = arith.constant 1 : i32
      %264 = arith.addi %263, %c1_i32_273 : i32
      %c0_274 = arith.constant 0 : index
      %265 = arith.index_cast %264 : i32 to index
      %c1_275 = arith.constant 1 : index
      %c0_276 = arith.constant 0 : index
      %266 = vector.load %arg13[%c0_274, %265, %c1_275, %c0_276] : memref<2x8x4x128xbf16, #tpu.memory_space<vmem>>, vector<1x1x2x128xbf16>
      %267 = vector.shape_cast %266 : vector<1x1x2x128xbf16> to vector<2x128xbf16>
      %c1_277 = arith.constant 1 : index
      %c0_278 = arith.constant 0 : index
      %c0_279 = arith.constant 0 : index
      %268 = vector.load %arg8[%c1_277, %c0_278, %c0_279] : memref<9x128x128xbf16, #tpu.memory_space<vmem>>, vector<1x128x128xbf16>
      %269 = vector.shape_cast %268 : vector<1x128x128xbf16> to vector<128x128xbf16>
      %cst_280 = arith.constant dense<0.000000e+00> : vector<2x128xf32>
      %270 = tpu.matmul %267, %269, %cst_280 {dimension_numbers = #tpu.dot_dimension_numbers<[1], [0], [0], [1], [0, 0, 1, 1], [], []>} : vector<2x128xbf16>, vector<128x128xbf16>, vector<2x128xf32> -> vector<2x128xf32>
      %271 = arith.addf %261, %270 : vector<2x128xf32>
      %c2_i32_281 = arith.constant 2 : i32
      %272 = arith.muli %c2_i32_281, %arg14 : i32
      %c0_i32_282 = arith.constant 0 : i32
      %273 = arith.addi %272, %c0_i32_282 : i32
      %c2_i32_283 = arith.constant 2 : i32
      %274 = arith.addi %273, %c2_i32_283 : i32
      %c0_284 = arith.constant 0 : index
      %275 = arith.index_cast %274 : i32 to index
      %c1_285 = arith.constant 1 : index
      %c0_286 = arith.constant 0 : index
      %276 = vector.load %arg13[%c0_284, %275, %c1_285, %c0_286] : memref<2x8x4x128xbf16, #tpu.memory_space<vmem>>, vector<1x1x2x128xbf16>
      %277 = vector.shape_cast %276 : vector<1x1x2x128xbf16> to vector<2x128xbf16>
      %c2_287 = arith.constant 2 : index
      %c0_288 = arith.constant 0 : index
      %c0_289 = arith.constant 0 : index
      %278 = vector.load %arg8[%c2_287, %c0_288, %c0_289] : memref<9x128x128xbf16, #tpu.memory_space<vmem>>, vector<1x128x128xbf16>
      %279 = vector.shape_cast %278 : vector<1x128x128xbf16> to vector<128x128xbf16>
      %cst_290 = arith.constant dense<0.000000e+00> : vector<2x128xf32>
      %280 = tpu.matmul %277, %279, %cst_290 {dimension_numbers = #tpu.dot_dimension_numbers<[1], [0], [0], [1], [0, 0, 1, 1], [], []>} : vector<2x128xbf16>, vector<128x128xbf16>, vector<2x128xf32> -> vector<2x128xf32>
      %281 = arith.addf %271, %280 : vector<2x128xf32>
      %c2_i32_291 = arith.constant 2 : i32
      %282 = arith.muli %c2_i32_291, %arg14 : i32
      %c0_i32_292 = arith.constant 0 : i32
      %283 = arith.addi %282, %c0_i32_292 : i32
      %c0_i32_293 = arith.constant 0 : i32
      %284 = arith.addi %283, %c0_i32_293 : i32
      %c1_294 = arith.constant 1 : index
      %285 = arith.index_cast %284 : i32 to index
      %c1_295 = arith.constant 1 : index
      %c0_296 = arith.constant 0 : index
      %286 = vector.load %arg13[%c1_294, %285, %c1_295, %c0_296] : memref<2x8x4x128xbf16, #tpu.memory_space<vmem>>, vector<1x1x2x128xbf16>
      %287 = vector.shape_cast %286 : vector<1x1x2x128xbf16> to vector<2x128xbf16>
      %c3_297 = arith.constant 3 : index
      %c0_298 = arith.constant 0 : index
      %c0_299 = arith.constant 0 : index
      %288 = vector.load %arg8[%c3_297, %c0_298, %c0_299] : memref<9x128x128xbf16, #tpu.memory_space<vmem>>, vector<1x128x128xbf16>
      %289 = vector.shape_cast %288 : vector<1x128x128xbf16> to vector<128x128xbf16>
      %cst_300 = arith.constant dense<0.000000e+00> : vector<2x128xf32>
      %290 = tpu.matmul %287, %289, %cst_300 {dimension_numbers = #tpu.dot_dimension_numbers<[1], [0], [0], [1], [0, 0, 1, 1], [], []>} : vector<2x128xbf16>, vector<128x128xbf16>, vector<2x128xf32> -> vector<2x128xf32>
      %291 = arith.addf %281, %290 : vector<2x128xf32>
      %c2_i32_301 = arith.constant 2 : i32
      %292 = arith.muli %c2_i32_301, %arg14 : i32
      %c0_i32_302 = arith.constant 0 : i32
      %293 = arith.addi %292, %c0_i32_302 : i32
      %c1_i32_303 = arith.constant 1 : i32
      %294 = arith.addi %293, %c1_i32_303 : i32
      %c1_304 = arith.constant 1 : index
      %295 = arith.index_cast %294 : i32 to index
      %c1_305 = arith.constant 1 : index
      %c0_306 = arith.constant 0 : index
      %296 = vector.load %arg13[%c1_304, %295, %c1_305, %c0_306] : memref<2x8x4x128xbf16, #tpu.memory_space<vmem>>, vector<1x1x2x128xbf16>
      %297 = vector.shape_cast %296 : vector<1x1x2x128xbf16> to vector<2x128xbf16>
      %c4_307 = arith.constant 4 : index
      %c0_308 = arith.constant 0 : index
      %c0_309 = arith.constant 0 : index
      %298 = vector.load %arg8[%c4_307, %c0_308, %c0_309] : memref<9x128x128xbf16, #tpu.memory_space<vmem>>, vector<1x128x128xbf16>
      %299 = vector.shape_cast %298 : vector<1x128x128xbf16> to vector<128x128xbf16>
      %cst_310 = arith.constant dense<0.000000e+00> : vector<2x128xf32>
      %300 = tpu.matmul %297, %299, %cst_310 {dimension_numbers = #tpu.dot_dimension_numbers<[1], [0], [0], [1], [0, 0, 1, 1], [], []>} : vector<2x128xbf16>, vector<128x128xbf16>, vector<2x128xf32> -> vector<2x128xf32>
      %301 = arith.addf %291, %300 : vector<2x128xf32>
      %c2_i32_311 = arith.constant 2 : i32
      %302 = arith.muli %c2_i32_311, %arg14 : i32
      %c0_i32_312 = arith.constant 0 : i32
      %303 = arith.addi %302, %c0_i32_312 : i32
      %c2_i32_313 = arith.constant 2 : i32
      %304 = arith.addi %303, %c2_i32_313 : i32
      %c1_314 = arith.constant 1 : index
      %305 = arith.index_cast %304 : i32 to index
      %c1_315 = arith.constant 1 : index
      %c0_316 = arith.constant 0 : index
      %306 = vector.load %arg13[%c1_314, %305, %c1_315, %c0_316] : memref<2x8x4x128xbf16, #tpu.memory_space<vmem>>, vector<1x1x2x128xbf16>
      %307 = vector.shape_cast %306 : vector<1x1x2x128xbf16> to vector<2x128xbf16>
      %c5_317 = arith.constant 5 : index
      %c0_318 = arith.constant 0 : index
      %c0_319 = arith.constant 0 : index
      %308 = vector.load %arg8[%c5_317, %c0_318, %c0_319] : memref<9x128x128xbf16, #tpu.memory_space<vmem>>, vector<1x128x128xbf16>
      %309 = vector.shape_cast %308 : vector<1x128x128xbf16> to vector<128x128xbf16>
      %cst_320 = arith.constant dense<0.000000e+00> : vector<2x128xf32>
      %310 = tpu.matmul %307, %309, %cst_320 {dimension_numbers = #tpu.dot_dimension_numbers<[1], [0], [0], [1], [0, 0, 1, 1], [], []>} : vector<2x128xbf16>, vector<128x128xbf16>, vector<2x128xf32> -> vector<2x128xf32>
      %311 = arith.addf %301, %310 : vector<2x128xf32>
      %c2_i32_321 = arith.constant 2 : i32
      %312 = arith.muli %c2_i32_321, %arg14 : i32
      %c0_i32_322 = arith.constant 0 : i32
      %313 = arith.addi %312, %c0_i32_322 : i32
      %c0_i32_323 = arith.constant 0 : i32
      %314 = arith.addi %313, %c0_i32_323 : i32
      %c0_324 = arith.constant 0 : index
      %315 = arith.index_cast %314 : i32 to index
      %c2_325 = arith.constant 2 : index
      %c0_326 = arith.constant 0 : index
      %316 = vector.load %arg13[%c0_324, %315, %c2_325, %c0_326] : memref<2x8x4x128xbf16, #tpu.memory_space<vmem>>, vector<1x1x2x128xbf16>
      %317 = vector.shape_cast %316 : vector<1x1x2x128xbf16> to vector<2x128xbf16>
      %c6_327 = arith.constant 6 : index
      %c0_328 = arith.constant 0 : index
      %c0_329 = arith.constant 0 : index
      %318 = vector.load %arg8[%c6_327, %c0_328, %c0_329] : memref<9x128x128xbf16, #tpu.memory_space<vmem>>, vector<1x128x128xbf16>
      %319 = vector.shape_cast %318 : vector<1x128x128xbf16> to vector<128x128xbf16>
      %cst_330 = arith.constant dense<0.000000e+00> : vector<2x128xf32>
      %320 = tpu.matmul %317, %319, %cst_330 {dimension_numbers = #tpu.dot_dimension_numbers<[1], [0], [0], [1], [0, 0, 1, 1], [], []>} : vector<2x128xbf16>, vector<128x128xbf16>, vector<2x128xf32> -> vector<2x128xf32>
      %321 = arith.addf %311, %320 : vector<2x128xf32>
      %c2_i32_331 = arith.constant 2 : i32
      %322 = arith.muli %c2_i32_331, %arg14 : i32
      %c0_i32_332 = arith.constant 0 : i32
      %323 = arith.addi %322, %c0_i32_332 : i32
      %c1_i32_333 = arith.constant 1 : i32
      %324 = arith.addi %323, %c1_i32_333 : i32
      %c0_334 = arith.constant 0 : index
      %325 = arith.index_cast %324 : i32 to index
      %c2_335 = arith.constant 2 : index
      %c0_336 = arith.constant 0 : index
      %326 = vector.load %arg13[%c0_334, %325, %c2_335, %c0_336] : memref<2x8x4x128xbf16, #tpu.memory_space<vmem>>, vector<1x1x2x128xbf16>
      %327 = vector.shape_cast %326 : vector<1x1x2x128xbf16> to vector<2x128xbf16>
      %c7_337 = arith.constant 7 : index
      %c0_338 = arith.constant 0 : index
      %c0_339 = arith.constant 0 : index
      %328 = vector.load %arg8[%c7_337, %c0_338, %c0_339] : memref<9x128x128xbf16, #tpu.memory_space<vmem>>, vector<1x128x128xbf16>
      %329 = vector.shape_cast %328 : vector<1x128x128xbf16> to vector<128x128xbf16>
      %cst_340 = arith.constant dense<0.000000e+00> : vector<2x128xf32>
      %330 = tpu.matmul %327, %329, %cst_340 {dimension_numbers = #tpu.dot_dimension_numbers<[1], [0], [0], [1], [0, 0, 1, 1], [], []>} : vector<2x128xbf16>, vector<128x128xbf16>, vector<2x128xf32> -> vector<2x128xf32>
      %331 = arith.addf %321, %330 : vector<2x128xf32>
      %c2_i32_341 = arith.constant 2 : i32
      %332 = arith.muli %c2_i32_341, %arg14 : i32
      %c0_i32_342 = arith.constant 0 : i32
      %333 = arith.addi %332, %c0_i32_342 : i32
      %c2_i32_343 = arith.constant 2 : i32
      %334 = arith.addi %333, %c2_i32_343 : i32
      %c0_344 = arith.constant 0 : index
      %335 = arith.index_cast %334 : i32 to index
      %c2_345 = arith.constant 2 : index
      %c0_346 = arith.constant 0 : index
      %336 = vector.load %arg13[%c0_344, %335, %c2_345, %c0_346] : memref<2x8x4x128xbf16, #tpu.memory_space<vmem>>, vector<1x1x2x128xbf16>
      %337 = vector.shape_cast %336 : vector<1x1x2x128xbf16> to vector<2x128xbf16>
      %c8_347 = arith.constant 8 : index
      %c0_348 = arith.constant 0 : index
      %c0_349 = arith.constant 0 : index
      %338 = vector.load %arg8[%c8_347, %c0_348, %c0_349] : memref<9x128x128xbf16, #tpu.memory_space<vmem>>, vector<1x128x128xbf16>
      %339 = vector.shape_cast %338 : vector<1x128x128xbf16> to vector<128x128xbf16>
      %cst_350 = arith.constant dense<0.000000e+00> : vector<2x128xf32>
      %340 = tpu.matmul %337, %339, %cst_350 {dimension_numbers = #tpu.dot_dimension_numbers<[1], [0], [0], [1], [0, 0, 1, 1], [], []>} : vector<2x128xbf16>, vector<128x128xbf16>, vector<2x128xf32> -> vector<2x128xf32>
      %341 = arith.addf %331, %340 : vector<2x128xf32>
      %342 = vector.broadcast %58 : vector<1x128xf32> to vector<2x128xf32>
      %343 = arith.addf %341, %342 : vector<2x128xf32>
      %cst_351 = arith.constant 0.000000e+00 : f32
      %344 = vector.broadcast %cst_351 : f32 to vector<2x128xf32>
      %345 = arith.maximumf %343, %344 : vector<2x128xf32>
      %346 = arith.maximumf %250, %345 : vector<2x128xf32>
      %cst_352 = arith.constant 0.000000e+00 : f32
      %347 = vector.broadcast %cst_352 : f32 to vector<2x128xf32>
      %c2_i32_353 = arith.constant 2 : i32
      %348 = arith.muli %c2_i32_353, %arg14 : i32
      %c1_i32_354 = arith.constant 1 : i32
      %349 = arith.addi %348, %c1_i32_354 : i32
      %c0_i32_355 = arith.constant 0 : i32
      %350 = arith.addi %349, %c0_i32_355 : i32
      %c0_356 = arith.constant 0 : index
      %351 = arith.index_cast %350 : i32 to index
      %c1_357 = arith.constant 1 : index
      %c0_358 = arith.constant 0 : index
      %352 = vector.load %arg13[%c0_356, %351, %c1_357, %c0_358] : memref<2x8x4x128xbf16, #tpu.memory_space<vmem>>, vector<1x1x2x128xbf16>
      %353 = vector.shape_cast %352 : vector<1x1x2x128xbf16> to vector<2x128xbf16>
      %c0_359 = arith.constant 0 : index
      %c0_360 = arith.constant 0 : index
      %c0_361 = arith.constant 0 : index
      %354 = vector.load %arg8[%c0_359, %c0_360, %c0_361] : memref<9x128x128xbf16, #tpu.memory_space<vmem>>, vector<1x128x128xbf16>
      %355 = vector.shape_cast %354 : vector<1x128x128xbf16> to vector<128x128xbf16>
      %cst_362 = arith.constant dense<0.000000e+00> : vector<2x128xf32>
      %356 = tpu.matmul %353, %355, %cst_362 {dimension_numbers = #tpu.dot_dimension_numbers<[1], [0], [0], [1], [0, 0, 1, 1], [], []>} : vector<2x128xbf16>, vector<128x128xbf16>, vector<2x128xf32> -> vector<2x128xf32>
      %357 = arith.addf %347, %356 : vector<2x128xf32>
      %c2_i32_363 = arith.constant 2 : i32
      %358 = arith.muli %c2_i32_363, %arg14 : i32
      %c1_i32_364 = arith.constant 1 : i32
      %359 = arith.addi %358, %c1_i32_364 : i32
      %c1_i32_365 = arith.constant 1 : i32
      %360 = arith.addi %359, %c1_i32_365 : i32
      %c0_366 = arith.constant 0 : index
      %361 = arith.index_cast %360 : i32 to index
      %c1_367 = arith.constant 1 : index
      %c0_368 = arith.constant 0 : index
      %362 = vector.load %arg13[%c0_366, %361, %c1_367, %c0_368] : memref<2x8x4x128xbf16, #tpu.memory_space<vmem>>, vector<1x1x2x128xbf16>
      %363 = vector.shape_cast %362 : vector<1x1x2x128xbf16> to vector<2x128xbf16>
      %c1_369 = arith.constant 1 : index
      %c0_370 = arith.constant 0 : index
      %c0_371 = arith.constant 0 : index
      %364 = vector.load %arg8[%c1_369, %c0_370, %c0_371] : memref<9x128x128xbf16, #tpu.memory_space<vmem>>, vector<1x128x128xbf16>
      %365 = vector.shape_cast %364 : vector<1x128x128xbf16> to vector<128x128xbf16>
      %cst_372 = arith.constant dense<0.000000e+00> : vector<2x128xf32>
      %366 = tpu.matmul %363, %365, %cst_372 {dimension_numbers = #tpu.dot_dimension_numbers<[1], [0], [0], [1], [0, 0, 1, 1], [], []>} : vector<2x128xbf16>, vector<128x128xbf16>, vector<2x128xf32> -> vector<2x128xf32>
      %367 = arith.addf %357, %366 : vector<2x128xf32>
      %c2_i32_373 = arith.constant 2 : i32
      %368 = arith.muli %c2_i32_373, %arg14 : i32
      %c1_i32_374 = arith.constant 1 : i32
      %369 = arith.addi %368, %c1_i32_374 : i32
      %c2_i32_375 = arith.constant 2 : i32
      %370 = arith.addi %369, %c2_i32_375 : i32
      %c0_376 = arith.constant 0 : index
      %371 = arith.index_cast %370 : i32 to index
      %c1_377 = arith.constant 1 : index
      %c0_378 = arith.constant 0 : index
      %372 = vector.load %arg13[%c0_376, %371, %c1_377, %c0_378] : memref<2x8x4x128xbf16, #tpu.memory_space<vmem>>, vector<1x1x2x128xbf16>
      %373 = vector.shape_cast %372 : vector<1x1x2x128xbf16> to vector<2x128xbf16>
      %c2_379 = arith.constant 2 : index
      %c0_380 = arith.constant 0 : index
      %c0_381 = arith.constant 0 : index
      %374 = vector.load %arg8[%c2_379, %c0_380, %c0_381] : memref<9x128x128xbf16, #tpu.memory_space<vmem>>, vector<1x128x128xbf16>
      %375 = vector.shape_cast %374 : vector<1x128x128xbf16> to vector<128x128xbf16>
      %cst_382 = arith.constant dense<0.000000e+00> : vector<2x128xf32>
      %376 = tpu.matmul %373, %375, %cst_382 {dimension_numbers = #tpu.dot_dimension_numbers<[1], [0], [0], [1], [0, 0, 1, 1], [], []>} : vector<2x128xbf16>, vector<128x128xbf16>, vector<2x128xf32> -> vector<2x128xf32>
      %377 = arith.addf %367, %376 : vector<2x128xf32>
      %c2_i32_383 = arith.constant 2 : i32
      %378 = arith.muli %c2_i32_383, %arg14 : i32
      %c1_i32_384 = arith.constant 1 : i32
      %379 = arith.addi %378, %c1_i32_384 : i32
      %c0_i32_385 = arith.constant 0 : i32
      %380 = arith.addi %379, %c0_i32_385 : i32
      %c1_386 = arith.constant 1 : index
      %381 = arith.index_cast %380 : i32 to index
      %c1_387 = arith.constant 1 : index
      %c0_388 = arith.constant 0 : index
      %382 = vector.load %arg13[%c1_386, %381, %c1_387, %c0_388] : memref<2x8x4x128xbf16, #tpu.memory_space<vmem>>, vector<1x1x2x128xbf16>
      %383 = vector.shape_cast %382 : vector<1x1x2x128xbf16> to vector<2x128xbf16>
      %c3_389 = arith.constant 3 : index
      %c0_390 = arith.constant 0 : index
      %c0_391 = arith.constant 0 : index
      %384 = vector.load %arg8[%c3_389, %c0_390, %c0_391] : memref<9x128x128xbf16, #tpu.memory_space<vmem>>, vector<1x128x128xbf16>
      %385 = vector.shape_cast %384 : vector<1x128x128xbf16> to vector<128x128xbf16>
      %cst_392 = arith.constant dense<0.000000e+00> : vector<2x128xf32>
      %386 = tpu.matmul %383, %385, %cst_392 {dimension_numbers = #tpu.dot_dimension_numbers<[1], [0], [0], [1], [0, 0, 1, 1], [], []>} : vector<2x128xbf16>, vector<128x128xbf16>, vector<2x128xf32> -> vector<2x128xf32>
      %387 = arith.addf %377, %386 : vector<2x128xf32>
      %c2_i32_393 = arith.constant 2 : i32
      %388 = arith.muli %c2_i32_393, %arg14 : i32
      %c1_i32_394 = arith.constant 1 : i32
      %389 = arith.addi %388, %c1_i32_394 : i32
      %c1_i32_395 = arith.constant 1 : i32
      %390 = arith.addi %389, %c1_i32_395 : i32
      %c1_396 = arith.constant 1 : index
      %391 = arith.index_cast %390 : i32 to index
      %c1_397 = arith.constant 1 : index
      %c0_398 = arith.constant 0 : index
      %392 = vector.load %arg13[%c1_396, %391, %c1_397, %c0_398] : memref<2x8x4x128xbf16, #tpu.memory_space<vmem>>, vector<1x1x2x128xbf16>
      %393 = vector.shape_cast %392 : vector<1x1x2x128xbf16> to vector<2x128xbf16>
      %c4_399 = arith.constant 4 : index
      %c0_400 = arith.constant 0 : index
      %c0_401 = arith.constant 0 : index
      %394 = vector.load %arg8[%c4_399, %c0_400, %c0_401] : memref<9x128x128xbf16, #tpu.memory_space<vmem>>, vector<1x128x128xbf16>
      %395 = vector.shape_cast %394 : vector<1x128x128xbf16> to vector<128x128xbf16>
      %cst_402 = arith.constant dense<0.000000e+00> : vector<2x128xf32>
      %396 = tpu.matmul %393, %395, %cst_402 {dimension_numbers = #tpu.dot_dimension_numbers<[1], [0], [0], [1], [0, 0, 1, 1], [], []>} : vector<2x128xbf16>, vector<128x128xbf16>, vector<2x128xf32> -> vector<2x128xf32>
      %397 = arith.addf %387, %396 : vector<2x128xf32>
      %c2_i32_403 = arith.constant 2 : i32
      %398 = arith.muli %c2_i32_403, %arg14 : i32
      %c1_i32_404 = arith.constant 1 : i32
      %399 = arith.addi %398, %c1_i32_404 : i32
      %c2_i32_405 = arith.constant 2 : i32
      %400 = arith.addi %399, %c2_i32_405 : i32
      %c1_406 = arith.constant 1 : index
      %401 = arith.index_cast %400 : i32 to index
      %c1_407 = arith.constant 1 : index
      %c0_408 = arith.constant 0 : index
      %402 = vector.load %arg13[%c1_406, %401, %c1_407, %c0_408] : memref<2x8x4x128xbf16, #tpu.memory_space<vmem>>, vector<1x1x2x128xbf16>
      %403 = vector.shape_cast %402 : vector<1x1x2x128xbf16> to vector<2x128xbf16>
      %c5_409 = arith.constant 5 : index
      %c0_410 = arith.constant 0 : index
      %c0_411 = arith.constant 0 : index
      %404 = vector.load %arg8[%c5_409, %c0_410, %c0_411] : memref<9x128x128xbf16, #tpu.memory_space<vmem>>, vector<1x128x128xbf16>
      %405 = vector.shape_cast %404 : vector<1x128x128xbf16> to vector<128x128xbf16>
      %cst_412 = arith.constant dense<0.000000e+00> : vector<2x128xf32>
      %406 = tpu.matmul %403, %405, %cst_412 {dimension_numbers = #tpu.dot_dimension_numbers<[1], [0], [0], [1], [0, 0, 1, 1], [], []>} : vector<2x128xbf16>, vector<128x128xbf16>, vector<2x128xf32> -> vector<2x128xf32>
      %407 = arith.addf %397, %406 : vector<2x128xf32>
      %c2_i32_413 = arith.constant 2 : i32
      %408 = arith.muli %c2_i32_413, %arg14 : i32
      %c1_i32_414 = arith.constant 1 : i32
      %409 = arith.addi %408, %c1_i32_414 : i32
      %c0_i32_415 = arith.constant 0 : i32
      %410 = arith.addi %409, %c0_i32_415 : i32
      %c0_416 = arith.constant 0 : index
      %411 = arith.index_cast %410 : i32 to index
      %c2_417 = arith.constant 2 : index
      %c0_418 = arith.constant 0 : index
      %412 = vector.load %arg13[%c0_416, %411, %c2_417, %c0_418] : memref<2x8x4x128xbf16, #tpu.memory_space<vmem>>, vector<1x1x2x128xbf16>
      %413 = vector.shape_cast %412 : vector<1x1x2x128xbf16> to vector<2x128xbf16>
      %c6_419 = arith.constant 6 : index
      %c0_420 = arith.constant 0 : index
      %c0_421 = arith.constant 0 : index
      %414 = vector.load %arg8[%c6_419, %c0_420, %c0_421] : memref<9x128x128xbf16, #tpu.memory_space<vmem>>, vector<1x128x128xbf16>
      %415 = vector.shape_cast %414 : vector<1x128x128xbf16> to vector<128x128xbf16>
      %cst_422 = arith.constant dense<0.000000e+00> : vector<2x128xf32>
      %416 = tpu.matmul %413, %415, %cst_422 {dimension_numbers = #tpu.dot_dimension_numbers<[1], [0], [0], [1], [0, 0, 1, 1], [], []>} : vector<2x128xbf16>, vector<128x128xbf16>, vector<2x128xf32> -> vector<2x128xf32>
      %417 = arith.addf %407, %416 : vector<2x128xf32>
      %c2_i32_423 = arith.constant 2 : i32
      %418 = arith.muli %c2_i32_423, %arg14 : i32
      %c1_i32_424 = arith.constant 1 : i32
      %419 = arith.addi %418, %c1_i32_424 : i32
      %c1_i32_425 = arith.constant 1 : i32
      %420 = arith.addi %419, %c1_i32_425 : i32
      %c0_426 = arith.constant 0 : index
      %421 = arith.index_cast %420 : i32 to index
      %c2_427 = arith.constant 2 : index
      %c0_428 = arith.constant 0 : index
      %422 = vector.load %arg13[%c0_426, %421, %c2_427, %c0_428] : memref<2x8x4x128xbf16, #tpu.memory_space<vmem>>, vector<1x1x2x128xbf16>
      %423 = vector.shape_cast %422 : vector<1x1x2x128xbf16> to vector<2x128xbf16>
      %c7_429 = arith.constant 7 : index
      %c0_430 = arith.constant 0 : index
      %c0_431 = arith.constant 0 : index
      %424 = vector.load %arg8[%c7_429, %c0_430, %c0_431] : memref<9x128x128xbf16, #tpu.memory_space<vmem>>, vector<1x128x128xbf16>
      %425 = vector.shape_cast %424 : vector<1x128x128xbf16> to vector<128x128xbf16>
      %cst_432 = arith.constant dense<0.000000e+00> : vector<2x128xf32>
      %426 = tpu.matmul %423, %425, %cst_432 {dimension_numbers = #tpu.dot_dimension_numbers<[1], [0], [0], [1], [0, 0, 1, 1], [], []>} : vector<2x128xbf16>, vector<128x128xbf16>, vector<2x128xf32> -> vector<2x128xf32>
      %427 = arith.addf %417, %426 : vector<2x128xf32>
      %c2_i32_433 = arith.constant 2 : i32
      %428 = arith.muli %c2_i32_433, %arg14 : i32
      %c1_i32_434 = arith.constant 1 : i32
      %429 = arith.addi %428, %c1_i32_434 : i32
      %c2_i32_435 = arith.constant 2 : i32
      %430 = arith.addi %429, %c2_i32_435 : i32
      %c0_436 = arith.constant 0 : index
      %431 = arith.index_cast %430 : i32 to index
      %c2_437 = arith.constant 2 : index
      %c0_438 = arith.constant 0 : index
      %432 = vector.load %arg13[%c0_436, %431, %c2_437, %c0_438] : memref<2x8x4x128xbf16, #tpu.memory_space<vmem>>, vector<1x1x2x128xbf16>
      %433 = vector.shape_cast %432 : vector<1x1x2x128xbf16> to vector<2x128xbf16>
      %c8_439 = arith.constant 8 : index
      %c0_440 = arith.constant 0 : index
      %c0_441 = arith.constant 0 : index
      %434 = vector.load %arg8[%c8_439, %c0_440, %c0_441] : memref<9x128x128xbf16, #tpu.memory_space<vmem>>, vector<1x128x128xbf16>
      %435 = vector.shape_cast %434 : vector<1x128x128xbf16> to vector<128x128xbf16>
      %cst_442 = arith.constant dense<0.000000e+00> : vector<2x128xf32>
      %436 = tpu.matmul %433, %435, %cst_442 {dimension_numbers = #tpu.dot_dimension_numbers<[1], [0], [0], [1], [0, 0, 1, 1], [], []>} : vector<2x128xbf16>, vector<128x128xbf16>, vector<2x128xf32> -> vector<2x128xf32>
      %437 = arith.addf %427, %436 : vector<2x128xf32>
      %438 = vector.broadcast %58 : vector<1x128xf32> to vector<2x128xf32>
      %439 = arith.addf %437, %438 : vector<2x128xf32>
      %cst_443 = arith.constant 0.000000e+00 : f32
      %440 = vector.broadcast %cst_443 : f32 to vector<2x128xf32>
      %441 = arith.maximumf %439, %440 : vector<2x128xf32>
      %442 = arith.maximumf %346, %441 : vector<2x128xf32>
      %c0_444 = arith.constant 0 : index
      %443 = arith.index_cast %arg14 : i32 to index
      %c0_445 = arith.constant 0 : index
      %c0_446 = arith.constant 0 : index
      %444 = vector.load %arg10[%c0_444, %443, %c0_445, %c0_446] : memref<1x3x2x128xf32, #tpu.memory_space<vmem>>, vector<1x1x2x128xf32>
      %445 = vector.shape_cast %444 : vector<1x1x2x128xf32> to vector<2x128xf32>
      %446 = vector.shape_cast %442 : vector<2x128xf32> to vector<1x1x2x128xf32>
      tpu.vector_store %arg10[%c0_444, %443, %c0_445, %c0_446], %446 {strides = array<i32>} : memref<1x3x2x128xf32, #tpu.memory_space<vmem>>, vector<1x1x2x128xf32>,
    }
    %c3_i32_80 = arith.constant 3 : i32
    return
  }
  func.func @transform_0(%arg0: i32) -> (i32, i32, i32, i32, i32) {
    %c0_i32 = arith.constant 0 : i32
    %c0_i32_0 = arith.constant 0 : i32
    %c0_i32_1 = arith.constant 0 : i32
    %c0_i32_2 = arith.constant 0 : i32
    %c0_i32_3 = arith.constant 0 : i32
    return %arg0, %c0_i32, %c0_i32_0, %c0_i32_1, %c0_i32_2 : i32, i32, i32, i32, i32
  }
  func.func @transform_1(%arg0: i32) -> (i32, i32) {
    %c0_i32 = arith.constant 0 : i32
    %c0_i32_0 = arith.constant 0 : i32
    %c0_i32_1 = arith.constant 0 : i32
    return %c0_i32, %c0_i32_0 : i32, i32
  }
  func.func @transform_2(%arg0: i32) -> (i32, i32) {
    %c0_i32 = arith.constant 0 : i32
    %c0_i32_0 = arith.constant 0 : i32
    %c0_i32_1 = arith.constant 0 : i32
    return %c0_i32, %c0_i32_0 : i32, i32
  }
  func.func @transform_3(%arg0: i32) -> (i32, i32, i32) {
    %c0_i32 = arith.constant 0 : i32
    %c0_i32_0 = arith.constant 0 : i32
    %c0_i32_1 = arith.constant 0 : i32
    %c0_i32_2 = arith.constant 0 : i32
    return %c0_i32, %c0_i32_0, %c0_i32_1 : i32, i32, i32
  }
  func.func @transform_4(%arg0: i32) -> (i32, i32) {
    %c0_i32 = arith.constant 0 : i32
    %c0_i32_0 = arith.constant 0 : i32
    %c0_i32_1 = arith.constant 0 : i32
    return %c0_i32, %c0_i32_0 : i32, i32
  }
  func.func @transform_5(%arg0: i32) -> (i32, i32, i32) {
    %c0_i32 = arith.constant 0 : i32
    %c0_i32_0 = arith.constant 0 : i32
    %c0_i32_1 = arith.constant 0 : i32
    %c0_i32_2 = arith.constant 0 : i32
    return %c0_i32, %c0_i32_0, %c0_i32_1 : i32, i32, i32
  }
  func.func @transform_6(%arg0: i32) -> (i32, i32) {
    %c0_i32 = arith.constant 0 : i32
    %c0_i32_0 = arith.constant 0 : i32
    %c0_i32_1 = arith.constant 0 : i32
    return %c0_i32, %c0_i32_0 : i32, i32
  }
  func.func @transform_7(%arg0: i32) -> (i32, i32, i32) {
    %c0_i32 = arith.constant 0 : i32
    %c0_i32_0 = arith.constant 0 : i32
    %c0_i32_1 = arith.constant 0 : i32
    %c0_i32_2 = arith.constant 0 : i32
    return %c0_i32, %c0_i32_0, %c0_i32_1 : i32, i32, i32
  }
  func.func @transform_8(%arg0: i32) -> (i32, i32) {
    %c0_i32 = arith.constant 0 : i32
    %c0_i32_0 = arith.constant 0 : i32
    %c0_i32_1 = arith.constant 0 : i32
    return %c0_i32, %c0_i32_0 : i32, i32
  }
  func.func @transform_9(%arg0: i32) -> (i32, i32, i32, i32) {
    %c0_i32 = arith.constant 0 : i32
    %c0_i32_0 = arith.constant 0 : i32
    %c0_i32_1 = arith.constant 0 : i32
    %c0_i32_2 = arith.constant 0 : i32
    return %arg0, %c0_i32, %c0_i32_0, %c0_i32_1 : i32, i32, i32, i32
  }
}

</mosaic_0001>

<bundles_post_ra>
// kernel: tpu_custom_call.1
= control target key start
LH: loop header
LB: loop body
LE: loop exit
PB: predicated region body
PF: predicated region fallthrough
CT: control target
= control target key end

     0   :  { %s15836_s0 = inlined_call_operand.vmem [shape: f32[2,4,15,4,1], index: 0, kind: input, shape index: {}]   ;;  %s15837_s1 = inlined_call_operand.vmem [shape: f32[9,64], index: 1, kind: input, shape index: {}]   ;;  %s15838_s2 = inlined_call_operand.vmem [shape: f32[1,64], index: 2, kind: input, shape index: {}]   ;;  %s15839_s3 = inlined_call_operand.vmem [shape: bf16[9,64,64], index: 3, kind: input, shape index: {}]   ;;  %s15840_s4 = inlined_call_operand.vmem [shape: f32[1,64], index: 4, kind: input, shape index: {}]   ;;  %s15841_s5 = inlined_call_operand.hbm [shape: bf16[9,64,128], index: 5, kind: input, shape index: {}]   ;;  %s15842_s6 = inlined_call_operand.vmem [shape: f32[1,128], index: 6, kind: input, shape index: {}]   ;;  %s15843_s7 = inlined_call_operand.hbm [shape: bf16[9,128,128], index: 7, kind: input, shape index: {}]   ;;  %s15844_s8 = inlined_call_operand.vmem [shape: f32[1,128], index: 8, kind: input, shape index: {}]   ;;  %s15845_s9 = inlined_call_operand.hbm [shape: f32[2,3,2,128], index: 9, kind: output, shape index: {}]  }
   0x1   :  { %15897 = sst [smem:[#allocation34_spill]] %s15841_s5 }
   0x2   :  { %14 = vsyncpa [#allocation6], 0 }
   0x3   :  { %15 = vsyncpa [#allocation9], 0 }
   0x4   :  { %16 = vsyncpa [#allocation7], 0 }
   0x5   :  { %18 = vsyncpa [#allocation7 + $0x1], 0  ;;  %s13080_s30 = smov 0   ;;  %s13082_s10 = smov 0  }
   0x6   :  { %s13084_s11 = smov 0   ;;  %s13086_s12 = smov 0  }
   0x7 LB: > { %s13101_s13 = sadd.s32 4294967295, %s12997_s12   ;;  %s9182_s14 = sadd.s32 4294967294, %s12997_s12   ;;  %s12997_s12 = sphi %s13086_s12, %s15982_s12   ;;  %s12993_s11 = sphi %s13084_s11, %s15981_s11   ;;  %s12989_s10 = sphi %s13082_s10, %s15980_s10   ;;  %s12985_s30 = sphi %s13080_s30, %s15979_s30  }
   0x8   : > { %s13105_s15 = sadd.s32 1, %s12997_s12   ;;  %s225_s16 = sadd.s32 1, %s12993_s11 }
   0x9   : > { %s222_s17 = ssub.s32 %s12997_s12, %s13105_s15  ;;  %p235_p0 = scmp.ne.s32.totalorder %s12993_s11, %s12989_s10 }
   0xa   : > { %p223_p1 = scmp.eq.s32.totalorder %s222_s17, 0  ;;  %p236_p2 = scmp.eq.s32.totalorder %s13101_s13, 1 }
   0xb   : > { %p241_p3 = scmp.ne.s32.totalorder %s12989_s10, %s12985_s30  ;;  %p242_p4 = scmp.eq.s32.totalorder %s9182_s14, 1 }
   0xc   : > { %s13116_s18 = scalar_select %p223_p1, %s12993_s11, %s225_s16  }
   0xd   : > { %p13118_p5 = por %p236_p2, %p235_p0  ;;  %p13122_p6 = por %p242_p4, %p241_p3 }
   0xe   : > { %p9183_p7 = scmp.ge.s32.totalorder %s12997_s12, 1  ;;  %p249_p8 = scmp.lt.s32.totalorder %s12997_s12, 3 }
   0xf   : > { %s15899_s20 = scalar_select %p13122_p6, 1, 0 }
  0x10   : > { %p15846_p9 = scmp.eq.s32.totalorder %s13101_s13, 0  ;;  %p13129_p10 = pnand %p9183_p7, %p249_p8 }
  0x11   : > { %s13015_s22 = smov [#allocation5]   ;;  %s13016_s25 = smov [#allocation8]  }
  0x12   : > { %s273_s23 = sshll.u32 %s13015_s22, 4  ;;  %p12473_p11 = pneg %p13129_p10  ;;  %s274_s23 = int_to_ptr.vmem [resolvable:$true] %s273_s23 }
  0x13   : > { %s289_s26 = sshll.u32 %s13016_s25, 4  ;;  %s12872_s27 = scalar_lea.vmem %s274_s23, 4608  ;;  %s290_s26 = int_to_ptr.vmem [resolvable:$true] %s289_s26 }
  0x14   : > { %p13137_p12 = pnand %p15846_p9, %p12473_p11  ;;  %p12873_p0 = scmp.ne.s32.totalorder %s274_s23, %s12872_s27 }
  0x15   : > { %p12880_p3 = scmp.lt.s32.totalorder %s274_s23, %s274_s23  ;;  %p12881_p4 = scmp.lt.s32.totalorder %s12872_s27, %s12872_s27 }
  0x16   : > { %p12863_p13 = pneg %p13137_p12 }
  0x17   : > { %p12882_p7 = por %p12881_p4, %p12880_p3 }
  0x18   : > { %p12875_p1 = pnand %p12873_p0, %p12863_p13 }
  0x1a   : > { %p12876_p2 = pneg %p12875_p1 }
  0x1c   : > { %p12883_p8 = pnand %p12882_p7, %p12876_p2 }
  0x1e   : > { %12886 = shalt.err (!%p12883_p8)
}
  0x1f   : > { %s13017_s28 = smov 64   ;;  %s13018_s29 = smov 4  }
  0x20   : > { %s15902_s5 = sld [smem:[#allocation34_spill]]  ;;  %s12898_s17 = scalar_lea.vmem %s290_s26, 9216 }
  0x21   : > { %p12899_p11 = scmp.ne.s32.totalorder %s290_s26, %s12898_s17  ;;  %p12906_p9 = scmp.lt.s32.totalorder %s290_s26, %s290_s26 }
  0x22   : > { %p12907_p6 = scmp.lt.s32.totalorder %s12898_s17, %s12898_s17 }
  0x23   : > { %p12901_p0 = pnand %p12899_p11, %p12863_p13 }
  0x24   : > { %p12908_p3 = por %p12907_p6, %p12906_p9 }
  0x25   : > { %p12902_p1 = pneg %p12901_p0 }
  0x26   : > { %12476 = dma.hbm_to_vmem [thread:$0]  (!%p13137_p12), %s15902_s5, 4608, %s274_s23, [#allocation6], %s13017_s28, %s13017_s28, %s13018_s29  }
  0x27   : > { %p12909_p2 = pnand %p12908_p3, %p12902_p1 }
  0x29   : > { %12912 = shalt.err (!%p12909_p2)
}
  0x2a   : > { %12479 = dma.hbm_to_vmem [thread:$0]  (!%p13137_p12), %s15843_s7, 9216, %s290_s26, [#allocation9], %s13017_s28, %s13017_s28, %s13018_s29  }
  0x2b   : > { %316 = sbr.rel (%p13129_p10) target bundleno = 2208 (0x8a0), region = 56 }
  0x30   : > { %p15903_p4 = scmp.eq.s32.totalorder %s13101_s13, 0 }
  0x32   : > { %12972 = dma.done.wait (%p15903_p4), [#allocation6], 4608   ;;  %p15904_p13 = pmov %p15903_p4 }
  0x33   : > { %p15905_p7 = pmov %p15903_p4 }
  0x34   : > { %12974 = vsyncadd (%p15904_p13), [#allocation6], 4294962688 }
  0x35   : > { %12976 = dma.done.wait (%p15905_p7), [#allocation9], 9216   ;;  %p15906_p6 = pmov %p15903_p4 }
  0x36   : > { %s15847_s23 = sand.u32 1, %s12989_s10   ;;  %p356_p9 = scmp.lt.s32.totalorder %s13101_s13, 1  ;;  %vm362_vm0 = vcmask 517120   ;;  %v13019_v0 = vmov 0   ;;  %v13198_v1 = vld [vmem:[%s15837_s1] sm:$0xff] }
  0x37   : > { %12978 = vsyncadd (%p15906_p6), [#allocation9], 4294958080  ;;  %s13173_s21 = smul.u32 6, %s15847_s23  ;;  %363 = vst.msk [vmem:[#allocation2] sm:$0x3] %vm362_vm0, %v13019_v0  ;;  %s13211_s5 = smov 0  }
  0x38   : > { %365 = vst.msk [vmem:[#allocation2 + $0x1c] sm:$0x3] %vm362_vm0, %v13019_v0  ;;  %367 = vst.msk [vmem:[#allocation2 + $0x1e] sm:$0x3] %vm362_vm0, %v13019_v0  ;;  %s357_s24 = scalar_select %p356_p9, %s13101_s13, 1 }
  0x39   : > { %369 = vst.msk [vmem:[#allocation2 + $0x3a] sm:$0x3] %vm362_vm0, %v13019_v0  ;;  %371 = vst.msk [vmem:[#allocation2 + $0x3c] sm:$0x3] %vm362_vm0, %v13019_v0  ;;  %v13203_v2 = vld [vmem:[%s15837_s1 + $0x8] ss:$0 sm:$0xff] }
  0x3a   : > { %373 = vst.msk [vmem:[#allocation2 + $0x58] sm:$0x3] %vm362_vm0, %v13019_v0  ;;  %375 = vst.msk [vmem:[#allocation2 + $0x5a] sm:$0x3] %vm362_vm0, %v13019_v0  ;;  %s12461_s26 = smul.u32 240, %s357_s24  ;;  %s355_s24 = scalar_lea.vmem [#allocation10], %s13173_s21 }
  0x3b   : > { %377 = vst.msk [vmem:[#allocation2 + $0x76] sm:$0x3] %vm362_vm0, %v13019_v0  ;;  %378 = vst.msk [vmem:[#allocation3] sm:$0x3] %vm362_vm0, %v13019_v0  ;;  %v13208_v3 = vld [vmem:[%s15838_s2] ss:$0 sm:$0xff] }
  0x3c   : > { %380 = vst.msk [vmem:[#allocation3 + $0xe] sm:$0x3] %vm362_vm0, %v13019_v0  ;;  %382 = vst.msk [vmem:[#allocation3 + $0x10] sm:$0x3] %vm362_vm0, %v13019_v0  ;;  %s13193_s29 = scalar_lea.vmem %s15836_s0, %s12461_s26 }
  0x3d   : > { %384 = vst.msk [vmem:[#allocation3 + $0x1e] sm:$0x3] %vm362_vm0, %v13019_v0  ;;  %385 = vst [vmem:[#allocation4] sm:$0x3] %v13019_v0 }
  0x3e   : > { %387 = vst [vmem:[#allocation4 + $0xe] sm:$0x3] %v13019_v0  ;;  %389 = vst [vmem:[#allocation4 + $0x10] sm:$0x3] %v13019_v0 }
  0x3f   : > { %391 = vst [vmem:[#allocation4 + $0x1e] sm:$0x3] %v13019_v0 }
  0x40 LB: >> { %v13020_v4 = vmov 0   ;;  %s9191_s26 = sshll.u32 %s13001_s5, 2  ;;  %v410_v41 = vlaneseq  ;;  %vm540_vm1 = vcmask 1040384   ;;  %vm542_vm2 = vcmask 1042432   ;;  %s9210_s23 = sshll.u32 %s13001_s5, 1  ;;  %s13001_s5 = sphi %s13211_s5, %s400_s5  }
  0x41   : >> { %12568 = vset.pattern.permute.xlu1 %v13020_v4  ;;  %12567 = vset.pattern.permute.xlu0 %v13020_v4  ;;  %s13218_s27 = scalar_lea.vmem %s13193_s29, %s9191_s26  ;;  %s13293_s28 = scalar_lea.vmem [#allocation2], %s9210_s23 }
  0x42   : >> { %v9197_v5 = vld [vmem:[%s13218_s27 + $0xbc] sm:$0x3]  ;;  %v9193_v6 = vld [vmem:[%s13218_s27 + $0xb4] sm:$0x3]  ;;  %v449_v7 = vld [vmem:[%s13218_s27 + $0x1] sm:$0x3] }
  0x43   : >> { %439 = vperm.xlu1 %12568, %v9197_v5   ;;  %407 = vperm.xlu0 %12567, %v9193_v6   ;;  %v9195_v8 = vld [vmem:[%s13218_s27 + $0xb8] sm:$0x3]  ;;  %v9201_v9 = vld [vmem:[%s13218_s27 + $0x9] sm:$0x3]  ;;  %v9199_v10 = vld [vmem:[%s13218_s27 + $0x5] sm:$0x3] }
  0x44   : >> { %v9205_v11 = vld [vmem:[%s13218_s27 + $0x41] sm:$0x3]  ;;  %v9203_v12 = vld [vmem:[%s13218_s27 + $0x3d] sm:$0x3]  ;;  %v9207_v14 = vld [vmem:[%s13218_s27 + $0x45] sm:$0x3] }
  0x45   : >> { %v548_v13 = vld [vmem:[%s13218_s27 + $0x1] sm:$0x3]  ;;  %v9213_v15 = vld [vmem:[%s13218_s27 + $0x9] sm:$0x3]  ;;  %v9212_v16 = vld [vmem:[%s13218_s27 + $0x5] sm:$0x3] }
  0x46   : >> { %v9215_v17 = vld [vmem:[%s13218_s27 + $0x41] sm:$0x3]  ;;  %v9214_v18 = vld [vmem:[%s13218_s27 + $0x3d] sm:$0x3]  ;;  %v9236_v22 = vld [vmem:[%s13218_s27 + $0x79] sm:$0x3] }
  0x47   : >> { %452 = vperm.xlu1 %12568, %v449_v7   ;;  %423 = vperm.xlu0 %12567, %v9195_v8   ;;  %v9226_v19 = vld [vmem:[%s13218_s27 + $0x41] sm:$0x3]  ;;  %v9225_v20 = vld [vmem:[%s13218_s27 + $0x3d] sm:$0x3]  ;;  %v9227_v24 = vld [vmem:[%s13218_s27 + $0x45] sm:$0x3] }
  0x48   : >> { %v9237_v21 = vld [vmem:[%s13218_s27 + $0x7d] sm:$0x3]  ;;  %v9238_v23 = vld [vmem:[%s13218_s27 + $0x81] sm:$0x3]  ;;  %v9239_v25 = vld [vmem:[%s13218_s27 + $0xb5] sm:$0x3] }
  0x49   : >> { %v9228_v26 = vld [vmem:[%s13218_s27 + $0x79] sm:$0x3]  ;;  %v9229_v28 = vld [vmem:[%s13218_s27 + $0x7d] sm:$0x3]  ;;  %v9230_v29 = vld [vmem:[%s13218_s27 + $0x81] sm:$0x3] }
  0x4a   : >> { %v9240_v27 = vld [vmem:[%s13218_s27 + $0xb9] sm:$0x3]  ;;  %v9216_v30 = vld [vmem:[%s13218_s27 + $0x45] sm:$0x3]  ;;  %v9241_v32 = vld [vmem:[%s13218_s27 + $0xbd] sm:$0x3] }
  0x4b   : >> { %478 = vperm.xlu1 %12568, %v9201_v9   ;;  %465 = vperm.xlu0 %12567, %v9199_v10   ;;  %v9218_v31 = vld [vmem:[%s13218_s27 + $0x79] sm:$0x3]  ;;  %v770_v33 = vld [vmem:[%s13218_s27 + $0x2] sm:$0x3]  ;;  %v9231_v34 = vld [vmem:[%s13218_s27 + $0xb5] sm:$0x3] }
  0x4c   : >> { %v9232_v35 = vld [vmem:[%s13218_s27 + $0xb9] sm:$0x3]  ;;  %v9220_v36 = vld [vmem:[%s13218_s27 + $0x7d] sm:$0x3]  ;;  %v9222_v37 = vld [vmem:[%s13218_s27 + $0x81] sm:$0x3] }
  0x4d   : >> { %v9242_v38 = vld [vmem:[%s13218_s27 + $0x6] sm:$0x3]  ;;  %v9243_v39 = vld [vmem:[%s13218_s27 + $0xa] sm:$0x3]  ;;  %v9233_v40 = vld [vmem:[%s13218_s27 + $0xbd] sm:$0x3] }
  0x4e   : >> { %v411_v42 = vshrl.u32 %v410_v41, 7  ;;  %s400_s5 = sadd.s32 1, %s13001_s5  }
  0x4f   : >> { %506 = vperm.xlu1 %12568, %v9205_v11   ;;  %492 = vperm.xlu0 %12567, %v9203_v12   ;;  %p397_p10 = scmp.ge.s32.totalorder %s400_s5, 13  }
  0x50   : >> { %v412_v43 = vsub.s32 0, %v411_v42  ;;  %v428_v44 = vsub.s32 1, %v411_v42  ;;  %v444_v45 = vsub.s32 2, %v411_v42  ;;  %v457_v49 = vsub.s32 3, %v411_v42  ;;  %s13347_s17 = smov (%p397_p10), 0  }
  0x51   : >> { %v470_v52 = vsub.s32 4, %v411_v42  ;;  %v483_v58 = vsub.s32 5, %v411_v42  ;;  %v497_v62 = vsub.s32 6, %v411_v42  ;;  %v511_v7 = vsub.s32 7, %v411_v42 }
  0x52   : >> { %v13257_v48 = vrot.slane %v13198_v1, %v412_v43  ;;  %v13260_v50 = vrot.slane %v13198_v1, %v428_v44  ;;  %v13263_v51 = vrot.slane %v13198_v1, %v444_v45  ;;  %v13267_v56 = vrot.slane %v13198_v1, %v457_v49 }
  0x53   : >> { %551 = vperm.xlu1 %12568, %v548_v13   ;;  %520 = vperm.xlu0 %12567, %v9207_v14   ;;  %v13272_v61 = vrot.slane %v13198_v1, %v470_v52  ;;  %v13276_v6 = vrot.slane %v13198_v1, %v483_v58  ;;  %v13280_v10 = vrot.slane %v13198_v1, %v497_v62 }
  0x57   : >> { %567 = vperm.xlu1 %12568, %v9213_v15   ;;  %559 = vperm.xlu0 %12567, %v9212_v16   ;;  %v13284_v15 = vrot.slane %v13198_v1, %v511_v7 }
  0x5b   : >> { %583 = vperm.xlu1 %12568, %v9215_v17   ;;  %575 = vperm.xlu0 %12567, %v9214_v18  }
  0x5f   : >> { %649 = vperm.xlu1 %12568, %v9226_v19   ;;  %641 = vperm.xlu0 %12567, %v9225_v20  }
  0x63   : >> { %733 = vperm.xlu1 %12568, %v9237_v21   ;;  %725 = vperm.xlu0 %12567, %v9236_v22  }
  0x67   : >> { %741 = vperm.xlu1 %12568, %v9238_v23   ;;  %657 = vperm.xlu0 %12567, %v9227_v24  }
  0x6b   : >> { %749 = vperm.xlu1 %12568, %v9239_v25   ;;  %665 = vperm.xlu0 %12567, %v9228_v26  }
  0x6f   : >> { %757 = vperm.xlu1 %12568, %v9240_v27   ;;  %673 = vperm.xlu0 %12567, %v9229_v28  }
  0x73   : >> { %681 = vperm.xlu1 %12568, %v9230_v29   ;;  %591 = vperm.xlu0 %12567, %v9216_v30  }
  0x77   : >> { %601 = vperm.xlu1 %12568, %v9218_v31   ;;  %765 = vperm.xlu0 %12567, %v9241_v32  }
  0x7b   : >> { %773 = vperm.xlu1 %12568, %v770_v33   ;;  %689 = vperm.xlu0 %12567, %v9231_v34  }
  0x7f   : >> { %697 = vperm.xlu1 %12568, %v9232_v35   ;;  %611 = vperm.xlu0 %12567, %v9220_v36  }
  0x83   : >> { %621 = vperm.xlu1 %12568, %v9222_v37   ;;  %781 = vperm.xlu0 %12567, %v9242_v38  }
  0x87   : >> { %789 = vperm.xlu1 %12568, %v9243_v39   ;;  %705 = vperm.xlu0 %12567, %v9233_v40  }
  0xbe   : >> { %v440_v46 = vpop.permute.xlu1 %439  ;;  %v408_v47 = vpop.permute.xlu0 %407 }
  0xbf   : >> { %v414_v55 = vmul.f32 %v13257_v48, %v408_v47  ;;  %v446_v59 = vmul.f32 %v13263_v51, %v440_v46 }
  0xc2   : >> { %v453_v53 = vpop.permute.xlu1 %452  ;;  %v424_v54 = vpop.permute.xlu0 %423 }
  0xc3   : >> { %v430_v57 = vmul.f32 %v13260_v50, %v424_v54  ;;  %v459_v4 = vmul.f32 %v13267_v56, %v453_v53 }
  0xc5   : >> { %v431_v60 = vadd.f32 %v430_v57, %v414_v55 }
  0xc6   : >> { %v479_v63 = vpop.permute.xlu1 %478  ;;  %v466_v0 = vpop.permute.xlu0 %465 }
  0xc7   : >> { %v447_v5 = vadd.f32 %v446_v59, %v431_v60  ;;  %v472_v9 = vmul.f32 %v13272_v61, %v466_v0  ;;  %v485_v13 = vmul.f32 %v13276_v6, %v479_v63 }
  0xc9   : >> { %v460_v8 = vadd.f32 %v459_v4, %v447_v5 }
  0xca   : >> { %v507_v11 = vpop.permute.xlu1 %506  ;;  %v493_v12 = vpop.permute.xlu0 %492 }
  0xcb   : >> { %v473_v14 = vadd.f32 %v472_v9, %v460_v8  ;;  %v499_v17 = vmul.f32 %v13280_v10, %v493_v12  ;;  %v513_v20 = vmul.f32 %v13284_v15, %v507_v11 }
  0xcd   : >> { %v486_v16 = vadd.f32 %v485_v13, %v473_v14 }
  0xce   : >> { %v552_v18 = vpop.permute.xlu1 %551  ;;  %v521_v19 = vpop.permute.xlu0 %520 }
  0xcf   : >> { %v500_v21 = vadd.f32 %v499_v17, %v486_v16  ;;  %v527_v23 = vmul.f32 %v13203_v2, %v521_v19  ;;  %v554_v46 = vmul.f32 %v552_v18, %v13257_v48 }
  0xd1   : >> { %v514_v22 = vadd.f32 %v513_v20, %v500_v21 }
  0xd2   : >> { %v568_v24 = vpop.permute.xlu1 %567  ;;  %v560_v25 = vpop.permute.xlu0 %559 }
  0xd3   : >> { %v528_v26 = vadd.f32 %v527_v23, %v514_v22  ;;  %v562_v43 = vmul.f32 %v560_v25, %v13260_v50  ;;  %v570_v53 = vmul.f32 %v568_v24, %v13263_v51 }
  0xd5   : >> { %v535_v27 = vadd.f32 %v13208_v3, %v528_v26  ;;  %v563_v47 = vadd.f32 %v562_v43, %v554_v46 }
  0xd6   : >> { %v584_v28 = vpop.permute.xlu1 %583  ;;  %v576_v29 = vpop.permute.xlu0 %575 }
  0xd7   : >> { %v536_v30 = vmax.f32 %v535_v27, 0.0  ;;  %v571_v54 = vadd.f32 %v570_v53, %v563_v47  ;;  %v578_v55 = vmul.f32 %v576_v29, %v13267_v56  ;;  %v586_v12 = vmul.f32 %v584_v28, %v13272_v61 }
  0xd9   : >> { %v538_v31 = vrot.slane %v536_v30, 7  ;;  %v579_v4 = vadd.f32 %v578_v55, %v571_v54 }
  0xda   : >> { %v650_v32 = vpop.permute.xlu1 %649  ;;  %v642_v33 = vpop.permute.xlu0 %641 }
  0xdb   : >> { %v541_v34 = vsel %vm540_vm1, 0.0, %v538_v31  ;;  %v652_v57 = vmul.f32 %v650_v32, %v13260_v50  ;;  %v644_v58 = vmul.f32 %v642_v33, %v13257_v48  ;;  %v587_v19 = vadd.f32 %v586_v12, %v579_v4 }
  0xdc   : >> { %v543_v35 = vsel %vm542_vm2, %v541_v34, 0.0 }
  0xdd   : >> { %v544_v36 = vpack.c.bf16 %v543_v35, %v543_v35  ;;  %v653_v7 = vadd.f32 %v652_v57, %v644_v58 }
  0xde   : >> { %v734_v37 = vpop.permute.xlu1 %733  ;;  %v726_v38 = vpop.permute.xlu0 %725 }
  0xdf   : >> { %9211 = vst.msk [vmem:[%s13293_s28 + $0x2] sm:$0x3] %vm362_vm0, %v544_v36  ;;  %v736_v62 = vmul.f32 %v734_v37, %v13260_v50  ;;  %v728_v63 = vmul.f32 %v726_v38, %v13257_v48 }
  0xe1   : >> { %v737_v13 = vadd.f32 %v736_v62, %v728_v63 }
  0xe2   : >> { %v742_v39 = vpop.permute.xlu1 %741  ;;  %v658_v40 = vpop.permute.xlu0 %657 }
  0xe3   : >> { %v660_v0 = vmul.f32 %v658_v40, %v13263_v51  ;;  %v744_v5 = vmul.f32 %v742_v39, %v13263_v51 }
  0xe5   : >> { %v661_v50 = vadd.f32 %v660_v0, %v653_v7  ;;  %v745_v17 = vadd.f32 %v744_v5, %v737_v13 }
  0xe6   : >> { %v750_v41 = vpop.permute.xlu1 %749  ;;  %v666_v42 = vpop.permute.xlu0 %665 }
  0xe7   : >> { %v668_v8 = vmul.f32 %v666_v42, %v13267_v56  ;;  %v752_v14 = vmul.f32 %v750_v41, %v13267_v56 }
  0xe9   : >> { %v669_v20 = vadd.f32 %v668_v8, %v661_v50  ;;  %v753_v24 = vadd.f32 %v752_v14, %v745_v17 }
  0xea   : >> { %v758_v44 = vpop.permute.xlu1 %757  ;;  %v674_v45 = vpop.permute.xlu0 %673 }
  0xeb   : >> { %v676_v48 = vmul.f32 %v674_v45, %v13272_v61  ;;  %v760_v18 = vmul.f32 %v758_v44, %v13272_v61 }
  0xed   : >> { %v677_v27 = vadd.f32 %v676_v48, %v669_v20  ;;  %v761_v29 = vadd.f32 %v760_v18, %v753_v24 }
  0xee   : >> { %v682_v49 = vpop.permute.xlu1 %681  ;;  %v592_v52 = vpop.permute.xlu0 %591 }
  0xef   : >> { %v594_v16 = vmul.f32 %v592_v52, %v13276_v6  ;;  %v684_v21 = vmul.f32 %v682_v49, %v13276_v6 }
  0xf1   : >> { %v595_v25 = vadd.f32 %v594_v16, %v587_v19  ;;  %v685_v31 = vadd.f32 %v684_v21, %v677_v27 }
  0xf2   : >> { %v602_v59 = vpop.permute.xlu1 %601  ;;  %v766_v60 = vpop.permute.xlu0 %765 }
  0xf3   : >> { %v604_v51 = vmul.f32 %v602_v59, %v13280_v10  ;;  %v768_v56 = vmul.f32 %v766_v60, %v13276_v6 }
  0xf5   : >> { %v605_v30 = vadd.f32 %v604_v51, %v595_v25  ;;  %v769_v35 = vadd.f32 %v768_v56, %v761_v29 }
  0xf6   : >> { %v774_v9 = vpop.permute.xlu1 %773  ;;  %v690_v11 = vpop.permute.xlu0 %689 }
  0xf7   : >> { %v692_v28 = vmul.f32 %v690_v11, %v13280_v10  ;;  %v776_v61 = vmul.f32 %v774_v9, %v13280_v10  ;;  %v13345_v11 = vld [vmem:[%s15840_s4] ss:$0 sm:$0xff] (%p397_p10) }
  0xf9   : >> { %v693_v38 = vadd.f32 %v692_v28, %v685_v31  ;;  %v777_v39 = vadd.f32 %v776_v61, %v769_v35 }
  0xfa   : >> { %v698_v22 = vpop.permute.xlu1 %697  ;;  %v612_v23 = vpop.permute.xlu0 %611 }
  0xfb   : >> { %v614_v26 = vmul.f32 %v612_v23, %v13284_v15  ;;  %v700_v32 = vmul.f32 %v698_v22, %v13284_v15 }
  0xfd   : >> { %v615_v36 = vadd.f32 %v614_v26, %v605_v30  ;;  %v701_v41 = vadd.f32 %v700_v32, %v693_v38 }
  0xfe   : >> { %v622_v33 = vpop.permute.xlu1 %621  ;;  %v782_v34 = vpop.permute.xlu0 %781 }
  0xff   : >> { %v624_v37 = vmul.f32 %v13203_v2, %v622_v33  ;;  %v784_v6 = vmul.f32 %v782_v34, %v13284_v15 }
 0x101   : >> { %v625_v40 = vadd.f32 %v624_v37, %v615_v36  ;;  %v785_v10 = vadd.f32 %v784_v6, %v777_v39 }
 0x102   : >> { %v790_v42 = vpop.permute.xlu1 %789  ;;  %v706_v43 = vpop.permute.xlu0 %705 }
 0x103   : >> { %v626_v44 = vadd.f32 %v13208_v3, %v625_v40  ;;  %v792_v45 = vmul.f32 %v13203_v2, %v790_v42  ;;  %v708_v46 = vmul.f32 %v13203_v2, %v706_v43 }
 0x105   : >> { %v627_v47 = vmax.f32 %v626_v44, 0.0  ;;  %v793_v49 = vadd.f32 %v792_v45, %v785_v10  ;;  %v709_v52 = vadd.f32 %v708_v46, %v701_v41 }
 0x107   : >> { %v629_v53 = vrot.slane %v627_v47, 7  ;;  %v794_v15 = vadd.f32 %v13208_v3, %v793_v49  ;;  %v710_v54 = vadd.f32 %v13208_v3, %v709_v52 }
 0x109   : >> { %v631_v55 = vsel %vm540_vm1, 0.0, %v629_v53  ;;  %v795_v57 = vmax.f32 %v794_v15, 0.0  ;;  %v711_v58 = vmax.f32 %v710_v54, 0.0 }
 0x10a   : >> { %v632_v59 = vsel %vm542_vm2, %v631_v55, 0.0 }
 0x10b   : >> { %v633_v60 = vpack.c.bf16 %v632_v59, %v632_v59  ;;  %v797_v62 = vrot.slane %v795_v57, 7  ;;  %v713_v63 = vrot.slane %v711_v58, 7 }
 0x10d   : >> { %9224 = vst.msk [vmem:[%s13293_s28 + $0x20] sm:$0x3] %vm362_vm0, %v633_v60  ;;  %v799_v0 = vsel %vm540_vm1, 0.0, %v797_v62  ;;  %v715_v4 = vsel %vm540_vm1, 0.0, %v713_v63  ;;  %399 = sbr.rel (!%p397_p10) target bundleno = 64 (0x40), region = 216 }
 0x10e   : >> { %v800_v5 = vsel %vm542_vm2, %v799_v0, 0.0  ;;  %v716_v7 = vsel %vm542_vm2, %v715_v4, 0.0 }
 0x10f   : >> { %v801_v8 = vpack.c.bf16 %v800_v5, %v800_v5  ;;  %v717_v9 = vpack.c.bf16 %v716_v7, %v716_v7 }
 0x111   : >> { %9245 = vst.msk [vmem:[%s13293_s28 + $0x5c] sm:$0x3] %vm362_vm0, %v801_v8  ;;  %9235 = vst.msk [vmem:[%s13293_s28 + $0x3e] sm:$0x3] %vm362_vm0, %v717_v9 }
 0x112 LB: >> { %v13355_v12 = vld [vmem:[%s15839_s3 + $0x38] sm:$0xff]   ;;  %v13021_v13 = vmov 0.0   ;;  %v13368_v2 = vld [vmem:[%s15839_s3 + $0x30] sm:$0xff]   ;;  %vm13022_vm3 = vmmov 0   ;;  %v13386_v14 = vld [vmem:[%s15839_s3 + $0x28] sm:$0xff]   ;;  %s9862_s22 = sshll.u32 %s13005_s17, 2  ;;  %s13005_s17 = sphi %s13347_s17, %s812_s17  }
 0x113   : >> { %10660 = vmatprep.subr.bf16.mxu0 %v13021_v13  ;;  %10672 = vmatprep.subr.bf16.mxu1 %v13021_v13  ;;  %v13362_v1 = vld [vmem:[%s15839_s3 + $0x18] sm:$0xff]   ;;  %v13377_v3 = vld [vmem:[%s15839_s3 + $0x10] sm:$0xff]   ;;  %v13394_v16 = vld [vmem:[%s15839_s3 + $0x8] sm:$0xff]   ;;  %s13411_s28 = scalar_lea.vmem [#allocation2], %s9862_s22  ;;  %vm864_vm4 = vcmask 523264   ;;  %s9442_s16 = sshll.u32 %s13005_s17, 1 }
 0x114   : >> { %10661 = vmatpush3.bf16.msra.mxu0 %v13355_v12  ;;  %10668 = vmatprep.mubr.msk.bf16.mxu0 %vm13022_vm3, %v13021_v13  ;;  %v13401_v50 = vld [vmem:[%s15839_s3 + $0x20] sm:$0xff]   ;;  %v13421_v19 = vld [vmem:[%s15839_s3 + $0x58] sm:$0xff]   ;;  %v13436_v20 = vld [vmem:[%s15839_s3 + $0x50] sm:$0xff]   ;;  %s14547_s22 = scalar_lea.vmem [#allocation3], %s9442_s16  ;;  %s812_s17 = sadd.s32 1, %s13005_s17  }
 0x115   : >> { %10673 = vmatpush3.bf16.msra.mxu1 %v13362_v1  ;;  %10662 = vmatprep.subr.bf16.mxu0 %v13021_v13  ;;  %v13408_v48 = vld [vmem:[%s15839_s3] sm:$0xff]   ;;  %v13428_v51 = vld [vmem:[%s15839_s3 + $0x78] sm:$0xff]   ;;  %v13441_v21 = vld [vmem:[%s15839_s3 + $0x70] sm:$0xff]   ;;  %p809_p12 = scmp.ge.s32.totalorder %s812_s17, 6  }
 0x116   : >> { %10674 = vmatprep.subr.bf16.mxu1 %v13021_v13  ;;  %10680 = vmatprep.mubr.msk.bf16.mxu1 %vm13022_vm3, %v13021_v13  ;;  %v13457_v23 = vld [vmem:[%s15839_s3 + $0x48] sm:$0xff]   ;;  %v13471_v56 = vld [vmem:[%s15839_s3 + $0x40] sm:$0xff]   ;;  %v13487_v30 = vld [vmem:[%s15839_s3 + $0x98] sm:$0xff]   ;;  %s14698_s5 = smov (%p809_p12), 0  }
 0x117   : >> { %v13464_v25 = vld [vmem:[%s15839_s3 + $0x68] sm:$0xff]   ;;  %v13478_v28 = vld [vmem:[%s15839_s3 + $0x60] sm:$0xff]   ;;  %v13495_v31 = vld [vmem:[%s15839_s3 + $0xb8] sm:$0xff]  }
 0x118   : >> { %10663 = vmatpush3.bf16.msra.mxu0 %v13368_v2  ;;  %v13414_v17 = vld [vmem:[%s13411_s28 + $0x5c] sm:$0x1]  ;;  %v9249_v18 = vld [vmem:[%s13411_s28 + $0x5a] sm:$0x1]  ;;  %v13482_v29 = vld [vmem:[%s13411_s28 + $0x5e] sm:$0x1] }
 0x119   : >> { %10675 = vmatpush3.bf16.msra.mxu1 %v13377_v3  ;;  %10664 = vmatprep.subr.bf16.mxu0 %v13021_v13  ;;  %v9296_v22 = vld.sshfl [vmem:[%s13411_s28] sm:$0x3 pattern:$0x76325410]  ;;  %v13509_v33 = vld [vmem:[%s15839_s3 + $0x90] sm:$0xff]   ;;  %v13530_v38 = vld [vmem:[%s15839_s3 + $0x88] sm:$0xff]  }
 0x11a   : >> { %10676 = vmatprep.subr.bf16.mxu1 %v13021_v13  ;;  %v1080_v24 = vshll.u32 %v9296_v22, 16  ;;  %v1078_v26 = vshrl.u32 %v9296_v22, 16  ;;  %v9313_v32 = vld.sshfl [vmem:[%s13411_s28 + $0x2] sm:$0x3 pattern:$0x76325410] }
 0x11b   : >> { %v13516_v34 = vld [vmem:[%s15839_s3 + $0xb0] sm:$0xff]   ;;  %v9330_v35 = vld.sshfl [vmem:[%s13411_s28 + $0x4] sm:$0x3 pattern:$0x76325410]  ;;  %v1175_v36 = vshll.u32 %v9313_v32, 16 }
 0x11c   : >> { %10665 = vmatpush3.bf16.msra.mxu0 %v13386_v14  ;;  %v1082_v27 = vrot.slane %v1080_v24, 1  ;;  %v9347_v37 = vld.sshfl [vmem:[%s13411_s28 + $0x1e] sm:$0x3 pattern:$0x76325410]  ;;  %v1270_v39 = vshll.u32 %v9330_v35, 16 }
 0x11d   : >> { %10677 = vmatpush3.bf16.msra.mxu1 %v13394_v16  ;;  %10666 = vmatprep.subr.bf16.mxu0 %v13021_v13  ;;  %v9364_v6 = vld.sshfl [vmem:[%s13411_s28 + $0x20] sm:$0x3 pattern:$0x76325410]  ;;  %v13537_v40 = vld [vmem:[%s15839_s3 + $0xa8] sm:$0xff]   ;;  %v1173_v41 = vshrl.u32 %v9313_v32, 16 }
 0x11e   : >> { %10678 = vmatprep.subr.bf16.mxu1 %v13021_v13  ;;  %v13490_v61 = vor.u32 %v1082_v27, %v1078_v26  ;;  %v1177_v42 = vrot.slane %v1175_v36, 1  ;;  %v13544_v43 = vld [vmem:[%s15839_s3 + $0x80] sm:$0xff]   ;;  %v1268_v44 = vshrl.u32 %v9330_v35, 16  ;;  %v1272_v10 = vrot.slane %v1270_v39, 1  ;;  %v13557_v49 = vld [vmem:[%s15839_s3 + $0xd8] sm:$0xff]   ;;  %v13575_v59 = vld [vmem:[%s15839_s3 + $0xd0] sm:$0xff]  }
 0x11f   : >> { %v1366_v45 = vshll.u32 %v9347_v37, 16  ;;  %v1462_v46 = vshll.u32 %v9364_v6, 16  ;;  %v13551_v47 = vld [vmem:[%s15839_s3 + $0xa0] sm:$0xff]   ;;  %v13564_v53 = vld [vmem:[%s15839_s3 + $0xf8] sm:$0xff]   ;;  %v1364_v15 = vshrl.u32 %v9347_v37, 16  ;;  %v1460_v54 = vshrl.u32 %v9364_v6, 16 }
 0x120   : >> { %10667 = vmatpush3.bf16.msra.mxu0 %v13401_v50  ;;  %v13559_v52 = vor.u32 %v1177_v42, %v1173_v41  ;;  %v13567_v55 = vor.u32 %v1272_v10, %v1268_v44  ;;  %v13582_v60 = vld [vmem:[%s15839_s3 + $0xf0] sm:$0xff]   ;;  %v13593_v62 = vld [vmem:[%s15839_s3 + $0xc8] sm:$0xff]   ;;  %v13611_v0 = vld [vmem:[%s15839_s3 + $0xc0] sm:$0xff]  }
 0x121   : >> { %10679 = vmatpush3.bf16.msra.mxu1 %v13408_v48  ;;  %10684 = vmatprep.subr.bf16.mxu0 %v13021_v13  ;;  %v1368_v57 = vrot.slane %v1366_v45, 1  ;;  %v1464_v58 = vrot.slane %v1462_v46, 1  ;;  %v13600_v63 = vld [vmem:[%s15839_s3 + $0xe8] sm:$0xff]   ;;  %v13616_v4 = vld [vmem:[%s15839_s3 + $0xe0] sm:$0xff]   ;;  %v13625_v5 = vld [vmem:[%s15839_s3 + $0x118] sm:$0xff]  }
 0x122   : >> { %10696 = vmatprep.subr.bf16.mxu1 %v13021_v13  ;;  %v13638_v9 = vld [vmem:[%s15839_s3 + $0x110] sm:$0xff]   ;;  %v13657_v24 = vld [vmem:[%s15839_s3 + $0x108] sm:$0xff]   ;;  %v13666_v32 = vld [vmem:[%s15839_s3 + $0x100] sm:$0xff]  }
 0x123   : >> { %10669 = vmatmul.mubr.msk.bf16.vlgmr.msra.gmra.mxu0 %vm864_vm4, %v13414_v17  ;;  %v13627_v7 = vor.u32 %v1368_v57, %v1364_v15  ;;  %v13630_v8 = vor.u32 %v1464_v58, %v1460_v54  ;;  %v9406_v41 = vld.sshfl [vmem:[%s13411_s28 + $0x24] sm:$0x3 pattern:$0x76325410] }
 0x124   : >> { %10681 = vmatmul.mubr.msk.bf16.vlgmr.msra.gmra.mxu1 %vm864_vm4, %v9249_v18  ;;  %10685 = vmatpush3.bf16.msra.mxu0 %v13421_v19  ;;  %v9381_v18 = vld.sshfl [vmem:[%s13411_s28 + $0x22] sm:$0x3 pattern:$0x76325410]  ;;  %v2008_v42 = vshll.u32 %v9406_v41, 16  ;;  %v2006_v44 = vshrl.u32 %v9406_v41, 16 }
 0x125   : >> { %10697 = vmatpush3.bf16.msra.mxu1 %v13428_v51  ;;  %10686 = vmatprep.subr.bf16.mxu0 %v13021_v13  ;;  %v1558_v22 = vshll.u32 %v9381_v18, 16  ;;  %v1556_v26 = vshrl.u32 %v9381_v18, 16 }
 0x126   : >> { %10698 = vmatprep.subr.bf16.mxu1 %v13021_v13  ;;  %10692 = vmatprep.mubr.msk.bf16.mxu0 %vm13022_vm3, %v13021_v13  ;;  %v2010_v10 = vrot.slane %v2008_v42, 1 }
 0x127   : >> { %10704 = vmatprep.mubr.msk.bf16.mxu1 %vm13022_vm3, %v13021_v13  ;;  %v1560_v27 = vrot.slane %v1558_v22, 1 }
 0x128   : >> { %10687 = vmatpush3.bf16.msra.mxu0 %v13436_v20  ;;  %v13774_v45 = vor.u32 %v2010_v10, %v2006_v44 }
 0x129   : >> { %10699 = vmatpush3.bf16.msra.mxu1 %v13441_v21  ;;  %10688 = vmatprep.subr.bf16.mxu0 %v13021_v13  ;;  %v13671_v35 = vor.u32 %v1560_v27, %v1556_v26  ;;  %v9427_v26 = vld.sshfl [vmem:[%s13411_s28 + $0x40] sm:$0x3 pattern:$0x76325410] }
 0x12a   : >> { %10700 = vmatprep.subr.bf16.mxu1 %v13021_v13  ;;  %v2442_v42 = vshrl.u32 %v9427_v26, 16 }
 0x12c   : >> { %10689 = vmatpush3.bf16.msra.mxu0 %v13457_v23 }
 0x12d   : >> { %10701 = vmatpush3.bf16.msra.mxu1 %v13464_v25  ;;  %10690 = vmatprep.subr.bf16.mxu0 %v13021_v13 }
 0x12e   : >> { %10702 = vmatprep.subr.bf16.mxu1 %v13021_v13 }
 0x130   : >> { %10691 = vmatpush3.bf16.msra.mxu0 %v13471_v56 }
 0x131   : >> { %10703 = vmatpush3.bf16.msra.mxu1 %v13478_v28  ;;  %10708 = vmatprep.subr.bf16.mxu0 %v13021_v13 }
 0x132   : >> { %10720 = vmatprep.subr.bf16.mxu1 %v13021_v13 }
 0x133   : >> { %10693 = vmatmul.mubr.msk.bf16.vlgmr.msra.gmra.mxu0 %vm864_vm4, %v13482_v29 }
 0x134   : >> { %10705 = vmatmul.mubr.msk.bf16.vlgmr.msra.gmra.mxu1 %vm864_vm4, %v13490_v61  ;;  %10709 = vmatpush3.bf16.msra.mxu0 %v13487_v30 }
 0x135   : >> { %10721 = vmatpush3.bf16.msra.mxu1 %v13495_v31  ;;  %10710 = vmatprep.subr.bf16.mxu0 %v13021_v13 }
 0x136   : >> { %10722 = vmatprep.subr.bf16.mxu1 %v13021_v13  ;;  %10716 = vmatprep.mubr.msk.bf16.mxu0 %vm13022_vm3, %v13021_v13 }
 0x137   : >> { %10728 = vmatprep.mubr.msk.bf16.mxu1 %vm13022_vm3, %v13021_v13 }
 0x138   : >> { %10711 = vmatpush3.bf16.msra.mxu0 %v13509_v33 }
 0x139   : >> { %10723 = vmatpush3.bf16.msra.mxu1 %v13516_v34  ;;  %10712 = vmatprep.subr.bf16.mxu0 %v13021_v13 }
 0x13a   : >> { %10724 = vmatprep.subr.bf16.mxu1 %v13021_v13 }
 0x13c   : >> { %10713 = vmatpush3.bf16.msra.mxu0 %v13530_v38 }
 0x13d   : >> { %10725 = vmatpush3.bf16.msra.mxu1 %v13537_v40  ;;  %10714 = vmatprep.subr.bf16.mxu0 %v13021_v13 }
 0x13e   : >> { %10726 = vmatprep.subr.bf16.mxu1 %v13021_v13 }
 0x140   : >> { %10715 = vmatpush3.bf16.msra.mxu0 %v13544_v43 }
 0x141   : >> { %10727 = vmatpush3.bf16.msra.mxu1 %v13551_v47  ;;  %10732 = vmatprep.subr.bf16.mxu0 %v13021_v13 }
 0x142   : >> { %10744 = vmatprep.subr.bf16.mxu1 %v13021_v13 }
 0x143   : >> { %10717 = vmatmul.mubr.msk.bf16.vlgmr.msra.gmra.mxu0 %vm864_vm4, %v13559_v52 }
 0x144   : >> { %10729 = vmatmul.mubr.msk.bf16.vlgmr.msra.gmra.mxu1 %vm864_vm4, %v13567_v55  ;;  %10733 = vmatpush3.bf16.msra.mxu0 %v13557_v49 }
 0x145   : >> { %10745 = vmatpush3.bf16.msra.mxu1 %v13564_v53  ;;  %10734 = vmatprep.subr.bf16.mxu0 %v13021_v13 }
 0x146   : >> { %10746 = vmatprep.subr.bf16.mxu1 %v13021_v13  ;;  %10740 = vmatprep.mubr.msk.bf16.mxu0 %vm13022_vm3, %v13021_v13 }
 0x147   : >> { %10752 = vmatprep.mubr.msk.bf16.mxu1 %vm13022_vm3, %v13021_v13 }
 0x148   : >> { %10735 = vmatpush3.bf16.msra.mxu0 %v13575_v59 }
 0x149   : >> { %10747 = vmatpush3.bf16.msra.mxu1 %v13582_v60  ;;  %10736 = vmatprep.subr.bf16.mxu0 %v13021_v13 }
 0x14a   : >> { %10748 = vmatprep.subr.bf16.mxu1 %v13021_v13 }
 0x14c   : >> { %10737 = vmatpush3.bf16.msra.mxu0 %v13593_v62 }
 0x14d   : >> { %10749 = vmatpush3.bf16.msra.mxu1 %v13600_v63  ;;  %10738 = vmatprep.subr.bf16.mxu0 %v13021_v13 }
 0x14e   : >> { %10750 = vmatprep.subr.bf16.mxu1 %v13021_v13 }
 0x150   : >> { %10739 = vmatpush3.bf16.msra.mxu0 %v13611_v0 }
 0x151   : >> { %10751 = vmatpush3.bf16.msra.mxu1 %v13616_v4  ;;  %10756 = vmatprep.subr.bf16.mxu0 %v13021_v13 }
 0x152   : >> { %10768 = vmatprep.subr.bf16.mxu1 %v13021_v13 }
 0x153   : >> { %10741 = vmatmul.mubr.msk.bf16.vlgmr.msra.gmra.mxu0 %vm864_vm4, %v13627_v7 }
 0x154   : >> { %10753 = vmatmul.mubr.msk.bf16.vlgmr.msra.gmra.mxu1 %vm864_vm4, %v13630_v8  ;;  %10757 = vmatpush3.bf16.msra.mxu0 %v13625_v5 }
 0x155   : >> { %10769 = vmatpush3.bf16.msra.mxu1 %v13355_v12  ;;  %10758 = vmatprep.subr.bf16.mxu0 %v13021_v13 }
 0x156   : >> { %10770 = vmatprep.subr.bf16.mxu1 %v13021_v13  ;;  %10764 = vmatprep.mubr.msk.bf16.mxu0 %vm13022_vm3, %v13021_v13 }
 0x157   : >> { %10776 = vmatprep.mubr.msk.bf16.mxu1 %vm13022_vm3, %v13021_v13 }
 0x158   : >> { %10759 = vmatpush3.bf16.msra.mxu0 %v13638_v9 }
 0x159   : >> { %10771 = vmatpush3.bf16.msra.mxu1 %v13368_v2  ;;  %10760 = vmatprep.subr.bf16.mxu0 %v13021_v13 }
 0x15a   : >> { %10772 = vmatprep.subr.bf16.mxu1 %v13021_v13 }
 0x15c   : >> { %10761 = vmatpush3.bf16.msra.mxu0 %v13657_v24 }
 0x15d   : >> { %10773 = vmatpush3.bf16.msra.mxu1 %v13386_v14  ;;  %10762 = vmatprep.subr.bf16.mxu0 %v13021_v13 }
 0x15e   : >> { %10774 = vmatprep.subr.bf16.mxu1 %v13021_v13 }
 0x160   : >> { %10763 = vmatpush3.bf16.msra.mxu0 %v13666_v32 }
 0x161   : >> { %10775 = vmatpush3.bf16.msra.mxu1 %v13401_v50  ;;  %10780 = vmatprep.subr.bf16.mxu0 %v13021_v13 }
 0x162   : >> { %10792 = vmatprep.subr.bf16.mxu1 %v13021_v13 }
 0x163   : >> { %10765 = vmatmul.mubr.msk.bf16.vlgmr.msra.gmra.mxu0 %vm864_vm4, %v13671_v35 }
 0x164   : >> { %10777 = vmatmul.mubr.msk.bf16.vlgmr.msra.gmra.mxu1 %vm864_vm4, %v13482_v29  ;;  %10781 = vmatpush3.bf16.msra.mxu0 %v13362_v1  ;;  %v9392_v29 = vld [vmem:[%s13411_s28 + $0x60] sm:$0x1] }
 0x165   : >> { %10793 = vmatpush3.bf16.msra.mxu1 %v13421_v19  ;;  %10782 = vmatprep.subr.bf16.mxu0 %v13021_v13 }
 0x166   : >> { %10794 = vmatprep.subr.bf16.mxu1 %v13021_v13  ;;  %10788 = vmatprep.mubr.msk.bf16.mxu0 %vm13022_vm3, %v13021_v13 }
 0x167   : >> { %10800 = vmatprep.mubr.msk.bf16.mxu1 %vm13022_vm3, %v13021_v13 }
 0x168   : >> { %10783 = vmatpush3.bf16.msra.mxu0 %v13377_v3 }
 0x169   : >> { %10795 = vmatpush3.bf16.msra.mxu1 %v13436_v20  ;;  %10784 = vmatprep.subr.bf16.mxu0 %v13021_v13 }
 0x16a   : >> { %10796 = vmatprep.subr.bf16.mxu1 %v13021_v13 }
 0x16c   : >> { %10785 = vmatpush3.bf16.msra.mxu0 %v13394_v16 }
 0x16d   : >> { %10797 = vmatpush3.bf16.msra.mxu1 %v13457_v23  ;;  %10786 = vmatprep.subr.bf16.mxu0 %v13021_v13 }
 0x16e   : >> { %10798 = vmatprep.subr.bf16.mxu1 %v13021_v13 }
 0x170   : >> { %10787 = vmatpush3.bf16.msra.mxu0 %v13408_v48 }
 0x171   : >> { %10799 = vmatpush3.bf16.msra.mxu1 %v13471_v56  ;;  %10804 = vmatprep.subr.bf16.mxu0 %v13021_v13 }
 0x172   : >> { %10816 = vmatprep.subr.bf16.mxu1 %v13021_v13 }
 0x173   : >> { %10789 = vmatmul.mubr.msk.bf16.vlgmr.msra.gmra.mxu0 %vm864_vm4, %v13414_v17  ;;  %v9399_v17 = vld.sshfl [vmem:[%s13411_s28 + $0x6] sm:$0x3 pattern:$0x76325410] }
 0x174   : >> { %10801 = vmatmul.mubr.msk.bf16.vlgmr.msra.gmra.mxu1 %vm864_vm4, %v9392_v29  ;;  %10805 = vmatpush3.bf16.msra.mxu0 %v13428_v51  ;;  %v1863_v36 = vshll.u32 %v9399_v17, 16  ;;  %v1861_v37 = vshrl.u32 %v9399_v17, 16 }
 0x175   : >> { %10817 = vmatpush3.bf16.msra.mxu1 %v13487_v30  ;;  %10806 = vmatprep.subr.bf16.mxu0 %v13021_v13 }
 0x176   : >> { %10818 = vmatprep.subr.bf16.mxu1 %v13021_v13  ;;  %10812 = vmatprep.mubr.msk.bf16.mxu0 %vm13022_vm3, %v13021_v13  ;;  %v1865_v6 = vrot.slane %v1863_v36, 1 }
 0x177   : >> { %10824 = vmatprep.mubr.msk.bf16.mxu1 %vm13022_vm3, %v13021_v13 }
 0x178   : >> { %10807 = vmatpush3.bf16.msra.mxu0 %v13441_v21  ;;  %v13746_v39 = vor.u32 %v1865_v6, %v1861_v37  ;;  %v2444_v37 = vshll.u32 %v9427_v26, 16 }
 0x179   : >> { %10819 = vmatpush3.bf16.msra.mxu1 %v13509_v33  ;;  %10808 = vmatprep.subr.bf16.mxu0 %v13021_v13 }
 0x17a   : >> { %10820 = vmatprep.subr.bf16.mxu1 %v13021_v13  ;;  %v2446_v44 = vrot.slane %v2444_v37, 1 }
 0x17c   : >> { %10809 = vmatpush3.bf16.msra.mxu0 %v13464_v25  ;;  %v13902_v10 = vor.u32 %v2446_v44, %v2442_v42  ;;  %v14042_v44 = vld [vmem:[%s15839_s3 + $0x10] sm:$0xff]  }
 0x17d   : >> { %10821 = vmatpush3.bf16.msra.mxu1 %v13530_v38  ;;  %10810 = vmatprep.subr.bf16.mxu0 %v13021_v13 }
 0x17e   : >> { %10822 = vmatprep.subr.bf16.mxu1 %v13021_v13 }
 0x180   : >> { %10811 = vmatpush3.bf16.msra.mxu0 %v13478_v28 }
 0x181   : >> { %10823 = vmatpush3.bf16.msra.mxu1 %v13544_v43  ;;  %10828 = vmatprep.subr.bf16.mxu0 %v13021_v13 }
 0x182   : >> { %10840 = vmatprep.subr.bf16.mxu1 %v13021_v13 }
 0x183   : >> { %10813 = vmatmul.mubr.msk.bf16.vlgmr.msra.gmra.mxu0 %vm864_vm4, %v13559_v52 }
 0x184   : >> { %10825 = vmatmul.mubr.msk.bf16.vlgmr.msra.gmra.mxu1 %vm864_vm4, %v13567_v55  ;;  %10829 = vmatpush3.bf16.msra.mxu0 %v13495_v31 }
 0x185   : >> { %10841 = vmatpush3.bf16.msra.mxu1 %v13557_v49  ;;  %10830 = vmatprep.subr.bf16.mxu0 %v13021_v13 }
 0x186   : >> { %10842 = vmatprep.subr.bf16.mxu1 %v13021_v13  ;;  %10836 = vmatprep.mubr.msk.bf16.mxu0 %vm13022_vm3, %v13021_v13 }
 0x187   : >> { %10848 = vmatprep.mubr.msk.bf16.mxu1 %vm13022_vm3, %v13021_v13 }
 0x188   : >> { %10831 = vmatpush3.bf16.msra.mxu0 %v13516_v34 }
 0x189   : >> { %10843 = vmatpush3.bf16.msra.mxu1 %v13575_v59  ;;  %10832 = vmatprep.subr.bf16.mxu0 %v13021_v13 }
 0x18a   : >> { %10844 = vmatprep.subr.bf16.mxu1 %v13021_v13 }
 0x18c   : >> { %10833 = vmatpush3.bf16.msra.mxu0 %v13537_v40 }
 0x18d   : >> { %10845 = vmatpush3.bf16.msra.mxu1 %v13593_v62  ;;  %10834 = vmatprep.subr.bf16.mxu0 %v13021_v13 }
 0x18e   : >> { %10846 = vmatprep.subr.bf16.mxu1 %v13021_v13 }
 0x190   : >> { %10835 = vmatpush3.bf16.msra.mxu0 %v13551_v47 }
 0x191   : >> { %10847 = vmatpush3.bf16.msra.mxu1 %v13611_v0  ;;  %10852 = vmatprep.subr.bf16.mxu0 %v13021_v13 }
 0x192   : >> { %10864 = vmatprep.subr.bf16.mxu1 %v13021_v13 }
 0x193   : >> { %10837 = vmatmul.mubr.msk.bf16.vlgmr.msra.gmra.mxu0 %vm864_vm4, %v13746_v39 }
 0x194   : >> { %10849 = vmatmul.mubr.msk.bf16.vlgmr.msra.gmra.mxu1 %vm864_vm4, %v13630_v8  ;;  %10853 = vmatpush3.bf16.msra.mxu0 %v13564_v53 }
 0x195   : >> { %10865 = vmatpush3.bf16.msra.mxu1 %v13625_v5  ;;  %10854 = vmatprep.subr.bf16.mxu0 %v13021_v13 }
 0x196   : >> { %10866 = vmatprep.subr.bf16.mxu1 %v13021_v13  ;;  %10860 = vmatprep.mubr.msk.bf16.mxu0 %vm13022_vm3, %v13021_v13 }
 0x197   : >> { %10872 = vmatprep.mubr.msk.bf16.mxu1 %vm13022_vm3, %v13021_v13 }
 0x198   : >> { %10855 = vmatpush3.bf16.msra.mxu0 %v13582_v60 }
 0x199   : >> { %10867 = vmatpush3.bf16.msra.mxu1 %v13638_v9  ;;  %10856 = vmatprep.subr.bf16.mxu0 %v13021_v13 }
 0x19a   : >> { %10868 = vmatprep.subr.bf16.mxu1 %v13021_v13 }
 0x19c   : >> { %10857 = vmatpush3.bf16.msra.mxu0 %v13600_v63 }
 0x19d   : >> { %10869 = vmatpush3.bf16.msra.mxu1 %v13657_v24  ;;  %10858 = vmatprep.subr.bf16.mxu0 %v13021_v13 }
 0x19e   : >> { %10870 = vmatprep.subr.bf16.mxu1 %v13021_v13 }
 0x1a0   : >> { %10859 = vmatpush3.bf16.msra.mxu0 %v13616_v4 }
 0x1a1   : >> { %10871 = vmatpush3.bf16.msra.mxu1 %v13666_v32  ;;  %10876 = vmatprep.subr.bf16.mxu0 %v13021_v13 }
 0x1a2   : >> { %10888 = vmatprep.subr.bf16.mxu1 %v13021_v13 }
 0x1a3   : >> { %10861 = vmatmul.mubr.msk.bf16.vlgmr.msra.gmra.mxu0 %vm864_vm4, %v13671_v35 }
 0x1a4   : >> { %10873 = vmatmul.mubr.msk.bf16.vlgmr.msra.gmra.mxu1 %vm864_vm4, %v13774_v45  ;;  %10877 = vmatpush3.bf16.msra.mxu0 %v13355_v12 }
 0x1a5   : >> { %10889 = vmatpush3.bf16.msra.mxu1 %v13362_v1  ;;  %10878 = vmatprep.subr.bf16.mxu0 %v13021_v13  ;;  %v9417_v1 = vld.sshfl [vmem:[%s13411_s28 + $0x3c] sm:$0x3 pattern:$0x76325410] }
 0x1a6   : >> { %10890 = vmatprep.subr.bf16.mxu1 %v13021_v13  ;;  %10884 = vmatprep.mubr.msk.bf16.mxu0 %vm13022_vm3, %v13021_v13 }
 0x1a7   : >> { %10896 = vmatprep.mubr.msk.bf16.mxu1 %vm13022_vm3, %v13021_v13 }
 0x1a8   : >> { %10879 = vmatpush3.bf16.msra.mxu0 %v13368_v2 }
 0x1a9   : >> { %10891 = vmatpush3.bf16.msra.mxu1 %v13377_v3  ;;  %10880 = vmatprep.subr.bf16.mxu0 %v13021_v13  ;;  %v9422_v3 = vld.sshfl [vmem:[%s13411_s28 + $0x3e] sm:$0x3 pattern:$0x76325410] }
 0x1aa   : >> { %10892 = vmatprep.subr.bf16.mxu1 %v13021_v13  ;;  %v2379_v15 = vshrl.u32 %v9422_v3, 16 }
 0x1ac   : >> { %10881 = vmatpush3.bf16.msra.mxu0 %v13386_v14 }
 0x1ad   : >> { %10893 = vmatpush3.bf16.msra.mxu1 %v13394_v16  ;;  %10882 = vmatprep.subr.bf16.mxu0 %v13021_v13  ;;  %v2318_v16 = vshll.u32 %v9417_v1, 16 }
 0x1ae   : >> { %10894 = vmatprep.subr.bf16.mxu1 %v13021_v13 }
 0x1af   : >> { %v2320_v46 = vrot.slane %v2318_v16, 1 }
 0x1b0   : >> { %10883 = vmatpush3.bf16.msra.mxu0 %v13401_v50 }
 0x1b1   : >> { %10895 = vmatpush3.bf16.msra.mxu1 %v13408_v48  ;;  %10900 = vmatprep.subr.bf16.mxu0 %v13021_v13  ;;  %v2381_v48 = vshll.u32 %v9422_v3, 16  ;;  %v12641_v3 = vld [vmem:[%s15839_s3 + $0x18] sm:$0xff]  }
 0x1b2   : >> { %10912 = vmatprep.subr.bf16.mxu1 %v13021_v13 }
 0x1b3   : >> { %10885 = vmatmul.mubr.msk.bf16.vlgmr.msra.gmra.mxu0 %vm864_vm4, %v13559_v52  ;;  %v2383_v54 = vrot.slane %v2381_v48, 1 }
 0x1b4   : >> { %10897 = vmatmul.mubr.msk.bf16.vlgmr.msra.gmra.mxu1 %vm864_vm4, %v13490_v61  ;;  %10901 = vmatpush3.bf16.msra.mxu0 %v13421_v19  ;;  %v2316_v61 = vshrl.u32 %v9417_v1, 16 }
 0x1b5   : >> { %10913 = vmatpush3.bf16.msra.mxu1 %v13428_v51  ;;  %10902 = vmatprep.subr.bf16.mxu0 %v13021_v13  ;;  %v13876_v58 = vor.u32 %v2383_v54, %v2379_v15  ;;  %v12643_v54 = vld [vmem:[%s15839_s3 + $0x8] sm:$0xff]  }
 0x1b6   : >> { %10914 = vmatprep.subr.bf16.mxu1 %v13021_v13  ;;  %10908 = vmatprep.mubr.msk.bf16.mxu0 %vm13022_vm3, %v13021_v13  ;;  %v13873_v57 = vor.u32 %v2320_v46, %v2316_v61  ;;  %v12642_v46 = vld [vmem:[%s15839_s3 + $0x10] sm:$0xff]  }
 0x1b7   : >> { %10920 = vmatprep.mubr.msk.bf16.mxu1 %vm13022_vm3, %v13021_v13 }
 0x1b8   : >> { %10903 = vmatpush3.bf16.msra.mxu0 %v13436_v20 }
 0x1b9   : >> { %10915 = vmatpush3.bf16.msra.mxu1 %v13441_v21  ;;  %10904 = vmatprep.subr.bf16.mxu0 %v13021_v13 }
 0x1ba   : >> { %10916 = vmatprep.subr.bf16.mxu1 %v13021_v13 }
 0x1bc   : >> { %10905 = vmatpush3.bf16.msra.mxu0 %v13457_v23 }
 0x1bd   : >> { %10917 = vmatpush3.bf16.msra.mxu1 %v13464_v25  ;;  %10906 = vmatprep.subr.bf16.mxu0 %v13021_v13 }
 0x1be   : >> { %10918 = vmatprep.subr.bf16.mxu1 %v13021_v13 }
 0x1c0   : >> { %10907 = vmatpush3.bf16.msra.mxu0 %v13471_v56 }
 0x1c1   : >> { %10919 = vmatpush3.bf16.msra.mxu1 %v13478_v28  ;;  %10924 = vmatprep.subr.bf16.mxu0 %v13021_v13 }
 0x1c2   : >> { %10936 = vmatprep.subr.bf16.mxu1 %v13021_v13 }
 0x1c3   : >> { %10909 = vmatmul.mubr.msk.bf16.vlgmr.msra.gmra.mxu0 %vm864_vm4, %v13567_v55 }
 0x1c4   : >> { %10921 = vmatmul.mubr.msk.bf16.vlgmr.msra.gmra.mxu1 %vm864_vm4, %v13627_v7  ;;  %10925 = vmatpush3.bf16.msra.mxu0 %v13487_v30 }
 0x1c5   : >> { %10937 = vmatpush3.bf16.msra.mxu1 %v13495_v31  ;;  %10926 = vmatprep.subr.bf16.mxu0 %v13021_v13 }
 0x1c6   : >> { %10938 = vmatprep.subr.bf16.mxu1 %v13021_v13  ;;  %10932 = vmatprep.mubr.msk.bf16.mxu0 %vm13022_vm3, %v13021_v13 }
 0x1c7   : >> { %10944 = vmatprep.mubr.msk.bf16.mxu1 %vm13022_vm3, %v13021_v13 }
 0x1c8   : >> { %10927 = vmatpush3.bf16.msra.mxu0 %v13509_v33 }
 0x1c9   : >> { %10939 = vmatpush3.bf16.msra.mxu1 %v13516_v34  ;;  %10928 = vmatprep.subr.bf16.mxu0 %v13021_v13 }
 0x1ca   : >> { %10940 = vmatprep.subr.bf16.mxu1 %v13021_v13 }
 0x1cc   : >> { %10929 = vmatpush3.bf16.msra.mxu0 %v13530_v38 }
 0x1cd   : >> { %10941 = vmatpush3.bf16.msra.mxu1 %v13537_v40  ;;  %10930 = vmatprep.subr.bf16.mxu0 %v13021_v13 }
 0x1ce   : >> { %10942 = vmatprep.subr.bf16.mxu1 %v13021_v13 }
 0x1d0   : >> { %10931 = vmatpush3.bf16.msra.mxu0 %v13544_v43 }
 0x1d1   : >> { %10943 = vmatpush3.bf16.msra.mxu1 %v13551_v47  ;;  %10948 = vmatprep.subr.bf16.mxu0 %v13021_v13 }
 0x1d2   : >> { %10960 = vmatprep.subr.bf16.mxu1 %v13021_v13 }
 0x1d3   : >> { %10933 = vmatmul.mubr.msk.bf16.vlgmr.msra.gmra.mxu0 %vm864_vm4, %v13630_v8 }
 0x1d4   : >> { %10945 = vmatmul.mubr.msk.bf16.vlgmr.msra.gmra.mxu1 %vm864_vm4, %v13671_v35  ;;  %10949 = vmatpush3.bf16.msra.mxu0 %v13557_v49 }
 0x1d5   : >> { %10961 = vmatpush3.bf16.msra.mxu1 %v13564_v53  ;;  %10950 = vmatprep.subr.bf16.mxu0 %v13021_v13 }
 0x1d6   : >> { %10962 = vmatprep.subr.bf16.mxu1 %v13021_v13  ;;  %10956 = vmatprep.mubr.msk.bf16.mxu0 %vm13022_vm3, %v13021_v13 }
 0x1d7   : >> { %10968 = vmatprep.mubr.msk.bf16.mxu1 %vm13022_vm3, %v13021_v13 }
 0x1d8   : >> { %10951 = vmatpush3.bf16.msra.mxu0 %v13575_v59 }
 0x1d9   : >> { %10963 = vmatpush3.bf16.msra.mxu1 %v13582_v60  ;;  %10952 = vmatprep.subr.bf16.mxu0 %v13021_v13 }
 0x1da   : >> { %10964 = vmatprep.subr.bf16.mxu1 %v13021_v13 }
 0x1dc   : >> { %10953 = vmatpush3.bf16.msra.mxu0 %v13593_v62 }
 0x1dd   : >> { %10965 = vmatpush3.bf16.msra.mxu1 %v13600_v63  ;;  %10954 = vmatprep.subr.bf16.mxu0 %v13021_v13 }
 0x1de   : >> { %10966 = vmatprep.subr.bf16.mxu1 %v13021_v13 }
 0x1e0   : >> { %10955 = vmatpush3.bf16.msra.mxu0 %v13611_v0 }
 0x1e1   : >> { %10967 = vmatpush3.bf16.msra.mxu1 %v13616_v4  ;;  %10972 = vmatprep.subr.bf16.mxu0 %v13021_v13 }
 0x1e2   : >> { %10984 = vmatprep.subr.bf16.mxu1 %v13021_v13 }
 0x1e3   : >> { %v902_v18 = vpop.f32.mrf.mxu0  ;;  %10957 = vmatmul.mubr.msk.bf16.vlgmr.msra.gmra.mxu0 %vm864_vm4, %v13873_v57 }
 0x1e4   : >> { %v969_v22 = vpop.f32.mrf.mxu1  ;;  %10969 = vmatmul.mubr.msk.bf16.vlgmr.msra.gmra.mxu1 %vm864_vm4, %v13876_v58  ;;  %10973 = vmatpush3.bf16.msra.mxu0 %v13625_v5 }
 0x1e5   : >> { %v970_v27 = vadd.f32 %v969_v22, %v902_v18  ;;  %10985 = vmatpush3.bf16.msra.mxu1 %v13355_v12  ;;  %v10670_v29 = vpop.f32.mrf.mxu0  ;;  %10974 = vmatprep.subr.bf16.mxu0 %v13021_v13 }
 0x1e6   : >> { %v10682_v17 = vpop.f32.mrf.mxu1  ;;  %10986 = vmatprep.subr.bf16.mxu1 %v13021_v13  ;;  %10980 = vmatprep.mubr.msk.bf16.mxu0 %vm13022_vm3, %v13021_v13 }
 0x1e7   : >> { %v905_v36 = vpop.f32.mrf.mxu0  ;;  %10992 = vmatprep.mubr.msk.bf16.mxu1 %vm13022_vm3, %v13021_v13 }
 0x1e8   : >> { %v972_v6 = vpop.f32.mrf.mxu1  ;;  %10975 = vmatpush3.bf16.msra.mxu0 %v13638_v9 }
 0x1e9   : >> { %10987 = vmatpush3.bf16.msra.mxu1 %v13368_v2  ;;  %v10671_v12 = vpop.f32.mrf.mxu0  ;;  %10976 = vmatprep.subr.bf16.mxu0 %v13021_v13 }
 0x1ea   : >> { %v10683_v41 = vpop.f32.mrf.mxu1  ;;  %10988 = vmatprep.subr.bf16.mxu1 %v13021_v13 }
 0x1ec   : >> { %10977 = vmatpush3.bf16.msra.mxu0 %v13657_v24 }
 0x1ed   : >> { %10989 = vmatpush3.bf16.msra.mxu1 %v13386_v14  ;;  %10978 = vmatprep.subr.bf16.mxu0 %v13021_v13 }
 0x1ee   : >> { %10990 = vmatprep.subr.bf16.mxu1 %v13021_v13 }
 0x1f0   : >> { %10979 = vmatpush3.bf16.msra.mxu0 %v13666_v32 }
 0x1f1   : >> { %10991 = vmatpush3.bf16.msra.mxu1 %v13401_v50  ;;  %10996 = vmatprep.subr.bf16.mxu0 %v13021_v13 }
 0x1f2   : >> { %11008 = vmatprep.subr.bf16.mxu1 %v13021_v13 }
 0x1f3   : >> { %v1050_v2 = vpop.f32.mrf.mxu0  ;;  %10981 = vmatmul.mubr.msk.bf16.vlgmr.msra.gmra.mxu0 %vm864_vm4, %v13902_v10 }
 0x1f4   : >> { %v1056_v1 = vadd.f32 %v1050_v2, %v970_v27  ;;  %v1145_v14 = vpop.f32.mrf.mxu1  ;;  %10993 = vmatmul.mubr.msk.bf16.vlgmr.msra.gmra.mxu1 %vm864_vm4, %v13567_v55  ;;  %10997 = vmatpush3.bf16.msra.mxu0 %v12641_v3 }
 0x1f5   : >> { %11009 = vmatpush3.bf16.msra.mxu1 %v13421_v19  ;;  %v10694_v50 = vpop.f32.mrf.mxu0  ;;  %10998 = vmatprep.subr.bf16.mxu0 %v13021_v13 }
 0x1f6   : >> { %v1151_v16 = vadd.f32 %v1145_v14, %v1056_v1  ;;  %v10706_v48 = vpop.f32.mrf.mxu1  ;;  %11010 = vmatprep.subr.bf16.mxu1 %v13021_v13  ;;  %11004 = vmatprep.mubr.msk.bf16.mxu0 %vm13022_vm3, %v13021_v13  ;;  %v14053_v50 = vld [vmem:[%s15839_s3 + $0x28] sm:$0xff]  }
 0x1f7   : >> { %v1053_v61 = vpop.f32.mrf.mxu0  ;;  %11016 = vmatprep.mubr.msk.bf16.mxu1 %vm13022_vm3, %v13021_v13  ;;  %v14060_v48 = vld [vmem:[%s15839_s3 + $0x8] sm:$0xff]  }
 0x1f8   : >> { %v1148_v55 = vpop.f32.mrf.mxu1  ;;  %10999 = vmatpush3.bf16.msra.mxu0 %v12642_v46  ;;  %v14074_v46 = vld [vmem:[%s15839_s3] sm:$0xff]  }
 0x1f9   : >> { %11011 = vmatpush3.bf16.msra.mxu1 %v13436_v20  ;;  %v10695_v19 = vpop.f32.mrf.mxu0  ;;  %11000 = vmatprep.subr.bf16.mxu0 %v13021_v13  ;;  %v12644_v20 = vld [vmem:[%s15839_s3] sm:$0xff]  }
 0x1fa   : >> { %v10707_v15 = vpop.f32.mrf.mxu1  ;;  %11012 = vmatprep.subr.bf16.mxu1 %v13021_v13  ;;  %v14067_v55 = vld [vmem:[%s15839_s3 + $0x20] sm:$0xff]   ;;  %v14081_v19 = vld [vmem:[%s15839_s3 + $0x58] sm:$0xff]  }
 0x1fb   : >> { %v14088_v15 = vld [vmem:[%s15839_s3 + $0x78] sm:$0xff]  }
 0x1fc   : >> { %11001 = vmatpush3.bf16.msra.mxu0 %v12643_v54 }
 0x1fd   : >> { %11013 = vmatpush3.bf16.msra.mxu1 %v13457_v23  ;;  %11002 = vmatprep.subr.bf16.mxu0 %v13021_v13 }
 0x1fe   : >> { %11014 = vmatprep.subr.bf16.mxu1 %v13021_v13 }
 0x200   : >> { %11003 = vmatpush3.bf16.msra.mxu0 %v12644_v20 }
 0x201   : >> { %11015 = vmatpush3.bf16.msra.mxu1 %v13471_v56  ;;  %11020 = vmatprep.subr.bf16.mxu0 %v13021_v13 }
 0x202   : >> { %11032 = vmatprep.subr.bf16.mxu1 %v13021_v13 }
 0x203   : >> { %v1240_v18 = vpop.f32.mrf.mxu0  ;;  %11005 = vmatmul.mubr.msk.bf16.vlgmr.msra.gmra.mxu0 %vm864_vm4, %v13559_v52 }
 0x204   : >> { %v1246_v23 = vadd.f32 %v1240_v18, %v1151_v16  ;;  %v1335_v22 = vpop.f32.mrf.mxu1  ;;  %11017 = vmatmul.mubr.msk.bf16.vlgmr.msra.gmra.mxu1 %vm864_vm4, %v13746_v39  ;;  %11021 = vmatpush3.bf16.msra.mxu0 %v13428_v51 }
 0x205   : >> { %11033 = vmatpush3.bf16.msra.mxu1 %v13487_v30  ;;  %v10718_v26 = vpop.f32.mrf.mxu0  ;;  %11022 = vmatprep.subr.bf16.mxu0 %v13021_v13 }
 0x206   : >> { %v1341_v56 = vadd.f32 %v1335_v22, %v1246_v23  ;;  %v10730_v27 = vpop.f32.mrf.mxu1  ;;  %11034 = vmatprep.subr.bf16.mxu1 %v13021_v13  ;;  %11028 = vmatprep.mubr.msk.bf16.mxu0 %vm13022_vm3, %v13021_v13  ;;  %v14099_v23 = vld [vmem:[%s15839_s3 + $0x50] sm:$0xff]  }
 0x207   : >> { %v1243_v52 = vpop.f32.mrf.mxu0  ;;  %11040 = vmatprep.mubr.msk.bf16.mxu1 %vm13022_vm3, %v13021_v13  ;;  %v14106_v26 = vld [vmem:[%s15839_s3 + $0x70] sm:$0xff]  }
 0x208   : >> { %v1338_v29 = vpop.f32.mrf.mxu1  ;;  %11023 = vmatpush3.bf16.msra.mxu0 %v13441_v21 }
 0x209   : >> { %11035 = vmatpush3.bf16.msra.mxu1 %v13509_v33  ;;  %v10719_v51 = vpop.f32.mrf.mxu0  ;;  %11024 = vmatprep.subr.bf16.mxu0 %v13021_v13  ;;  %v14117_v29 = vld [vmem:[%s15839_s3 + $0x48] sm:$0xff]  }
 0x20a   : >> { %v10731_v30 = vpop.f32.mrf.mxu1  ;;  %11036 = vmatprep.subr.bf16.mxu1 %v13021_v13 }
 0x20b   : >> { %v14124_v30 = vld [vmem:[%s15839_s3 + $0x68] sm:$0xff]  }
 0x20c   : >> { %11025 = vmatpush3.bf16.msra.mxu0 %v13464_v25 }
 0x20d   : >> { %11037 = vmatpush3.bf16.msra.mxu1 %v13530_v38  ;;  %11026 = vmatprep.subr.bf16.mxu0 %v13021_v13 }
 0x20e   : >> { %11038 = vmatprep.subr.bf16.mxu1 %v13021_v13 }
 0x210   : >> { %11027 = vmatpush3.bf16.msra.mxu0 %v13478_v28 }
 0x211   : >> { %11039 = vmatpush3.bf16.msra.mxu1 %v13544_v43  ;;  %11044 = vmatprep.subr.bf16.mxu0 %v13021_v13 }
 0x212   : >> { %11056 = vmatprep.subr.bf16.mxu1 %v13021_v13 }
 0x213   : >> { %v1431_v21 = vpop.f32.mrf.mxu0  ;;  %11029 = vmatmul.mubr.msk.bf16.vlgmr.msra.gmra.mxu0 %vm864_vm4, %v13630_v8 }
 0x214   : >> { %v1437_v33 = vadd.f32 %v1431_v21, %v1341_v56  ;;  %v1527_v25 = vpop.f32.mrf.mxu1  ;;  %11041 = vmatmul.mubr.msk.bf16.vlgmr.msra.gmra.mxu1 %vm864_vm4, %v13671_v35  ;;  %11045 = vmatpush3.bf16.msra.mxu0 %v13495_v31 }
 0x215   : >> { %11057 = vmatpush3.bf16.msra.mxu1 %v13557_v49  ;;  %v10742_v28 = vpop.f32.mrf.mxu0  ;;  %11046 = vmatprep.subr.bf16.mxu0 %v13021_v13 }
 0x216   : >> { %v1533_v38 = vadd.f32 %v1527_v25, %v1437_v33  ;;  %v10754_v43 = vpop.f32.mrf.mxu1  ;;  %11058 = vmatprep.subr.bf16.mxu1 %v13021_v13  ;;  %11052 = vmatprep.mubr.msk.bf16.mxu0 %vm13022_vm3, %v13021_v13  ;;  %v14131_v33 = vld [vmem:[%s15839_s3 + $0x40] sm:$0xff]   ;;  %v14145_v28 = vld [vmem:[%s15839_s3 + $0x98] sm:$0xff]  }
 0x217   : >> { %v1434_v39 = vpop.f32.mrf.mxu0  ;;  %11064 = vmatprep.mubr.msk.bf16.mxu1 %vm13022_vm3, %v13021_v13  ;;  %v14138_v25 = vld [vmem:[%s15839_s3 + $0x60] sm:$0xff]  }
 0x218   : >> { %v1530_v17 = vpop.f32.mrf.mxu1  ;;  %11047 = vmatpush3.bf16.msra.mxu0 %v13516_v34 }
 0x219   : >> { %11059 = vmatpush3.bf16.msra.mxu1 %v13575_v59  ;;  %v10743_v31 = vpop.f32.mrf.mxu0  ;;  %11048 = vmatprep.subr.bf16.mxu0 %v13021_v13 }
 0x21a   : >> { %v10755_v49 = vpop.f32.mrf.mxu1  ;;  %11060 = vmatprep.subr.bf16.mxu1 %v13021_v13  ;;  %v14163_v31 = vld [vmem:[%s15839_s3 + $0x90] sm:$0xff]  }
 0x21c   : >> { %11049 = vmatpush3.bf16.msra.mxu0 %v13537_v40 }
 0x21d   : >> { %11061 = vmatpush3.bf16.msra.mxu1 %v13593_v62  ;;  %11050 = vmatprep.subr.bf16.mxu0 %v13021_v13  ;;  %v9440_v62 = vld.sshfl [vmem:[%s13411_s28 + $0x42] sm:$0x3 pattern:$0x76325410] }
 0x21e   : >> { %11062 = vmatprep.subr.bf16.mxu1 %v13021_v13  ;;  %v2834_v6 = vshrl.u32 %v9440_v62, 16 }
 0x220   : >> { %11051 = vmatpush3.bf16.msra.mxu0 %v13551_v47 }
 0x221   : >> { %11063 = vmatpush3.bf16.msra.mxu1 %v13611_v0  ;;  %11068 = vmatprep.subr.bf16.mxu0 %v13021_v13 }
 0x222   : >> { %11080 = vmatprep.subr.bf16.mxu1 %v13021_v13 }
 0x223   : >> { %v1623_v34 = vpop.f32.mrf.mxu0  ;;  %11053 = vmatmul.mubr.msk.bf16.vlgmr.msra.gmra.mxu0 %vm864_vm4, %v13774_v45 }
 0x224   : >> { %v13990_v40 = vadd.f32 %v1623_v34, %v1533_v38  ;;  %v1672_v59 = vpop.f32.mrf.mxu1  ;;  %11065 = vmatmul.mubr.msk.bf16.vlgmr.msra.gmra.mxu1 %vm864_vm4, %v13876_v58  ;;  %11069 = vmatpush3.bf16.msra.mxu0 %v13564_v53  ;;  %v2836_v53 = vshll.u32 %v9440_v62, 16  ;;  %v14152_v38 = vld [vmem:[%s15839_s3 + $0xb8] sm:$0xff]   ;;  %v14170_v34 = vld [vmem:[%s15839_s3 + $0xb0] sm:$0xff]  }
 0x225   : >> { %11081 = vmatpush3.bf16.msra.mxu1 %v13625_v5  ;;  %v10766_v47 = vpop.f32.mrf.mxu0  ;;  %11070 = vmatprep.subr.bf16.mxu0 %v13021_v13 }
 0x226   : >> { %v10778_v0 = vpop.f32.mrf.mxu1  ;;  %11082 = vmatprep.subr.bf16.mxu1 %v13021_v13  ;;  %11076 = vmatprep.mubr.msk.bf16.mxu0 %vm13022_vm3, %v13021_v13  ;;  %v2838_v12 = vrot.slane %v2836_v53, 1  ;;  %v14188_v53 = vld [vmem:[%s15839_s3 + $0xa8] sm:$0xff]  }
 0x227   : >> { %v1626_v45 = vpop.f32.mrf.mxu0  ;;  %11088 = vmatprep.mubr.msk.bf16.mxu1 %vm13022_vm3, %v13021_v13 }
 0x228   : >> { %v1675_v36 = vpop.f32.mrf.mxu1  ;;  %11071 = vmatpush3.bf16.msra.mxu0 %v13582_v60  ;;  %v14012_v60 = vor.u32 %v2838_v12, %v2834_v6  ;;  %v14181_v45 = vld [vmem:[%s15839_s3 + $0x88] sm:$0xff]   ;;  %v14202_v6 = vld [vmem:[%s15839_s3 + $0xa0] sm:$0xff]   ;;  %v14209_v12 = vld [vmem:[%s15839_s3 + $0xd8] sm:$0xff]  }
 0x229   : >> { %11083 = vmatpush3.bf16.msra.mxu1 %v13638_v9  ;;  %v10767_v5 = vpop.f32.mrf.mxu0  ;;  %11072 = vmatprep.subr.bf16.mxu0 %v13021_v13  ;;  %v14017_v9 = vld [vmem:[%s15839_s3 + $0x38] sm:$0xff]  }
 0x22a   : >> { %v10779_v37 = vpop.f32.mrf.mxu1  ;;  %11084 = vmatprep.subr.bf16.mxu1 %v13021_v13 }
 0x22b   : >> { %v14195_v37 = vld [vmem:[%s15839_s3 + $0x80] sm:$0xff]  }
 0x22c   : >> { %11073 = vmatpush3.bf16.msra.mxu0 %v13600_v63  ;;  %v14024_v63 = vld [vmem:[%s15839_s3 + $0x18] sm:$0xff]  }
 0x22d   : >> { %11085 = vmatpush3.bf16.msra.mxu1 %v13657_v24  ;;  %11074 = vmatprep.subr.bf16.mxu0 %v13021_v13 }
 0x22e   : >> { %11086 = vmatprep.subr.bf16.mxu1 %v13021_v13 }
 0x230   : >> { %11075 = vmatpush3.bf16.msra.mxu0 %v13616_v4 }
 0x231   : >> { %11087 = vmatpush3.bf16.msra.mxu1 %v13666_v32  ;;  %11092 = vmatprep.subr.bf16.mxu0 %v13021_v13  ;;  %v14035_v32 = vld [vmem:[%s15839_s3 + $0x30] sm:$0xff]  }
 0x232   : >> { %11104 = vmatprep.subr.bf16.mxu1 %v13021_v13 }
 0x233   : >> { %v1712_v24 = vpop.f32.mrf.mxu0  ;;  %11077 = vmatmul.mubr.msk.bf16.vlgmr.msra.gmra.mxu0 %vm864_vm4, %v13902_v10 }
 0x234   : >> { %v1713_v4 = vadd.f32 %v1712_v24, %v1672_v59  ;;  %v1760_v41 = vpop.f32.mrf.mxu1  ;;  %11089 = vmatmul.mubr.msk.bf16.vlgmr.msra.gmra.mxu1 %vm864_vm4, %v14012_v60  ;;  %11093 = vmatpush3.bf16.msra.mxu0 %v14017_v9  ;;  %v14216_v24 = vld [vmem:[%s15839_s3 + $0xf8] sm:$0xff]  }
 0x235   : >> { %11105 = vmatpush3.bf16.msra.mxu1 %v14024_v63  ;;  %v10790_v42 = vpop.f32.mrf.mxu0  ;;  %11094 = vmatprep.subr.bf16.mxu0 %v13021_v13 }
 0x236   : >> { %v1766_v2 = vadd.f32 %v1760_v41, %v1713_v4  ;;  %v10802_v1 = vpop.f32.mrf.mxu1  ;;  %11106 = vmatprep.subr.bf16.mxu1 %v13021_v13  ;;  %11100 = vmatprep.mubr.msk.bf16.mxu0 %vm13022_vm3, %v13021_v13 }
 0x237   : >> { %v1715_v14 = vpop.f32.mrf.mxu0  ;;  %11112 = vmatprep.mubr.msk.bf16.mxu1 %vm13022_vm3, %v13021_v13  ;;  %v9535_v1 = vld.sshfl [vmem:[%s13411_s28 + $0x5a] sm:$0x3 pattern:$0x76325410] }
 0x238   : >> { %v1763_v3 = vpop.f32.mrf.mxu1  ;;  %11095 = vmatpush3.bf16.msra.mxu0 %v14035_v32 }
 0x239   : >> { %11107 = vmatpush3.bf16.msra.mxu1 %v14042_v44  ;;  %v10791_v16 = vpop.f32.mrf.mxu0  ;;  %11096 = vmatprep.subr.bf16.mxu0 %v13021_v13  ;;  %v14235_v3 = vld [vmem:[%s15839_s3 + $0xf0] sm:$0xff]  }
 0x23a   : >> { %v10803_v61 = vpop.f32.mrf.mxu1  ;;  %11108 = vmatprep.subr.bf16.mxu1 %v13021_v13  ;;  %v9550_v16 = vld.sshfl [vmem:[%s13411_s28 + $0x5c] sm:$0x3 pattern:$0x76325410] }
 0x23b   : >> { %v1636_v61 = vadd.f32 %v13345_v11, %v13990_v40  ;;  %v14250_v40 = vld [vmem:[%s15839_s3 + $0xc8] sm:$0xff]  }
 0x23c   : >> { %11097 = vmatpush3.bf16.msra.mxu0 %v14053_v50 }
 0x23d   : >> { %11109 = vmatpush3.bf16.msra.mxu1 %v14060_v48  ;;  %11098 = vmatprep.subr.bf16.mxu0 %v13021_v13 }
 0x23e   : >> { %11110 = vmatprep.subr.bf16.mxu1 %v13021_v13 }
 0x240   : >> { %11099 = vmatpush3.bf16.msra.mxu0 %v14067_v55 }
 0x241   : >> { %11111 = vmatpush3.bf16.msra.mxu1 %v14074_v46  ;;  %11116 = vmatprep.subr.bf16.mxu0 %v13021_v13 }
 0x242   : >> { %11128 = vmatprep.subr.bf16.mxu1 %v13021_v13 }
 0x243   : >> { %v1801_v54 = vpop.f32.mrf.mxu0  ;;  %11101 = vmatmul.mubr.msk.bf16.vlgmr.msra.gmra.mxu0 %vm864_vm4, %v13630_v8 }
 0x244   : >> { %v1807_v20 = vadd.f32 %v1801_v54, %v1766_v2  ;;  %v1842_v18 = vpop.f32.mrf.mxu1  ;;  %11113 = vmatmul.mubr.msk.bf16.vlgmr.msra.gmra.mxu1 %vm864_vm4, %v13627_v7  ;;  %11117 = vmatpush3.bf16.msra.mxu0 %v14081_v19  ;;  %v14227_v2 = vld [vmem:[%s15839_s3 + $0xd0] sm:$0xff]  }
 0x245   : >> { %11129 = vmatpush3.bf16.msra.mxu1 %v14088_v15  ;;  %v10814_v22 = vpop.f32.mrf.mxu0  ;;  %11118 = vmatprep.subr.bf16.mxu0 %v13021_v13 }
 0x246   : >> { %v1848_v56 = vadd.f32 %v1842_v18, %v1807_v20  ;;  %v10826_v27 = vpop.f32.mrf.mxu1  ;;  %11130 = vmatprep.subr.bf16.mxu1 %v13021_v13  ;;  %11124 = vmatprep.mubr.msk.bf16.mxu0 %vm13022_vm3, %v13021_v13  ;;  %v3469_v22 = vshll.u32 %v9535_v1, 16 }
 0x247   : >> { %v1804_v7 = vpop.f32.mrf.mxu0  ;;  %11136 = vmatprep.mubr.msk.bf16.mxu1 %vm13022_vm3, %v13021_v13 }
 0x248   : >> { %v1845_v52 = vpop.f32.mrf.mxu1  ;;  %11119 = vmatpush3.bf16.msra.mxu0 %v14099_v23  ;;  %v3561_v7 = vshll.u32 %v9550_v16, 16 }
 0x249   : >> { %11131 = vmatpush3.bf16.msra.mxu1 %v14106_v26  ;;  %v10815_v51 = vpop.f32.mrf.mxu0  ;;  %11120 = vmatprep.subr.bf16.mxu0 %v13021_v13 }
 0x24a   : >> { %v10827_v21 = vpop.f32.mrf.mxu1  ;;  %11132 = vmatprep.subr.bf16.mxu1 %v13021_v13  ;;  %v14257_v51 = vld [vmem:[%s15839_s3 + $0xe8] sm:$0xff]  }
 0x24b   : >> { %v1637_v21 = vmax.f32 %v1636_v61, 0.0 }
 0x24c   : >> { %11121 = vmatpush3.bf16.msra.mxu0 %v14117_v29 }
 0x24d   : >> { %11133 = vmatpush3.bf16.msra.mxu1 %v14124_v30  ;;  %11122 = vmatprep.subr.bf16.mxu0 %v13021_v13 }
 0x24e   : >> { %11134 = vmatprep.subr.bf16.mxu1 %v13021_v13 }
 0x250   : >> { %11123 = vmatpush3.bf16.msra.mxu0 %v14131_v33 }
 0x251   : >> { %11135 = vmatpush3.bf16.msra.mxu1 %v14138_v25  ;;  %11140 = vmatprep.subr.bf16.mxu0 %v13021_v13 }
 0x252   : >> { %11152 = vmatprep.subr.bf16.mxu1 %v13021_v13 }
 0x253   : >> { %v1904_v43 = vpop.f32.mrf.mxu0  ;;  %11125 = vmatmul.mubr.msk.bf16.vlgmr.msra.gmra.mxu0 %vm864_vm4, %v13671_v35 }
 0x254   : >> { %v1910_v39 = vadd.f32 %v1904_v43, %v1848_v56  ;;  %v1945_v17 = vpop.f32.mrf.mxu1  ;;  %11137 = vmatmul.mubr.msk.bf16.vlgmr.msra.gmra.mxu1 %vm864_vm4, %v13873_v57  ;;  %11141 = vmatpush3.bf16.msra.mxu0 %v14145_v28 }
 0x255   : >> { %11153 = vmatpush3.bf16.msra.mxu1 %v14152_v38  ;;  %v10838_v49 = vpop.f32.mrf.mxu0  ;;  %11142 = vmatprep.subr.bf16.mxu0 %v13021_v13 }
 0x256   : >> { %v1951_v59 = vadd.f32 %v1945_v17, %v1910_v39  ;;  %v10850_v47 = vpop.f32.mrf.mxu1  ;;  %11154 = vmatprep.subr.bf16.mxu1 %v13021_v13  ;;  %11148 = vmatprep.mubr.msk.bf16.mxu0 %vm13022_vm3, %v13021_v13  ;;  %v3467_v17 = vshrl.u32 %v9535_v1, 16  ;;  %v3471_v49 = vrot.slane %v3469_v22, 1 }
 0x257   : >> { %v1907_v62 = vpop.f32.mrf.mxu0  ;;  %11160 = vmatprep.mubr.msk.bf16.mxu1 %vm13022_vm3, %v13021_v13  ;;  %v14266_v47 = vld [vmem:[%s15839_s3 + $0xc0] sm:$0xff]  }
 0x258   : >> { %v1948_v0 = vpop.f32.mrf.mxu1  ;;  %11143 = vmatpush3.bf16.msra.mxu0 %v14163_v31  ;;  %v3559_v62 = vshrl.u32 %v9550_v16, 16  ;;  %v9565_v16 = vld.sshfl [vmem:[%s13411_s28 + $0x5e] sm:$0x3 pattern:$0x76325410] }
 0x259   : >> { %11155 = vmatpush3.bf16.msra.mxu1 %v14170_v34  ;;  %v10839_v36 = vpop.f32.mrf.mxu0  ;;  %11144 = vmatprep.subr.bf16.mxu0 %v13021_v13  ;;  %v3563_v0 = vrot.slane %v3561_v7, 1  ;;  %v3653_v22 = vshll.u32 %v9565_v16, 16 }
 0x25a   : >> { %v10851_v5 = vpop.f32.mrf.mxu1  ;;  %11156 = vmatprep.subr.bf16.mxu1 %v13021_v13  ;;  %v14273_v36 = vld [vmem:[%s15839_s3 + $0xe0] sm:$0xff]  }
 0x25b   : >> { %v14276_v5 = vor.u32 %v3471_v49, %v3467_v17 }
 0x25c   : >> { %11145 = vmatpush3.bf16.msra.mxu0 %v14181_v45 }
 0x25d   : >> { %11157 = vmatpush3.bf16.msra.mxu1 %v14188_v53  ;;  %11146 = vmatprep.subr.bf16.mxu0 %v13021_v13 }
 0x25e   : >> { %11158 = vmatprep.subr.bf16.mxu1 %v13021_v13 }
 0x260   : >> { %11147 = vmatpush3.bf16.msra.mxu0 %v14195_v37 }
 0x261   : >> { %11159 = vmatpush3.bf16.msra.mxu1 %v14202_v6  ;;  %11164 = vmatprep.subr.bf16.mxu0 %v13021_v13 }
 0x262   : >> { %11176 = vmatprep.subr.bf16.mxu1 %v13021_v13 }
 0x263   : >> { %v1986_v4 = vpop.f32.mrf.mxu0  ;;  %11149 = vmatmul.mubr.msk.bf16.vlgmr.msra.gmra.mxu0 %vm864_vm4, %v13876_v58 }
 0x264   : >> { %v1992_v41 = vadd.f32 %v1986_v4, %v1951_v59  ;;  %v2049_v42 = vpop.f32.mrf.mxu1  ;;  %11161 = vmatmul.mubr.msk.bf16.vlgmr.msra.gmra.mxu1 %vm864_vm4, %v13902_v10  ;;  %11165 = vmatpush3.bf16.msra.mxu0 %v14209_v12  ;;  %v14279_v4 = vor.u32 %v3563_v0, %v3559_v62 }
 0x265   : >> { %11177 = vmatpush3.bf16.msra.mxu1 %v14216_v24  ;;  %v10862_v14 = vpop.f32.mrf.mxu0  ;;  %11166 = vmatprep.subr.bf16.mxu0 %v13021_v13 }
 0x266   : >> { %v2055_v54 = vadd.f32 %v2049_v42, %v1992_v41  ;;  %v10874_v20 = vpop.f32.mrf.mxu1  ;;  %11178 = vmatprep.subr.bf16.mxu1 %v13021_v13  ;;  %11172 = vmatprep.mubr.msk.bf16.mxu0 %vm13022_vm3, %v13021_v13  ;;  %v14284_v41 = vld [vmem:[%s15839_s3 + $0x118] sm:$0xff]   ;;  %v14297_v14 = vld [vmem:[%s15839_s3 + $0x110] sm:$0xff]  }
 0x267   : >> { %v1989_v18 = vpop.f32.mrf.mxu0  ;;  %11184 = vmatprep.mubr.msk.bf16.mxu1 %vm13022_vm3, %v13021_v13 }
 0x268   : >> { %v2056_v56 = vadd.f32 %v13345_v11, %v2055_v54  ;;  %v2052_v27 = vpop.f32.mrf.mxu1  ;;  %11167 = vmatpush3.bf16.msra.mxu0 %v14227_v2 }
 0x269   : >> { %11179 = vmatpush3.bf16.msra.mxu1 %v14235_v3  ;;  %v10863_v52 = vpop.f32.mrf.mxu0  ;;  %11168 = vmatprep.subr.bf16.mxu0 %v13021_v13  ;;  %v14311_v27 = vld [vmem:[%s15839_s3 + $0x108] sm:$0xff]  }
 0x26a   : >> { %v2057_v43 = vmax.f32 %v2056_v56, 0.0  ;;  %v10875_v39 = vpop.f32.mrf.mxu1  ;;  %11180 = vmatprep.subr.bf16.mxu1 %v13021_v13 }
 0x26b   : >> { %v14320_v39 = vld [vmem:[%s15839_s3 + $0x100] sm:$0xff]  }
 0x26c   : >> { %v14260_v59 = vmax.f32 %v1637_v21, %v2057_v43  ;;  %11169 = vmatpush3.bf16.msra.mxu0 %v14250_v40  ;;  %v3651_v21 = vshrl.u32 %v9565_v16, 16  ;;  %v3655_v43 = vrot.slane %v3653_v22, 1 }
 0x26d   : >> { %11181 = vmatpush3.bf16.msra.mxu1 %v14257_v51  ;;  %11170 = vmatprep.subr.bf16.mxu0 %v13021_v13 }
 0x26e   : >> { %11182 = vmatprep.subr.bf16.mxu1 %v13021_v13  ;;  %v14325_v17 = vor.u32 %v3655_v43, %v3651_v21 }
 0x270   : >> { %11171 = vmatpush3.bf16.msra.mxu0 %v14266_v47 }
 0x271   : >> { %11183 = vmatpush3.bf16.msra.mxu1 %v14273_v36  ;;  %11188 = vmatprep.subr.bf16.mxu0 %v13021_v13 }
 0x272   : >> { %11200 = vmatprep.subr.bf16.mxu1 %v13021_v13 }
 0x273   : >> { %v2093_v42 = vpop.f32.mrf.mxu0  ;;  %11173 = vmatmul.mubr.msk.bf16.vlgmr.msra.gmra.mxu0 %vm864_vm4, %v14276_v5 }
 0x274   : >> { %v2133_v1 = vpop.f32.mrf.mxu1  ;;  %11185 = vmatmul.mubr.msk.bf16.vlgmr.msra.gmra.mxu1 %vm864_vm4, %v14279_v4  ;;  %11189 = vmatpush3.bf16.msra.mxu0 %v14284_v41 }
 0x275   : >> { %v2134_v61 = vadd.f32 %v2133_v1, %v2093_v42  ;;  %11201 = vmatpush3.bf16.msra.mxu1 %v14017_v9  ;;  %v10886_v54 = vpop.f32.mrf.mxu0  ;;  %11190 = vmatprep.subr.bf16.mxu0 %v13021_v13  ;;  %v9574_v1 = vld.sshfl [vmem:[%s13411_s28 + $0x24] sm:$0x3 pattern:$0x76325410] }
 0x276   : >> { %v10898_v20 = vpop.f32.mrf.mxu1  ;;  %11202 = vmatprep.subr.bf16.mxu1 %v13021_v13  ;;  %11196 = vmatprep.mubr.msk.bf16.mxu0 %vm13022_vm3, %v13021_v13 }
 0x277   : >> { %v2096_v18 = vpop.f32.mrf.mxu0  ;;  %11208 = vmatprep.mubr.msk.bf16.mxu1 %vm13022_vm3, %v13021_v13  ;;  %v3819_v20 = vshll.u32 %v9574_v1, 16 }
 0x278   : >> { %v2136_v56 = vpop.f32.mrf.mxu1  ;;  %11191 = vmatpush3.bf16.msra.mxu0 %v14297_v14 }
 0x279   : >> { %11203 = vmatpush3.bf16.msra.mxu1 %v14035_v32  ;;  %v10887_v7 = vpop.f32.mrf.mxu0  ;;  %11192 = vmatprep.subr.bf16.mxu0 %v13021_v13  ;;  %v3817_v56 = vshrl.u32 %v9574_v1, 16 }
 0x27a   : >> { %v10899_v52 = vpop.f32.mrf.mxu1  ;;  %11204 = vmatprep.subr.bf16.mxu1 %v13021_v13  ;;  %v3821_v7 = vrot.slane %v3819_v20, 1 }
 0x27c   : >> { %11193 = vmatpush3.bf16.msra.mxu0 %v14311_v27  ;;  %v3822_v52 = vor.u32 %v3821_v7, %v3817_v56 }
 0x27d   : >> { %11205 = vmatpush3.bf16.msra.mxu1 %v14053_v50  ;;  %11194 = vmatprep.subr.bf16.mxu0 %v13021_v13 }
 0x27e   : >> { %11206 = vmatprep.subr.bf16.mxu1 %v13021_v13 }
 0x280   : >> { %11195 = vmatpush3.bf16.msra.mxu0 %v14320_v39 }
 0x281   : >> { %11207 = vmatpush3.bf16.msra.mxu1 %v14067_v55  ;;  %11212 = vmatprep.subr.bf16.mxu0 %v13021_v13 }
 0x282   : >> { %11224 = vmatprep.subr.bf16.mxu1 %v13021_v13 }
 0x283   : >> { %v2173_v49 = vpop.f32.mrf.mxu0  ;;  %11197 = vmatmul.mubr.msk.bf16.vlgmr.msra.gmra.mxu0 %vm864_vm4, %v14325_v17 }
 0x284   : >> { %v2179_v62 = vadd.f32 %v2173_v49, %v2134_v61  ;;  %v2214_v0 = vpop.f32.mrf.mxu1  ;;  %11209 = vmatmul.mubr.msk.bf16.vlgmr.msra.gmra.mxu1 %vm864_vm4, %v13671_v35  ;;  %11213 = vmatpush3.bf16.msra.mxu0 %v14024_v63 }
 0x285   : >> { %11225 = vmatpush3.bf16.msra.mxu1 %v14081_v19  ;;  %v10910_v42 = vpop.f32.mrf.mxu0  ;;  %11214 = vmatprep.subr.bf16.mxu0 %v13021_v13 }
 0x286   : >> { %v2220_v16 = vadd.f32 %v2214_v0, %v2179_v62  ;;  %v10922_v54 = vpop.f32.mrf.mxu1  ;;  %11226 = vmatprep.subr.bf16.mxu1 %v13021_v13  ;;  %11220 = vmatprep.mubr.msk.bf16.mxu0 %vm13022_vm3, %v13021_v13 }
 0x287   : >> { %v2176_v61 = vpop.f32.mrf.mxu0  ;;  %11232 = vmatprep.mubr.msk.bf16.mxu1 %vm13022_vm3, %v13021_v13 }
 0x288   : >> { %v2217_v35 = vpop.f32.mrf.mxu1  ;;  %11215 = vmatpush3.bf16.msra.mxu0 %v14042_v44 }
 0x289   : >> { %11227 = vmatpush3.bf16.msra.mxu1 %v14099_v23  ;;  %v10911_v18 = vpop.f32.mrf.mxu0  ;;  %11216 = vmatprep.subr.bf16.mxu0 %v13021_v13 }
 0x28a   : >> { %v10923_v22 = vpop.f32.mrf.mxu1  ;;  %11228 = vmatprep.subr.bf16.mxu1 %v13021_v13 }
 0x28c   : >> { %11217 = vmatpush3.bf16.msra.mxu0 %v14060_v48 }
 0x28d   : >> { %11229 = vmatpush3.bf16.msra.mxu1 %v14117_v29  ;;  %11218 = vmatprep.subr.bf16.mxu0 %v13021_v13 }
 0x28e   : >> { %11230 = vmatprep.subr.bf16.mxu1 %v13021_v13 }
 0x290   : >> { %11219 = vmatpush3.bf16.msra.mxu0 %v14074_v46 }
 0x291   : >> { %11231 = vmatpush3.bf16.msra.mxu1 %v14131_v33  ;;  %11236 = vmatprep.subr.bf16.mxu0 %v13021_v13 }
 0x292   : >> { %11248 = vmatprep.subr.bf16.mxu1 %v13021_v13 }
 0x293   : >> { %v2255_v21 = vpop.f32.mrf.mxu0  ;;  %11221 = vmatmul.mubr.msk.bf16.vlgmr.msra.gmra.mxu0 %vm864_vm4, %v13630_v8 }
 0x294   : >> { %v2261_v43 = vadd.f32 %v2255_v21, %v2220_v16  ;;  %v2296_v49 = vpop.f32.mrf.mxu1  ;;  %11233 = vmatmul.mubr.msk.bf16.vlgmr.msra.gmra.mxu1 %vm864_vm4, %v3822_v52  ;;  %11237 = vmatpush3.bf16.msra.mxu0 %v14088_v15 }
 0x295   : >> { %11249 = vmatpush3.bf16.msra.mxu1 %v14145_v28  ;;  %v10934_v62 = vpop.f32.mrf.mxu0  ;;  %11238 = vmatprep.subr.bf16.mxu0 %v13021_v13 }
 0x296   : >> { %v2302_v0 = vadd.f32 %v2296_v49, %v2261_v43  ;;  %v10946_v42 = vpop.f32.mrf.mxu1  ;;  %11250 = vmatprep.subr.bf16.mxu1 %v13021_v13  ;;  %11244 = vmatprep.mubr.msk.bf16.mxu0 %vm13022_vm3, %v13021_v13 }
 0x297   : >> { %v2258_v1 = vpop.f32.mrf.mxu0  ;;  %11256 = vmatprep.mubr.msk.bf16.mxu1 %vm13022_vm3, %v13021_v13 }
 0x298   : >> { %v2299_v8 = vpop.f32.mrf.mxu1  ;;  %11239 = vmatpush3.bf16.msra.mxu0 %v14106_v26  ;;  %v9584_v1 = vld.sshfl [vmem:[%s13411_s28 + $0x60] sm:$0x3 pattern:$0x76325410] }
 0x299   : >> { %11251 = vmatpush3.bf16.msra.mxu1 %v14163_v31  ;;  %v10935_v16 = vpop.f32.mrf.mxu0  ;;  %11240 = vmatprep.subr.bf16.mxu0 %v13021_v13 }
 0x29a   : >> { %v10947_v54 = vpop.f32.mrf.mxu1  ;;  %11252 = vmatprep.subr.bf16.mxu1 %v13021_v13 }
 0x29c   : >> { %11241 = vmatpush3.bf16.msra.mxu0 %v14124_v30 }
 0x29d   : >> { %11253 = vmatpush3.bf16.msra.mxu1 %v14181_v45  ;;  %11242 = vmatprep.subr.bf16.mxu0 %v13021_v13 }
 0x29e   : >> { %11254 = vmatprep.subr.bf16.mxu1 %v13021_v13 }
 0x2a0   : >> { %11243 = vmatpush3.bf16.msra.mxu0 %v14138_v25 }
 0x2a1   : >> { %11255 = vmatpush3.bf16.msra.mxu1 %v14195_v37  ;;  %11260 = vmatprep.subr.bf16.mxu0 %v13021_v13 }
 0x2a2   : >> { %11272 = vmatprep.subr.bf16.mxu1 %v13021_v13 }
 0x2a3   : >> { %v2359_v61 = vpop.f32.mrf.mxu0  ;;  %11245 = vmatmul.mubr.msk.bf16.vlgmr.msra.gmra.mxu0 %vm864_vm4, %v13876_v58 }
 0x2a4   : >> { %v2365_v35 = vadd.f32 %v2359_v61, %v2302_v0  ;;  %v2422_v20 = vpop.f32.mrf.mxu1  ;;  %11257 = vmatmul.mubr.msk.bf16.vlgmr.msra.gmra.mxu1 %vm864_vm4, %v13902_v10  ;;  %11261 = vmatpush3.bf16.msra.mxu0 %v14152_v38 }
 0x2a5   : >> { %11273 = vmatpush3.bf16.msra.mxu1 %v14209_v12  ;;  %v10958_v18 = vpop.f32.mrf.mxu0  ;;  %11262 = vmatprep.subr.bf16.mxu0 %v13021_v13 }
 0x2a6   : >> { %v2428_v22 = vadd.f32 %v2422_v20, %v2365_v35  ;;  %v10970_v56 = vpop.f32.mrf.mxu1  ;;  %11274 = vmatprep.subr.bf16.mxu1 %v13021_v13  ;;  %11268 = vmatprep.mubr.msk.bf16.mxu0 %vm13022_vm3, %v13021_v13  ;;  %v4103_v20 = vshll.u32 %v9584_v1, 16 }
 0x2a7   : >> { %v2362_v7 = vpop.f32.mrf.mxu0  ;;  %11280 = vmatprep.mubr.msk.bf16.mxu1 %vm13022_vm3, %v13021_v13 }
 0x2a8   : >> { %v2425_v52 = vpop.f32.mrf.mxu1  ;;  %11263 = vmatpush3.bf16.msra.mxu0 %v14170_v34  ;;  %v4101_v7 = vshrl.u32 %v9584_v1, 16 }
 0x2a9   : >> { %11275 = vmatpush3.bf16.msra.mxu1 %v14227_v2  ;;  %v10959_v21 = vpop.f32.mrf.mxu0  ;;  %11264 = vmatprep.subr.bf16.mxu0 %v13021_v13  ;;  %v4105_v52 = vrot.slane %v4103_v20, 1 }
 0x2aa   : >> { %v10971_v43 = vpop.f32.mrf.mxu1  ;;  %11276 = vmatprep.subr.bf16.mxu1 %v13021_v13 }
 0x2ab   : >> { %v14431_v21 = vor.u32 %v4105_v52, %v4101_v7 }
 0x2ac   : >> { %11265 = vmatpush3.bf16.msra.mxu0 %v14188_v53 }
 0x2ad   : >> { %11277 = vmatpush3.bf16.msra.mxu1 %v14250_v40  ;;  %11266 = vmatprep.subr.bf16.mxu0 %v13021_v13 }
 0x2ae   : >> { %11278 = vmatprep.subr.bf16.mxu1 %v13021_v13 }
 0x2b0   : >> { %11267 = vmatpush3.bf16.msra.mxu0 %v14202_v6 }
 0x2b1   : >> { %11279 = vmatpush3.bf16.msra.mxu1 %v14266_v47  ;;  %11284 = vmatprep.subr.bf16.mxu0 %v13021_v13 }
 0x2b2   : >> { %11296 = vmatprep.subr.bf16.mxu1 %v13021_v13 }
 0x2b3   : >> { %v2485_v49 = vpop.f32.mrf.mxu0  ;;  %11269 = vmatmul.mubr.msk.bf16.vlgmr.msra.gmra.mxu0 %vm864_vm4, %v14012_v60 }
 0x2b4   : >> { %v2491_v62 = vadd.f32 %v2485_v49, %v2428_v22  ;;  %v14405_v0 = vpop.f32.mrf.mxu1  ;;  %11281 = vmatmul.mubr.msk.bf16.vlgmr.msra.gmra.mxu1 %vm864_vm4, %v14279_v4  ;;  %11285 = vmatpush3.bf16.msra.mxu0 %v14216_v24 }
 0x2b5   : >> { %11297 = vmatpush3.bf16.msra.mxu1 %v14284_v41  ;;  %v10982_v42 = vpop.f32.mrf.mxu0  ;;  %11286 = vmatprep.subr.bf16.mxu0 %v13021_v13 }
 0x2b6   : >> { %v2492_v8 = vadd.f32 %v13345_v11, %v2491_v62  ;;  %v10994_v16 = vpop.f32.mrf.mxu1  ;;  %11298 = vmatprep.subr.bf16.mxu1 %v13021_v13  ;;  %11292 = vmatprep.mubr.msk.bf16.mxu0 %vm13022_vm3, %v13021_v13 }
 0x2b7   : >> { %v2488_v54 = vpop.f32.mrf.mxu0  ;;  %11304 = vmatprep.mubr.msk.bf16.mxu1 %vm13022_vm3, %v13021_v13 }
 0x2b8   : >> { %v2493_v61 = vmax.f32 %v2492_v8, 0.0  ;;  %v2532_v35 = vpop.f32.mrf.mxu1  ;;  %11287 = vmatpush3.bf16.msra.mxu0 %v14235_v3 }
 0x2b9   : >> { %11299 = vmatpush3.bf16.msra.mxu1 %v14297_v14  ;;  %v10983_v18 = vpop.f32.mrf.mxu0  ;;  %11288 = vmatprep.subr.bf16.mxu0 %v13021_v13 }
 0x2ba   : >> { %v14423_v22 = vmax.f32 %v14260_v59, %v2493_v61  ;;  %v10995_v56 = vpop.f32.mrf.mxu1  ;;  %11300 = vmatprep.subr.bf16.mxu1 %v13021_v13 }
 0x2bc   : >> { %11289 = vmatpush3.bf16.msra.mxu0 %v14257_v51 }
 0x2bd   : >> { %11301 = vmatpush3.bf16.msra.mxu1 %v14311_v27  ;;  %11290 = vmatprep.subr.bf16.mxu0 %v13021_v13 }
 0x2be   : >> { %11302 = vmatprep.subr.bf16.mxu1 %v13021_v13 }
 0x2c0   : >> { %11291 = vmatpush3.bf16.msra.mxu0 %v14273_v36 }
 0x2c1   : >> { %11303 = vmatpush3.bf16.msra.mxu1 %v14320_v39  ;;  %11308 = vmatprep.subr.bf16.mxu0 %v13021_v13 }
 0x2c2   : >> { %11320 = vmatprep.subr.bf16.mxu1 %v13021_v13 }
 0x2c3   : >> { %v2569_v59 = vpop.f32.mrf.mxu0  ;;  %11293 = vmatmul.mubr.msk.bf16.vlgmr.msra.gmra.mxu0 %vm864_vm4, %v14325_v17 }
 0x2c4   : >> { %v14438_v43 = vpop.f32.mrf.mxu1  ;;  %11305 = vmatmul.mubr.msk.bf16.vlgmr.msra.gmra.mxu1 %vm864_vm4, %v14431_v21  ;;  %11309 = vmatpush3.bf16.msra.mxu0 %v14017_v9  ;;  %v2570_v52 = vadd.f32 %v2569_v59, %v14405_v0 }
 0x2c5   : >> { %11321 = vmatpush3.bf16.msra.mxu1 %v14024_v63  ;;  %v11006_v49 = vpop.f32.mrf.mxu0  ;;  %11310 = vmatprep.subr.bf16.mxu0 %v13021_v13 }
 0x2c6   : >> { %v11018_v62 = vpop.f32.mrf.mxu1  ;;  %11322 = vmatprep.subr.bf16.mxu1 %v13021_v13  ;;  %11316 = vmatprep.mubr.msk.bf16.mxu0 %vm13022_vm3, %v13021_v13 }
 0x2c7   : >> { %v2572_v42 = vpop.f32.mrf.mxu0  ;;  %11328 = vmatprep.mubr.msk.bf16.mxu1 %vm13022_vm3, %v13021_v13 }
 0x2c8   : >> { %v2612_v1 = vpop.f32.mrf.mxu1  ;;  %11311 = vmatpush3.bf16.msra.mxu0 %v14035_v32 }
 0x2c9   : >> { %11323 = vmatpush3.bf16.msra.mxu1 %v14042_v44  ;;  %v11007_v8 = vpop.f32.mrf.mxu0  ;;  %11312 = vmatprep.subr.bf16.mxu0 %v13021_v13  ;;  %v2615_v1 = vadd.f32 %v14438_v43, %v2570_v52 }
 0x2ca   : >> { %v11019_v16 = vpop.f32.mrf.mxu1  ;;  %11324 = vmatprep.subr.bf16.mxu1 %v13021_v13 }
 0x2cc   : >> { %11313 = vmatpush3.bf16.msra.mxu0 %v14053_v50 }
 0x2cd   : >> { %11325 = vmatpush3.bf16.msra.mxu1 %v14060_v48  ;;  %11314 = vmatprep.subr.bf16.mxu0 %v13021_v13 }
 0x2ce   : >> { %11326 = vmatprep.subr.bf16.mxu1 %v13021_v13 }
 0x2d0   : >> { %11315 = vmatpush3.bf16.msra.mxu0 %v14067_v55 }
 0x2d1   : >> { %11327 = vmatpush3.bf16.msra.mxu1 %v14074_v46  ;;  %11332 = vmatprep.subr.bf16.mxu0 %v13021_v13 }
 0x2d2   : >> { %11344 = vmatprep.subr.bf16.mxu1 %v13021_v13 }
 0x2d3   : >> { %v2650_v54 = vpop.f32.mrf.mxu0  ;;  %11317 = vmatmul.mubr.msk.bf16.vlgmr.msra.gmra.mxu0 %vm864_vm4, %v13876_v58 }
 0x2d4   : >> { %v2691_v61 = vpop.f32.mrf.mxu1  ;;  %11329 = vmatmul.mubr.msk.bf16.vlgmr.msra.gmra.mxu1 %vm864_vm4, %v13873_v57  ;;  %11333 = vmatpush3.bf16.msra.mxu0 %v14081_v19 }
 0x2d5   : >> { %11345 = vmatpush3.bf16.msra.mxu1 %v14088_v15  ;;  %v11030_v35 = vpop.f32.mrf.mxu0  ;;  %11334 = vmatprep.subr.bf16.mxu0 %v13021_v13 }
 0x2d6   : >> { %v11042_v20 = vpop.f32.mrf.mxu1  ;;  %11346 = vmatprep.subr.bf16.mxu1 %v13021_v13  ;;  %11340 = vmatprep.mubr.msk.bf16.mxu0 %vm13022_vm3, %v13021_v13 }
 0x2d7   : >> { %v2653_v18 = vpop.f32.mrf.mxu0  ;;  %11352 = vmatprep.mubr.msk.bf16.mxu1 %vm13022_vm3, %v13021_v13 }
 0x2d8   : >> { %v2694_v56 = vpop.f32.mrf.mxu1  ;;  %11335 = vmatpush3.bf16.msra.mxu0 %v14099_v23 }
 0x2d9   : >> { %11347 = vmatpush3.bf16.msra.mxu1 %v14106_v26  ;;  %v11031_v57 = vpop.f32.mrf.mxu0  ;;  %11336 = vmatprep.subr.bf16.mxu0 %v13021_v13 }
 0x2da   : >> { %v11043_v7 = vpop.f32.mrf.mxu1  ;;  %11348 = vmatprep.subr.bf16.mxu1 %v13021_v13 }
 0x2dc   : >> { %11337 = vmatpush3.bf16.msra.mxu0 %v14117_v29 }
 0x2dd   : >> { %11349 = vmatpush3.bf16.msra.mxu1 %v14124_v30  ;;  %11338 = vmatprep.subr.bf16.mxu0 %v13021_v13 }
 0x2de   : >> { %11350 = vmatprep.subr.bf16.mxu1 %v13021_v13 }
 0x2e0   : >> { %11339 = vmatpush3.bf16.msra.mxu0 %v14131_v33 }
 0x2e1   : >> { %11351 = vmatpush3.bf16.msra.mxu1 %v14138_v25  ;;  %11356 = vmatprep.subr.bf16.mxu0 %v13021_v13 }
 0x2e2   : >> { %11368 = vmatprep.subr.bf16.mxu1 %v13021_v13 }
 0x2e3   : >> { %v2732_v49 = vpop.f32.mrf.mxu0  ;;  %11341 = vmatmul.mubr.msk.bf16.vlgmr.msra.gmra.mxu0 %vm864_vm4, %v13902_v10 }
 0x2e4   : >> { %v2773_v62 = vpop.f32.mrf.mxu1  ;;  %11353 = vmatmul.mubr.msk.bf16.vlgmr.msra.gmra.mxu1 %vm864_vm4, %v14276_v5  ;;  %11357 = vmatpush3.bf16.msra.mxu0 %v14145_v28  ;;  %v2656_v5 = vadd.f32 %v2650_v54, %v2615_v1 }
 0x2e5   : >> { %11369 = vmatpush3.bf16.msra.mxu1 %v14152_v38  ;;  %v11054_v42 = vpop.f32.mrf.mxu0  ;;  %11358 = vmatprep.subr.bf16.mxu0 %v13021_v13 }
 0x2e6   : >> { %v11066_v0 = vpop.f32.mrf.mxu1  ;;  %11370 = vmatprep.subr.bf16.mxu1 %v13021_v13  ;;  %11364 = vmatprep.mubr.msk.bf16.mxu0 %vm13022_vm3, %v13021_v13  ;;  %v2697_v35 = vadd.f32 %v2691_v61, %v2656_v5 }
 0x2e7   : >> { %v2735_v59 = vpop.f32.mrf.mxu0  ;;  %11376 = vmatprep.mubr.msk.bf16.mxu1 %vm13022_vm3, %v13021_v13 }
 0x2e8   : >> { %v2776_v8 = vpop.f32.mrf.mxu1  ;;  %11359 = vmatpush3.bf16.msra.mxu0 %v14163_v31  ;;  %v2738_v20 = vadd.f32 %v2732_v49, %v2697_v35 }
 0x2e9   : >> { %11371 = vmatpush3.bf16.msra.mxu1 %v14170_v34  ;;  %v11055_v16 = vpop.f32.mrf.mxu0  ;;  %11360 = vmatprep.subr.bf16.mxu0 %v13021_v13  ;;  %v9592_v8 = vld.sshfl [vmem:[%s13411_s28] sm:$0x2 pattern:$0x76325410] }
 0x2ea   : >> { %v11067_v43 = vpop.f32.mrf.mxu1  ;;  %11372 = vmatprep.subr.bf16.mxu1 %v13021_v13  ;;  %v2779_v54 = vadd.f32 %v2773_v62, %v2738_v20  ;;  %v14535_v16 = vld.sshfl [vmem:[%s13411_s28 + $0x2] sm:$0x2 pattern:$0x76325410]  ;;  %v4407_v35 = vrot.slane %v9592_v8, 1 }
 0x2ec   : >> { %11361 = vmatpush3.bf16.msra.mxu0 %v14181_v45 }
 0x2ed   : >> { %11373 = vmatpush3.bf16.msra.mxu1 %v14188_v53  ;;  %11362 = vmatprep.subr.bf16.mxu0 %v13021_v13 }
 0x2ee   : >> { %11374 = vmatprep.subr.bf16.mxu1 %v13021_v13 }
 0x2f0   : >> { %11363 = vmatpush3.bf16.msra.mxu0 %v14195_v37 }
 0x2f1   : >> { %11375 = vmatpush3.bf16.msra.mxu1 %v14202_v6  ;;  %11380 = vmatprep.subr.bf16.mxu0 %v13021_v13 }
 0x2f2   : >> { %11392 = vmatprep.subr.bf16.mxu1 %v13021_v13 }
 0x2f3   : >> { %v2814_v18 = vpop.f32.mrf.mxu0  ;;  %11365 = vmatmul.mubr.msk.bf16.vlgmr.msra.gmra.mxu0 %vm864_vm4, %v14279_v4 }
 0x2f4   : >> { %v2820_v61 = vadd.f32 %v2814_v18, %v2779_v54  ;;  %v2877_v56 = vpop.f32.mrf.mxu1  ;;  %11377 = vmatmul.mubr.msk.bf16.vlgmr.msra.gmra.mxu1 %vm864_vm4, %v14325_v17  ;;  %11381 = vmatpush3.bf16.msra.mxu0 %v14209_v12 }
 0x2f5   : >> { %11393 = vmatpush3.bf16.msra.mxu1 %v14216_v24  ;;  %v11078_v57 = vpop.f32.mrf.mxu0  ;;  %11382 = vmatprep.subr.bf16.mxu0 %v13021_v13 }
 0x2f6   : >> { %v2883_v7 = vadd.f32 %v2877_v56, %v2820_v61  ;;  %v11090_v52 = vpop.f32.mrf.mxu1  ;;  %11394 = vmatprep.subr.bf16.mxu1 %v13021_v13  ;;  %11388 = vmatprep.mubr.msk.bf16.mxu0 %vm13022_vm3, %v13021_v13 }
 0x2f7   : >> { %v2817_v49 = vpop.f32.mrf.mxu0  ;;  %11400 = vmatprep.mubr.msk.bf16.mxu1 %vm13022_vm3, %v13021_v13 }
 0x2f8   : >> { %v2884_v62 = vadd.f32 %v13345_v11, %v2883_v7  ;;  %v2880_v42 = vpop.f32.mrf.mxu1  ;;  %11383 = vmatpush3.bf16.msra.mxu0 %v14227_v2 }
 0x2f9   : >> { %11395 = vmatpush3.bf16.msra.mxu1 %v14235_v3  ;;  %v11079_v1 = vpop.f32.mrf.mxu0  ;;  %11384 = vmatprep.subr.bf16.mxu0 %v13021_v13 }
 0x2fa   : >> { %v2885_v0 = vmax.f32 %v2884_v62, 0.0  ;;  %v11091_v59 = vpop.f32.mrf.mxu1  ;;  %11396 = vmatprep.subr.bf16.mxu1 %v13021_v13  ;;  %v14568_v1 = vld.sshfl [vmem:[%s13411_s28 + $0x4] sm:$0x2 pattern:$0x76325410] }
 0x2fc   : >> { %v2886_v5 = vmax.f32 %v14423_v22, %v2885_v0  ;;  %11385 = vmatpush3.bf16.msra.mxu0 %v14250_v40  ;;  %v4461_v22 = vrot.slane %v14535_v16, 1  ;;  %v4515_v0 = vrot.slane %v14568_v1, 1 }
 0x2fd   : >> { %11397 = vmatpush3.bf16.msra.mxu1 %v14257_v51  ;;  %11386 = vmatprep.subr.bf16.mxu0 %v13021_v13 }
 0x2fe   : >> { %v2888_v43 = vrot.slane %v2886_v5, 7  ;;  %11398 = vmatprep.subr.bf16.mxu1 %v13021_v13 }
 0x300   : >> { %v2891_v20 = vsel %vm540_vm1, 0.0, %v2888_v43  ;;  %11387 = vmatpush3.bf16.msra.mxu0 %v14266_v47 }
 0x301   : >> { %v2893_v54 = vsel %vm542_vm2, %v2891_v20, 0.0  ;;  %11399 = vmatpush3.bf16.msra.mxu1 %v14273_v36  ;;  %11404 = vmatprep.subr.bf16.mxu0 %v13021_v13 }
 0x302   : >> { %v2894_v18 = vpack.c.bf16 %v2893_v54, %v2893_v54  ;;  %11416 = vmatprep.subr.bf16.mxu1 %v13021_v13 }
 0x303   : >> { %v2993_v61 = vpop.f32.mrf.mxu0  ;;  %11389 = vmatmul.mubr.msk.bf16.vlgmr.msra.gmra.mxu0 %vm864_vm4, %v4407_v35 }
 0x304   : >> { %9443 = vst.msk [vmem:[%s14547_s22 + $0x2] sm:$0x3] %vm362_vm0, %v2894_v18  ;;  %v3075_v56 = vpop.f32.mrf.mxu1  ;;  %11401 = vmatmul.mubr.msk.bf16.vlgmr.msra.gmra.mxu1 %vm864_vm4, %v4461_v22  ;;  %11405 = vmatpush3.bf16.msra.mxu0 %v14284_v41 }
 0x305   : >> { %v3076_v57 = vadd.f32 %v3075_v56, %v2993_v61  ;;  %11417 = vmatpush3.bf16.msra.mxu1 %v14017_v9  ;;  %v11102_v7 = vpop.f32.mrf.mxu0  ;;  %11406 = vmatprep.subr.bf16.mxu0 %v13021_v13 }
 0x306   : >> { %v11114_v52 = vpop.f32.mrf.mxu1  ;;  %11418 = vmatprep.subr.bf16.mxu1 %v13021_v13  ;;  %11412 = vmatprep.mubr.msk.bf16.mxu0 %vm13022_vm3, %v13021_v13 }
 0x307   : >> { %v2996_v49 = vpop.f32.mrf.mxu0  ;;  %11424 = vmatprep.mubr.msk.bf16.mxu1 %vm13022_vm3, %v13021_v13 }
 0x308   : >> { %v3078_v62 = vpop.f32.mrf.mxu1  ;;  %11407 = vmatpush3.bf16.msra.mxu0 %v14297_v14 }
 0x309   : >> { %11419 = vmatpush3.bf16.msra.mxu1 %v14035_v32  ;;  %v11103_v9 = vpop.f32.mrf.mxu0  ;;  %11408 = vmatprep.subr.bf16.mxu0 %v13021_v13 }
 0x30a   : >> { %v11115_v42 = vpop.f32.mrf.mxu1  ;;  %11420 = vmatprep.subr.bf16.mxu1 %v13021_v13 }
 0x30c   : >> { %11409 = vmatpush3.bf16.msra.mxu0 %v14311_v27 }
 0x30d   : >> { %11421 = vmatpush3.bf16.msra.mxu1 %v14053_v50  ;;  %11410 = vmatprep.subr.bf16.mxu0 %v13021_v13 }
 0x30e   : >> { %11422 = vmatprep.subr.bf16.mxu1 %v13021_v13 }
 0x310   : >> { %11411 = vmatpush3.bf16.msra.mxu0 %v14320_v39 }
 0x311   : >> { %11423 = vmatpush3.bf16.msra.mxu1 %v14067_v55  ;;  %11428 = vmatprep.subr.bf16.mxu0 %v13021_v13 }
 0x312   : >> { %11440 = vmatprep.subr.bf16.mxu1 %v13021_v13 }
 0x313   : >> { %v3166_v32 = vpop.f32.mrf.mxu0  ;;  %11413 = vmatmul.mubr.msk.bf16.vlgmr.msra.gmra.mxu0 %vm864_vm4, %v4515_v0 }
 0x314   : >> { %v3172_v50 = vadd.f32 %v3166_v32, %v3076_v57  ;;  %v3258_v59 = vpop.f32.mrf.mxu1  ;;  %11425 = vmatmul.mubr.msk.bf16.vlgmr.msra.gmra.mxu1 %vm864_vm4, %v13902_v10  ;;  %11429 = vmatpush3.bf16.msra.mxu0 %v14024_v63 }
 0x315   : >> { %11441 = vmatpush3.bf16.msra.mxu1 %v14081_v19  ;;  %v11126_v5 = vpop.f32.mrf.mxu0  ;;  %11430 = vmatprep.subr.bf16.mxu0 %v13021_v13 }
 0x316   : >> { %v3264_v55 = vadd.f32 %v3258_v59, %v3172_v50  ;;  %v11138_v8 = vpop.f32.mrf.mxu1  ;;  %11442 = vmatprep.subr.bf16.mxu1 %v13021_v13  ;;  %11436 = vmatprep.mubr.msk.bf16.mxu0 %vm13022_vm3, %v13021_v13 }
 0x317   : >> { %v3169_v43 = vpop.f32.mrf.mxu0  ;;  %11448 = vmatprep.mubr.msk.bf16.mxu1 %vm13022_vm3, %v13021_v13 }
 0x318   : >> { %v3261_v35 = vpop.f32.mrf.mxu1  ;;  %11431 = vmatpush3.bf16.msra.mxu0 %v14042_v44 }
 0x319   : >> { %11443 = vmatpush3.bf16.msra.mxu1 %v14099_v23  ;;  %v11127_v10 = vpop.f32.mrf.mxu0  ;;  %11432 = vmatprep.subr.bf16.mxu0 %v13021_v13 }
 0x31a   : >> { %v11139_v63 = vpop.f32.mrf.mxu1  ;;  %11444 = vmatprep.subr.bf16.mxu1 %v13021_v13 }
 0x31c   : >> { %11433 = vmatpush3.bf16.msra.mxu0 %v14060_v48 }
 0x31d   : >> { %11445 = vmatpush3.bf16.msra.mxu1 %v14117_v29  ;;  %11434 = vmatprep.subr.bf16.mxu0 %v13021_v13 }
 0x31e   : >> { %11446 = vmatprep.subr.bf16.mxu1 %v13021_v13 }
 0x320   : >> { %11435 = vmatpush3.bf16.msra.mxu0 %v14074_v46 }
 0x321   : >> { %11447 = vmatpush3.bf16.msra.mxu1 %v14131_v33  ;;  %11452 = vmatprep.subr.bf16.mxu0 %v13021_v13 }
 0x322   : >> { %11464 = vmatprep.subr.bf16.mxu1 %v13021_v13 }
 0x323   : >> { %v3350_v44 = vpop.f32.mrf.mxu0  ;;  %11437 = vmatmul.mubr.msk.bf16.vlgmr.msra.gmra.mxu0 %vm864_vm4, %v13876_v58 }
 0x324   : >> { %v3356_v19 = vadd.f32 %v3350_v44, %v3264_v55  ;;  %v3442_v48 = vpop.f32.mrf.mxu1  ;;  %11449 = vmatmul.mubr.msk.bf16.vlgmr.msra.gmra.mxu1 %vm864_vm4, %v14012_v60  ;;  %11453 = vmatpush3.bf16.msra.mxu0 %v14088_v15 }
 0x325   : >> { %11465 = vmatpush3.bf16.msra.mxu1 %v14145_v28  ;;  %v11150_v46 = vpop.f32.mrf.mxu0  ;;  %11454 = vmatprep.subr.bf16.mxu0 %v13021_v13 }
 0x326   : >> { %v3448_v23 = vadd.f32 %v3442_v48, %v3356_v19  ;;  %v11162_v29 = vpop.f32.mrf.mxu1  ;;  %11466 = vmatprep.subr.bf16.mxu1 %v13021_v13  ;;  %11460 = vmatprep.mubr.msk.bf16.mxu0 %vm13022_vm3, %v13021_v13 }
 0x327   : >> { %v3353_v58 = vpop.f32.mrf.mxu0  ;;  %11472 = vmatprep.mubr.msk.bf16.mxu1 %vm13022_vm3, %v13021_v13 }
 0x328   : >> { %v3445_v33 = vpop.f32.mrf.mxu1  ;;  %11455 = vmatpush3.bf16.msra.mxu0 %v14106_v26 }
 0x329   : >> { %11467 = vmatpush3.bf16.msra.mxu1 %v14163_v31  ;;  %v11151_v60 = vpop.f32.mrf.mxu0  ;;  %11456 = vmatprep.subr.bf16.mxu0 %v13021_v13 }
 0x32a   : >> { %v11163_v15 = vpop.f32.mrf.mxu1  ;;  %11468 = vmatprep.subr.bf16.mxu1 %v13021_v13 }
 0x32c   : >> { %11457 = vmatpush3.bf16.msra.mxu0 %v14124_v30 }
 0x32d   : >> { %11469 = vmatpush3.bf16.msra.mxu1 %v14181_v45  ;;  %11458 = vmatprep.subr.bf16.mxu0 %v13021_v13 }
 0x32e   : >> { %11470 = vmatprep.subr.bf16.mxu1 %v13021_v13 }
 0x330   : >> { %11459 = vmatpush3.bf16.msra.mxu0 %v14138_v25 }
 0x331   : >> { %11471 = vmatpush3.bf16.msra.mxu1 %v14195_v37  ;;  %11476 = vmatprep.subr.bf16.mxu0 %v13021_v13 }
 0x332   : >> { %11488 = vmatprep.subr.bf16.mxu1 %v13021_v13 }
 0x333   : >> { %v3534_v26 = vpop.f32.mrf.mxu0  ;;  %11461 = vmatmul.mubr.msk.bf16.vlgmr.msra.gmra.mxu0 %vm864_vm4, %v14279_v4 }
 0x334   : >> { %v3540_v28 = vadd.f32 %v3534_v26, %v3448_v23  ;;  %v3626_v30 = vpop.f32.mrf.mxu1  ;;  %11473 = vmatmul.mubr.msk.bf16.vlgmr.msra.gmra.mxu1 %vm864_vm4, %v14325_v17  ;;  %11477 = vmatpush3.bf16.msra.mxu0 %v14152_v38 }
 0x335   : >> { %11489 = vmatpush3.bf16.msra.mxu1 %v14209_v12  ;;  %v11174_v25 = vpop.f32.mrf.mxu0  ;;  %11478 = vmatprep.subr.bf16.mxu0 %v13021_v13 }
 0x336   : >> { %v3632_v31 = vadd.f32 %v3626_v30, %v3540_v28  ;;  %v11186_v45 = vpop.f32.mrf.mxu1  ;;  %11490 = vmatprep.subr.bf16.mxu1 %v13021_v13  ;;  %11484 = vmatprep.mubr.msk.bf16.mxu0 %vm13022_vm3, %v13021_v13 }
 0x337   : >> { %v3537_v37 = vpop.f32.mrf.mxu0  ;;  %11496 = vmatprep.mubr.msk.bf16.mxu1 %vm13022_vm3, %v13021_v13 }
 0x338   : >> { %v3629_v4 = vpop.f32.mrf.mxu1  ;;  %11479 = vmatpush3.bf16.msra.mxu0 %v14170_v34 }
 0x339   : >> { %11491 = vmatpush3.bf16.msra.mxu1 %v14227_v2  ;;  %v11175_v38 = vpop.f32.mrf.mxu0  ;;  %11480 = vmatprep.subr.bf16.mxu0 %v13021_v13 }
 0x33a   : >> { %v11187_v12 = vpop.f32.mrf.mxu1  ;;  %11492 = vmatprep.subr.bf16.mxu1 %v13021_v13 }
 0x33c   : >> { %11481 = vmatpush3.bf16.msra.mxu0 %v14188_v53 }
 0x33d   : >> { %11493 = vmatpush3.bf16.msra.mxu1 %v14250_v40  ;;  %11482 = vmatprep.subr.bf16.mxu0 %v13021_v13 }
 0x33e   : >> { %11494 = vmatprep.subr.bf16.mxu1 %v13021_v13 }
 0x340   : >> { %11483 = vmatpush3.bf16.msra.mxu0 %v14202_v6 }
 0x341   : >> { %11495 = vmatpush3.bf16.msra.mxu1 %v14266_v47  ;;  %11500 = vmatprep.subr.bf16.mxu0 %v13021_v13 }
 0x342   : >> { %11512 = vmatprep.subr.bf16.mxu1 %v13021_v13 }
 0x343   : >> { %v3718_v34 = vpop.f32.mrf.mxu0  ;;  %11485 = vmatmul.mubr.msk.bf16.vlgmr.msra.gmra.mxu0 %vm864_vm4, %v14431_v21  ;;  %v9609_v21 = vld.sshfl [vmem:[%s13411_s28 + $0x6] sm:$0x2 pattern:$0x76325410] }
 0x344   : >> { %v14653_v2 = vadd.f32 %v3718_v34, %v3632_v31  ;;  %v3761_v53 = vpop.f32.mrf.mxu1  ;;  %11497 = vmatmul.mubr.msk.bf16.vlgmr.msra.gmra.mxu1 %vm864_vm4, %v4461_v22  ;;  %11501 = vmatpush3.bf16.msra.mxu0 %v14216_v24 }
 0x345   : >> { %11513 = vmatpush3.bf16.msra.mxu1 %v14284_v41  ;;  %v11198_v6 = vpop.f32.mrf.mxu0  ;;  %11502 = vmatprep.subr.bf16.mxu0 %v13021_v13 }
 0x346   : >> { %v11210_v40 = vpop.f32.mrf.mxu1  ;;  %11514 = vmatprep.subr.bf16.mxu1 %v13021_v13  ;;  %11508 = vmatprep.mubr.msk.bf16.mxu0 %vm13022_vm3, %v13021_v13  ;;  %v3725_v48 = vadd.f32 %v13345_v11, %v14653_v2 }
 0x347   : >> { %v3721_v47 = vpop.f32.mrf.mxu0  ;;  %11520 = vmatprep.mubr.msk.bf16.mxu1 %vm13022_vm3, %v13021_v13 }
 0x348   : >> { %v3764_v17 = vpop.f32.mrf.mxu1  ;;  %11503 = vmatpush3.bf16.msra.mxu0 %v14235_v3  ;;  %v4898_v3 = vrot.slane %v9609_v21, 1  ;;  %v3726_v15 = vmax.f32 %v3725_v48, 0.0 }
 0x349   : >> { %11515 = vmatpush3.bf16.msra.mxu1 %v14297_v14  ;;  %v11199_v24 = vpop.f32.mrf.mxu0  ;;  %11504 = vmatprep.subr.bf16.mxu0 %v13021_v13 }
 0x34a   : >> { %v11211_v41 = vpop.f32.mrf.mxu1  ;;  %11516 = vmatprep.subr.bf16.mxu1 %v13021_v13 }
 0x34c   : >> { %11505 = vmatpush3.bf16.msra.mxu0 %v14257_v51 }
 0x34d   : >> { %11517 = vmatpush3.bf16.msra.mxu1 %v14311_v27  ;;  %11506 = vmatprep.subr.bf16.mxu0 %v13021_v13 }
 0x34e   : >> { %11518 = vmatprep.subr.bf16.mxu1 %v13021_v13 }
 0x350   : >> { %11507 = vmatpush3.bf16.msra.mxu0 %v14273_v36 }
 0x351   : >> { %11519 = vmatpush3.bf16.msra.mxu1 %v14320_v39 }
 0x353   : >> { %v3801_v14 = vpop.f32.mrf.mxu0  ;;  %11509 = vmatmul.mubr.msk.bf16.vlgmr.msra.gmra.mxu0 %vm864_vm4, %v4515_v0 }
 0x354   : >> { %v3802_v16 = vadd.f32 %v3801_v14, %v3761_v53  ;;  %v3860_v20 = vpop.f32.mrf.mxu1  ;;  %11521 = vmatmul.mubr.msk.bf16.vlgmr.msra.gmra.mxu1 %vm864_vm4, %v4898_v3 }
 0x355   : >> { %v11222_v51 = vpop.f32.mrf.mxu0 }
 0x356   : >> { %v3866_v27 = vadd.f32 %v3860_v20, %v3802_v16  ;;  %v11234_v22 = vpop.f32.mrf.mxu1 }
 0x357   : >> { %v3804_v54 = vpop.f32.mrf.mxu0 }
 0x358   : >> { %v3863_v18 = vpop.f32.mrf.mxu1 }
 0x359   : >> { %v11223_v13 = vpop.f32.mrf.mxu0 }
 0x35a   : >> { %v11235_v61 = vpop.f32.mrf.mxu1 }
 0x363   : >> { %v3901_v36 = vpop.f32.mrf.mxu0 }
 0x364   : >> { %v3907_v56 = vadd.f32 %v3901_v36, %v3866_v27  ;;  %v3942_v57 = vpop.f32.mrf.mxu1 }
 0x365   : >> { %v11246_v39 = vpop.f32.mrf.mxu0 }
 0x366   : >> { %v3948_v7 = vadd.f32 %v3942_v57, %v3907_v56  ;;  %v11258_v52 = vpop.f32.mrf.mxu1 }
 0x367   : >> { %v3904_v49 = vpop.f32.mrf.mxu0 }
 0x368   : >> { %v3945_v62 = vpop.f32.mrf.mxu1 }
 0x369   : >> { %v11247_v9 = vpop.f32.mrf.mxu0 }
 0x36a   : >> { %v11259_v42 = vpop.f32.mrf.mxu1 }
 0x373   : >> { %v4002_v1 = vpop.f32.mrf.mxu0 }
 0x374   : >> { %v4008_v0 = vadd.f32 %v4002_v1, %v3948_v7  ;;  %v4043_v32 = vpop.f32.mrf.mxu1 }
 0x375   : >> { %v11270_v50 = vpop.f32.mrf.mxu0 }
 0x376   : >> { %v4049_v59 = vadd.f32 %v4043_v32, %v4008_v0  ;;  %v11282_v5 = vpop.f32.mrf.mxu1 }
 0x377   : >> { %v4005_v55 = vpop.f32.mrf.mxu0 }
 0x378   : >> { %v4046_v8 = vpop.f32.mrf.mxu1 }
 0x379   : >> { %v11271_v43 = vpop.f32.mrf.mxu0 }
 0x37a   : >> { %v11283_v35 = vpop.f32.mrf.mxu1 }
 0x383   : >> { %v4084_v10 = vpop.f32.mrf.mxu0 }
 0x384   : >> { %v4090_v63 = vadd.f32 %v4084_v10, %v4049_v59  ;;  %v4144_v44 = vpop.f32.mrf.mxu1 }
 0x385   : >> { %v11294_v19 = vpop.f32.mrf.mxu0 }
 0x386   : >> { %v4150_v46 = vadd.f32 %v4144_v44, %v4090_v63  ;;  %v11306_v23 = vpop.f32.mrf.mxu1 }
 0x387   : >> { %v4087_v29 = vpop.f32.mrf.mxu0 }
 0x388   : >> { %v4151_v58 = vadd.f32 %v13345_v11, %v4150_v46  ;;  %v4147_v33 = vpop.f32.mrf.mxu1 }
 0x389   : >> { %v11295_v60 = vpop.f32.mrf.mxu0 }
 0x38a   : >> { %v4152_v26 = vmax.f32 %v4151_v58, 0.0  ;;  %v11307_v28 = vpop.f32.mrf.mxu1 }
 0x38c   : >> { %v4153_v30 = vmax.f32 %v3726_v15, %v4152_v26 }
 0x393   : >> { %v4188_v25 = vpop.f32.mrf.mxu0 }
 0x394   : >> { %v4228_v31 = vpop.f32.mrf.mxu1 }
 0x395   : >> { %v4229_v45 = vadd.f32 %v4228_v31, %v4188_v25  ;;  %v11318_v37 = vpop.f32.mrf.mxu0 }
 0x396   : >> { %v11330_v4 = vpop.f32.mrf.mxu1 }
 0x397   : >> { %v4191_v38 = vpop.f32.mrf.mxu0 }
 0x398   : >> { %v4231_v12 = vpop.f32.mrf.mxu1 }
 0x399   : >> { %v11319_v34 = vpop.f32.mrf.mxu0 }
 0x39a   : >> { %v11331_v2 = vpop.f32.mrf.mxu1 }
 0x3a3   : >> { %v4268_v53 = vpop.f32.mrf.mxu0 }
 0x3a4   : >> { %v4274_v6 = vadd.f32 %v4268_v53, %v4229_v45  ;;  %v4309_v40 = vpop.f32.mrf.mxu1 }
 0x3a5   : >> { %v11342_v47 = vpop.f32.mrf.mxu0 }
 0x3a6   : >> { %v4315_v17 = vadd.f32 %v4309_v40, %v4274_v6  ;;  %v11354_v24 = vpop.f32.mrf.mxu1 }
 0x3a7   : >> { %v4271_v41 = vpop.f32.mrf.mxu0 }
 0x3a8   : >> { %v4312_v21 = vpop.f32.mrf.mxu1 }
 0x3a9   : >> { %v11343_v3 = vpop.f32.mrf.mxu0 }
 0x3aa   : >> { %v11355_v14 = vpop.f32.mrf.mxu1 }
 0x3b3   : >> { %v4350_v16 = vpop.f32.mrf.mxu0 }
 0x3b4   : >> { %v4356_v20 = vadd.f32 %v4350_v16, %v4315_v17  ;;  %v4391_v51 = vpop.f32.mrf.mxu1 }
 0x3b5   : >> { %v11366_v27 = vpop.f32.mrf.mxu0 }
 0x3b6   : >> { %v4397_v22 = vadd.f32 %v4391_v51, %v4356_v20  ;;  %v11378_v54 = vpop.f32.mrf.mxu1 }
 0x3b7   : >> { %v4353_v18 = vpop.f32.mrf.mxu0 }
 0x3b8   : >> { %v4394_v13 = vpop.f32.mrf.mxu1 }
 0x3b9   : >> { %v11367_v61 = vpop.f32.mrf.mxu0 }
 0x3ba   : >> { %v11379_v36 = vpop.f32.mrf.mxu1 }
 0x3c3   : >> { %v4445_v56 = vpop.f32.mrf.mxu0 }
 0x3c4   : >> { %v4451_v57 = vadd.f32 %v4445_v56, %v4397_v22  ;;  %v4499_v39 = vpop.f32.mrf.mxu1 }
 0x3c5   : >> { %v11390_v7 = vpop.f32.mrf.mxu0 }
 0x3c6   : >> { %v4505_v52 = vadd.f32 %v4499_v39, %v4451_v57  ;;  %v11402_v49 = vpop.f32.mrf.mxu1 }
 0x3c7   : >> { %v4448_v62 = vpop.f32.mrf.mxu0 }
 0x3c8   : >> { %v4502_v9 = vpop.f32.mrf.mxu1  ;;  %v14696_v62 = vld [vmem:[%s15842_s6] ss:$0 sm:$0xff] (%p809_p12) }
 0x3c9   : >> { %v11391_v42 = vpop.f32.mrf.mxu0 }
 0x3ca   : >> { %v11403_v1 = vpop.f32.mrf.mxu1 }
 0x3d3   : >> { %v4553_v0 = vpop.f32.mrf.mxu0 }
 0x3d4   : >> { %v4559_v32 = vadd.f32 %v4553_v0, %v4505_v52  ;;  %v4597_v50 = vpop.f32.mrf.mxu1 }
 0x3d5   : >> { %v11414_v59 = vpop.f32.mrf.mxu0 }
 0x3d6   : >> { %v4560_v5 = vadd.f32 %v13345_v11, %v4559_v32  ;;  %v11426_v55 = vpop.f32.mrf.mxu1 }
 0x3d7   : >> { %v4556_v8 = vpop.f32.mrf.mxu0 }
 0x3d8   : >> { %v4561_v43 = vmax.f32 %v4560_v5, 0.0  ;;  %v4600_v35 = vpop.f32.mrf.mxu1 }
 0x3d9   : >> { %v11415_v10 = vpop.f32.mrf.mxu0 }
 0x3da   : >> { %v4562_v63 = vmax.f32 %v4153_v30, %v4561_v43  ;;  %v11427_v44 = vpop.f32.mrf.mxu1 }
 0x3e3   : >> { %v4637_v19 = vpop.f32.mrf.mxu0 }
 0x3e4   : >> { %v4677_v48 = vpop.f32.mrf.mxu1  ;;  %v4638_v38 = vadd.f32 %v4637_v19, %v4597_v50 }
 0x3e5   : >> { %v11438_v46 = vpop.f32.mrf.mxu0 }
 0x3e6   : >> { %v11450_v23 = vpop.f32.mrf.mxu1  ;;  %v4683_v2 = vadd.f32 %v4677_v48, %v4638_v38 }
 0x3e7   : >> { %v4640_v29 = vpop.f32.mrf.mxu0 }
 0x3e8   : >> { %v4680_v58 = vpop.f32.mrf.mxu1 }
 0x3e9   : >> { %v11439_v33 = vpop.f32.mrf.mxu0 }
 0x3ea   : >> { %v11451_v60 = vpop.f32.mrf.mxu1 }
 0x3f3   : >> { %v4718_v15 = vpop.f32.mrf.mxu0 }
 0x3f4   : >> { %v4759_v26 = vpop.f32.mrf.mxu1  ;;  %v4724_v40 = vadd.f32 %v4718_v15, %v4683_v2 }
 0x3f5   : >> { %v11462_v28 = vpop.f32.mrf.mxu0 }
 0x3f6   : >> { %v11474_v25 = vpop.f32.mrf.mxu1  ;;  %v4765_v41 = vadd.f32 %v4759_v26, %v4724_v40 }
 0x3f7   : >> { %v4721_v31 = vpop.f32.mrf.mxu0 }
 0x3f8   : >> { %v4762_v45 = vpop.f32.mrf.mxu1 }
 0x3f9   : >> { %v11463_v37 = vpop.f32.mrf.mxu0 }
 0x3fa   : >> { %v11475_v4 = vpop.f32.mrf.mxu1 }
 0x403   : >> { %v4800_v12 = vpop.f32.mrf.mxu0 }
 0x404   : >> { %v4841_v30 = vpop.f32.mrf.mxu1  ;;  %v4806_v21 = vadd.f32 %v4800_v12, %v4765_v41 }
 0x405   : >> { %v11486_v34 = vpop.f32.mrf.mxu0 }
 0x406   : >> { %v11498_v53 = vpop.f32.mrf.mxu1  ;;  %v4847_v3 = vadd.f32 %v4841_v30, %v4806_v21 }
 0x407   : >> { %v4803_v6 = vpop.f32.mrf.mxu0 }
 0x408   : >> { %v4844_v47 = vpop.f32.mrf.mxu1 }
 0x409   : >> { %v11487_v17 = vpop.f32.mrf.mxu0 }
 0x40a   : >> { %v11499_v24 = vpop.f32.mrf.mxu1 }
 0x413   : >> { %v4882_v14 = vpop.f32.mrf.mxu0 }
 0x414   : >> { %v4888_v16 = vadd.f32 %v4882_v14, %v4847_v3  ;;  %v4936_v20 = vpop.f32.mrf.mxu1 }
 0x415   : >> { %v11510_v51 = vpop.f32.mrf.mxu0 }
 0x416   : >> { %v4942_v27 = vadd.f32 %v4936_v20, %v4888_v16  ;;  %v11522_v22 = vpop.f32.mrf.mxu1 }
 0x417   : >> { %v4885_v54 = vpop.f32.mrf.mxu0 }
 0x418   : >> { %v4943_v18 = vadd.f32 %v13345_v11, %v4942_v27  ;;  %v4939_v13 = vpop.f32.mrf.mxu1 }
 0x419   : >> { %v11511_v61 = vpop.f32.mrf.mxu0 }
 0x41a   : >> { %v4944_v36 = vmax.f32 %v4943_v18, 0.0  ;;  %v11523_v56 = vpop.f32.mrf.mxu1 }
 0x41c   : >> { %v4945_v57 = vmax.f32 %v4562_v63, %v4944_v36 }
 0x41e   : >> { %v4947_v39 = vrot.slane %v4945_v57, 7 }
 0x420   : >> { %v4949_v7 = vsel %vm540_vm1, 0.0, %v4947_v39  ;;  %811 = sbr.rel (!%p809_p12) target bundleno = 274 (0x112), region = 227 }
 0x421   : >> { %v4950_v52 = vsel %vm542_vm2, %v4949_v7, 0.0 }
 0x422   : >> { %v4951_v49 = vpack.c.bf16 %v4950_v52, %v4950_v52 }
 0x424   : >> { %9612 = vst.msk [vmem:[%s14547_s22 + $0x12] sm:$0x3] %vm362_vm0, %v4951_v49 }
 0x425 LB: >> { %v12645_v9 = vld [vmem:[#allocation5 + $0x38] sm:$0xff]   ;;  %v13023_v42 = vmov 0.0   ;;  %v12647_v11 = vld [vmem:[#allocation5 + $0x30] sm:$0xff]   ;;  %vm13024_vm5 = vmmov 0   ;;  %v12649_v32 = vld [vmem:[#allocation5 + $0x28] sm:$0xff]   ;;  %s9613_s17 = sshll.u32 %s13009_s5, 1  ;;  %s13009_s5 = sphi %s14698_s5, %s4962_s5  }
 0x426   : >> { %11524 = vmatprep.subr.bf16.mxu0 %v13023_v42  ;;  %11536 = vmatprep.subr.bf16.mxu1 %v13023_v42  ;;  %v12646_v1 = vld [vmem:[#allocation5 + $0x18] sm:$0xff]   ;;  %v12648_v0 = vld [vmem:[#allocation5 + $0x10] sm:$0xff]   ;;  %v12650_v50 = vld [vmem:[#allocation5 + $0x8] sm:$0xff]   ;;  %s14718_s29 = scalar_lea.vmem [#allocation3], %s9613_s17  ;;  %s14875_s26 = scalar_lea.vmem [#allocation4], %s9613_s17 }
 0x427   : >> { %11525 = vmatpush3.bf16.msra.mxu0 %v12645_v9  ;;  %11532 = vmatprep.mubr.msk.bf16.mxu0 %vm13024_vm5, %v13023_v42  ;;  %v12651_v59 = vld [vmem:[#allocation5 + $0x20] sm:$0xff]   ;;  %v12653_v43 = vld [vmem:[#allocation5 + $0x58] sm:$0xff]   ;;  %v12655_v10 = vld [vmem:[#allocation5 + $0x50] sm:$0xff]   ;;  %s4962_s5 = sadd.s32 1, %s13009_s5  }
 0x428   : >> { %11537 = vmatpush3.bf16.msra.mxu1 %v12646_v1  ;;  %11526 = vmatprep.subr.bf16.mxu0 %v13023_v42  ;;  %v12652_v5 = vld [vmem:[#allocation5] sm:$0xff]   ;;  %v12654_v35 = vld [vmem:[#allocation5 + $0x78] sm:$0xff]   ;;  %v12656_v63 = vld [vmem:[#allocation5 + $0x70] sm:$0xff]   ;;  %p4959_p8 = scmp.ge.s32.totalorder %s4962_s5, 6  }
 0x429   : >> { %11538 = vmatprep.subr.bf16.mxu1 %v13023_v42  ;;  %11544 = vmatprep.mubr.msk.bf16.mxu1 %vm13024_vm5, %v13023_v42  ;;  %v12657_v19 = vld [vmem:[#allocation5 + $0x48] sm:$0xff]   ;;  %v12659_v23 = vld [vmem:[#allocation5 + $0x40] sm:$0xff]   ;;  %v12661_v15 = vld [vmem:[#allocation5 + $0x98] sm:$0xff]   ;;  %s14890_s14 = smov (%p4959_p8), 0  }
 0x42a   : >> { %v12658_v46 = vld [vmem:[#allocation5 + $0x68] sm:$0xff]   ;;  %v12660_v33 = vld [vmem:[#allocation5 + $0x60] sm:$0xff]   ;;  %v12662_v28 = vld [vmem:[#allocation5 + $0xb8] sm:$0xff]  }
 0x42b   : >> { %11527 = vmatpush3.bf16.msra.mxu0 %v12647_v11  ;;  %v9616_v55 = vld [vmem:[%s14718_s29 + $0x12] sm:$0x1]  ;;  %v9614_v8 = vld [vmem:[%s14718_s29 + $0x10] sm:$0x1]  ;;  %v9628_v60 = vld [vmem:[%s14718_s29 + $0x14] sm:$0x1] }
 0x42c   : >> { %11539 = vmatpush3.bf16.msra.mxu1 %v12648_v0  ;;  %11528 = vmatprep.subr.bf16.mxu0 %v13023_v42  ;;  %v9635_v44 = vld.sshfl [vmem:[%s14718_s29] sm:$0x3 pattern:$0x76325410]  ;;  %v12663_v31 = vld [vmem:[#allocation5 + $0x90] sm:$0xff]   ;;  %v12667_v34 = vld [vmem:[#allocation5 + $0x80] sm:$0xff]  }
 0x42d   : >> { %11540 = vmatprep.subr.bf16.mxu1 %v13023_v42  ;;  %v5229_v48 = vshll.u32 %v9635_v44, 16  ;;  %v5227_v29 = vshrl.u32 %v9635_v44, 16  ;;  %v9643_v25 = vld.sshfl [vmem:[%s14718_s29 + $0x2] sm:$0x3 pattern:$0x76325410] }
 0x42e   : >> { %v12664_v45 = vld [vmem:[#allocation5 + $0xb0] sm:$0xff]   ;;  %v9651_v37 = vld.sshfl [vmem:[%s14718_s29 + $0x4] sm:$0x3 pattern:$0x76325410]  ;;  %v5324_v4 = vshll.u32 %v9643_v25, 16 }
 0x42f   : >> { %11529 = vmatpush3.bf16.msra.mxu0 %v12649_v32  ;;  %v5231_v58 = vrot.slane %v5229_v48, 1  ;;  %v12665_v38 = vld [vmem:[#allocation5 + $0x88] sm:$0xff]   ;;  %v5419_v12 = vshll.u32 %v9651_v37, 16  ;;  %v5322_v2 = vshrl.u32 %v9643_v25, 16  ;;  %v5417_v6 = vshrl.u32 %v9651_v37, 16  ;;  %v12668_v47 = vld [vmem:[#allocation5 + $0xa0] sm:$0xff]  }
 0x430   : >> { %11541 = vmatpush3.bf16.msra.mxu1 %v12650_v50  ;;  %11530 = vmatprep.subr.bf16.mxu0 %v13023_v42  ;;  %v12666_v30 = vld [vmem:[#allocation5 + $0xa8] sm:$0xff]   ;;  %v5326_v53 = vrot.slane %v5324_v4, 1  ;;  %v12669_v41 = vld [vmem:[#allocation5 + $0xd8] sm:$0xff]   ;;  %v12671_v16 = vld [vmem:[#allocation5 + $0xd0] sm:$0xff]  }
 0x431   : >> { %11542 = vmatprep.subr.bf16.mxu1 %v13023_v42  ;;  %v14738_v26 = vor.u32 %v5231_v58, %v5227_v29  ;;  %v5421_v40 = vrot.slane %v5419_v12, 1  ;;  %v12670_v21 = vld [vmem:[#allocation5 + $0xf8] sm:$0xff]   ;;  %v12672_v20 = vld [vmem:[#allocation5 + $0xf0] sm:$0xff]   ;;  %v12673_v27 = vld [vmem:[#allocation5 + $0xc8] sm:$0xff]  }
 0x432   : >> { %v14757_v17 = vor.u32 %v5326_v53, %v5322_v2  ;;  %v9658_v3 = vld.sshfl [vmem:[%s14718_s29 + $0x10] sm:$0x3 pattern:$0x76325410]  ;;  %v12674_v54 = vld [vmem:[#allocation5 + $0xe8] sm:$0xff]   ;;  %v12675_v18 = vld [vmem:[#allocation5 + $0xc0] sm:$0xff]  }
 0x433   : >> { %11531 = vmatpush3.bf16.msra.mxu0 %v12651_v59  ;;  %v14759_v24 = vor.u32 %v5421_v40, %v5417_v6  ;;  %v9665_v14 = vld.sshfl [vmem:[%s14718_s29 + $0x12] sm:$0x3 pattern:$0x76325410]  ;;  %v5512_v51 = vshll.u32 %v9658_v3, 16  ;;  %v5510_v13 = vshrl.u32 %v9658_v3, 16 }
 0x434   : >> { %11543 = vmatpush3.bf16.msra.mxu1 %v12652_v5  ;;  %11548 = vmatprep.subr.bf16.mxu0 %v13023_v42  ;;  %v5605_v22 = vshll.u32 %v9665_v14, 16  ;;  %v5603_v36 = vshrl.u32 %v9665_v14, 16  ;;  %v12676_v57 = vld [vmem:[#allocation5 + $0xe0] sm:$0xff]   ;;  %v12677_v52 = vld [vmem:[#allocation5 + $0x118] sm:$0xff]   ;;  %v12679_v1 = vld [vmem:[#allocation5 + $0x110] sm:$0xff]  }
 0x435   : >> { %11560 = vmatprep.subr.bf16.mxu1 %v13023_v42  ;;  %v5514_v61 = vrot.slane %v5512_v51, 1  ;;  %v12678_v49 = vld [vmem:[#allocation5 + $0x38] sm:$0xff]   ;;  %v12680_v11 = vld [vmem:[#allocation5 + $0x30] sm:$0xff]   ;;  %v12681_v32 = vld [vmem:[#allocation5 + $0x108] sm:$0xff]  }
 0x436   : >> { %11533 = vmatmul.mubr.msk.bf16.vlgmr.msra.gmra.mxu0 %vm864_vm4, %v9616_v55  ;;  %v5607_v56 = vrot.slane %v5605_v22, 1  ;;  %v9672_v9 = vld.sshfl [vmem:[%s14718_s29 + $0x14] sm:$0x3 pattern:$0x76325410]  ;;  %v12682_v50 = vld [vmem:[#allocation5 + $0x28] sm:$0xff]  }
 0x437   : >> { %11545 = vmatmul.mubr.msk.bf16.vlgmr.msra.gmra.mxu1 %vm864_vm4, %v9614_v8  ;;  %11549 = vmatpush3.bf16.msra.mxu0 %v12653_v43  ;;  %v14779_v39 = vor.u32 %v5514_v61, %v5510_v13  ;;  %v5698_v0 = vshll.u32 %v9672_v9, 16  ;;  %v5696_v59 = vshrl.u32 %v9672_v9, 16  ;;  %v12683_v55 = vld [vmem:[#allocation5 + $0x100] sm:$0xff]   ;;  %v12688_v44 = vld [vmem:[#allocation5 + $0x50] sm:$0xff]   ;;  %v12690_v48 = vld [vmem:[#allocation5 + $0x48] sm:$0xff]  }
 0x438   : >> { %11561 = vmatpush3.bf16.msra.mxu1 %v12654_v35  ;;  %11550 = vmatprep.subr.bf16.mxu0 %v13023_v42  ;;  %v14781_v7 = vor.u32 %v5607_v56, %v5603_v36  ;;  %v12684_v8 = vld [vmem:[#allocation5 + $0x20] sm:$0xff]   ;;  %v12685_v35 = vld [vmem:[#allocation5 + $0x18] sm:$0xff]   ;;  %v12703_v37 = vld [vmem:[#allocation5 + $0xb0] sm:$0xff]  }
 0x439   : >> { %11562 = vmatprep.subr.bf16.mxu1 %v13023_v42  ;;  %11556 = vmatprep.mubr.msk.bf16.mxu0 %vm13024_vm5, %v13023_v42  ;;  %v5700_v5 = vrot.slane %v5698_v0, 1  ;;  %v12693_v29 = vld [vmem:[#allocation5 + $0x78] sm:$0xff]   ;;  %v12700_v25 = vld [vmem:[#allocation5 + $0x80] sm:$0xff]   ;;  %v12704_v4 = vld [vmem:[#allocation5 + $0xd0] sm:$0xff]  }
 0x43a   : >> { %11568 = vmatprep.mubr.msk.bf16.mxu1 %vm13024_vm5, %v13023_v42  ;;  %v12694_v58 = vld [vmem:[#allocation5 + $0x98] sm:$0xff]   ;;  %v12706_v12 = vld [vmem:[#allocation5 + $0xc8] sm:$0xff]   ;;  %v12716_v14 = vld [vmem:[#allocation5 + $0x100] sm:$0xff]  }
 0x43b   : >> { %11551 = vmatpush3.bf16.msra.mxu0 %v12655_v10  ;;  %v14800_v43 = vor.u32 %v5700_v5, %v5696_v59  ;;  %v12686_v10 = vld [vmem:[#allocation5 + $0x58] sm:$0xff]   ;;  %v9722_v2 = vld.sshfl [vmem:[%s14718_s29] sm:$0x2 pattern:$0x76325410] }
 0x43c   : >> { %11563 = vmatpush3.bf16.msra.mxu1 %v12656_v63  ;;  %11552 = vmatprep.subr.bf16.mxu0 %v13023_v42  ;;  %v12687_v63 = vld [vmem:[#allocation5 + $0x10] sm:$0xff]   ;;  %v6356_v53 = vrot.slane %v9722_v2, 1  ;;  %v12709_v6 = vld [vmem:[#allocation5 + $0xf8] sm:$0xff]  }
 0x43d   : >> { %11564 = vmatprep.subr.bf16.mxu1 %v13023_v42  ;;  %v12710_v40 = vld [vmem:[#allocation5 + $0x118] sm:$0xff]   ;;  %v9729_v3 = vld.sshfl [vmem:[%s14718_s29 + $0x2] sm:$0x2 pattern:$0x76325410] }
 0x43f   : >> { %11553 = vmatpush3.bf16.msra.mxu0 %v12657_v19  ;;  %v12689_v19 = vld [vmem:[#allocation5 + $0x8] sm:$0xff]  }
 0x440   : >> { %11565 = vmatpush3.bf16.msra.mxu1 %v12658_v46  ;;  %11554 = vmatprep.subr.bf16.mxu0 %v13023_v42  ;;  %v12691_v46 = vld [vmem:[#allocation5] sm:$0xff]  }
 0x441   : >> { %11566 = vmatprep.subr.bf16.mxu1 %v13023_v42 }
 0x443   : >> { %11555 = vmatpush3.bf16.msra.mxu0 %v12659_v23  ;;  %v12692_v23 = vld [vmem:[#allocation5 + $0x40] sm:$0xff]  }
 0x444   : >> { %11567 = vmatpush3.bf16.msra.mxu1 %v12660_v33  ;;  %11572 = vmatprep.subr.bf16.mxu0 %v13023_v42  ;;  %v12695_v33 = vld [vmem:[#allocation5 + $0x70] sm:$0xff]  }
 0x445   : >> { %11584 = vmatprep.subr.bf16.mxu1 %v13023_v42 }
 0x446   : >> { %11557 = vmatmul.mubr.msk.bf16.vlgmr.msra.gmra.mxu0 %vm864_vm4, %v9628_v60  ;;  %v12696_v60 = vld [vmem:[#allocation5 + $0x90] sm:$0xff]  }
 0x447   : >> { %11569 = vmatmul.mubr.msk.bf16.vlgmr.msra.gmra.mxu1 %vm864_vm4, %v14738_v26  ;;  %11573 = vmatpush3.bf16.msra.mxu0 %v12661_v15  ;;  %v12697_v15 = vld [vmem:[#allocation5 + $0x68] sm:$0xff]  }
 0x448   : >> { %11585 = vmatpush3.bf16.msra.mxu1 %v12662_v28  ;;  %11574 = vmatprep.subr.bf16.mxu0 %v13023_v42  ;;  %v12699_v28 = vld [vmem:[#allocation5 + $0x60] sm:$0xff]  }
 0x449   : >> { %11586 = vmatprep.subr.bf16.mxu1 %v13023_v42  ;;  %11580 = vmatprep.mubr.msk.bf16.mxu0 %vm13024_vm5, %v13023_v42 }
 0x44a   : >> { %11592 = vmatprep.mubr.msk.bf16.mxu1 %vm13024_vm5, %v13023_v42 }
 0x44b   : >> { %11575 = vmatpush3.bf16.msra.mxu0 %v12663_v31  ;;  %v12701_v31 = vld [vmem:[#allocation5 + $0xb8] sm:$0xff]  }
 0x44c   : >> { %11587 = vmatpush3.bf16.msra.mxu1 %v12664_v45  ;;  %11576 = vmatprep.subr.bf16.mxu0 %v13023_v42  ;;  %v12702_v45 = vld [vmem:[#allocation5 + $0xd8] sm:$0xff]  }
 0x44d   : >> { %11588 = vmatprep.subr.bf16.mxu1 %v13023_v42 }
 0x44f   : >> { %11577 = vmatpush3.bf16.msra.mxu0 %v12665_v38  ;;  %v12705_v38 = vld [vmem:[#allocation5 + $0xa8] sm:$0xff]  }
 0x450   : >> { %11589 = vmatpush3.bf16.msra.mxu1 %v12666_v30  ;;  %11578 = vmatprep.subr.bf16.mxu0 %v13023_v42  ;;  %v12707_v30 = vld [vmem:[#allocation5 + $0xa0] sm:$0xff]  }
 0x451   : >> { %11590 = vmatprep.subr.bf16.mxu1 %v13023_v42 }
 0x453   : >> { %11579 = vmatpush3.bf16.msra.mxu0 %v12667_v34  ;;  %v12708_v34 = vld [vmem:[#allocation5 + $0xc0] sm:$0xff]  }
 0x454   : >> { %11591 = vmatpush3.bf16.msra.mxu1 %v12668_v47  ;;  %11596 = vmatprep.subr.bf16.mxu0 %v13023_v42  ;;  %v12711_v47 = vld [vmem:[#allocation5 + $0xf0] sm:$0xff]  }
 0x455   : >> { %11608 = vmatprep.subr.bf16.mxu1 %v13023_v42 }
 0x456   : >> { %11581 = vmatmul.mubr.msk.bf16.vlgmr.msra.gmra.mxu0 %vm864_vm4, %v14757_v17 }
 0x457   : >> { %11593 = vmatmul.mubr.msk.bf16.vlgmr.msra.gmra.mxu1 %vm864_vm4, %v14759_v24  ;;  %11597 = vmatpush3.bf16.msra.mxu0 %v12669_v41  ;;  %v12714_v41 = vld [vmem:[#allocation5 + $0x108] sm:$0xff]  }
 0x458   : >> { %11609 = vmatpush3.bf16.msra.mxu1 %v12670_v21  ;;  %11598 = vmatprep.subr.bf16.mxu0 %v13023_v42  ;;  %v12715_v21 = vld [vmem:[#allocation5 + $0xe0] sm:$0xff]  }
 0x459   : >> { %11610 = vmatprep.subr.bf16.mxu1 %v13023_v42  ;;  %11604 = vmatprep.mubr.msk.bf16.mxu0 %vm13024_vm5, %v13023_v42 }
 0x45a   : >> { %11616 = vmatprep.mubr.msk.bf16.mxu1 %vm13024_vm5, %v13023_v42 }
 0x45b   : >> { %11599 = vmatpush3.bf16.msra.mxu0 %v12671_v16  ;;  %v9736_v16 = vld.sshfl [vmem:[%s14718_s29 + $0x4] sm:$0x2 pattern:$0x76325410] }
 0x45c   : >> { %11611 = vmatpush3.bf16.msra.mxu1 %v12672_v20  ;;  %11600 = vmatprep.subr.bf16.mxu0 %v13023_v42  ;;  %v6442_v20 = vrot.slane %v9729_v3, 1  ;;  %v6528_v51 = vrot.slane %v9736_v16, 1 }
 0x45d   : >> { %11612 = vmatprep.subr.bf16.mxu1 %v13023_v42 }
 0x45f   : >> { %11601 = vmatpush3.bf16.msra.mxu0 %v12673_v27 }
 0x460   : >> { %11613 = vmatpush3.bf16.msra.mxu1 %v12674_v54  ;;  %11602 = vmatprep.subr.bf16.mxu0 %v13023_v42 }
 0x461   : >> { %11614 = vmatprep.subr.bf16.mxu1 %v13023_v42 }
 0x463   : >> { %11603 = vmatpush3.bf16.msra.mxu0 %v12675_v18 }
 0x464   : >> { %11615 = vmatpush3.bf16.msra.mxu1 %v12676_v57  ;;  %11620 = vmatprep.subr.bf16.mxu0 %v13023_v42 }
 0x465   : >> { %11632 = vmatprep.subr.bf16.mxu1 %v13023_v42 }
 0x466   : >> { %11605 = vmatmul.mubr.msk.bf16.vlgmr.msra.gmra.mxu0 %vm864_vm4, %v14779_v39 }
 0x467   : >> { %11617 = vmatmul.mubr.msk.bf16.vlgmr.msra.gmra.mxu1 %vm864_vm4, %v14781_v7  ;;  %11621 = vmatpush3.bf16.msra.mxu0 %v12677_v52 }
 0x468   : >> { %11633 = vmatpush3.bf16.msra.mxu1 %v12678_v49  ;;  %11622 = vmatprep.subr.bf16.mxu0 %v13023_v42 }
 0x469   : >> { %11634 = vmatprep.subr.bf16.mxu1 %v13023_v42  ;;  %11628 = vmatprep.mubr.msk.bf16.mxu0 %vm13024_vm5, %v13023_v42 }
 0x46a   : >> { %11640 = vmatprep.mubr.msk.bf16.mxu1 %vm13024_vm5, %v13023_v42 }
 0x46b   : >> { %11623 = vmatpush3.bf16.msra.mxu0 %v12679_v1 }
 0x46c   : >> { %11635 = vmatpush3.bf16.msra.mxu1 %v12680_v11  ;;  %11624 = vmatprep.subr.bf16.mxu0 %v13023_v42 }
 0x46d   : >> { %11636 = vmatprep.subr.bf16.mxu1 %v13023_v42 }
 0x46f   : >> { %11625 = vmatpush3.bf16.msra.mxu0 %v12681_v32 }
 0x470   : >> { %11637 = vmatpush3.bf16.msra.mxu1 %v12682_v50  ;;  %11626 = vmatprep.subr.bf16.mxu0 %v13023_v42 }
 0x471   : >> { %11638 = vmatprep.subr.bf16.mxu1 %v13023_v42 }
 0x473   : >> { %11627 = vmatpush3.bf16.msra.mxu0 %v12683_v55 }
 0x474   : >> { %11639 = vmatpush3.bf16.msra.mxu1 %v12684_v8  ;;  %11644 = vmatprep.subr.bf16.mxu0 %v13023_v42 }
 0x475   : >> { %11656 = vmatprep.subr.bf16.mxu1 %v13023_v42 }
 0x476   : >> { %11629 = vmatmul.mubr.msk.bf16.vlgmr.msra.gmra.mxu0 %vm864_vm4, %v14800_v43 }
 0x477   : >> { %11641 = vmatmul.mubr.msk.bf16.vlgmr.msra.gmra.mxu1 %vm864_vm4, %v14757_v17  ;;  %11645 = vmatpush3.bf16.msra.mxu0 %v12685_v35  ;;  %v12712_v17 = vld [vmem:[#allocation5 + $0x110] sm:$0xff]  }
 0x478   : >> { %11657 = vmatpush3.bf16.msra.mxu1 %v12686_v10  ;;  %11646 = vmatprep.subr.bf16.mxu0 %v13023_v42 }
 0x479   : >> { %11658 = vmatprep.subr.bf16.mxu1 %v13023_v42  ;;  %11652 = vmatprep.mubr.msk.bf16.mxu0 %vm13024_vm5, %v13023_v42 }
 0x47a   : >> { %11664 = vmatprep.mubr.msk.bf16.mxu1 %vm13024_vm5, %v13023_v42 }
 0x47b   : >> { %11647 = vmatpush3.bf16.msra.mxu0 %v12687_v63 }
 0x47c   : >> { %11659 = vmatpush3.bf16.msra.mxu1 %v12688_v44  ;;  %11648 = vmatprep.subr.bf16.mxu0 %v13023_v42 }
 0x47d   : >> { %11660 = vmatprep.subr.bf16.mxu1 %v13023_v42 }
 0x47f   : >> { %11649 = vmatpush3.bf16.msra.mxu0 %v12689_v19 }
 0x480   : >> { %11661 = vmatpush3.bf16.msra.mxu1 %v12690_v48  ;;  %11650 = vmatprep.subr.bf16.mxu0 %v13023_v42 }
 0x481   : >> { %11662 = vmatprep.subr.bf16.mxu1 %v13023_v42 }
 0x483   : >> { %11651 = vmatpush3.bf16.msra.mxu0 %v12691_v46 }
 0x484   : >> { %11663 = vmatpush3.bf16.msra.mxu1 %v12692_v23  ;;  %11668 = vmatprep.subr.bf16.mxu0 %v13023_v42 }
 0x485   : >> { %11680 = vmatprep.subr.bf16.mxu1 %v13023_v42 }
 0x486   : >> { %11653 = vmatmul.mubr.msk.bf16.vlgmr.msra.gmra.mxu0 %vm864_vm4, %v14738_v26  ;;  %v12698_v26 = vld [vmem:[#allocation5 + $0x88] sm:$0xff]  }
 0x487   : >> { %11665 = vmatmul.mubr.msk.bf16.vlgmr.msra.gmra.mxu1 %vm864_vm4, %v14759_v24  ;;  %11669 = vmatpush3.bf16.msra.mxu0 %v12693_v29  ;;  %v12713_v24 = vld [vmem:[#allocation5 + $0xe8] sm:$0xff]  }
 0x488   : >> { %11681 = vmatpush3.bf16.msra.mxu1 %v12694_v58  ;;  %11670 = vmatprep.subr.bf16.mxu0 %v13023_v42 }
 0x489   : >> { %11682 = vmatprep.subr.bf16.mxu1 %v13023_v42  ;;  %11676 = vmatprep.mubr.msk.bf16.mxu0 %vm13024_vm5, %v13023_v42 }
 0x48a   : >> { %11688 = vmatprep.mubr.msk.bf16.mxu1 %vm13024_vm5, %v13023_v42 }
 0x48b   : >> { %11671 = vmatpush3.bf16.msra.mxu0 %v12695_v33 }
 0x48c   : >> { %11683 = vmatpush3.bf16.msra.mxu1 %v12696_v60  ;;  %11672 = vmatprep.subr.bf16.mxu0 %v13023_v42 }
 0x48d   : >> { %11684 = vmatprep.subr.bf16.mxu1 %v13023_v42 }
 0x48f   : >> { %11673 = vmatpush3.bf16.msra.mxu0 %v12697_v15 }
 0x490   : >> { %11685 = vmatpush3.bf16.msra.mxu1 %v12698_v26  ;;  %11674 = vmatprep.subr.bf16.mxu0 %v13023_v42 }
 0x491   : >> { %11686 = vmatprep.subr.bf16.mxu1 %v13023_v42 }
 0x493   : >> { %11675 = vmatpush3.bf16.msra.mxu0 %v12699_v28 }
 0x494   : >> { %11687 = vmatpush3.bf16.msra.mxu1 %v12700_v25  ;;  %11692 = vmatprep.subr.bf16.mxu0 %v13023_v42 }
 0x495   : >> { %11704 = vmatprep.subr.bf16.mxu1 %v13023_v42 }
 0x496   : >> { %11677 = vmatmul.mubr.msk.bf16.vlgmr.msra.gmra.mxu0 %vm864_vm4, %v14779_v39 }
 0x497   : >> { %11689 = vmatmul.mubr.msk.bf16.vlgmr.msra.gmra.mxu1 %vm864_vm4, %v14781_v7  ;;  %11693 = vmatpush3.bf16.msra.mxu0 %v12701_v31 }
 0x498   : >> { %11705 = vmatpush3.bf16.msra.mxu1 %v12702_v45  ;;  %11694 = vmatprep.subr.bf16.mxu0 %v13023_v42 }
 0x499   : >> { %11706 = vmatprep.subr.bf16.mxu1 %v13023_v42  ;;  %11700 = vmatprep.mubr.msk.bf16.mxu0 %vm13024_vm5, %v13023_v42 }
 0x49a   : >> { %11712 = vmatprep.mubr.msk.bf16.mxu1 %vm13024_vm5, %v13023_v42 }
 0x49b   : >> { %11695 = vmatpush3.bf16.msra.mxu0 %v12703_v37 }
 0x49c   : >> { %11707 = vmatpush3.bf16.msra.mxu1 %v12704_v4  ;;  %11696 = vmatprep.subr.bf16.mxu0 %v13023_v42 }
 0x49d   : >> { %11708 = vmatprep.subr.bf16.mxu1 %v13023_v42 }
 0x49f   : >> { %11697 = vmatpush3.bf16.msra.mxu0 %v12705_v38 }
 0x4a0   : >> { %11709 = vmatpush3.bf16.msra.mxu1 %v12706_v12  ;;  %11698 = vmatprep.subr.bf16.mxu0 %v13023_v42 }
 0x4a1   : >> { %11710 = vmatprep.subr.bf16.mxu1 %v13023_v42 }
 0x4a3   : >> { %11699 = vmatpush3.bf16.msra.mxu0 %v12707_v30 }
 0x4a4   : >> { %11711 = vmatpush3.bf16.msra.mxu1 %v12708_v34  ;;  %11716 = vmatprep.subr.bf16.mxu0 %v13023_v42 }
 0x4a5   : >> { %11728 = vmatprep.subr.bf16.mxu1 %v13023_v42 }
 0x4a6   : >> { %11701 = vmatmul.mubr.msk.bf16.vlgmr.msra.gmra.mxu0 %vm864_vm4, %v14800_v43 }
 0x4a7   : >> { %11713 = vmatmul.mubr.msk.bf16.vlgmr.msra.gmra.mxu1 %vm864_vm4, %v6356_v53  ;;  %11717 = vmatpush3.bf16.msra.mxu0 %v12709_v6 }
 0x4a8   : >> { %11729 = vmatpush3.bf16.msra.mxu1 %v12710_v40  ;;  %11718 = vmatprep.subr.bf16.mxu0 %v13023_v42 }
 0x4a9   : >> { %11730 = vmatprep.subr.bf16.mxu1 %v13023_v42  ;;  %11724 = vmatprep.mubr.msk.bf16.mxu0 %vm13024_vm5, %v13023_v42 }
 0x4aa   : >> { %11736 = vmatprep.mubr.msk.bf16.mxu1 %vm13024_vm5, %v13023_v42 }
 0x4ab   : >> { %11719 = vmatpush3.bf16.msra.mxu0 %v12711_v47 }
 0x4ac   : >> { %11731 = vmatpush3.bf16.msra.mxu1 %v12712_v17  ;;  %11720 = vmatprep.subr.bf16.mxu0 %v13023_v42 }
 0x4ad   : >> { %11732 = vmatprep.subr.bf16.mxu1 %v13023_v42 }
 0x4af   : >> { %11721 = vmatpush3.bf16.msra.mxu0 %v12713_v24 }
 0x4b0   : >> { %11733 = vmatpush3.bf16.msra.mxu1 %v12714_v41  ;;  %11722 = vmatprep.subr.bf16.mxu0 %v13023_v42 }
 0x4b1   : >> { %11734 = vmatprep.subr.bf16.mxu1 %v13023_v42 }
 0x4b3   : >> { %11723 = vmatpush3.bf16.msra.mxu0 %v12715_v21 }
 0x4b4   : >> { %11735 = vmatpush3.bf16.msra.mxu1 %v12716_v14 }
 0x4b6   : >> { %11725 = vmatmul.mubr.msk.bf16.vlgmr.msra.gmra.mxu0 %vm864_vm4, %v6442_v20 }
 0x4b7   : >> { %11737 = vmatmul.mubr.msk.bf16.vlgmr.msra.gmra.mxu1 %vm864_vm4, %v6528_v51 }
 0x4f6   : >> { %v5051_v27 = vpop.f32.mrf.mxu0 }
 0x4f7   : >> { %v5118_v22 = vpop.f32.mrf.mxu1 }
 0x4f8   : >> { %v11534_v54 = vpop.f32.mrf.mxu0  ;;  %v5119_v43 = vadd.f32 %v5118_v22, %v5051_v27 }
 0x4f9   : >> { %v11546_v18 = vpop.f32.mrf.mxu1 }
 0x4fa   : >> { %v5054_v13 = vpop.f32.mrf.mxu0 }
 0x4fb   : >> { %v5121_v61 = vpop.f32.mrf.mxu1 }
 0x4fc   : >> { %v11535_v36 = vpop.f32.mrf.mxu0 }
 0x4fd   : >> { %v11547_v56 = vpop.f32.mrf.mxu1 }
 0x506   : >> { %v5199_v57 = vpop.f32.mrf.mxu0 }
 0x507   : >> { %v5294_v39 = vpop.f32.mrf.mxu1  ;;  %v5205_v35 = vadd.f32 %v5199_v57, %v5119_v43 }
 0x508   : >> { %v11558_v7 = vpop.f32.mrf.mxu0 }
 0x509   : >> { %v11570_v42 = vpop.f32.mrf.mxu1  ;;  %v5300_v19 = vadd.f32 %v5294_v39, %v5205_v35 }
 0x50a   : >> { %v5202_v52 = vpop.f32.mrf.mxu0 }
 0x50b   : >> { %v5297_v49 = vpop.f32.mrf.mxu1 }
 0x50c   : >> { %v11559_v9 = vpop.f32.mrf.mxu0 }
 0x50d   : >> { %v11571_v1 = vpop.f32.mrf.mxu1 }
 0x516   : >> { %v5389_v11 = vpop.f32.mrf.mxu0 }
 0x517   : >> { %v5484_v0 = vpop.f32.mrf.mxu1  ;;  %v5395_v23 = vadd.f32 %v5389_v11, %v5300_v19 }
 0x518   : >> { %v11582_v32 = vpop.f32.mrf.mxu0 }
 0x519   : >> { %v11594_v50 = vpop.f32.mrf.mxu1  ;;  %v5490_v60 = vadd.f32 %v5484_v0, %v5395_v23 }
 0x51a   : >> { %v5392_v59 = vpop.f32.mrf.mxu0 }
 0x51b   : >> { %v5487_v5 = vpop.f32.mrf.mxu1 }
 0x51c   : >> { %v11583_v55 = vpop.f32.mrf.mxu0 }
 0x51d   : >> { %v11595_v8 = vpop.f32.mrf.mxu1 }
 0x526   : >> { %v5577_v10 = vpop.f32.mrf.mxu0 }
 0x527   : >> { %v5670_v63 = vpop.f32.mrf.mxu1  ;;  %v5583_v15 = vadd.f32 %v5577_v10, %v5490_v60 }
 0x528   : >> { %v11606_v44 = vpop.f32.mrf.mxu0 }
 0x529   : >> { %v11618_v48 = vpop.f32.mrf.mxu1  ;;  %v5676_v26 = vadd.f32 %v5670_v63, %v5583_v15  ;;  %v14888_v15 = vld [vmem:[%s15844_s8] ss:$0 sm:$0xff] (%p4959_p8) }
 0x52a   : >> { %v5580_v46 = vpop.f32.mrf.mxu0  ;;  %15907 = vst [vmem:[#allocation14_spill] sm:$0xff] (%p4959_p8), %v14888_v15 }
 0x52b   : >> { %v5673_v29 = vpop.f32.mrf.mxu1 }
 0x52c   : >> { %v11607_v58 = vpop.f32.mrf.mxu0 }
 0x52d   : >> { %v11619_v33 = vpop.f32.mrf.mxu1 }
 0x536   : >> { %v5763_v28 = vpop.f32.mrf.mxu0 }
 0x537   : >> { %v5769_v25 = vadd.f32 %v5763_v28, %v5676_v26  ;;  %v5883_v31 = vpop.f32.mrf.mxu1 }
 0x538   : >> { %v11630_v45 = vpop.f32.mrf.mxu0 }
 0x539   : >> { %v5776_v37 = vadd.f32 %v14696_v62, %v5769_v25  ;;  %v11642_v4 = vpop.f32.mrf.mxu1 }
 0x53a   : >> { %v5766_v38 = vpop.f32.mrf.mxu0 }
 0x53b   : >> { %v5777_v12 = vmax.f32 %v5776_v37, 0.0  ;;  %v5886_v30 = vpop.f32.mrf.mxu1 }
 0x53c   : >> { %v11631_v34 = vpop.f32.mrf.mxu0 }
 0x53d   : >> { %v5779_v2 = vrot.slane %v5777_v12, 7  ;;  %v11643_v53 = vpop.f32.mrf.mxu1 }
 0x53f   : >> { %v5782_v6 = vsel %vm540_vm1, 0.0, %v5779_v2 }
 0x540   : >> { %v5784_v40 = vsel %vm542_vm2, %v5782_v6, 0.0 }
 0x541   : >> { %v5785_v47 = vpack.c.bf16 %v5784_v40, %v5784_v40 }
 0x543   : >> { %9680 = vst [vmem:[%s14875_s26 + $0x2] sm:$0x3] %v5785_v47 }
 0x546   : >> { %v5965_v17 = vpop.f32.mrf.mxu0 }
 0x547   : >> { %v6056_v24 = vpop.f32.mrf.mxu1  ;;  %v5966_v56 = vadd.f32 %v5965_v17, %v5883_v31 }
 0x548   : >> { %v11654_v41 = vpop.f32.mrf.mxu0 }
 0x549   : >> { %v11666_v21 = vpop.f32.mrf.mxu1  ;;  %v6062_v42 = vadd.f32 %v6056_v24, %v5966_v56 }
 0x54a   : >> { %v5968_v3 = vpop.f32.mrf.mxu0 }
 0x54b   : >> { %v6059_v14 = vpop.f32.mrf.mxu1 }
 0x54c   : >> { %v11655_v16 = vpop.f32.mrf.mxu0 }
 0x54d   : >> { %v11667_v20 = vpop.f32.mrf.mxu1 }
 0x556   : >> { %v6148_v51 = vpop.f32.mrf.mxu0 }
 0x557   : >> { %v6240_v27 = vpop.f32.mrf.mxu1  ;;  %v6154_v9 = vadd.f32 %v6148_v51, %v6062_v42 }
 0x558   : >> { %v11678_v22 = vpop.f32.mrf.mxu0 }
 0x559   : >> { %v11690_v54 = vpop.f32.mrf.mxu1  ;;  %v6246_v32 = vadd.f32 %v6240_v27, %v6154_v9 }
 0x55a   : >> { %v6151_v18 = vpop.f32.mrf.mxu0 }
 0x55b   : >> { %v6243_v13 = vpop.f32.mrf.mxu1 }
 0x55c   : >> { %v11679_v61 = vpop.f32.mrf.mxu0 }
 0x55d   : >> { %v11691_v36 = vpop.f32.mrf.mxu1 }
 0x566   : >> { %v6332_v57 = vpop.f32.mrf.mxu0 }
 0x567   : >> { %v6418_v39 = vpop.f32.mrf.mxu1  ;;  %v6338_v50 = vadd.f32 %v6332_v57, %v6246_v32 }
 0x568   : >> { %v11702_v7 = vpop.f32.mrf.mxu0 }
 0x569   : >> { %v11714_v52 = vpop.f32.mrf.mxu1  ;;  %v6424_v59 = vadd.f32 %v6418_v39, %v6338_v50 }
 0x56a   : >> { %v6335_v49 = vpop.f32.mrf.mxu0 }
 0x56b   : >> { %v6421_v1 = vpop.f32.mrf.mxu1 }
 0x56c   : >> { %v11703_v11 = vpop.f32.mrf.mxu0 }
 0x56d   : >> { %v11715_v0 = vpop.f32.mrf.mxu1 }
 0x576   : >> { %v6504_v5 = vpop.f32.mrf.mxu0 }
 0x577   : >> { %v6510_v55 = vadd.f32 %v6504_v5, %v6424_v59  ;;  %v6590_v8 = vpop.f32.mrf.mxu1 }
 0x578   : >> { %v11726_v43 = vpop.f32.mrf.mxu0 }
 0x579   : >> { %v6596_v35 = vadd.f32 %v6590_v8, %v6510_v55  ;;  %v11738_v10 = vpop.f32.mrf.mxu1 }
 0x57a   : >> { %v6507_v63 = vpop.f32.mrf.mxu0 }
 0x57b   : >> { %v6597_v44 = vadd.f32 %v14696_v62, %v6596_v35  ;;  %v6593_v19 = vpop.f32.mrf.mxu1 }
 0x57c   : >> { %v11727_v48 = vpop.f32.mrf.mxu0 }
 0x57d   : >> { %v6598_v46 = vmax.f32 %v6597_v44, 0.0  ;;  %v11739_v23 = vpop.f32.mrf.mxu1 }
 0x57f   : >> { %v6600_v29 = vrot.slane %v6598_v46, 7 }
 0x581   : >> { %v6602_v58 = vsel %vm540_vm1, 0.0, %v6600_v29  ;;  %4961 = sbr.rel (!%p4959_p8) target bundleno = 1061 (0x425), region = 238 }
 0x582   : >> { %v6603_v33 = vsel %vm542_vm2, %v6602_v58, 0.0 }
 0x583   : >> { %v6604_v60 = vpack.c.bf16 %v6603_v33, %v6603_v33 }
 0x585   : >> { %9743 = vst [vmem:[%s14875_s26 + $0x12] sm:$0x3] %v6604_v60 }
 0x586 LB: >> { %v14895_v26 = vld [vmem:[#allocation8 + $0x78] sm:$0xff]   ;;  %v13025_v28 = vmov 0.0   ;;  %v14902_v62 = vld [vmem:[#allocation8 + $0x70] sm:$0xff]   ;;  %vm13026_vm6 = vmmov 0   ;;  %v14914_v45 = vld [vmem:[#allocation8 + $0x68] sm:$0xff]   ;;  %s9878_s16 = sshll.u32 %s13013_s14, 2  ;;  %s13013_s14 = sphi %s14890_s14, %s6614_s14  }
 0x587   : >> { %11740 = vmatprep.subr.bf16.mxu0 %v13025_v28  ;;  %11760 = vmatprep.subr.bf16.mxu1 %v13025_v28  ;;  %v14899_v25 = vld [vmem:[#allocation8 + $0x38] sm:$0xff]   ;;  %v14908_v31 = vld [vmem:[#allocation8 + $0x30] sm:$0xff]   ;;  %v14918_v37 = vld [vmem:[#allocation8 + $0x28] sm:$0xff]   ;;  %s14962_s22 = scalar_lea.vmem [#allocation4], %s9878_s16  ;;  %s9744_s28 = sshll.u32 %s13013_s14, 1 }
 0x588   : >> { %11741 = vmatpush3.bf16.msra.mxu0 %v14895_v26  ;;  %11756 = vmatprep.mubr.msk.bf16.mxu0 %vm13026_vm6, %v13025_v28  ;;  %v14922_v4 = vld [vmem:[#allocation8 + $0x60] sm:$0xff]   ;;  %v14930_v12 = vld [vmem:[#allocation8 + $0x58] sm:$0xff]   ;;  %v14938_v34 = vld [vmem:[#allocation8 + $0x50] sm:$0xff]   ;;  %s8892_s25 = scalar_lea.vmem %s355_s24, %s9744_s28 [#allocation10]  ;;  %s6614_s14 = sadd.s32 1, %s13013_s14  }
 0x589   : >> { %11761 = vmatpush3.bf16.msra.mxu1 %v14899_v25  ;;  %11742 = vmatprep.subr.bf16.mxu0 %v13025_v28  ;;  %v14926_v38 = vld [vmem:[#allocation8 + $0x20] sm:$0xff]   ;;  %v14934_v30 = vld [vmem:[#allocation8 + $0x18] sm:$0xff]   ;;  %v14942_v2 = vld [vmem:[#allocation8 + $0x10] sm:$0xff]   ;;  %p6611_p11 = scmp.ge.s32.totalorder %s6614_s14, 3  }
 0x58a   : >> { %11762 = vmatprep.subr.bf16.mxu1 %v13025_v28  ;;  %11776 = vmatprep.mubr.msk.bf16.mxu1 %vm13026_vm6, %v13025_v28  ;;  %v14946_v53 = vld [vmem:[#allocation8 + $0x48] sm:$0xff]   ;;  %v14955_v40 = vld [vmem:[#allocation8 + $0x40] sm:$0xff]   ;;  %v14969_v41 = vld [vmem:[#allocation8 + $0xb8] sm:$0xff]   ;;  %s12462_s5 = smul.u32 (%p6611_p11), 96, %s13101_s13  ;;  %s8908_s17 = sshll.u32 (%p6611_p11), %s355_s24, 4  ;;  %s15792_s17 = int_to_ptr.vmem [resolvable:$true] %s8908_s17 }
 0x58b   : >> { %v14951_v6 = vld [vmem:[#allocation8 + $0x8] sm:$0xff]   ;;  %v14959_v47 = vld [vmem:[#allocation8] sm:$0xff]   ;;  %v14973_v21 = vld [vmem:[#allocation8 + $0xf8] sm:$0xff]   ;;  %s15977_s23 = sand.u32 (%p6611_p11), 1, %s12989_s10   ;;  %s12913_s16 = scalar_lea.vmem (%p6611_p11), %s15792_s17, 96 }
 0x58c   : >> { %11743 = vmatpush3.bf16.msra.mxu0 %v14902_v62  ;;  %v14965_v17 = vld [vmem:[%s14962_s22 + $0x12] sm:$0x1]  ;;  %v9747_v24 = vld [vmem:[%s14962_s22 + $0x10] sm:$0x1]  ;;  %v14978_v3 = vld [vmem:[#allocation8 + $0xb0] sm:$0xff]   ;;  %s15790_s27 = scalar_lea.hbm (%p6611_p11), %s15845_s9, %s12462_s5  ;;  %s15796_s14 = scalar_lea.sflag (%p6611_p11), [#allocation7], %s15977_s23 }
 0x58d   : >> { %11763 = vmatpush3.bf16.msra.mxu1 %v14908_v31  ;;  %11744 = vmatprep.subr.bf16.mxu0 %v13025_v28  ;;  %v14980_v14 = vld [vmem:[#allocation8 + $0xf0] sm:$0xff]   ;;  %v14990_v16 = vld [vmem:[#allocation8 + $0xa8] sm:$0xff]   ;;  %v14998_v51 = vld [vmem:[#allocation8 + $0xa0] sm:$0xff]   ;;  %p12914_p0 = scmp.ne.s32.totalorder (%p6611_p11), %s15792_s17, %s12913_s16  ;;  %s13027_s13 = smov (%p6611_p11), [#allocation10]  }
 0x58e   : >> { %11764 = vmatprep.subr.bf16.mxu1 %v13025_v28  ;;  %v14994_v20 = vld [vmem:[#allocation8 + $0xe8] sm:$0xff]   ;;  %v15002_v27 = vld [vmem:[#allocation8 + $0xe0] sm:$0xff]   ;;  %v15006_v22 = vld [vmem:[#allocation8 + $0x98] sm:$0xff]   ;;  %s12917_s21 = sshll.u32 (%p6611_p11), %s13027_s13, 4  ;;  %s12918_s21 = int_to_ptr.vmem [resolvable:$false] %s12917_s21 }
 0x58f   : >> { %v15010_v54 = vld [vmem:[#allocation8 + $0xd8] sm:$0xff]   ;;  %v15014_v18 = vld [vmem:[#allocation8 + $0x90] sm:$0xff]   ;;  %v9779_v61 = vld.sshfl [vmem:[%s14962_s22] sm:$0x3 pattern:$0x76325410]  ;;  %p12915_p1 = pnand (%p6611_p11), %p12914_p0, %p13118_p5  ;;  %p12920_p2 = scmp.lt.s32.totalorder (%p6611_p11), %s15792_s17, %s12918_s21 }
 0x590   : >> { %11745 = vmatpush3.bf16.msra.mxu0 %v14914_v45  ;;  %v15018_v13 = vld [vmem:[#allocation8 + $0xd0] sm:$0xff]   ;;  %v15022_v36 = vld [vmem:[#allocation8 + $0x88] sm:$0xff]   ;;  %v6976_v57 = vshll.u32 %v9779_v61, 16  ;;  %v15030_v39 = vld [vmem:[#allocation8 + $0x80] sm:$0xff]   ;;  %v6974_v7 = vshrl.u32 %v9779_v61, 16  ;;  %s12919_s24 = scalar_lea.vmem (%p6611_p11), %s12918_s21, 192 }
 0x591   : >> { %11765 = vmatpush3.bf16.msra.mxu1 %v14918_v37  ;;  %11746 = vmatprep.subr.bf16.mxu0 %v13025_v28  ;;  %v15025_v56 = vld [vmem:[#allocation8 + $0xc8] sm:$0xff]   ;;  %v15035_v52 = vld [vmem:[#allocation8 + $0xc0] sm:$0xff]   ;;  %v15039_v49 = vld [vmem:[%s14962_s22 + $0x14] sm:$0x1]  ;;  %p12916_p3 = pneg (%p6611_p11), %p12915_p1  ;;  %p12921_p4 = scmp.lt.s32.totalorder (%p6611_p11), %s12919_s24, %s12913_s16 }
 0x592   : >> { %11766 = vmatprep.subr.bf16.mxu1 %v13025_v28  ;;  %v6978_v42 = vrot.slane %v6976_v57, 1  ;;  %v15044_v1 = vld [vmem:[#allocation8 + $0x138] sm:$0xff]   ;;  %v15054_v0 = vld [vmem:[#allocation8 + $0x130] sm:$0xff]   ;;  %v15066_v50 = vld [vmem:[#allocation8 + $0x128] sm:$0xff]  }
 0x593   : >> { %v15048_v11 = vld [vmem:[#allocation8 + $0x178] sm:$0xff]   ;;  %v15058_v32 = vld [vmem:[#allocation8 + $0x170] sm:$0xff]   ;;  %v15070_v59 = vld [vmem:[#allocation8 + $0x168] sm:$0xff]   ;;  %p12922_p13 = por (%p6611_p11), %p12921_p4, %p12920_p2 }
 0x594   : >> { %11747 = vmatpush3.bf16.msra.mxu0 %v14922_v4  ;;  %v15042_v9 = vor.u32 %v6978_v42, %v6974_v7  ;;  %v15074_v5 = vld [vmem:[#allocation8 + $0x120] sm:$0xff]   ;;  %v15082_v8 = vld [vmem:[#allocation8 + $0x118] sm:$0xff]   ;;  %v15090_v35 = vld [vmem:[#allocation8 + $0x110] sm:$0xff]  }
 0x595   : >> { %11767 = vmatpush3.bf16.msra.mxu1 %v14926_v38  ;;  %11748 = vmatprep.subr.bf16.mxu0 %v13025_v28  ;;  %v15078_v55 = vld [vmem:[#allocation8 + $0x160] sm:$0xff]   ;;  %v15086_v43 = vld [vmem:[#allocation8 + $0x158] sm:$0xff]   ;;  %v9791_v10 = vld.sshfl [vmem:[%s14962_s22 + $0x2] sm:$0x3 pattern:$0x76325410]  ;;  %p12923_p7 = pnand (%p6611_p11), %p12922_p13, %p12916_p3 }
 0x596   : >> { %11768 = vmatprep.subr.bf16.mxu1 %v13025_v28  ;;  %15908 = vst [vmem:[#allocation15_spill] sm:$0xff] %v15042_v9  ;;  %15909 = vst [vmem:[#allocation16_spill] sm:$0xff] %v15078_v55  ;;  %v15095_v63 = vld [vmem:[#allocation8 + $0x150] sm:$0xff]   ;;  %v7101_v19 = vshll.u32 %v9791_v10, 16  ;;  %v15100_v48 = vld [vmem:[#allocation8 + $0x108] sm:$0xff]   ;;  %v7099_v29 = vshrl.u32 %v9791_v10, 16 }
 0x597   : >> { %15910 = vst [vmem:[#allocation17_spill] sm:$0xff] %v15086_v43  ;;  %15911 = vst [vmem:[#allocation18_spill] sm:$0xff] %v15095_v63  ;;  %v9803_v44 = vld.sshfl [vmem:[%s14962_s22 + $0x4] sm:$0x3 pattern:$0x76325410] }
 0x598   : >> { %11749 = vmatpush3.bf16.msra.mxu0 %v14930_v12  ;;  %v7226_v46 = vshll.u32 %v9803_v44, 16  ;;  %v15104_v23 = vld [vmem:[#allocation8 + $0x148] sm:$0xff]   ;;  %v7103_v58 = vrot.slane %v7101_v19, 1  ;;  %v15108_v33 = vld [vmem:[#allocation8 + $0x100] sm:$0xff]   ;;  %v7224_v60 = vshrl.u32 %v9803_v44, 16  ;;  %v15120_v42 = vld [vmem:[#allocation8 + $0x1b8] sm:$0xff]  }
 0x599   : >> { %11769 = vmatpush3.bf16.msra.mxu1 %v14934_v30  ;;  %11750 = vmatprep.subr.bf16.mxu0 %v13025_v28  ;;  %15912 = vst [vmem:[#allocation19_spill] sm:$0xff] %v15104_v23  ;;  %v15112_v61 = vld [vmem:[#allocation8 + $0x140] sm:$0xff]   ;;  %v15124_v10 = vld [vmem:[#allocation8 + $0x1f8] sm:$0xff]   ;;  %v15130_v44 = vld [vmem:[#allocation8 + $0x1b0] sm:$0xff]  }
 0x59a   : >> { %11770 = vmatprep.subr.bf16.mxu1 %v13025_v28  ;;  %15913 = vst [vmem:[#allocation20_spill] sm:$0xff] %v15112_v61  ;;  %v15115_v57 = vor.u32 %v7103_v58, %v7099_v29  ;;  %15914 = vst [vmem:[#allocation21_spill] sm:$0xff] %v15124_v10  ;;  %v15134_v19 = vld [vmem:[#allocation8 + $0x1f0] sm:$0xff]   ;;  %v15146_v29 = vld [vmem:[#allocation8 + $0x1e8] sm:$0xff]  }
 0x59b   : >> { %15915 = vst [vmem:[#allocation22_spill] sm:$0xff] %v15134_v19  ;;  %15916 = vst [vmem:[#allocation23_spill] sm:$0xff] %v15146_v29  ;;  %v15150_v58 = vld [vmem:[#allocation8 + $0x1a0] sm:$0xff]   ;;  %v15162_v15 = vld [vmem:[#allocation8 + $0x1d8] sm:$0xff]  }
 0x59c   : >> { %11751 = vmatpush3.bf16.msra.mxu0 %v14938_v34  ;;  %15917 = vst [vmem:[#allocation24_spill] sm:$0xff] %v15150_v58  ;;  %15920 = vst [vmem:[#allocation27_spill] sm:$0xff] %v15162_v15 }
 0x59d   : >> { %11771 = vmatpush3.bf16.msra.mxu1 %v14942_v2  ;;  %11752 = vmatprep.subr.bf16.mxu0 %v13025_v28 }
 0x59e   : >> { %11772 = vmatprep.subr.bf16.mxu1 %v13025_v28 }
 0x5a0   : >> { %11753 = vmatpush3.bf16.msra.mxu0 %v14946_v53 }
 0x5a1   : >> { %11773 = vmatpush3.bf16.msra.mxu1 %v14951_v6  ;;  %11754 = vmatprep.subr.bf16.mxu0 %v13025_v28 }
 0x5a2   : >> { %11774 = vmatprep.subr.bf16.mxu1 %v13025_v28 }
 0x5a4   : >> { %11755 = vmatpush3.bf16.msra.mxu0 %v14955_v40 }
 0x5a5   : >> { %11775 = vmatpush3.bf16.msra.mxu1 %v14959_v47  ;;  %11780 = vmatprep.subr.bf16.mxu0 %v13025_v28 }
 0x5a6   : >> { %11800 = vmatprep.subr.bf16.mxu1 %v13025_v28 }
 0x5a7   : >> { %11757 = vmatmul.mubr.bf16.vlgmr.msra.gmra.mxu0 %v14965_v17 }
 0x5a8   : >> { %11777 = vmatmul.mubr.bf16.vlgmr.msra.gmra.mxu1 %v9747_v24  ;;  %11781 = vmatpush3.bf16.msra.mxu0 %v14969_v41  ;;  %v7228_v24 = vrot.slane %v7226_v46, 1  ;;  %v15142_v46 = vld [vmem:[#allocation8 + $0x1a8] sm:$0xff]  }
 0x5a9   : >> { %11801 = vmatpush3.bf16.msra.mxu1 %v14973_v21  ;;  %11782 = vmatprep.subr.bf16.mxu0 %v13025_v28 }
 0x5aa   : >> { %11802 = vmatprep.subr.bf16.mxu1 %v13025_v28  ;;  %11796 = vmatprep.mubr.msk.bf16.mxu0 %vm13026_vm6, %v13025_v28  ;;  %v15118_v7 = vor.u32 %v7228_v24, %v7224_v60  ;;  %v15154_v60 = vld [vmem:[#allocation8 + $0x1e0] sm:$0xff]   ;;  %v15158_v24 = vld [vmem:[#allocation8 + $0x198] sm:$0xff]  }
 0x5ab   : >> { %11816 = vmatprep.mubr.msk.bf16.mxu1 %vm13026_vm6, %v13025_v28  ;;  %15918 = vst [vmem:[#allocation25_spill] sm:$0xff] %v15154_v60  ;;  %15919 = vst [vmem:[#allocation26_spill] sm:$0xff] %v15158_v24 }
 0x5ac   : >> { %11783 = vmatpush3.bf16.msra.mxu0 %v14978_v3 }
 0x5ad   : >> { %11803 = vmatpush3.bf16.msra.mxu1 %v14980_v14  ;;  %11784 = vmatprep.subr.bf16.mxu0 %v13025_v28 }
 0x5ae   : >> { %11804 = vmatprep.subr.bf16.mxu1 %v13025_v28 }
 0x5b0   : >> { %11785 = vmatpush3.bf16.msra.mxu0 %v14990_v16 }
 0x5b1   : >> { %11805 = vmatpush3.bf16.msra.mxu1 %v14994_v20  ;;  %11786 = vmatprep.subr.bf16.mxu0 %v13025_v28 }
 0x5b2   : >> { %11806 = vmatprep.subr.bf16.mxu1 %v13025_v28 }
 0x5b4   : >> { %11787 = vmatpush3.bf16.msra.mxu0 %v14998_v51 }
 0x5b5   : >> { %11807 = vmatpush3.bf16.msra.mxu1 %v15002_v27  ;;  %11788 = vmatprep.subr.bf16.mxu0 %v13025_v28 }
 0x5b6   : >> { %11808 = vmatprep.subr.bf16.mxu1 %v13025_v28 }
 0x5b8   : >> { %11789 = vmatpush3.bf16.msra.mxu0 %v15006_v22 }
 0x5b9   : >> { %11809 = vmatpush3.bf16.msra.mxu1 %v15010_v54  ;;  %11790 = vmatprep.subr.bf16.mxu0 %v13025_v28 }
 0x5ba   : >> { %11810 = vmatprep.subr.bf16.mxu1 %v13025_v28 }
 0x5bc   : >> { %11791 = vmatpush3.bf16.msra.mxu0 %v15014_v18 }
 0x5bd   : >> { %11811 = vmatpush3.bf16.msra.mxu1 %v15018_v13  ;;  %11792 = vmatprep.subr.bf16.mxu0 %v13025_v28 }
 0x5be   : >> { %11812 = vmatprep.subr.bf16.mxu1 %v13025_v28 }
 0x5c0   : >> { %11793 = vmatpush3.bf16.msra.mxu0 %v15022_v36 }
 0x5c1   : >> { %11813 = vmatpush3.bf16.msra.mxu1 %v15025_v56  ;;  %11794 = vmatprep.subr.bf16.mxu0 %v13025_v28 }
 0x5c2   : >> { %11814 = vmatprep.subr.bf16.mxu1 %v13025_v28 }
 0x5c4   : >> { %11795 = vmatpush3.bf16.msra.mxu0 %v15030_v39 }
 0x5c5   : >> { %11815 = vmatpush3.bf16.msra.mxu1 %v15035_v52  ;;  %11820 = vmatprep.subr.bf16.mxu0 %v13025_v28 }
 0x5c6   : >> { %11840 = vmatprep.subr.bf16.mxu1 %v13025_v28 }
 0x5c7   : >> { %11797 = vmatmul.mubr.bf16.vlgmr.msra.gmra.mxu0 %v15039_v49 }
 0x5c8   : >> { %11817 = vmatmul.mubr.bf16.vlgmr.msra.gmra.mxu1 %v15042_v9  ;;  %11821 = vmatpush3.bf16.msra.mxu0 %v15044_v1  ;;  %v15166_v9 = vld [vmem:[#allocation8 + $0x190] sm:$0xff]  }
 0x5c9   : >> { %11841 = vmatpush3.bf16.msra.mxu1 %v15048_v11  ;;  %11822 = vmatprep.subr.bf16.mxu0 %v13025_v28  ;;  %15921 = vst [vmem:[#allocation28_spill] sm:$0xff] %v15166_v9 }
 0x5ca   : >> { %11842 = vmatprep.subr.bf16.mxu1 %v13025_v28  ;;  %11836 = vmatprep.mubr.msk.bf16.mxu0 %vm13026_vm6, %v13025_v28 }
 0x5cb   : >> { %11856 = vmatprep.mubr.msk.bf16.mxu1 %vm13026_vm6, %v13025_v28 }
 0x5cc   : >> { %11823 = vmatpush3.bf16.msra.mxu0 %v15054_v0 }
 0x5cd   : >> { %11843 = vmatpush3.bf16.msra.mxu1 %v15058_v32  ;;  %11824 = vmatprep.subr.bf16.mxu0 %v13025_v28 }
 0x5ce   : >> { %11844 = vmatprep.subr.bf16.mxu1 %v13025_v28 }
 0x5d0   : >> { %11825 = vmatpush3.bf16.msra.mxu0 %v15066_v50 }
 0x5d1   : >> { %11845 = vmatpush3.bf16.msra.mxu1 %v15070_v59  ;;  %11826 = vmatprep.subr.bf16.mxu0 %v13025_v28 }
 0x5d2   : >> { %11846 = vmatprep.subr.bf16.mxu1 %v13025_v28 }
 0x5d4   : >> { %11827 = vmatpush3.bf16.msra.mxu0 %v15074_v5 }
 0x5d5   : >> { %11847 = vmatpush3.bf16.msra.mxu1 %v15078_v55  ;;  %11828 = vmatprep.subr.bf16.mxu0 %v13025_v28 }
 0x5d6   : >> { %11848 = vmatprep.subr.bf16.mxu1 %v13025_v28 }
 0x5d8   : >> { %11829 = vmatpush3.bf16.msra.mxu0 %v15082_v8 }
 0x5d9   : >> { %11849 = vmatpush3.bf16.msra.mxu1 %v15086_v43  ;;  %11830 = vmatprep.subr.bf16.mxu0 %v13025_v28  ;;  %v15184_v43 = vld [vmem:[#allocation8 + $0x180] sm:$0xff]  }
 0x5da   : >> { %11850 = vmatprep.subr.bf16.mxu1 %v13025_v28 }
 0x5dc   : >> { %11831 = vmatpush3.bf16.msra.mxu0 %v15090_v35 }
 0x5dd   : >> { %11851 = vmatpush3.bf16.msra.mxu1 %v15095_v63  ;;  %11832 = vmatprep.subr.bf16.mxu0 %v13025_v28  ;;  %v15180_v63 = vld [vmem:[#allocation8 + $0x1c8] sm:$0xff]  }
 0x5de   : >> { %11852 = vmatprep.subr.bf16.mxu1 %v13025_v28 }
 0x5e0   : >> { %11833 = vmatpush3.bf16.msra.mxu0 %v15100_v48 }
 0x5e1   : >> { %11853 = vmatpush3.bf16.msra.mxu1 %v15104_v23  ;;  %11834 = vmatprep.subr.bf16.mxu0 %v13025_v28 }
 0x5e2   : >> { %11854 = vmatprep.subr.bf16.mxu1 %v13025_v28 }
 0x5e4   : >> { %11835 = vmatpush3.bf16.msra.mxu0 %v15108_v33 }
 0x5e5   : >> { %11855 = vmatpush3.bf16.msra.mxu1 %v15112_v61  ;;  %11860 = vmatprep.subr.bf16.mxu0 %v13025_v28  ;;  %v15176_v61 = vld [vmem:[#allocation8 + $0x188] sm:$0xff]  }
 0x5e6   : >> { %11880 = vmatprep.subr.bf16.mxu1 %v13025_v28 }
 0x5e7   : >> { %11837 = vmatmul.mubr.bf16.vlgmr.msra.gmra.mxu0 %v15115_v57 }
 0x5e8   : >> { %11857 = vmatmul.mubr.bf16.vlgmr.msra.gmra.mxu1 %v15118_v7  ;;  %11861 = vmatpush3.bf16.msra.mxu0 %v15120_v42 }
 0x5e9   : >> { %11881 = vmatpush3.bf16.msra.mxu1 %v15124_v10  ;;  %11862 = vmatprep.subr.bf16.mxu0 %v13025_v28  ;;  %v9823_v10 = vld.sshfl [vmem:[%s14962_s22 + $0x12] sm:$0x3 pattern:$0x76325410] }
 0x5ea   : >> { %11882 = vmatprep.subr.bf16.mxu1 %v13025_v28  ;;  %11876 = vmatprep.mubr.msk.bf16.mxu0 %vm13026_vm6, %v13025_v28  ;;  %v7472_v23 = vshll.u32 %v9823_v10, 16 }
 0x5eb   : >> { %11896 = vmatprep.mubr.msk.bf16.mxu1 %vm13026_vm6, %v13025_v28 }
 0x5ec   : >> { %11863 = vmatpush3.bf16.msra.mxu0 %v15130_v44  ;;  %v7474_v55 = vrot.slane %v7472_v23, 1  ;;  %v15226_v23 = vld [vmem:[#allocation8 + $0x218] sm:$0xff]  }
 0x5ed   : >> { %11883 = vmatpush3.bf16.msra.mxu1 %v15134_v19  ;;  %11864 = vmatprep.subr.bf16.mxu0 %v13025_v28  ;;  %v15171_v19 = vld [vmem:[#allocation8 + $0x1d0] sm:$0xff]  }
 0x5ee   : >> { %11884 = vmatprep.subr.bf16.mxu1 %v13025_v28  ;;  %15922 = vst [vmem:[#allocation29_spill] sm:$0xff] %v15171_v19 }
 0x5f0   : >> { %11865 = vmatpush3.bf16.msra.mxu0 %v15142_v46 }
 0x5f1   : >> { %11885 = vmatpush3.bf16.msra.mxu1 %v15146_v29  ;;  %11866 = vmatprep.subr.bf16.mxu0 %v13025_v28  ;;  %v9813_v29 = vld.sshfl [vmem:[%s14962_s22 + $0x10] sm:$0x3 pattern:$0x76325410] }
 0x5f2   : >> { %11886 = vmatprep.subr.bf16.mxu1 %v13025_v28 }
 0x5f4   : >> { %11867 = vmatpush3.bf16.msra.mxu0 %v15150_v58  ;;  %v7470_v58 = vshrl.u32 %v9823_v10, 16  ;;  %v9833_v10 = vld.sshfl [vmem:[%s14962_s22 + $0x14] sm:$0x3 pattern:$0x76325410] }
 0x5f5   : >> { %11887 = vmatpush3.bf16.msra.mxu1 %v15154_v60  ;;  %11868 = vmatprep.subr.bf16.mxu0 %v13025_v28  ;;  %v7349_v60 = vshll.u32 %v9813_v29, 16 }
 0x5f6   : >> { %11888 = vmatprep.subr.bf16.mxu1 %v13025_v28 }
 0x5f8   : >> { %11869 = vmatpush3.bf16.msra.mxu0 %v15158_v24  ;;  %v7351_v24 = vrot.slane %v7349_v60, 1  ;;  %v15196_v60 = vld [vmem:[#allocation8 + $0x238] sm:$0xff]  }
 0x5f9   : >> { %11889 = vmatpush3.bf16.msra.mxu1 %v15162_v15  ;;  %11870 = vmatprep.subr.bf16.mxu0 %v13025_v28  ;;  %v7347_v15 = vshrl.u32 %v9813_v29, 16  ;;  %v15194_v29 = vor.u32 %v7474_v55, %v7470_v58  ;;  %v15214_v55 = vld [vmem:[#allocation8 + $0x228] sm:$0xff]  }
 0x5fa   : >> { %11890 = vmatprep.subr.bf16.mxu1 %v13025_v28  ;;  %v15239_v58 = vld [vmem:[#allocation8 + $0x208] sm:$0xff]  }
 0x5fb   : >> { %15925 = vst [vmem:[#allocation32_spill] sm:$0xff] %v15239_v58 }
 0x5fc   : >> { %11871 = vmatpush3.bf16.msra.mxu0 %v15166_v9  ;;  %v15188_v9 = vld [vmem:[#allocation8 + $0x1c0] sm:$0xff]  }
 0x5fd   : >> { %11891 = vmatpush3.bf16.msra.mxu1 %v15171_v19  ;;  %11872 = vmatprep.subr.bf16.mxu0 %v13025_v28  ;;  %v15191_v19 = vor.u32 %v7351_v24, %v7347_v15  ;;  %v15204_v15 = vld [vmem:[#allocation8 + $0x230] sm:$0xff]  }
 0x5fe   : >> { %11892 = vmatprep.subr.bf16.mxu1 %v13025_v28 }
 0x5ff   : >> { %15923 = vst [vmem:[#allocation30_spill] sm:$0xff] %v15191_v19 }
 0x600   : >> { %11873 = vmatpush3.bf16.msra.mxu0 %v15176_v61 }
 0x601   : >> { %11893 = vmatpush3.bf16.msra.mxu1 %v15180_v63  ;;  %11874 = vmatprep.subr.bf16.mxu0 %v13025_v28 }
 0x602   : >> { %11894 = vmatprep.subr.bf16.mxu1 %v13025_v28 }
 0x604   : >> { %11875 = vmatpush3.bf16.msra.mxu0 %v15184_v43 }
 0x605   : >> { %11895 = vmatpush3.bf16.msra.mxu1 %v15188_v9  ;;  %11900 = vmatprep.subr.bf16.mxu0 %v13025_v28 }
 0x606   : >> { %11920 = vmatprep.subr.bf16.mxu1 %v13025_v28 }
 0x607   : >> { %11877 = vmatmul.mubr.bf16.vlgmr.msra.gmra.mxu0 %v15191_v19 }
 0x608   : >> { %11897 = vmatmul.mubr.bf16.vlgmr.msra.gmra.mxu1 %v15194_v29  ;;  %11901 = vmatpush3.bf16.msra.mxu0 %v15196_v60 }
 0x609   : >> { %11921 = vmatpush3.bf16.msra.mxu1 %v14895_v26  ;;  %11902 = vmatprep.subr.bf16.mxu0 %v13025_v28  ;;  %v15220_v26 = vld [vmem:[#allocation8 + $0x220] sm:$0xff]  }
 0x60a   : >> { %11922 = vmatprep.subr.bf16.mxu1 %v13025_v28  ;;  %11916 = vmatprep.mubr.msk.bf16.mxu0 %vm13026_vm6, %v13025_v28 }
 0x60b   : >> { %11936 = vmatprep.mubr.msk.bf16.mxu1 %vm13026_vm6, %v13025_v28 }
 0x60c   : >> { %11903 = vmatpush3.bf16.msra.mxu0 %v15204_v15 }
 0x60d   : >> { %11923 = vmatpush3.bf16.msra.mxu1 %v14902_v62  ;;  %11904 = vmatprep.subr.bf16.mxu0 %v13025_v28  ;;  %v15232_v62 = vld [vmem:[#allocation8 + $0x210] sm:$0xff]  }
 0x60e   : >> { %11924 = vmatprep.subr.bf16.mxu1 %v13025_v28  ;;  %15924 = vst [vmem:[#allocation31_spill] sm:$0xff] %v15232_v62 }
 0x610   : >> { %11905 = vmatpush3.bf16.msra.mxu0 %v15214_v55 }
 0x611   : >> { %11925 = vmatpush3.bf16.msra.mxu1 %v14914_v45  ;;  %11906 = vmatprep.subr.bf16.mxu0 %v13025_v28  ;;  %v7595_v45 = vshll.u32 %v9833_v10, 16 }
 0x612   : >> { %11926 = vmatprep.subr.bf16.mxu1 %v13025_v28 }
 0x613   : >> { %v7597_v24 = vrot.slane %v7595_v45, 1  ;;  %v15935_v45 = vld [vmem:[#allocation20_spill] sm:$0xff] }
 0x614   : >> { %11907 = vmatpush3.bf16.msra.mxu0 %v15220_v26 }
 0x615   : >> { %11927 = vmatpush3.bf16.msra.mxu1 %v14922_v4  ;;  %11908 = vmatprep.subr.bf16.mxu0 %v13025_v28  ;;  %v7593_v4 = vshrl.u32 %v9833_v10, 16 }
 0x616   : >> { %11928 = vmatprep.subr.bf16.mxu1 %v13025_v28 }
 0x617   : >> { %v15250_v19 = vor.u32 %v7597_v24, %v7593_v4 }
 0x618   : >> { %11909 = vmatpush3.bf16.msra.mxu0 %v15226_v23 }
 0x619   : >> { %11929 = vmatpush3.bf16.msra.mxu1 %v14930_v12  ;;  %11910 = vmatprep.subr.bf16.mxu0 %v13025_v28  ;;  %v15245_v12 = vld [vmem:[#allocation8 + $0x200] sm:$0xff]  }
 0x61a   : >> { %11930 = vmatprep.subr.bf16.mxu1 %v13025_v28  ;;  %15926 = vst [vmem:[#allocation33_spill] sm:$0xff] %v15245_v12 }
 0x61c   : >> { %11911 = vmatpush3.bf16.msra.mxu0 %v15232_v62 }
 0x61d   : >> { %11931 = vmatpush3.bf16.msra.mxu1 %v14938_v34  ;;  %11912 = vmatprep.subr.bf16.mxu0 %v13025_v28 }
 0x61e   : >> { %11932 = vmatprep.subr.bf16.mxu1 %v13025_v28 }
 0x620   : >> { %11913 = vmatpush3.bf16.msra.mxu0 %v15239_v58 }
 0x621   : >> { %11933 = vmatpush3.bf16.msra.mxu1 %v14946_v53  ;;  %11914 = vmatprep.subr.bf16.mxu0 %v13025_v28 }
 0x622   : >> { %11934 = vmatprep.subr.bf16.mxu1 %v13025_v28 }
 0x624   : >> { %11915 = vmatpush3.bf16.msra.mxu0 %v15245_v12 }
 0x625   : >> { %11935 = vmatpush3.bf16.msra.mxu1 %v14955_v40  ;;  %11940 = vmatprep.subr.bf16.mxu0 %v13025_v28 }
 0x626   : >> { %11960 = vmatprep.subr.bf16.mxu1 %v13025_v28 }
 0x627   : >> { %11917 = vmatmul.mubr.bf16.vlgmr.msra.gmra.mxu0 %v15250_v19 }
 0x628   : >> { %11937 = vmatmul.mubr.bf16.vlgmr.msra.gmra.mxu1 %v15039_v49  ;;  %11941 = vmatpush3.bf16.msra.mxu0 %v14899_v25  ;;  %v9845_v25 = vld [vmem:[%s14962_s22 + $0x16] sm:$0x1]  ;;  %v15933_v49 = vld [vmem:[#allocation19_spill] sm:$0xff] }
 0x629   : >> { %11961 = vmatpush3.bf16.msra.mxu1 %v14969_v41  ;;  %11942 = vmatprep.subr.bf16.mxu0 %v13025_v28  ;;  %v15929_v41 = vld [vmem:[#allocation17_spill] sm:$0xff] }
 0x62a   : >> { %11962 = vmatprep.subr.bf16.mxu1 %v13025_v28  ;;  %11956 = vmatprep.mubr.msk.bf16.mxu0 %vm13026_vm6, %v13025_v28 }
 0x62b   : >> { %11976 = vmatprep.mubr.msk.bf16.mxu1 %vm13026_vm6, %v13025_v28 }
 0x62c   : >> { %11943 = vmatpush3.bf16.msra.mxu0 %v14908_v31 }
 0x62d   : >> { %11963 = vmatpush3.bf16.msra.mxu1 %v14978_v3  ;;  %11944 = vmatprep.subr.bf16.mxu0 %v13025_v28  ;;  %v15930_v3 = vld [vmem:[#allocation26_spill] sm:$0xff] }
 0x62e   : >> { %11964 = vmatprep.subr.bf16.mxu1 %v13025_v28 }
 0x630   : >> { %11945 = vmatpush3.bf16.msra.mxu0 %v14918_v37 }
 0x631   : >> { %11965 = vmatpush3.bf16.msra.mxu1 %v14990_v16  ;;  %11946 = vmatprep.subr.bf16.mxu0 %v13025_v28  ;;  %v15931_v16 = vld [vmem:[#allocation18_spill] sm:$0xff] }
 0x632   : >> { %11966 = vmatprep.subr.bf16.mxu1 %v13025_v28 }
 0x634   : >> { %11947 = vmatpush3.bf16.msra.mxu0 %v14926_v38 }
 0x635   : >> { %11967 = vmatpush3.bf16.msra.mxu1 %v14998_v51  ;;  %11948 = vmatprep.subr.bf16.mxu0 %v13025_v28 }
 0x636   : >> { %11968 = vmatprep.subr.bf16.mxu1 %v13025_v28 }
 0x638   : >> { %11949 = vmatpush3.bf16.msra.mxu0 %v14934_v30 }
 0x639   : >> { %11969 = vmatpush3.bf16.msra.mxu1 %v15006_v22  ;;  %11950 = vmatprep.subr.bf16.mxu0 %v13025_v28 }
 0x63a   : >> { %11970 = vmatprep.subr.bf16.mxu1 %v13025_v28 }
 0x63c   : >> { %11951 = vmatpush3.bf16.msra.mxu0 %v14942_v2 }
 0x63d   : >> { %11971 = vmatpush3.bf16.msra.mxu1 %v15014_v18  ;;  %11952 = vmatprep.subr.bf16.mxu0 %v13025_v28 }
 0x63e   : >> { %11972 = vmatprep.subr.bf16.mxu1 %v13025_v28 }
 0x640   : >> { %11953 = vmatpush3.bf16.msra.mxu0 %v14951_v6 }
 0x641   : >> { %11973 = vmatpush3.bf16.msra.mxu1 %v15022_v36  ;;  %11954 = vmatprep.subr.bf16.mxu0 %v13025_v28 }
 0x642   : >> { %11974 = vmatprep.subr.bf16.mxu1 %v13025_v28 }
 0x644   : >> { %11955 = vmatpush3.bf16.msra.mxu0 %v14959_v47  ;;  %v15927_v47 = vld [vmem:[#allocation16_spill] sm:$0xff] }
 0x645   : >> { %11975 = vmatpush3.bf16.msra.mxu1 %v15030_v39  ;;  %11980 = vmatprep.subr.bf16.mxu0 %v13025_v28 }
 0x646   : >> { %12000 = vmatprep.subr.bf16.mxu1 %v13025_v28 }
 0x647   : >> { %11957 = vmatmul.mubr.bf16.vlgmr.msra.gmra.mxu0 %v14965_v17  ;;  %v15928_v17 = vld [vmem:[#allocation24_spill] sm:$0xff] }
 0x648   : >> { %11977 = vmatmul.mubr.bf16.vlgmr.msra.gmra.mxu1 %v9845_v25  ;;  %11981 = vmatpush3.bf16.msra.mxu0 %v14973_v21  ;;  %v9849_v21 = vld.sshfl [vmem:[%s14962_s22 + $0x6] sm:$0x3 pattern:$0x76325410] }
 0x649   : >> { %12001 = vmatpush3.bf16.msra.mxu1 %v15044_v1  ;;  %11982 = vmatprep.subr.bf16.mxu0 %v13025_v28  ;;  %v7917_v51 = vshrl.u32 %v9849_v21, 16 }
 0x64a   : >> { %12002 = vmatprep.subr.bf16.mxu1 %v13025_v28  ;;  %11996 = vmatprep.mubr.msk.bf16.mxu0 %vm13026_vm6, %v13025_v28 }
 0x64b   : >> { %12016 = vmatprep.mubr.msk.bf16.mxu1 %vm13026_vm6, %v13025_v28 }
 0x64c   : >> { %11983 = vmatpush3.bf16.msra.mxu0 %v14980_v14  ;;  %v7919_v14 = vshll.u32 %v9849_v21, 16  ;;  %v15938_v21 = vld [vmem:[#allocation23_spill] sm:$0xff] }
 0x64d   : >> { %12003 = vmatpush3.bf16.msra.mxu1 %v15054_v0  ;;  %11984 = vmatprep.subr.bf16.mxu0 %v13025_v28 }
 0x64e   : >> { %12004 = vmatprep.subr.bf16.mxu1 %v13025_v28 }
 0x650   : >> { %11985 = vmatpush3.bf16.msra.mxu0 %v14994_v20  ;;  %v15932_v20 = vld [vmem:[#allocation28_spill] sm:$0xff] }
 0x651   : >> { %12005 = vmatpush3.bf16.msra.mxu1 %v15066_v50  ;;  %11986 = vmatprep.subr.bf16.mxu0 %v13025_v28 }
 0x652   : >> { %12006 = vmatprep.subr.bf16.mxu1 %v13025_v28 }
 0x654   : >> { %11987 = vmatpush3.bf16.msra.mxu0 %v15002_v27  ;;  %v7921_v27 = vrot.slane %v7919_v14, 1  ;;  %v15939_v14 = vld [vmem:[#allocation25_spill] sm:$0xff] }
 0x655   : >> { %12007 = vmatpush3.bf16.msra.mxu1 %v15074_v5  ;;  %11988 = vmatprep.subr.bf16.mxu0 %v13025_v28 }
 0x656   : >> { %12008 = vmatprep.subr.bf16.mxu1 %v13025_v28  ;;  %v15367_v10 = vor.u32 %v7921_v27, %v7917_v51  ;;  %v15940_v51 = vld [vmem:[#allocation27_spill] sm:$0xff]  ;;  %v9851_v27 = vld.sshfl [vmem:[%s14962_s22 + $0x16] sm:$0x3 pattern:$0x76325410] }
 0x658   : >> { %11989 = vmatpush3.bf16.msra.mxu0 %v15010_v54  ;;  %15934 = vst [vmem:[#allocation16_spill] sm:$0xff] %v15367_v10 }
 0x659   : >> { %12009 = vmatpush3.bf16.msra.mxu1 %v15082_v8  ;;  %11990 = vmatprep.subr.bf16.mxu0 %v13025_v28 }
 0x65a   : >> { %12010 = vmatprep.subr.bf16.mxu1 %v13025_v28 }
 0x65c   : >> { %11991 = vmatpush3.bf16.msra.mxu0 %v15018_v13 }
 0x65d   : >> { %12011 = vmatpush3.bf16.msra.mxu1 %v15090_v35  ;;  %11992 = vmatprep.subr.bf16.mxu0 %v13025_v28 }
 0x65e   : >> { %12012 = vmatprep.subr.bf16.mxu1 %v13025_v28 }
 0x660   : >> { %11993 = vmatpush3.bf16.msra.mxu0 %v15025_v56 }
 0x661   : >> { %12013 = vmatpush3.bf16.msra.mxu1 %v15100_v48  ;;  %11994 = vmatprep.subr.bf16.mxu0 %v13025_v28 }
 0x662   : >> { %12014 = vmatprep.subr.bf16.mxu1 %v13025_v28 }
 0x664   : >> { %11995 = vmatpush3.bf16.msra.mxu0 %v15035_v52 }
 0x665   : >> { %12015 = vmatpush3.bf16.msra.mxu1 %v15108_v33  ;;  %12020 = vmatprep.subr.bf16.mxu0 %v13025_v28 }
 0x666   : >> { %12040 = vmatprep.subr.bf16.mxu1 %v13025_v28 }
 0x667   : >> { %v6740_v31 = vpop.f32.mrf.mxu0  ;;  %11997 = vmatmul.mubr.bf16.vlgmr.msra.gmra.mxu0 %v15115_v57 }
 0x668   : >> { %v6828_v37 = vpop.f32.mrf.mxu1  ;;  %12017 = vmatmul.mubr.bf16.vlgmr.msra.gmra.mxu1 %v15118_v7  ;;  %12021 = vmatpush3.bf16.msra.mxu0 %v15048_v11 }
 0x669   : >> { %v6829_v38 = vadd.f32 %v6828_v37, %v6740_v31  ;;  %12041 = vmatpush3.bf16.msra.mxu1 %v15120_v42  ;;  %v11758_v30 = vpop.f32.mrf.mxu0  ;;  %12022 = vmatprep.subr.bf16.mxu0 %v13025_v28  ;;  %v15936_v31 = vld [vmem:[#allocation21_spill] sm:$0xff] }
 0x66a   : >> { %v11778_v34 = vpop.f32.mrf.mxu1  ;;  %12042 = vmatprep.subr.bf16.mxu1 %v13025_v28  ;;  %12036 = vmatprep.mubr.msk.bf16.mxu0 %vm13026_vm6, %v13025_v28 }
 0x66b   : >> { %v6743_v2 = vpop.f32.mrf.mxu0  ;;  %12056 = vmatprep.mubr.msk.bf16.mxu1 %vm13026_vm6, %v13025_v28 }
 0x66c   : >> { %v6831_v53 = vpop.f32.mrf.mxu1  ;;  %12023 = vmatpush3.bf16.msra.mxu0 %v15058_v32 }
 0x66d   : >> { %12043 = vmatpush3.bf16.msra.mxu1 %v15130_v44  ;;  %v11759_v6 = vpop.f32.mrf.mxu0  ;;  %12024 = vmatprep.subr.bf16.mxu0 %v13025_v28  ;;  %v15937_v53 = vld [vmem:[#allocation22_spill] sm:$0xff] }
 0x66e   : >> { %v11779_v40 = vpop.f32.mrf.mxu1  ;;  %12044 = vmatprep.subr.bf16.mxu1 %v13025_v28 }
 0x670   : >> { %12025 = vmatpush3.bf16.msra.mxu0 %v15070_v59 }
 0x671   : >> { %12045 = vmatpush3.bf16.msra.mxu1 %v15142_v46  ;;  %12026 = vmatprep.subr.bf16.mxu0 %v13025_v28 }
 0x672   : >> { %12046 = vmatprep.subr.bf16.mxu1 %v13025_v28 }
 0x674   : >> { %12027 = vmatpush3.bf16.msra.mxu0 %v15927_v47 }
 0x675   : >> { %12047 = vmatpush3.bf16.msra.mxu1 %v15928_v17  ;;  %12028 = vmatprep.subr.bf16.mxu0 %v13025_v28 }
 0x676   : >> { %12048 = vmatprep.subr.bf16.mxu1 %v13025_v28 }
 0x678   : >> { %12029 = vmatpush3.bf16.msra.mxu0 %v15929_v41 }
 0x679   : >> { %12049 = vmatpush3.bf16.msra.mxu1 %v15930_v3  ;;  %12030 = vmatprep.subr.bf16.mxu0 %v13025_v28 }
 0x67a   : >> { %12050 = vmatprep.subr.bf16.mxu1 %v13025_v28 }
 0x67c   : >> { %12031 = vmatpush3.bf16.msra.mxu0 %v15931_v16 }
 0x67d   : >> { %12051 = vmatpush3.bf16.msra.mxu1 %v15932_v20  ;;  %12032 = vmatprep.subr.bf16.mxu0 %v13025_v28 }
 0x67e   : >> { %12052 = vmatprep.subr.bf16.mxu1 %v13025_v28 }
 0x680   : >> { %12033 = vmatpush3.bf16.msra.mxu0 %v15933_v49 }
 0x681   : >> { %12053 = vmatpush3.bf16.msra.mxu1 %v15176_v61  ;;  %12034 = vmatprep.subr.bf16.mxu0 %v13025_v28 }
 0x682   : >> { %12054 = vmatprep.subr.bf16.mxu1 %v13025_v28 }
 0x684   : >> { %12035 = vmatpush3.bf16.msra.mxu0 %v15935_v45 }
 0x685   : >> { %12055 = vmatpush3.bf16.msra.mxu1 %v15184_v43  ;;  %12060 = vmatprep.subr.bf16.mxu0 %v13025_v28 }
 0x686   : >> { %12080 = vmatprep.subr.bf16.mxu1 %v13025_v28 }
 0x687   : >> { %v6938_v4 = vpop.f32.mrf.mxu0  ;;  %12037 = vmatmul.mubr.bf16.vlgmr.msra.gmra.mxu0 %v15367_v10  ;;  %v15431_v10 = vld [vmem:[#allocation8 + $0x30] sm:$0xff]  }
 0x688   : >> { %v6944_v24 = vadd.f32 %v6938_v4, %v6829_v38  ;;  %v7063_v25 = vpop.f32.mrf.mxu1  ;;  %12057 = vmatmul.mubr.bf16.vlgmr.msra.gmra.mxu1 %v15194_v29  ;;  %12061 = vmatpush3.bf16.msra.mxu0 %v15936_v31  ;;  %v15941_v4 = vld [vmem:[#allocation29_spill] sm:$0xff]  ;;  %15944 = vst [vmem:[#allocation26_spill] sm:$0xff] %v15431_v10 }
 0x689   : >> { %12081 = vmatpush3.bf16.msra.mxu1 %v15196_v60  ;;  %v11798_v37 = vpop.f32.mrf.mxu0  ;;  %12062 = vmatprep.subr.bf16.mxu0 %v13025_v28 }
 0x68a   : >> { %v7069_v30 = vadd.f32 %v7063_v25, %v6944_v24  ;;  %v11818_v34 = vpop.f32.mrf.mxu1  ;;  %12082 = vmatprep.subr.bf16.mxu1 %v13025_v28  ;;  %12076 = vmatprep.mubr.msk.bf16.mxu0 %vm13026_vm6, %v13025_v28  ;;  %v8059_v24 = vshll.u32 %v9851_v27, 16  ;;  %v8057_v25 = vshrl.u32 %v9851_v27, 16  ;;  %v15419_v27 = vld [vmem:[#allocation8 + $0x38] sm:$0xff]  }
 0x68b   : >> { %v6941_v2 = vpop.f32.mrf.mxu0  ;;  %12096 = vmatprep.mubr.msk.bf16.mxu1 %vm13026_vm6, %v13025_v28  ;;  %15943 = vst [vmem:[#allocation17_spill] sm:$0xff] %v15419_v27 }
 0x68c   : >> { %v7066_v38 = vpop.f32.mrf.mxu1  ;;  %12063 = vmatpush3.bf16.msra.mxu0 %v15937_v53  ;;  %v8061_v37 = vrot.slane %v8059_v24, 1 }
 0x68d   : >> { %12083 = vmatpush3.bf16.msra.mxu1 %v15204_v15  ;;  %v11799_v6 = vpop.f32.mrf.mxu0  ;;  %12064 = vmatprep.subr.bf16.mxu0 %v13025_v28 }
 0x68e   : >> { %v11819_v40 = vpop.f32.mrf.mxu1  ;;  %12084 = vmatprep.subr.bf16.mxu1 %v13025_v28  ;;  %v15409_v34 = vor.u32 %v8061_v37, %v8057_v25 }
 0x68f   : >> { %v15416_v40 = vld [vmem:[#allocation8 + $0x78] sm:$0xff]  }
 0x690   : >> { %12065 = vmatpush3.bf16.msra.mxu0 %v15938_v21  ;;  %15942 = vst [vmem:[#allocation24_spill] sm:$0xff] %v15409_v34 }
 0x691   : >> { %12085 = vmatpush3.bf16.msra.mxu1 %v15214_v55  ;;  %12066 = vmatprep.subr.bf16.mxu0 %v13025_v28 }
 0x692   : >> { %12086 = vmatprep.subr.bf16.mxu1 %v13025_v28 }
 0x694   : >> { %12067 = vmatpush3.bf16.msra.mxu0 %v15939_v14 }
 0x695   : >> { %12087 = vmatpush3.bf16.msra.mxu1 %v15220_v26  ;;  %12068 = vmatprep.subr.bf16.mxu0 %v13025_v28 }
 0x696   : >> { %12088 = vmatprep.subr.bf16.mxu1 %v13025_v28 }
 0x698   : >> { %12069 = vmatpush3.bf16.msra.mxu0 %v15940_v51 }
 0x699   : >> { %12089 = vmatpush3.bf16.msra.mxu1 %v15226_v23  ;;  %12070 = vmatprep.subr.bf16.mxu0 %v13025_v28 }
 0x69a   : >> { %12090 = vmatprep.subr.bf16.mxu1 %v13025_v28 }
 0x69c   : >> { %12071 = vmatpush3.bf16.msra.mxu0 %v15941_v4 }
 0x69d   : >> { %12091 = vmatpush3.bf16.msra.mxu1 %v15232_v62  ;;  %12072 = vmatprep.subr.bf16.mxu0 %v13025_v28 }
 0x69e   : >> { %12092 = vmatprep.subr.bf16.mxu1 %v13025_v28 }
 0x6a0   : >> { %12073 = vmatpush3.bf16.msra.mxu0 %v15180_v63 }
 0x6a1   : >> { %12093 = vmatpush3.bf16.msra.mxu1 %v15239_v58  ;;  %12074 = vmatprep.subr.bf16.mxu0 %v13025_v28  ;;  %v15955_v58 = vld [vmem:[#allocation15_spill] sm:$0xff] }
 0x6a2   : >> { %12094 = vmatprep.subr.bf16.mxu1 %v13025_v28 }
 0x6a4   : >> { %12075 = vmatpush3.bf16.msra.mxu0 %v15188_v9 }
 0x6a5   : >> { %12095 = vmatpush3.bf16.msra.mxu1 %v15245_v12  ;;  %12100 = vmatprep.subr.bf16.mxu0 %v13025_v28 }
 0x6a6   : >> { %12120 = vmatprep.subr.bf16.mxu1 %v13025_v28 }
 0x6a7   : >> { %v7188_v2 = vpop.f32.mrf.mxu0  ;;  %12077 = vmatmul.mubr.bf16.vlgmr.msra.gmra.mxu0 %v15250_v19 }
 0x6a8   : >> { %v7194_v38 = vadd.f32 %v7188_v2, %v7069_v30  ;;  %v7313_v6 = vpop.f32.mrf.mxu1  ;;  %12097 = vmatmul.mubr.bf16.vlgmr.msra.gmra.mxu1 %v15409_v34  ;;  %12101 = vmatpush3.bf16.msra.mxu0 %v15416_v40  ;;  %v15428_v34 = vld [vmem:[#allocation8 + $0x70] sm:$0xff]  }
 0x6a9   : >> { %12121 = vmatpush3.bf16.msra.mxu1 %v15419_v27  ;;  %v11838_v24 = vpop.f32.mrf.mxu0  ;;  %12102 = vmatprep.subr.bf16.mxu0 %v13025_v28  ;;  %v15476_v27 = vld [vmem:[#allocation8 + $0x40] sm:$0xff]  }
 0x6aa   : >> { %v7319_v25 = vadd.f32 %v7313_v6, %v7194_v38  ;;  %v11858_v37 = vpop.f32.mrf.mxu1  ;;  %12122 = vmatprep.subr.bf16.mxu1 %v13025_v28  ;;  %12116 = vmatprep.mubr.msk.bf16.mxu0 %vm13026_vm6, %v13025_v28  ;;  %v15436_v24 = vld [vmem:[#allocation8 + $0x68] sm:$0xff]   ;;  %15953 = vst [vmem:[#allocation27_spill] sm:$0xff] %v15476_v27 }
 0x6ab   : >> { %v7191_v30 = vpop.f32.mrf.mxu0  ;;  %12136 = vmatprep.mubr.msk.bf16.mxu1 %vm13026_vm6, %v13025_v28  ;;  %v15439_v37 = vld [vmem:[#allocation8 + $0x28] sm:$0xff]  }
 0x6ac   : >> { %v7316_v2 = vpop.f32.mrf.mxu1  ;;  %12103 = vmatpush3.bf16.msra.mxu0 %v15428_v34  ;;  %15945 = vst [vmem:[#allocation18_spill] sm:$0xff] %v15439_v37  ;;  %v15444_v30 = vld [vmem:[#allocation8 + $0x60] sm:$0xff]  }
 0x6ad   : >> { %12123 = vmatpush3.bf16.msra.mxu1 %v15431_v10  ;;  %v11839_v38 = vpop.f32.mrf.mxu0  ;;  %12104 = vmatprep.subr.bf16.mxu0 %v13025_v28  ;;  %v15447_v2 = vld [vmem:[#allocation8 + $0x20] sm:$0xff]   ;;  %v15468_v10 = vld [vmem:[#allocation8 + $0x48] sm:$0xff]  }
 0x6ae   : >> { %v11859_v6 = vpop.f32.mrf.mxu1  ;;  %12124 = vmatprep.subr.bf16.mxu1 %v13025_v28  ;;  %15946 = vst [vmem:[#allocation28_spill] sm:$0xff] %v15447_v2  ;;  %v15452_v38 = vld [vmem:[#allocation8 + $0x58] sm:$0xff]   ;;  %15951 = vst [vmem:[#allocation23_spill] sm:$0xff] %v15468_v10 }
 0x6af   : >> { %15947 = vst [vmem:[#allocation19_spill] sm:$0xff] %v15452_v38  ;;  %v15455_v6 = vld [vmem:[#allocation8 + $0x18] sm:$0xff]  }
 0x6b0   : >> { %12105 = vmatpush3.bf16.msra.mxu0 %v15436_v24  ;;  %15948 = vst [vmem:[#allocation20_spill] sm:$0xff] %v15455_v6 }
 0x6b1   : >> { %12125 = vmatpush3.bf16.msra.mxu1 %v15439_v37  ;;  %12106 = vmatprep.subr.bf16.mxu0 %v13025_v28  ;;  %v15460_v37 = vld [vmem:[#allocation8 + $0x50] sm:$0xff]  }
 0x6b2   : >> { %12126 = vmatprep.subr.bf16.mxu1 %v13025_v28  ;;  %15949 = vst [vmem:[#allocation21_spill] sm:$0xff] %v15460_v37 }
 0x6b4   : >> { %12107 = vmatpush3.bf16.msra.mxu0 %v15444_v30 }
 0x6b5   : >> { %12127 = vmatpush3.bf16.msra.mxu1 %v15447_v2  ;;  %12108 = vmatprep.subr.bf16.mxu0 %v13025_v28  ;;  %v15463_v2 = vld [vmem:[#allocation8 + $0x10] sm:$0xff]  }
 0x6b6   : >> { %12128 = vmatprep.subr.bf16.mxu1 %v13025_v28  ;;  %15950 = vst [vmem:[#allocation22_spill] sm:$0xff] %v15463_v2 }
 0x6b8   : >> { %12109 = vmatpush3.bf16.msra.mxu0 %v15452_v38 }
 0x6b9   : >> { %12129 = vmatpush3.bf16.msra.mxu1 %v15455_v6  ;;  %12110 = vmatprep.subr.bf16.mxu0 %v13025_v28  ;;  %v15471_v6 = vld [vmem:[#allocation8 + $0x8] sm:$0xff]  }
 0x6ba   : >> { %12130 = vmatprep.subr.bf16.mxu1 %v13025_v28  ;;  %15952 = vst [vmem:[#allocation25_spill] sm:$0xff] %v15471_v6 }
 0x6bc   : >> { %12111 = vmatpush3.bf16.msra.mxu0 %v15460_v37  ;;  %v15486_v37 = vld [vmem:[#allocation8 + $0xb8] sm:$0xff]  }
 0x6bd   : >> { %12131 = vmatpush3.bf16.msra.mxu1 %v15463_v2  ;;  %12112 = vmatprep.subr.bf16.mxu0 %v13025_v28  ;;  %v15479_v2 = vld [vmem:[#allocation8] sm:$0xff]  }
 0x6be   : >> { %12132 = vmatprep.subr.bf16.mxu1 %v13025_v28  ;;  %15954 = vst [vmem:[#allocation29_spill] sm:$0xff] %v15479_v2 }
 0x6c0   : >> { %12113 = vmatpush3.bf16.msra.mxu0 %v15468_v10 }
 0x6c1   : >> { %12133 = vmatpush3.bf16.msra.mxu1 %v15471_v6  ;;  %12114 = vmatprep.subr.bf16.mxu0 %v13025_v28 }
 0x6c2   : >> { %12134 = vmatprep.subr.bf16.mxu1 %v13025_v28 }
 0x6c4   : >> { %12115 = vmatpush3.bf16.msra.mxu0 %v15476_v27  ;;  %v15489_v27 = vld [vmem:[#allocation8 + $0xf8] sm:$0xff]  }
 0x6c5   : >> { %12135 = vmatpush3.bf16.msra.mxu1 %v15479_v2  ;;  %12140 = vmatprep.subr.bf16.mxu0 %v13025_v28  ;;  %15956 = vst [vmem:[#allocation15_spill] sm:$0xff] %v15489_v27 }
 0x6c6   : >> { %12160 = vmatprep.subr.bf16.mxu1 %v13025_v28 }
 0x6c7   : >> { %v7436_v12 = vpop.f32.mrf.mxu0  ;;  %12117 = vmatmul.mubr.bf16.vlgmr.msra.gmra.mxu0 %v15115_v57 }
 0x6c8   : >> { %v7442_v6 = vadd.f32 %v7436_v12, %v7319_v25  ;;  %v7559_v10 = vpop.f32.mrf.mxu1  ;;  %12137 = vmatmul.mubr.bf16.vlgmr.msra.gmra.mxu1 %v15955_v58  ;;  %12141 = vmatpush3.bf16.msra.mxu0 %v15486_v37  ;;  %v15498_v25 = vld [vmem:[#allocation8 + $0xb0] sm:$0xff]  }
 0x6c9   : >> { %12161 = vmatpush3.bf16.msra.mxu1 %v15489_v27  ;;  %v11878_v2 = vpop.f32.mrf.mxu0  ;;  %12142 = vmatprep.subr.bf16.mxu0 %v13025_v28  ;;  %v15501_v27 = vld [vmem:[#allocation8 + $0xf0] sm:$0xff]  }
 0x6ca   : >> { %v7565_v62 = vadd.f32 %v7559_v10, %v7442_v6  ;;  %v11898_v38 = vpop.f32.mrf.mxu1  ;;  %12162 = vmatprep.subr.bf16.mxu1 %v13025_v28  ;;  %12156 = vmatprep.mubr.msk.bf16.mxu0 %vm13026_vm6, %v13025_v28  ;;  %v15509_v6 = vld [vmem:[#allocation8 + $0xe8] sm:$0xff]  }
 0x6cb   : >> { %v7439_v12 = vpop.f32.mrf.mxu0  ;;  %12176 = vmatprep.mubr.msk.bf16.mxu1 %vm13026_vm6, %v13025_v28  ;;  %v15506_v38 = vld [vmem:[#allocation8 + $0xa8] sm:$0xff]  }
 0x6cc   : >> { %v7562_v58 = vpop.f32.mrf.mxu1  ;;  %12143 = vmatpush3.bf16.msra.mxu0 %v15498_v25  ;;  %v15514_v12 = vld [vmem:[#allocation8 + $0xa0] sm:$0xff]  }
 0x6cd   : >> { %12163 = vmatpush3.bf16.msra.mxu1 %v15501_v27  ;;  %v11879_v10 = vpop.f32.mrf.mxu0  ;;  %12144 = vmatprep.subr.bf16.mxu0 %v13025_v28  ;;  %v15517_v58 = vld [vmem:[#allocation8 + $0xe0] sm:$0xff]  }
 0x6ce   : >> { %v11899_v2 = vpop.f32.mrf.mxu1  ;;  %12164 = vmatprep.subr.bf16.mxu1 %v13025_v28 }
 0x6d0   : >> { %12145 = vmatpush3.bf16.msra.mxu0 %v15506_v38 }
 0x6d1   : >> { %12165 = vmatpush3.bf16.msra.mxu1 %v15509_v6  ;;  %12146 = vmatprep.subr.bf16.mxu0 %v13025_v28 }
 0x6d2   : >> { %12166 = vmatprep.subr.bf16.mxu1 %v13025_v28 }
 0x6d4   : >> { %12147 = vmatpush3.bf16.msra.mxu0 %v15514_v12 }
 0x6d5   : >> { %12167 = vmatpush3.bf16.msra.mxu1 %v15517_v58  ;;  %12148 = vmatprep.subr.bf16.mxu0 %v13025_v28 }
 0x6d6   : >> { %12168 = vmatprep.subr.bf16.mxu1 %v13025_v28 }
 0x6d8   : >> { %12149 = vmatpush3.bf16.msra.mxu0 %v15006_v22 }
 0x6d9   : >> { %12169 = vmatpush3.bf16.msra.mxu1 %v15010_v54  ;;  %12150 = vmatprep.subr.bf16.mxu0 %v13025_v28 }
 0x6da   : >> { %12170 = vmatprep.subr.bf16.mxu1 %v13025_v28 }
 0x6dc   : >> { %12151 = vmatpush3.bf16.msra.mxu0 %v15014_v18 }
 0x6dd   : >> { %12171 = vmatpush3.bf16.msra.mxu1 %v15018_v13  ;;  %12152 = vmatprep.subr.bf16.mxu0 %v13025_v28  ;;  %v15957_v13 = vld [vmem:[#allocation30_spill] sm:$0xff] }
 0x6de   : >> { %12172 = vmatprep.subr.bf16.mxu1 %v13025_v28 }
 0x6e0   : >> { %12153 = vmatpush3.bf16.msra.mxu0 %v15022_v36 }
 0x6e1   : >> { %12173 = vmatpush3.bf16.msra.mxu1 %v15025_v56  ;;  %12154 = vmatprep.subr.bf16.mxu0 %v13025_v28 }
 0x6e2   : >> { %12174 = vmatprep.subr.bf16.mxu1 %v13025_v28 }
 0x6e4   : >> { %12155 = vmatpush3.bf16.msra.mxu0 %v15030_v39 }
 0x6e5   : >> { %12175 = vmatpush3.bf16.msra.mxu1 %v15035_v52  ;;  %12180 = vmatprep.subr.bf16.mxu0 %v13025_v28 }
 0x6e6   : >> { %12200 = vmatprep.subr.bf16.mxu1 %v13025_v28 }
 0x6e7   : >> { %v7682_v22 = vpop.f32.mrf.mxu0  ;;  %12157 = vmatmul.mubr.bf16.vlgmr.msra.gmra.mxu0 %v15118_v7 }
 0x6e8   : >> { %v15539_v54 = vadd.f32 %v7682_v22, %v7565_v62  ;;  %v7731_v18 = vpop.f32.mrf.mxu1  ;;  %12177 = vmatmul.mubr.bf16.vlgmr.msra.gmra.mxu1 %v15957_v13  ;;  %12181 = vmatpush3.bf16.msra.mxu0 %v15044_v1  ;;  %v15968_v13 = vld [vmem:[#allocation28_spill] sm:$0xff] }
 0x6e9   : >> { %12201 = vmatpush3.bf16.msra.mxu1 %v15048_v11  ;;  %v11918_v36 = vpop.f32.mrf.mxu0  ;;  %12182 = vmatprep.subr.bf16.mxu0 %v13025_v28 }
 0x6ea   : >> { %v11938_v56 = vpop.f32.mrf.mxu1  ;;  %12202 = vmatprep.subr.bf16.mxu1 %v13025_v28  ;;  %12196 = vmatprep.mubr.msk.bf16.mxu0 %vm13026_vm6, %v13025_v28  ;;  %v12813_v36 = vld [vmem:[#allocation8 + $0x98] sm:$0xff]  }
 0x6eb   : >> { %v7685_v39 = vpop.f32.mrf.mxu0  ;;  %12216 = vmatprep.mubr.msk.bf16.mxu1 %vm13026_vm6, %v13025_v28  ;;  %v12814_v56 = vld [vmem:[#allocation8 + $0x90] sm:$0xff]  }
 0x6ec   : >> { %v7734_v52 = vpop.f32.mrf.mxu1  ;;  %12183 = vmatpush3.bf16.msra.mxu0 %v15054_v0  ;;  %v12815_v39 = vld [vmem:[#allocation8 + $0x88] sm:$0xff]  }
 0x6ed   : >> { %12203 = vmatpush3.bf16.msra.mxu1 %v15058_v32  ;;  %v11919_v1 = vpop.f32.mrf.mxu0  ;;  %12184 = vmatprep.subr.bf16.mxu0 %v13025_v28  ;;  %v15972_v52 = vld [vmem:[#allocation29_spill] sm:$0xff] }
 0x6ee   : >> { %v11939_v11 = vpop.f32.mrf.mxu1  ;;  %12204 = vmatprep.subr.bf16.mxu1 %v13025_v28  ;;  %v12816_v1 = vld [vmem:[#allocation8 + $0x80] sm:$0xff]  }
 0x6f0   : >> { %12185 = vmatpush3.bf16.msra.mxu0 %v15066_v50 }
 0x6f1   : >> { %12205 = vmatpush3.bf16.msra.mxu1 %v15070_v59  ;;  %12186 = vmatprep.subr.bf16.mxu0 %v13025_v28 }
 0x6f2   : >> { %12206 = vmatprep.subr.bf16.mxu1 %v13025_v28 }
 0x6f4   : >> { %12187 = vmatpush3.bf16.msra.mxu0 %v15074_v5 }
 0x6f5   : >> { %12207 = vmatpush3.bf16.msra.mxu1 %v15927_v47  ;;  %12188 = vmatprep.subr.bf16.mxu0 %v13025_v28 }
 0x6f6   : >> { %12208 = vmatprep.subr.bf16.mxu1 %v13025_v28 }
 0x6f8   : >> { %12189 = vmatpush3.bf16.msra.mxu0 %v15082_v8 }
 0x6f9   : >> { %12209 = vmatpush3.bf16.msra.mxu1 %v15929_v41  ;;  %12190 = vmatprep.subr.bf16.mxu0 %v13025_v28 }
 0x6fa   : >> { %12210 = vmatprep.subr.bf16.mxu1 %v13025_v28 }
 0x6fc   : >> { %12191 = vmatpush3.bf16.msra.mxu0 %v15090_v35 }
 0x6fd   : >> { %12211 = vmatpush3.bf16.msra.mxu1 %v15931_v16  ;;  %12192 = vmatprep.subr.bf16.mxu0 %v13025_v28 }
 0x6fe   : >> { %12212 = vmatprep.subr.bf16.mxu1 %v13025_v28 }
 0x700   : >> { %12193 = vmatpush3.bf16.msra.mxu0 %v15100_v48 }
 0x701   : >> { %12213 = vmatpush3.bf16.msra.mxu1 %v15933_v49  ;;  %12194 = vmatprep.subr.bf16.mxu0 %v13025_v28  ;;  %v15960_v49 = vld [vmem:[#allocation21_spill] sm:$0xff] }
 0x702   : >> { %12214 = vmatprep.subr.bf16.mxu1 %v13025_v28 }
 0x704   : >> { %12195 = vmatpush3.bf16.msra.mxu0 %v15108_v33 }
 0x705   : >> { %12215 = vmatpush3.bf16.msra.mxu1 %v15935_v45  ;;  %12220 = vmatprep.subr.bf16.mxu0 %v13025_v28  ;;  %v15653_v45 = vld.sshfl [vmem:[%s14962_s22 + $0x4] sm:$0x2 pattern:$0x76325410] }
 0x706   : >> { %12240 = vmatprep.subr.bf16.mxu1 %v13025_v28 }
 0x707   : >> { %v7771_v0 = vpop.f32.mrf.mxu0  ;;  %12197 = vmatmul.mubr.bf16.vlgmr.msra.gmra.mxu0 %v15194_v29 }
 0x708   : >> { %v7772_v32 = vadd.f32 %v7771_v0, %v7731_v18  ;;  %v7816_v50 = vpop.f32.mrf.mxu1  ;;  %12217 = vmatmul.mubr.bf16.vlgmr.msra.gmra.mxu1 %v15250_v19  ;;  %12221 = vmatpush3.bf16.msra.mxu0 %v15120_v42  ;;  %v15967_v18 = vld [vmem:[#allocation18_spill] sm:$0xff] }
 0x709   : >> { %12241 = vmatpush3.bf16.msra.mxu1 %v15936_v31  ;;  %v11958_v59 = vpop.f32.mrf.mxu0  ;;  %12222 = vmatprep.subr.bf16.mxu0 %v13025_v28  ;;  %v15962_v31 = vld [vmem:[#allocation23_spill] sm:$0xff] }
 0x70a   : >> { %v7822_v5 = vadd.f32 %v7816_v50, %v7772_v32  ;;  %v11978_v8 = vpop.f32.mrf.mxu1  ;;  %12242 = vmatprep.subr.bf16.mxu1 %v13025_v28  ;;  %12236 = vmatprep.mubr.msk.bf16.mxu0 %vm13026_vm6, %v13025_v28  ;;  %v15973_v50 = vld [vmem:[#allocation16_spill] sm:$0xff]  ;;  %v15974_v59 = vld [vmem:[#allocation15_spill] sm:$0xff] }
 0x70b   : >> { %v7774_v35 = vpop.f32.mrf.mxu0  ;;  %12256 = vmatprep.mubr.msk.bf16.mxu1 %vm13026_vm6, %v13025_v28 }
 0x70c   : >> { %v7819_v48 = vpop.f32.mrf.mxu1  ;;  %12223 = vmatpush3.bf16.msra.mxu0 %v15130_v44  ;;  %v9852_v44 = vld.sshfl [vmem:[%s14962_s22] sm:$0x2 pattern:$0x76325410]  ;;  %v15975_v35 = vld [vmem:[#allocation14_spill] sm:$0xff] }
 0x70d   : >> { %12243 = vmatpush3.bf16.msra.mxu1 %v15937_v53  ;;  %v11959_v33 = vpop.f32.mrf.mxu0  ;;  %12224 = vmatprep.subr.bf16.mxu0 %v13025_v28  ;;  %v8361_v62 = vrot.slane %v9852_v44, 1  ;;  %v15963_v53 = vld [vmem:[#allocation33_spill] sm:$0xff]  ;;  %v7695_v48 = vadd.f32 %v15975_v35, %v15539_v54 }
 0x70e   : >> { %v11979_v42 = vpop.f32.mrf.mxu1  ;;  %12244 = vmatprep.subr.bf16.mxu1 %v13025_v28 }
 0x70f   : >> { %v7696_v54 = vmax.f32 %v7695_v48, 0.0 }
 0x710   : >> { %12225 = vmatpush3.bf16.msra.mxu0 %v15142_v46  ;;  %v15613_v46 = vld.sshfl [vmem:[%s14962_s22 + $0x2] sm:$0x2 pattern:$0x76325410] }
 0x711   : >> { %12245 = vmatpush3.bf16.msra.mxu1 %v15938_v21  ;;  %12226 = vmatprep.subr.bf16.mxu0 %v13025_v28  ;;  %v8413_v47 = vrot.slane %v15613_v46, 1  ;;  %v15964_v21 = vld [vmem:[#allocation27_spill] sm:$0xff] }
 0x712   : >> { %12246 = vmatprep.subr.bf16.mxu1 %v13025_v28 }
 0x714   : >> { %12227 = vmatpush3.bf16.msra.mxu0 %v15928_v17 }
 0x715   : >> { %12247 = vmatpush3.bf16.msra.mxu1 %v15939_v14  ;;  %12228 = vmatprep.subr.bf16.mxu0 %v13025_v28 }
 0x716   : >> { %12248 = vmatprep.subr.bf16.mxu1 %v13025_v28 }
 0x718   : >> { %12229 = vmatpush3.bf16.msra.mxu0 %v15930_v3 }
 0x719   : >> { %12249 = vmatpush3.bf16.msra.mxu1 %v15940_v51  ;;  %12230 = vmatprep.subr.bf16.mxu0 %v13025_v28 }
 0x71a   : >> { %12250 = vmatprep.subr.bf16.mxu1 %v13025_v28 }
 0x71c   : >> { %12231 = vmatpush3.bf16.msra.mxu0 %v15932_v20 }
 0x71d   : >> { %12251 = vmatpush3.bf16.msra.mxu1 %v15941_v4  ;;  %12232 = vmatprep.subr.bf16.mxu0 %v13025_v28 }
 0x71e   : >> { %12252 = vmatprep.subr.bf16.mxu1 %v13025_v28 }
 0x720   : >> { %12233 = vmatpush3.bf16.msra.mxu0 %v15176_v61 }
 0x721   : >> { %12253 = vmatpush3.bf16.msra.mxu1 %v15180_v63  ;;  %12234 = vmatprep.subr.bf16.mxu0 %v13025_v28 }
 0x722   : >> { %12254 = vmatprep.subr.bf16.mxu1 %v13025_v28 }
 0x724   : >> { %12235 = vmatpush3.bf16.msra.mxu0 %v15184_v43 }
 0x725   : >> { %12255 = vmatpush3.bf16.msra.mxu1 %v15188_v9  ;;  %12260 = vmatprep.subr.bf16.mxu0 %v13025_v28 }
 0x726   : >> { %12280 = vmatprep.subr.bf16.mxu1 %v13025_v28 }
 0x727   : >> { %v7857_v61 = vpop.f32.mrf.mxu0  ;;  %12237 = vmatmul.mubr.bf16.vlgmr.msra.gmra.mxu0 %v8361_v62 }
 0x728   : >> { %v7863_v63 = vadd.f32 %v7857_v61, %v7822_v5  ;;  %v7898_v17 = vpop.f32.mrf.mxu1  ;;  %12257 = vmatmul.mubr.bf16.vlgmr.msra.gmra.mxu1 %v8413_v47  ;;  %12261 = vmatpush3.bf16.msra.mxu0 %v15196_v60  ;;  %v12817_v5 = vld [vmem:[#allocation8 + $0x138] sm:$0xff]   ;;  %v12818_v61 = vld [vmem:[#allocation8 + $0x130] sm:$0xff]  }
 0x729   : >> { %12281 = vmatpush3.bf16.msra.mxu1 %v15416_v40  ;;  %v11998_v43 = vpop.f32.mrf.mxu0  ;;  %12262 = vmatprep.subr.bf16.mxu0 %v13025_v28 }
 0x72a   : >> { %v7904_v41 = vadd.f32 %v7898_v17, %v7863_v63  ;;  %v12018_v9 = vpop.f32.mrf.mxu1  ;;  %12282 = vmatprep.subr.bf16.mxu1 %v13025_v28  ;;  %12276 = vmatprep.mubr.msk.bf16.mxu0 %vm13026_vm6, %v13025_v28 }
 0x72b   : >> { %v7860_v3 = vpop.f32.mrf.mxu0  ;;  %12296 = vmatprep.mubr.msk.bf16.mxu1 %vm13026_vm6, %v13025_v28  ;;  %v12819_v9 = vld [vmem:[#allocation8 + $0x128] sm:$0xff]  }
 0x72c   : >> { %v7901_v16 = vpop.f32.mrf.mxu1  ;;  %12263 = vmatpush3.bf16.msra.mxu0 %v15204_v15  ;;  %v15958_v15 = vld [vmem:[#allocation19_spill] sm:$0xff] }
 0x72d   : >> { %12283 = vmatpush3.bf16.msra.mxu1 %v15428_v34  ;;  %v11999_v60 = vpop.f32.mrf.mxu0  ;;  %12264 = vmatprep.subr.bf16.mxu0 %v13025_v28  ;;  %v15965_v34 = vld [vmem:[#allocation17_spill] sm:$0xff]  ;;  %v12821_v3 = vld [vmem:[#allocation8 + $0xd8] sm:$0xff]  }
 0x72e   : >> { %v12019_v20 = vpop.f32.mrf.mxu1  ;;  %12284 = vmatprep.subr.bf16.mxu1 %v13025_v28  ;;  %v12822_v16 = vld [vmem:[#allocation8 + $0x118] sm:$0xff]   ;;  %v12824_v60 = vld [vmem:[#allocation8 + $0x110] sm:$0xff]  }
 0x72f   : >> { %v12826_v20 = vld [vmem:[#allocation8 + $0x108] sm:$0xff]  }
 0x730   : >> { %12265 = vmatpush3.bf16.msra.mxu0 %v15214_v55  ;;  %v15959_v55 = vld [vmem:[#allocation31_spill] sm:$0xff] }
 0x731   : >> { %12285 = vmatpush3.bf16.msra.mxu1 %v15436_v24  ;;  %12266 = vmatprep.subr.bf16.mxu0 %v13025_v28 }
 0x732   : >> { %12286 = vmatprep.subr.bf16.mxu1 %v13025_v28 }
 0x734   : >> { %12267 = vmatpush3.bf16.msra.mxu0 %v15220_v26  ;;  %v15961_v26 = vld [vmem:[#allocation32_spill] sm:$0xff] }
 0x735   : >> { %12287 = vmatpush3.bf16.msra.mxu1 %v15444_v30  ;;  %12268 = vmatprep.subr.bf16.mxu0 %v13025_v28 }
 0x736   : >> { %12288 = vmatprep.subr.bf16.mxu1 %v13025_v28 }
 0x738   : >> { %12269 = vmatpush3.bf16.msra.mxu0 %v15226_v23  ;;  %v8465_v23 = vrot.slane %v15653_v45, 1 }
 0x739   : >> { %12289 = vmatpush3.bf16.msra.mxu1 %v15958_v15  ;;  %12270 = vmatprep.subr.bf16.mxu0 %v13025_v28  ;;  %v12827_v15 = vld [vmem:[#allocation8 + $0xc0] sm:$0xff]  }
 0x73a   : >> { %12290 = vmatprep.subr.bf16.mxu1 %v13025_v28 }
 0x73c   : >> { %12271 = vmatpush3.bf16.msra.mxu0 %v15959_v55  ;;  %v12828_v55 = vld [vmem:[#allocation8 + $0x100] sm:$0xff]  }
 0x73d   : >> { %12291 = vmatpush3.bf16.msra.mxu1 %v15960_v49  ;;  %12272 = vmatprep.subr.bf16.mxu0 %v13025_v28 }
 0x73e   : >> { %12292 = vmatprep.subr.bf16.mxu1 %v13025_v28 }
 0x740   : >> { %12273 = vmatpush3.bf16.msra.mxu0 %v15961_v26 }
 0x741   : >> { %12293 = vmatpush3.bf16.msra.mxu1 %v15962_v31  ;;  %12274 = vmatprep.subr.bf16.mxu0 %v13025_v28  ;;  %v12829_v31 = vld [vmem:[#allocation8 + $0x178] sm:$0xff]  }
 0x742   : >> { %12294 = vmatprep.subr.bf16.mxu1 %v13025_v28 }
 0x744   : >> { %12275 = vmatpush3.bf16.msra.mxu0 %v15963_v53 }
 0x745   : >> { %12295 = vmatpush3.bf16.msra.mxu1 %v15964_v21  ;;  %12300 = vmatprep.subr.bf16.mxu0 %v13025_v28  ;;  %v12830_v21 = vld [vmem:[#allocation8 + $0x1b8] sm:$0xff]  }
 0x746   : >> { %12320 = vmatprep.subr.bf16.mxu1 %v13025_v28 }
 0x747   : >> { %v7958_v14 = vpop.f32.mrf.mxu0  ;;  %12277 = vmatmul.mubr.bf16.vlgmr.msra.gmra.mxu0 %v8465_v23 }
 0x748   : >> { %v7964_v51 = vadd.f32 %v7958_v14, %v7904_v41  ;;  %v7999_v4 = vpop.f32.mrf.mxu1  ;;  %12297 = vmatmul.mubr.bf16.vlgmr.msra.gmra.mxu1 %v15118_v7  ;;  %12301 = vmatpush3.bf16.msra.mxu0 %v15965_v34  ;;  %v15966_v7 = vld [vmem:[#allocation26_spill] sm:$0xff] }
 0x749   : >> { %12321 = vmatpush3.bf16.msra.mxu1 %v15486_v37  ;;  %v12038_v40 = vpop.f32.mrf.mxu0  ;;  %12302 = vmatprep.subr.bf16.mxu0 %v13025_v28  ;;  %v12832_v34 = vld [vmem:[#allocation8 + $0x1b0] sm:$0xff]  }
 0x74a   : >> { %v8005_v24 = vadd.f32 %v7999_v4, %v7964_v51  ;;  %v12058_v30 = vpop.f32.mrf.mxu1  ;;  %12322 = vmatprep.subr.bf16.mxu1 %v13025_v28  ;;  %12316 = vmatprep.mubr.msk.bf16.mxu0 %vm13026_vm6, %v13025_v28 }
 0x74b   : >> { %v7961_v10 = vpop.f32.mrf.mxu0  ;;  %12336 = vmatprep.mubr.msk.bf16.mxu1 %vm13026_vm6, %v13025_v28  ;;  %v12833_v30 = vld [vmem:[#allocation8 + $0x168] sm:$0xff]  }
 0x74c   : >> { %v8002_v2 = vpop.f32.mrf.mxu1  ;;  %12303 = vmatpush3.bf16.msra.mxu0 %v15966_v7  ;;  %v12834_v10 = vld [vmem:[#allocation8 + $0x1a8] sm:$0xff]   ;;  %v12836_v7 = vld [vmem:[#allocation8 + $0x1a0] sm:$0xff]  }
 0x74d   : >> { %12323 = vmatpush3.bf16.msra.mxu1 %v15498_v25  ;;  %v12039_v37 = vpop.f32.mrf.mxu0  ;;  %12304 = vmatprep.subr.bf16.mxu0 %v13025_v28  ;;  %v15969_v25 = vld [vmem:[#allocation20_spill] sm:$0xff] }
 0x74e   : >> { %v12059_v22 = vpop.f32.mrf.mxu1  ;;  %12324 = vmatprep.subr.bf16.mxu1 %v13025_v28  ;;  %v12835_v2 = vld [vmem:[#allocation8 + $0x160] sm:$0xff]   ;;  %v12837_v37 = vld [vmem:[#allocation8 + $0x158] sm:$0xff]  }
 0x74f   : >> { %v12838_v22 = vld [vmem:[#allocation8 + $0x198] sm:$0xff]  }
 0x750   : >> { %12305 = vmatpush3.bf16.msra.mxu0 %v15967_v18  ;;  %v12839_v18 = vld [vmem:[#allocation8 + $0x150] sm:$0xff]  }
 0x751   : >> { %12325 = vmatpush3.bf16.msra.mxu1 %v15506_v38  ;;  %12306 = vmatprep.subr.bf16.mxu0 %v13025_v28  ;;  %v15970_v38 = vld [vmem:[#allocation22_spill] sm:$0xff] }
 0x752   : >> { %12326 = vmatprep.subr.bf16.mxu1 %v13025_v28 }
 0x754   : >> { %12307 = vmatpush3.bf16.msra.mxu0 %v15968_v13  ;;  %v12840_v13 = vld [vmem:[#allocation8 + $0x190] sm:$0xff]  }
 0x755   : >> { %12327 = vmatpush3.bf16.msra.mxu1 %v15514_v12  ;;  %12308 = vmatprep.subr.bf16.mxu0 %v13025_v28  ;;  %v15971_v12 = vld [vmem:[#allocation25_spill] sm:$0xff] }
 0x756   : >> { %12328 = vmatprep.subr.bf16.mxu1 %v13025_v28 }
 0x758   : >> { %12309 = vmatpush3.bf16.msra.mxu0 %v15969_v25  ;;  %v12841_v25 = vld [vmem:[#allocation8 + $0x148] sm:$0xff]  }
 0x759   : >> { %12329 = vmatpush3.bf16.msra.mxu1 %v12813_v36  ;;  %12310 = vmatprep.subr.bf16.mxu0 %v13025_v28  ;;  %v12842_v36 = vld [vmem:[#allocation8 + $0x188] sm:$0xff]  }
 0x75a   : >> { %12330 = vmatprep.subr.bf16.mxu1 %v13025_v28 }
 0x75c   : >> { %12311 = vmatpush3.bf16.msra.mxu0 %v15970_v38  ;;  %v12843_v38 = vld [vmem:[#allocation8 + $0x140] sm:$0xff]  }
 0x75d   : >> { %12331 = vmatpush3.bf16.msra.mxu1 %v12814_v56  ;;  %12312 = vmatprep.subr.bf16.mxu0 %v13025_v28  ;;  %v12844_v56 = vld [vmem:[#allocation8 + $0x180] sm:$0xff]  }
 0x75e   : >> { %12332 = vmatprep.subr.bf16.mxu1 %v13025_v28 }
 0x760   : >> { %12313 = vmatpush3.bf16.msra.mxu0 %v15971_v12 }
 0x761   : >> { %12333 = vmatpush3.bf16.msra.mxu1 %v12815_v39  ;;  %12314 = vmatprep.subr.bf16.mxu0 %v13025_v28  ;;  %v15976_v39 = vld [vmem:[#allocation24_spill] sm:$0xff] }
 0x762   : >> { %12334 = vmatprep.subr.bf16.mxu1 %v13025_v28 }
 0x764   : >> { %12315 = vmatpush3.bf16.msra.mxu0 %v15972_v52 }
 0x765   : >> { %12335 = vmatpush3.bf16.msra.mxu1 %v12816_v1  ;;  %12340 = vmatprep.subr.bf16.mxu0 %v13025_v28 }
 0x766   : >> { %12360 = vmatprep.subr.bf16.mxu1 %v13025_v28 }
 0x767   : >> { %v8040_v11 = vpop.f32.mrf.mxu0  ;;  %12317 = vmatmul.mubr.bf16.vlgmr.msra.gmra.mxu0 %v15115_v57 }
 0x768   : >> { %v8046_v0 = vadd.f32 %v8040_v11, %v8005_v24  ;;  %v8098_v32 = vpop.f32.mrf.mxu1  ;;  %12337 = vmatmul.mubr.bf16.vlgmr.msra.gmra.mxu1 %v15973_v50  ;;  %12341 = vmatpush3.bf16.msra.mxu0 %v15974_v59  ;;  %v12845_v11 = vld [vmem:[#allocation8 + $0x1f8] sm:$0xff]  }
 0x769   : >> { %12361 = vmatpush3.bf16.msra.mxu1 %v12817_v5  ;;  %v12078_v8 = vpop.f32.mrf.mxu0  ;;  %12342 = vmatprep.subr.bf16.mxu0 %v13025_v28 }
 0x76a   : >> { %v8104_v33 = vadd.f32 %v8098_v32, %v8046_v0  ;;  %v12098_v42 = vpop.f32.mrf.mxu1  ;;  %12362 = vmatprep.subr.bf16.mxu1 %v13025_v28  ;;  %12356 = vmatprep.mubr.msk.bf16.mxu0 %vm13026_vm6, %v13025_v28  ;;  %v12846_v0 = vld [vmem:[#allocation8 + $0x238] sm:$0xff]   ;;  %v12848_v8 = vld [vmem:[#allocation8 + $0x230] sm:$0xff]  }
 0x76b   : >> { %v8043_v57 = vpop.f32.mrf.mxu0  ;;  %12376 = vmatprep.mubr.msk.bf16.mxu1 %vm13026_vm6, %v13025_v28  ;;  %v12849_v42 = vld [vmem:[#allocation8 + $0x1e8] sm:$0xff]  }
 0x76c   : >> { %v8105_v44 = vadd.f32 %v15975_v35, %v8104_v33  ;;  %v8101_v62 = vpop.f32.mrf.mxu1  ;;  %12343 = vmatpush3.bf16.msra.mxu0 %v15501_v27  ;;  %v12820_v27 = vld [vmem:[#allocation8 + $0x120] sm:$0xff]   ;;  %v12850_v57 = vld [vmem:[#allocation8 + $0x228] sm:$0xff]  }
 0x76d   : >> { %12363 = vmatpush3.bf16.msra.mxu1 %v12818_v61  ;;  %v12079_v63 = vpop.f32.mrf.mxu0  ;;  %12344 = vmatprep.subr.bf16.mxu0 %v13025_v28  ;;  %v12852_v62 = vld [vmem:[#allocation8 + $0x220] sm:$0xff]   ;;  %v12853_v61 = vld [vmem:[#allocation8 + $0x1d8] sm:$0xff]  }
 0x76e   : >> { %v8106_v17 = vmax.f32 %v8105_v44, 0.0  ;;  %v12099_v43 = vpop.f32.mrf.mxu1  ;;  %12364 = vmatprep.subr.bf16.mxu1 %v13025_v28  ;;  %v12851_v44 = vld [vmem:[#allocation8 + $0x1e0] sm:$0xff]   ;;  %v12854_v63 = vld [vmem:[#allocation8 + $0x218] sm:$0xff]  }
 0x76f   : >> { %v12857_v43 = vld [vmem:[#allocation8 + $0x1c8] sm:$0xff]  }
 0x770   : >> { %v15713_v41 = vmax.f32 %v7696_v54, %v8106_v17  ;;  %12345 = vmatpush3.bf16.msra.mxu0 %v15509_v6  ;;  %v12823_v6 = vld [vmem:[#allocation8 + $0xd0] sm:$0xff]  }
 0x771   : >> { %12365 = vmatpush3.bf16.msra.mxu1 %v12819_v9  ;;  %12346 = vmatprep.subr.bf16.mxu0 %v13025_v28  ;;  %v12855_v54 = vld [vmem:[#allocation8 + $0x1d0] sm:$0xff]   ;;  %v12858_v9 = vld [vmem:[#allocation8 + $0x208] sm:$0xff]  }
 0x772   : >> { %12366 = vmatprep.subr.bf16.mxu1 %v13025_v28  ;;  %v12856_v17 = vld [vmem:[#allocation8 + $0x210] sm:$0xff]  }
 0x774   : >> { %12347 = vmatpush3.bf16.msra.mxu0 %v15517_v58  ;;  %v12825_v58 = vld [vmem:[#allocation8 + $0xc8] sm:$0xff]  }
 0x775   : >> { %12367 = vmatpush3.bf16.msra.mxu1 %v12820_v27  ;;  %12348 = vmatprep.subr.bf16.mxu0 %v13025_v28  ;;  %v9858_v27 = vld.sshfl [vmem:[%s14962_s22 + $0x6] sm:$0x2 pattern:$0x76325410] }
 0x776   : >> { %12368 = vmatprep.subr.bf16.mxu1 %v13025_v28 }
 0x778   : >> { %12349 = vmatpush3.bf16.msra.mxu0 %v12821_v3  ;;  %v12859_v3 = vld [vmem:[#allocation8 + $0x1c0] sm:$0xff]  }
 0x779   : >> { %12369 = vmatpush3.bf16.msra.mxu1 %v12822_v16  ;;  %12350 = vmatprep.subr.bf16.mxu0 %v13025_v28  ;;  %v8846_v16 = vrot.slane %v9858_v27, 1 }
 0x77a   : >> { %12370 = vmatprep.subr.bf16.mxu1 %v13025_v28 }
 0x77c   : >> { %12351 = vmatpush3.bf16.msra.mxu0 %v12823_v6  ;;  %v12860_v6 = vld [vmem:[#allocation8 + $0x200] sm:$0xff]  }
 0x77d   : >> { %12371 = vmatpush3.bf16.msra.mxu1 %v12824_v60  ;;  %12352 = vmatprep.subr.bf16.mxu0 %v13025_v28 }
 0x77e   : >> { %12372 = vmatprep.subr.bf16.mxu1 %v13025_v28 }
 0x780   : >> { %12353 = vmatpush3.bf16.msra.mxu0 %v12825_v58 }
 0x781   : >> { %12373 = vmatpush3.bf16.msra.mxu1 %v12826_v20  ;;  %12354 = vmatprep.subr.bf16.mxu0 %v13025_v28 }
 0x782   : >> { %12374 = vmatprep.subr.bf16.mxu1 %v13025_v28 }
 0x784   : >> { %12355 = vmatpush3.bf16.msra.mxu0 %v12827_v15 }
 0x785   : >> { %12375 = vmatpush3.bf16.msra.mxu1 %v12828_v55  ;;  %12380 = vmatprep.subr.bf16.mxu0 %v13025_v28 }
 0x786   : >> { %12400 = vmatprep.subr.bf16.mxu1 %v13025_v28 }
 0x787   : >> { %v8142_v49 = vpop.f32.mrf.mxu0  ;;  %12357 = vmatmul.mubr.bf16.vlgmr.msra.gmra.mxu0 %v15194_v29 }
 0x788   : >> { %v8182_v26 = vpop.f32.mrf.mxu1  ;;  %12377 = vmatmul.mubr.bf16.vlgmr.msra.gmra.mxu1 %v15250_v19  ;;  %12381 = vmatpush3.bf16.msra.mxu0 %v12829_v31  ;;  %v12831_v19 = vld [vmem:[#allocation8 + $0x170] sm:$0xff]  }
 0x789   : >> { %v8183_v53 = vadd.f32 %v8182_v26, %v8142_v49  ;;  %12401 = vmatpush3.bf16.msra.mxu1 %v12830_v21  ;;  %v12118_v14 = vpop.f32.mrf.mxu0  ;;  %12382 = vmatprep.subr.bf16.mxu0 %v13025_v28 }
 0x78a   : >> { %v12138_v51 = vpop.f32.mrf.mxu1  ;;  %12402 = vmatprep.subr.bf16.mxu1 %v13025_v28  ;;  %12396 = vmatprep.mubr.msk.bf16.mxu0 %vm13026_vm6, %v13025_v28 }
 0x78b   : >> { %v8145_v4 = vpop.f32.mrf.mxu0  ;;  %12416 = vmatprep.mubr.msk.bf16.mxu1 %vm13026_vm6, %v13025_v28 }
 0x78c   : >> { %v8185_v29 = vpop.f32.mrf.mxu1  ;;  %12383 = vmatpush3.bf16.msra.mxu0 %v12831_v19 }
 0x78d   : >> { %12403 = vmatpush3.bf16.msra.mxu1 %v12832_v34  ;;  %v12119_v40 = vpop.f32.mrf.mxu0  ;;  %12384 = vmatprep.subr.bf16.mxu0 %v13025_v28 }
 0x78e   : >> { %v12139_v24 = vpop.f32.mrf.mxu1  ;;  %12404 = vmatprep.subr.bf16.mxu1 %v13025_v28 }
 0x790   : >> { %12385 = vmatpush3.bf16.msra.mxu0 %v12833_v30 }
 0x791   : >> { %12405 = vmatpush3.bf16.msra.mxu1 %v12834_v10  ;;  %12386 = vmatprep.subr.bf16.mxu0 %v13025_v28 }
 0x792   : >> { %12406 = vmatprep.subr.bf16.mxu1 %v13025_v28 }
 0x794   : >> { %12387 = vmatpush3.bf16.msra.mxu0 %v12835_v2 }
 0x795   : >> { %12407 = vmatpush3.bf16.msra.mxu1 %v12836_v7  ;;  %12388 = vmatprep.subr.bf16.mxu0 %v13025_v28 }
 0x796   : >> { %12408 = vmatprep.subr.bf16.mxu1 %v13025_v28 }
 0x798   : >> { %12389 = vmatpush3.bf16.msra.mxu0 %v12837_v37 }
 0x799   : >> { %12409 = vmatpush3.bf16.msra.mxu1 %v12838_v22  ;;  %12390 = vmatprep.subr.bf16.mxu0 %v13025_v28 }
 0x79a   : >> { %12410 = vmatprep.subr.bf16.mxu1 %v13025_v28 }
 0x79c   : >> { %12391 = vmatpush3.bf16.msra.mxu0 %v12839_v18 }
 0x79d   : >> { %12411 = vmatpush3.bf16.msra.mxu1 %v12840_v13  ;;  %12392 = vmatprep.subr.bf16.mxu0 %v13025_v28 }
 0x79e   : >> { %12412 = vmatprep.subr.bf16.mxu1 %v13025_v28 }
 0x7a0   : >> { %12393 = vmatpush3.bf16.msra.mxu0 %v12841_v25 }
 0x7a1   : >> { %12413 = vmatpush3.bf16.msra.mxu1 %v12842_v36  ;;  %12394 = vmatprep.subr.bf16.mxu0 %v13025_v28 }
 0x7a2   : >> { %12414 = vmatprep.subr.bf16.mxu1 %v13025_v28 }
 0x7a4   : >> { %12395 = vmatpush3.bf16.msra.mxu0 %v12843_v38 }
 0x7a5   : >> { %12415 = vmatpush3.bf16.msra.mxu1 %v12844_v56  ;;  %12420 = vmatprep.subr.bf16.mxu0 %v13025_v28 }
 0x7a6   : >> { %12440 = vmatprep.subr.bf16.mxu1 %v13025_v28 }
 0x7a7   : >> { %v8222_v12 = vpop.f32.mrf.mxu0  ;;  %12397 = vmatmul.mubr.bf16.vlgmr.msra.gmra.mxu0 %v15976_v39 }
 0x7a8   : >> { %v8228_v52 = vadd.f32 %v8222_v12, %v8183_v53  ;;  %v8263_v1 = vpop.f32.mrf.mxu1  ;;  %12417 = vmatmul.mubr.bf16.vlgmr.msra.gmra.mxu1 %v8413_v47  ;;  %12421 = vmatpush3.bf16.msra.mxu0 %v12845_v11  ;;  %v12847_v47 = vld [vmem:[#allocation8 + $0x1f0] sm:$0xff]  }
 0x7a9   : >> { %12441 = vmatpush3.bf16.msra.mxu1 %v12846_v0  ;;  %v12158_v32 = vpop.f32.mrf.mxu0  ;;  %12422 = vmatprep.subr.bf16.mxu0 %v13025_v28 }
 0x7aa   : >> { %v8269_v50 = vadd.f32 %v8263_v1, %v8228_v52  ;;  %v12178_v59 = vpop.f32.mrf.mxu1  ;;  %12442 = vmatprep.subr.bf16.mxu1 %v13025_v28  ;;  %12436 = vmatprep.mubr.msk.bf16.mxu0 %vm13026_vm6, %v13025_v28 }
 0x7ab   : >> { %v8225_v5 = vpop.f32.mrf.mxu0  ;;  %12456 = vmatprep.mubr.msk.bf16.mxu1 %vm13026_vm6, %v13025_v28 }
 0x7ac   : >> { %v8266_v46 = vpop.f32.mrf.mxu1  ;;  %12423 = vmatpush3.bf16.msra.mxu0 %v12847_v47 }
 0x7ad   : >> { %12443 = vmatpush3.bf16.msra.mxu1 %v12848_v8  ;;  %v12159_v48 = vpop.f32.mrf.mxu0  ;;  %12424 = vmatprep.subr.bf16.mxu0 %v13025_v28 }
 0x7ae   : >> { %v12179_v33 = vpop.f32.mrf.mxu1  ;;  %12444 = vmatprep.subr.bf16.mxu1 %v13025_v28 }
 0x7b0   : >> { %12425 = vmatpush3.bf16.msra.mxu0 %v12849_v42 }
 0x7b1   : >> { %12445 = vmatpush3.bf16.msra.mxu1 %v12850_v57  ;;  %12426 = vmatprep.subr.bf16.mxu0 %v13025_v28 }
 0x7b2   : >> { %12446 = vmatprep.subr.bf16.mxu1 %v13025_v28 }
 0x7b4   : >> { %12427 = vmatpush3.bf16.msra.mxu0 %v12851_v44 }
 0x7b5   : >> { %12447 = vmatpush3.bf16.msra.mxu1 %v12852_v62  ;;  %12428 = vmatprep.subr.bf16.mxu0 %v13025_v28 }
 0x7b6   : >> { %12448 = vmatprep.subr.bf16.mxu1 %v13025_v28 }
 0x7b8   : >> { %12429 = vmatpush3.bf16.msra.mxu0 %v12853_v61 }
 0x7b9   : >> { %12449 = vmatpush3.bf16.msra.mxu1 %v12854_v63  ;;  %12430 = vmatprep.subr.bf16.mxu0 %v13025_v28 }
 0x7ba   : >> { %12450 = vmatprep.subr.bf16.mxu1 %v13025_v28 }
 0x7bc   : >> { %12431 = vmatpush3.bf16.msra.mxu0 %v12855_v54 }
 0x7bd   : >> { %12451 = vmatpush3.bf16.msra.mxu1 %v12856_v17  ;;  %12432 = vmatprep.subr.bf16.mxu0 %v13025_v28 }
 0x7be   : >> { %12452 = vmatprep.subr.bf16.mxu1 %v13025_v28 }
 0x7c0   : >> { %12433 = vmatpush3.bf16.msra.mxu0 %v12857_v43 }
 0x7c1   : >> { %12453 = vmatpush3.bf16.msra.mxu1 %v12858_v9  ;;  %12434 = vmatprep.subr.bf16.mxu0 %v13025_v28 }
 0x7c2   : >> { %12454 = vmatprep.subr.bf16.mxu1 %v13025_v28 }
 0x7c4   : >> { %12435 = vmatpush3.bf16.msra.mxu0 %v12859_v3 }
 0x7c5   : >> { %12455 = vmatpush3.bf16.msra.mxu1 %v12860_v6 }
 0x7c7   : >> { %v8304_v60 = vpop.f32.mrf.mxu0  ;;  %12437 = vmatmul.mubr.bf16.vlgmr.msra.gmra.mxu0 %v8465_v23 }
 0x7c8   : >> { %v8310_v58 = vadd.f32 %v8304_v60, %v8269_v50  ;;  %v8345_v20 = vpop.f32.mrf.mxu1  ;;  %12457 = vmatmul.mubr.bf16.vlgmr.msra.gmra.mxu1 %v8846_v16 }
 0x7c9   : >> { %v12198_v15 = vpop.f32.mrf.mxu0 }
 0x7ca   : >> { %v8351_v55 = vadd.f32 %v8345_v20, %v8310_v58  ;;  %v12218_v49 = vpop.f32.mrf.mxu1 }
 0x7cb   : >> { %v8307_v26 = vpop.f32.mrf.mxu0 }
 0x7cc   : >> { %v8348_v31 = vpop.f32.mrf.mxu1 }
 0x7cd   : >> { %v12199_v53 = vpop.f32.mrf.mxu0 }
 0x7ce   : >> { %v12219_v21 = vpop.f32.mrf.mxu1 }
 0x7e7   : >> { %v8397_v28 = vpop.f32.mrf.mxu0 }
 0x7e8   : >> { %v8403_v14 = vadd.f32 %v8397_v28, %v8351_v55  ;;  %v8449_v51 = vpop.f32.mrf.mxu1 }
 0x7e9   : >> { %v12238_v4 = vpop.f32.mrf.mxu0 }
 0x7ea   : >> { %v8455_v29 = vadd.f32 %v8449_v51, %v8403_v14  ;;  %v12258_v19 = vpop.f32.mrf.mxu1 }
 0x7eb   : >> { %v8400_v34 = vpop.f32.mrf.mxu0 }
 0x7ec   : >> { %v8452_v40 = vpop.f32.mrf.mxu1 }
 0x7ed   : >> { %v12239_v45 = vpop.f32.mrf.mxu0 }
 0x7ee   : >> { %v12259_v23 = vpop.f32.mrf.mxu1 }
 0x807   : >> { %v8501_v24 = vpop.f32.mrf.mxu0 }
 0x808   : >> { %v8507_v30 = vadd.f32 %v8501_v24, %v8455_v29  ;;  %v8545_v10 = vpop.f32.mrf.mxu1 }
 0x809   : >> { %v12278_v2 = vpop.f32.mrf.mxu0 }
 0x80a   : >> { %v8508_v7 = vadd.f32 %v15975_v35, %v8507_v30  ;;  %v12298_v37 = vpop.f32.mrf.mxu1 }
 0x80b   : >> { %v8504_v22 = vpop.f32.mrf.mxu0 }
 0x80c   : >> { %v8509_v18 = vmax.f32 %v8508_v7, 0.0  ;;  %v8548_v13 = vpop.f32.mrf.mxu1 }
 0x80d   : >> { %v12279_v25 = vpop.f32.mrf.mxu0 }
 0x80e   : >> { %v8510_v36 = vmax.f32 %v15713_v41, %v8509_v18  ;;  %v12299_v38 = vpop.f32.mrf.mxu1 }
 0x827   : >> { %v8585_v56 = vpop.f32.mrf.mxu0 }
 0x828   : >> { %v8586_v12 = vadd.f32 %v8585_v56, %v8545_v10  ;;  %v8625_v39 = vpop.f32.mrf.mxu1 }
 0x829   : >> { %v12318_v52 = vpop.f32.mrf.mxu0 }
 0x82a   : >> { %v8631_v1 = vadd.f32 %v8625_v39, %v8586_v12  ;;  %v12338_v11 = vpop.f32.mrf.mxu1 }
 0x82b   : >> { %v8588_v0 = vpop.f32.mrf.mxu0 }
 0x82c   : >> { %v8628_v32 = vpop.f32.mrf.mxu1 }
 0x82d   : >> { %v12319_v50 = vpop.f32.mrf.mxu0 }
 0x82e   : >> { %v12339_v59 = vpop.f32.mrf.mxu1 }
 0x847   : >> { %v8666_v5 = vpop.f32.mrf.mxu0 }
 0x848   : >> { %v8707_v46 = vpop.f32.mrf.mxu1  ;;  %v8672_v9 = vadd.f32 %v8666_v5, %v8631_v1 }
 0x849   : >> { %v12358_v47 = vpop.f32.mrf.mxu0 }
 0x84a   : >> { %v12378_v8 = vpop.f32.mrf.mxu1  ;;  %v8713_v27 = vadd.f32 %v8707_v46, %v8672_v9 }
 0x84b   : >> { %v8669_v48 = vpop.f32.mrf.mxu0 }
 0x84c   : >> { %v8710_v33 = vpop.f32.mrf.mxu1 }
 0x84d   : >> { %v12359_v42 = vpop.f32.mrf.mxu0 }
 0x84e   : >> { %v12379_v57 = vpop.f32.mrf.mxu1 }
 0x867   : >> { %v8748_v41 = vpop.f32.mrf.mxu0 }
 0x868   : >> { %v8789_v44 = vpop.f32.mrf.mxu1  ;;  %v8754_v3 = vadd.f32 %v8748_v41, %v8713_v27 }
 0x869   : >> { %v12398_v62 = vpop.f32.mrf.mxu0 }
 0x86a   : >> { %v12418_v61 = vpop.f32.mrf.mxu1  ;;  %v8795_v16 = vadd.f32 %v8789_v44, %v8754_v3 }
 0x86b   : >> { %v8751_v63 = vpop.f32.mrf.mxu0 }
 0x86c   : >> { %v8792_v54 = vpop.f32.mrf.mxu1 }
 0x86d   : >> { %v12399_v17 = vpop.f32.mrf.mxu0 }
 0x86e   : >> { %v12419_v43 = vpop.f32.mrf.mxu1 }
 0x887   : >> { %v8830_v6 = vpop.f32.mrf.mxu0 }
 0x888   : >> { %v8836_v60 = vadd.f32 %v8830_v6, %v8795_v16  ;;  %v8882_v58 = vpop.f32.mrf.mxu1 }
 0x889   : >> { %v12438_v20 = vpop.f32.mrf.mxu0 }
 0x88a   : >> { %v8888_v15 = vadd.f32 %v8882_v58, %v8836_v60  ;;  %v12458_v55 = vpop.f32.mrf.mxu1 }
 0x88b   : >> { %v8833_v49 = vpop.f32.mrf.mxu0 }
 0x88c   : >> { %v8889_v26 = vadd.f32 %v15975_v35, %v8888_v15  ;;  %v8885_v31 = vpop.f32.mrf.mxu1 }
 0x88d   : >> { %v12439_v53 = vpop.f32.mrf.mxu0 }
 0x88e   : >> { %v8890_v21 = vmax.f32 %v8889_v26, 0.0  ;;  %v12459_v28 = vpop.f32.mrf.mxu1  ;;  %6613 = sbr.rel (!%p6611_p11) target bundleno = 1414 (0x586), region = 249 }
 0x890   : >> { %v8891_v14 = vmax.f32 %v8510_v36, %v8890_v21 }
 0x892   : >> { %8893 = vst [vmem:[%s8892_s25] sm:$0x3] %v8891_v14 }
 0x893   : > { %12926 = shalt.err (!%p12923_p7)
}
 0x894   : > { %s12927_s22 = scalar_lea.hbm %s15790_s27, 96  ;;  %s12931_s5 = scalar_lea.hbm %s15845_s9, 192 }
 0x895   : > { %p12928_p6 = scmp.ne.s32.totalorder %s15790_s27, %s12927_s22  ;;  %p12932_p12 = scmp.lt.s32.totalorder %s15790_s27, %s15845_s9 }
 0x896   : > { %p12933_p8 = scmp.lt.s32.totalorder %s12931_s5, %s12927_s22 }
 0x897   : > { %p12929_p9 = pnand %p12928_p6, %p13118_p5 }
 0x898   : > { %p12934_p11 = por %p12933_p8, %p12932_p12 }
 0x899   : > { %p12930_p10 = pneg %p12929_p9 }
 0x89b   : > { %p12935_p0 = pnand %p12934_p11, %p12930_p10 }
 0x89d   : > { %12938 = shalt.err (!%p12935_p0)
}
 0x89e   : > { %s13028_s23 = smov 32   ;;  %s13029_s16 = smov 2  }
 0x89f   : > { %12471 = dma.vmem_to_hbm [thread:$0]  (%p13118_p5), %s15792_s17, 96, %s15790_s27, %s15796_s14, %s13028_s23, %s13028_s23, %s13029_s16  }
 0x8a0 PF: > { %p12488_p1 = scmp.ge.s32.totalorder %s12997_s12, 2  ;;  %s8923_s13 = sand.u32 1, %s12985_s30  }
 0x8a1   : > { %p15978_p3 = scmp.ne.s32.totalorder %s15899_s20, 0  ;;  %s8924_s21 = scalar_lea.sflag [#allocation7], %s8923_s13 }
 0x8a3   : > { %p12481_p2 = pnand %p12488_p1, %p15978_p3 }
 0x8a5   : > { %p12482_p4 = pneg %p12481_p2 }
 0x8a7   : > { %12980 = dma.done.wait (%p12482_p4), %s8924_s21, 96  }
 0x8a8   : > { %12982 = vsyncadd (%p12482_p4), %s8924_s21, 4294967200  ;;  %p21_p13 = scmp.ge.s32.totalorder %s13105_s15, 4   ;;  %s15979_s30 = smov %s12989_s10 }
 0x8a9   : > { %s15980_s10 = smov %s12993_s11  ;;  %s15981_s11 = smov %s13116_s18 }
 0x8aa   : > { %s15982_s12 = smov %s13105_s15  ;;  %23 = sbr.rel (!%p21_p13) target bundleno = 7 (0x7), region = 260 }
 0x8af   :  { %8929 = vsyncpa [#allocation6], 1 }
 0x8b0   :  { %8931 = vsyncpa [#allocation6 + $0x1], 1 }
 0x8b1   :  { %8932 = vsyncpa [#allocation9], 1 }
 0x8b2   :  { %8933 = vsyncpa [#allocation7], 1 }
 0x8b3   :  { %8935 = vsyncpa [#allocation7 + $0x1], 1 }

</bundles_post_ra>
